<compile_context>
chip_gen: v7x
topology: tpu7x:2x2x1
jax: 0.10.0
libtpu: 0.0.40
codegen_flags: <defaults>
</compile_context>

<pallas_src>
import math
import jax
import jax.numpy as jnp
from jax.experimental import pallas as pl
from jax.experimental.pallas import tpu as pltpu

# ---- model hyper-parameters (fixed by the torch source) ----
d_Q = 64
d_V = 64
d_model = 256
n_head = 1          # n_head == 1, so the head dim is folded away exactly like torch
d_ff = 256
n_layers = 6
d_feature = 3
N_GRAPH_HEADS = 6   # six parallel MultiHeadAttention blocks per encoder layer
LN_EPS = 1e-5       # nn.LayerNorm default eps, fresh instance => gamma=1, beta=0
BIG_NEG = 1e9


# =====================  in-kernel building blocks  =====================

def _layernorm(x):
    mu = jnp.mean(x, axis=-1, keepdims=True)
    var = jnp.mean((x - mu) ** 2, axis=-1, keepdims=True)
    return (x - mu) * jax.lax.rsqrt(var + LN_EPS)


def _mha(xq2, xkv2, keep, wq, wk, wv, wo, B, Lq, Lk):
    """One MultiHeadAttention (n_head == 1) on batch-folded activations.

    xq2 : (B*Lq, d_model)    xkv2 : (B*Lk, d_model)
    keep: (B, Lq, Lk) float32, 1.0 = attend, 0.0 = masked
    returns LayerNorm(out_proj(attention) + xq2), shape (B*Lq, d_model)
    """
    q = jnp.dot(xq2, wq, preferred_element_type=jnp.float32).reshape(B, Lq, d_Q)
    k = jnp.dot(xkv2, wk, preferred_element_type=jnp.float32).reshape(B, Lk, d_Q)
    v = jnp.dot(xkv2, wv, preferred_element_type=jnp.float32).reshape(B, Lk, d_V)

    s = jnp.einsum('bqe,bke->bqk', q, k, preferred_element_type=jnp.float32)
    s = s * jnp.float32(1.0 / math.sqrt(d_Q))
    # masked_fill_(-1e9) -> additive mask (underflows to 0 after exp, like torch)
    s = s + (keep - 1.0) * jnp.float32(BIG_NEG)

    m = jnp.max(s, axis=-1, keepdims=True)
    e = jnp.exp(s - m)
    attn = e * pl.reciprocal(jnp.sum(e, axis=-1, keepdims=True), approx=True)
    attn = attn * keep                       # masked_fill_(0) after the softmax

    ctx = jnp.einsum('bqk,bke->bqe', attn, v,
                     preferred_element_type=jnp.float32).reshape(B * Lq, d_V)
    out = jnp.dot(ctx, wo, preferred_element_type=jnp.float32) + xq2
    return _layernorm(out)


def _ffn(x2, w1, w2):
    """PoswiseFeedForwardNet on batch-folded activations: (B*L, d_model)."""
    h = jnp.maximum(jnp.dot(x2, w1, preferred_element_type=jnp.float32), 0.0)
    return _layernorm(jnp.dot(h, w2, preferred_element_type=jnp.float32) + x2)


# =====================  fused encoder-layer kernel  =====================

def enc_layer_kernel(x_ref, keep_ref, wq_ref, wk_ref, wv_ref, wo_ref,
                     w1_ref, w2_ref, out_ref):
    """6 graph-attention heads (each with its own residual+LN) + head sum + FFN,
    all in one kernel.  Head weights are stacked on a leading axis of size 6."""
    B, Lg, D = x_ref.shape
    x2 = x_ref[...].reshape(B * Lg, D)

    acc = jnp.zeros((B * Lg, D), jnp.float32)
    for h in range(N_GRAPH_HEADS):                     # static unroll
        acc = acc + _mha(x2, x2, keep_ref[h],
                         wq_ref[h], wk_ref[h], wv_ref[h], wo_ref[h],
                         B, Lg, Lg)

    out = _ffn(acc, w1_ref[...], w2_ref[...])
    out_ref[...] = out.reshape(B, Lg, D)


def encoder_layer(x, keep_masks, p):
    """x: (B, Lg, d_model); keep_masks: (6, B, Lg, Lg); p: stacked layer params."""
    B, Lg, D = x.shape
    return pl.pallas_call(
        enc_layer_kernel,
        out_shape=jax.ShapeDtypeStruct((B, Lg, D), jnp.float32),
    )(x, keep_masks, p['wq'], p['wk'], p['wv'], p['wo'], p['w1'], p['w2'])


# =====================  fused whole-decoder kernel  =====================

def dec_stack_kernel(dec0_ref, enc_ref, selfk_ref, crossk_ref,
                     wqs_ref, wks_ref, wvs_ref, wos_ref,
                     wqc_ref, wkc_ref, wvc_ref, woc_ref,
                     w1_ref, w2_ref,
                     out_ref, x_scr):
    """One grid step == one DecoderLayer (self-attn -> cross-attn -> FFN).
    The running decoder embedding lives in a VMEM scratch across grid steps;
    per-layer weight slabs are selected by the BlockSpec index_maps."""
    B, Ls, D = dec0_ref.shape
    Lg = enc_ref.shape[1]

    @pl.when(pl.program_id(0) == 0)
    def _():
        x_scr[...] = dec0_ref[...].reshape(B * Ls, D)

    x = x_scr[...]
    enc2 = enc_ref[...].reshape(B * Lg, D)

    # dec_self_attn
    x = _mha(x, x, selfk_ref[...],
             wqs_ref[0], wks_ref[0], wvs_ref[0], wos_ref[0], B, Ls, Ls)
    # dec_enc_attn
    x = _mha(x, enc2, crossk_ref[...],
             wqc_ref[0], wkc_ref[0], wvc_ref[0], woc_ref[0], B, Ls, Lg)
    # pos_ffn
    x = _ffn(x, w1_ref[0], w2_ref[0])

    x_scr[...] = x
    out_ref[...] = x.reshape(B, Ls, D)        # resident output block, written back once


def decoder_stack(dec0, enc_emb, self_keep, cross_keep, dp):
    B, Ls, D = dec0.shape
    Lg = enc_emb.shape[1]

    full3 = lambda shape: pl.BlockSpec(shape, lambda l: (0, 0, 0))
    per_layer = lambda shape: pl.BlockSpec((1,) + shape, lambda l: (l, 0, 0))

    return pl.pallas_call(
        dec_stack_kernel,
        out_shape=jax.ShapeDtypeStruct((B, Ls, D), jnp.float32),
        grid=(n_layers,),
        in_specs=[
            full3((B, Ls, D)),            # dec0
            full3((B, Lg, D)),            # enc embedding
            full3((B, Ls, Ls)),           # self keep mask
            full3((B, Ls, Lg)),           # cross keep mask
            per_layer((d_model, d_Q)),    # self wq
            per_layer((d_model, d_Q)),    # self wk
            per_layer((d_model, d_V)),    # self wv
            per_layer((d_V, d_model)),    # self wo
            per_layer((d_model, d_Q)),    # cross wq
            per_layer((d_model, d_Q)),    # cross wk
            per_layer((d_model, d_V)),    # cross wv
            per_layer((d_V, d_model)),    # cross wo
            per_layer((d_model, d_ff)),   # ffn w1
            per_layer((d_ff, d_model)),   # ffn w2
        ],
        out_specs=pl.BlockSpec((B, Ls, D), lambda l: (0, 0, 0)),
        scratch_shapes=[pltpu.VMEM((B * Ls, D), jnp.float32)],
        compiler_params=pltpu.CompilerParams(dimension_semantics=("arbitrary",)),
    )(dec0, enc_emb, self_keep, cross_keep,
      dp['self_wq'], dp['self_wk'], dp['self_wv'], dp['self_wo'],
      dp['cross_wq'], dp['cross_wk'], dp['cross_wv'], dp['cross_wo'],
      dp['ffn_w1'], dp['ffn_w2'])


# =====================  glue (plain JAX)  =====================

def make_pe_table(length, d):
    pos = jnp.arange(length, dtype=jnp.float32)[:, None]
    div = jnp.exp(jnp.arange(0, d, 2, dtype=jnp.float32) * (-math.log(10000.0) / d))
    pe = jnp.zeros((length, d), dtype=jnp.float32)
    pe = pe.at[:, 0::2].set(jnp.sin(pos * div))
    pe = pe.at[:, 1::2].set(jnp.cos(pos * div))
    return pe


def pad_mask_bool(p1, p2):
    a = (p1[:, :, 1] == -1.0)               # (B, Lq)
    b = (p2[:, :, 1] == -1.0)               # (B, Lk)
    return a[:, :, None] | b[:, None, :]    # True == masked


def init_params(key):
    keys = iter(jax.random.split(key, 64))

    def nrm(shape, scale=0.05):
        return scale * jax.random.normal(next(keys), shape, dtype=jnp.float32)

    # encoder layers: six heads' weights stacked on a leading axis of size 6
    enc_layers = [dict(
        wq=nrm((N_GRAPH_HEADS, d_model, d_Q)), wk=nrm((N_GRAPH_HEADS, d_model, d_Q)),
        wv=nrm((N_GRAPH_HEADS, d_model, d_V)), wo=nrm((N_GRAPH_HEADS, d_V, d_model)),
        w1=nrm((d_model, d_ff)), w2=nrm((d_ff, d_model)),
    ) for _ in range(n_layers)]

    # decoder: weights stacked across layers on a leading axis of size n_layers
    dec = dict(
        self_wq=nrm((n_layers, d_model, d_Q)), self_wk=nrm((n_layers, d_model, d_Q)),
        self_wv=nrm((n_layers, d_model, d_V)), self_wo=nrm((n_layers, d_V, d_model)),
        cross_wq=nrm((n_layers, d_model, d_Q)), cross_wk=nrm((n_layers, d_model, d_Q)),
        cross_wv=nrm((n_layers, d_model, d_V)), cross_wo=nrm((n_layers, d_V, d_model)),
        ffn_w1=nrm((n_layers, d_model, d_ff)), ffn_w2=nrm((n_layers, d_ff, d_model)),
    )

    return dict(
        enc_pos2emb_w=nrm((d_feature, d_model)), enc_pos2emb_b=nrm((d_model,)),
        dec_pos2emb_w=nrm((d_feature, d_model)), dec_pos2emb_b=nrm((d_model,)),
        emb2pos_w=nrm((d_model, d_feature)), emb2pos_b=nrm((d_feature,)),
        enc_layers=enc_layers, dec=dec,
    )


def forward(params, position_graph, blockM, position_seq):
    B, Lg, _ = position_graph.shape
    Ls = position_seq.shape[1]

    # ---------------- Encoder ----------------
    enc_pos_emb = position_graph @ params['enc_pos2emb_w'] + params['enc_pos2emb_b']
    # graph_attn_mask: masked where blockM == 0  ->  keep = (blockM != 0)
    enc_keep = jnp.transpose((blockM != 0).astype(jnp.float32), (1, 0, 2, 3))  # (6,B,Lg,Lg)

    # NOTE: torch's Encoder feeds enc_pos_embeddings to EVERY layer and overwrites
    # enc_embeddings each iteration, so only the last layer's output survives.
    # Layers 0..n-2 are dead compute; skipping them yields an identical output.
    enc_embedding = encoder_layer(enc_pos_emb, enc_keep, params['enc_layers'][-1])

    # ---------------- Decoder ----------------
    dec0 = position_seq @ params['dec_pos2emb_w'] + params['dec_pos2emb_b']
    dec0 = dec0 + make_pe_table(Ls, d_model)[None, :, :]
    # TODO(synk): torch applies nn.Dropout(p=0.1) in training mode here; implemented
    # as eval-mode identity (deterministic kernel).

    subseq = jnp.triu(jnp.ones((Ls, Ls), dtype=bool), k=1)[None, :, :]
    self_keep = (~(subseq | pad_mask_bool(position_seq, position_seq))).astype(jnp.float32)
    cross_keep = (~pad_mask_bool(position_seq, position_graph)).astype(jnp.float32)

    dec_emb = decoder_stack(dec0, enc_embedding, self_keep, cross_keep, params['dec'])

    # ---------------- embedding2position ----------------
    return dec_emb @ params['emb2pos_w'] + params['emb2pos_b']


if __name__ == "__main__":
    key = jax.random.PRNGKey(0)
    kp, k1, k2, k3 = jax.random.split(key, 4)
    params = init_params(kp)

    B, Lg, Ls = 2, 8, 8
    position_graph = jax.random.normal(k1, (B, Lg, d_feature), dtype=jnp.float32)
    position_seq = jax.random.normal(k2, (B, Ls, d_feature), dtype=jnp.float32)
    # mark the last sequence position as padding (column 1 == -1) to exercise pad masks
    position_seq = position_seq.at[:, -1, 1].set(-1.0)
    blockM = jax.random.bernoulli(k3, 0.7, (B, N_GRAPH_HEADS, Lg, Lg)).astype(jnp.float32)

    out = jax.jit(forward)(params, position_graph, blockM, position_seq)
    jax.block_until_ready(out)
    assert out.shape == (B, Ls, d_feature) and out.dtype == jnp.float32
    assert bool(jnp.all(jnp.isfinite(out)))
    print("KERNEL_OK")
</pallas_src>

<mosaic_0001>
module attributes {stable_mosaic.version = 11 : i64} {
  func.func @enc_layer_kernel(%arg0: memref<2x8x256xf32, #tpu.memory_space<vmem>>, %arg1: memref<6x2x8x8xf32, #tpu.memory_space<vmem>>, %arg2: memref<6x256x64xf32, #tpu.memory_space<vmem>>, %arg3: memref<6x256x64xf32, #tpu.memory_space<vmem>>, %arg4: memref<6x256x64xf32, #tpu.memory_space<vmem>>, %arg5: memref<6x64x256xf32, #tpu.memory_space<vmem>>, %arg6: memref<256x256xf32, #tpu.memory_space<vmem>>, %arg7: memref<256x256xf32, #tpu.memory_space<vmem>>, %arg8: memref<2x8x256xf32, #tpu.memory_space<vmem>>) attributes {dimension_semantics = [], scalar_prefetch = 0 : i64, scratch_operands = 0 : i64, tpu.core_type = #tpu.core_type<tc>} {
    %c0 = arith.constant 0 : index
    %c0_0 = arith.constant 0 : index
    %c0_1 = arith.constant 0 : index
    %0 = vector.load %arg0[%c0, %c0_0, %c0_1] : memref<2x8x256xf32, #tpu.memory_space<vmem>>, vector<2x8x256xf32>
    %1 = vector.shape_cast %0 : vector<2x8x256xf32> to vector<16x256xf32>
    %cst = arith.constant 0.000000e+00 : f32
    %2 = vector.broadcast %cst : f32 to vector<16x256xf32>
    %c0_2 = arith.constant 0 : index
    %c0_3 = arith.constant 0 : index
    %c0_4 = arith.constant 0 : index
    %c0_5 = arith.constant 0 : index
    %3 = vector.load %arg1[%c0_2, %c0_3, %c0_4, %c0_5] : memref<6x2x8x8xf32, #tpu.memory_space<vmem>>, vector<1x2x8x8xf32>
    %4 = vector.shape_cast %3 : vector<1x2x8x8xf32> to vector<2x8x8xf32>
    %c0_6 = arith.constant 0 : index
    %c0_7 = arith.constant 0 : index
    %c0_8 = arith.constant 0 : index
    %5 = vector.load %arg2[%c0_6, %c0_7, %c0_8] : memref<6x256x64xf32, #tpu.memory_space<vmem>>, vector<1x256x64xf32>
    %6 = vector.shape_cast %5 : vector<1x256x64xf32> to vector<256x64xf32>
    %c0_9 = arith.constant 0 : index
    %c0_10 = arith.constant 0 : index
    %c0_11 = arith.constant 0 : index
    %7 = vector.load %arg3[%c0_9, %c0_10, %c0_11] : memref<6x256x64xf32, #tpu.memory_space<vmem>>, vector<1x256x64xf32>
    %8 = vector.shape_cast %7 : vector<1x256x64xf32> to vector<256x64xf32>
    %c0_12 = arith.constant 0 : index
    %c0_13 = arith.constant 0 : index
    %c0_14 = arith.constant 0 : index
    %9 = vector.load %arg4[%c0_12, %c0_13, %c0_14] : memref<6x256x64xf32, #tpu.memory_space<vmem>>, vector<1x256x64xf32>
    %10 = vector.shape_cast %9 : vector<1x256x64xf32> to vector<256x64xf32>
    %c0_15 = arith.constant 0 : index
    %c0_16 = arith.constant 0 : index
    %c0_17 = arith.constant 0 : index
    %11 = vector.load %arg5[%c0_15, %c0_16, %c0_17] : memref<6x64x256xf32, #tpu.memory_space<vmem>>, vector<1x64x256xf32>
    %12 = vector.shape_cast %11 : vector<1x64x256xf32> to vector<64x256xf32>
    %cst_18 = arith.constant dense<0.000000e+00> : vector<16x64xf32>
    %13 = tpu.matmul %1, %6, %cst_18 {dimension_numbers = #tpu.dot_dimension_numbers<[1], [0], [0], [1], [0, 0, 1, 1], [], []>} : vector<16x256xf32>, vector<256x64xf32>, vector<16x64xf32> -> vector<16x64xf32>
    %14 = vector.shape_cast %13 : vector<16x64xf32> to vector<2x8x64xf32>
    %cst_19 = arith.constant dense<0.000000e+00> : vector<16x64xf32>
    %15 = tpu.matmul %1, %8, %cst_19 {dimension_numbers = #tpu.dot_dimension_numbers<[1], [0], [0], [1], [0, 0, 1, 1], [], []>} : vector<16x256xf32>, vector<256x64xf32>, vector<16x64xf32> -> vector<16x64xf32>
    %16 = vector.shape_cast %15 : vector<16x64xf32> to vector<2x8x64xf32>
    %cst_20 = arith.constant dense<0.000000e+00> : vector<16x64xf32>
    %17 = tpu.matmul %1, %10, %cst_20 {dimension_numbers = #tpu.dot_dimension_numbers<[1], [0], [0], [1], [0, 0, 1, 1], [], []>} : vector<16x256xf32>, vector<256x64xf32>, vector<16x64xf32> -> vector<16x64xf32>
    %18 = vector.shape_cast %17 : vector<16x64xf32> to vector<2x8x64xf32>
    "tpu.trace_start"() <{level = 10 : i32, message = "bqe,bke->bqk"}> : () -> ()
    %cst_21 = arith.constant dense<0.000000e+00> : vector<2x8x8xf32>
    %19 = tpu.matmul %14, %16, %cst_21 {dimension_numbers = #tpu.dot_dimension_numbers<[2], [2], [1], [1], [0, 0, 0, 1, 1, 1], [0], [0]>} : vector<2x8x64xf32>, vector<2x8x64xf32>, vector<2x8x8xf32> -> vector<2x8x8xf32>
    "tpu.trace_stop"() : () -> ()
    %cst_22 = arith.constant 1.250000e-01 : f32
    %20 = vector.broadcast %cst_22 : f32 to vector<2x8x8xf32>
    %21 = arith.mulf %19, %20 : vector<2x8x8xf32>
    %cst_23 = arith.constant 1.000000e+00 : f32
    %22 = vector.broadcast %cst_23 : f32 to vector<2x8x8xf32>
    %23 = arith.subf %4, %22 : vector<2x8x8xf32>
    %cst_24 = arith.constant 1.000000e+09 : f32
    %24 = vector.broadcast %cst_24 : f32 to vector<2x8x8xf32>
    %25 = arith.mulf %23, %24 : vector<2x8x8xf32>
    %26 = arith.addf %21, %25 : vector<2x8x8xf32>
    %cst_25 = arith.constant dense<0xFF800000> : vector<2x8xf32>
    %27 = vector.multi_reduction <maximumf>, %26, %cst_25 [2] : vector<2x8x8xf32> to vector<2x8xf32>
    %28 = vector.shape_cast %27 : vector<2x8xf32> to vector<2x8x1xf32>
    %29 = vector.broadcast %28 : vector<2x8x1xf32> to vector<2x8x8xf32>
    %30 = arith.subf %26, %29 : vector<2x8x8xf32>
    %31 = math.exp %30 : vector<2x8x8xf32>
    %cst_26 = arith.constant dense<0.000000e+00> : vector<2x8xf32>
    %32 = vector.multi_reduction <add>, %31, %cst_26 [2] : vector<2x8x8xf32> to vector<2x8xf32>
    %33 = vector.shape_cast %32 : vector<2x8xf32> to vector<2x8x1xf32>
    %34 = tpu.reciprocal %33 {approx = true} : vector<2x8x1xf32> -> vector<2x8x1xf32>
    %35 = vector.broadcast %34 : vector<2x8x1xf32> to vector<2x8x8xf32>
    %36 = arith.mulf %31, %35 : vector<2x8x8xf32>
    %37 = arith.mulf %36, %4 : vector<2x8x8xf32>
    "tpu.trace_start"() <{level = 10 : i32, message = "bqk,bke->bqe"}> : () -> ()
    %cst_27 = arith.constant dense<0.000000e+00> : vector<2x8x64xf32>
    %38 = tpu.matmul %37, %18, %cst_27 {dimension_numbers = #tpu.dot_dimension_numbers<[2], [1], [1], [2], [0, 0, 0, 1, 1, 2], [0], [0]>} : vector<2x8x8xf32>, vector<2x8x64xf32>, vector<2x8x64xf32> -> vector<2x8x64xf32>
    "tpu.trace_stop"() : () -> ()
    %39 = vector.shape_cast %38 : vector<2x8x64xf32> to vector<16x64xf32>
    %cst_28 = arith.constant dense<0.000000e+00> : vector<16x256xf32>
    %40 = tpu.matmul %39, %12, %cst_28 {dimension_numbers = #tpu.dot_dimension_numbers<[1], [0], [0], [1], [0, 0, 1, 1], [], []>} : vector<16x64xf32>, vector<64x256xf32>, vector<16x256xf32> -> vector<16x256xf32>
    %41 = arith.addf %40, %1 : vector<16x256xf32>
    %cst_29 = arith.constant dense<0.000000e+00> : vector<16xf32>
    %42 = vector.multi_reduction <add>, %41, %cst_29 [1] : vector<16x256xf32> to vector<16xf32>
    %43 = vector.shape_cast %42 : vector<16xf32> to vector<16x1xf32>
    %cst_30 = arith.constant 2.560000e+02 : f32
    %44 = vector.broadcast %cst_30 : f32 to vector<16x1xf32>
    %45 = arith.divf %43, %44 : vector<16x1xf32>
    %46 = vector.broadcast %45 : vector<16x1xf32> to vector<16x256xf32>
    %47 = arith.subf %41, %46 : vector<16x256xf32>
    %48 = arith.mulf %47, %47 : vector<16x256xf32>
    %cst_31 = arith.constant dense<0.000000e+00> : vector<16xf32>
    %49 = vector.multi_reduction <add>, %48, %cst_31 [1] : vector<16x256xf32> to vector<16xf32>
    %50 = vector.shape_cast %49 : vector<16xf32> to vector<16x1xf32>
    %cst_32 = arith.constant 2.560000e+02 : f32
    %51 = vector.broadcast %cst_32 : f32 to vector<16x1xf32>
    %52 = arith.divf %50, %51 : vector<16x1xf32>
    %53 = vector.broadcast %45 : vector<16x1xf32> to vector<16x256xf32>
    %54 = arith.subf %41, %53 : vector<16x256xf32>
    %cst_33 = arith.constant 9.99999974E-6 : f32
    %55 = vector.broadcast %cst_33 : f32 to vector<16x1xf32>
    %56 = arith.addf %52, %55 : vector<16x1xf32>
    %57 = math.rsqrt %56 : vector<16x1xf32>
    %58 = vector.broadcast %57 : vector<16x1xf32> to vector<16x256xf32>
    %59 = arith.mulf %54, %58 : vector<16x256xf32>
    %60 = arith.addf %2, %59 : vector<16x256xf32>
    %c1 = arith.constant 1 : index
    %c0_34 = arith.constant 0 : index
    %c0_35 = arith.constant 0 : index
    %c0_36 = arith.constant 0 : index
    %61 = vector.load %arg1[%c1, %c0_34, %c0_35, %c0_36] : memref<6x2x8x8xf32, #tpu.memory_space<vmem>>, vector<1x2x8x8xf32>
    %62 = vector.shape_cast %61 : vector<1x2x8x8xf32> to vector<2x8x8xf32>
    %c1_37 = arith.constant 1 : index
    %c0_38 = arith.constant 0 : index
    %c0_39 = arith.constant 0 : index
    %63 = vector.load %arg2[%c1_37, %c0_38, %c0_39] : memref<6x256x64xf32, #tpu.memory_space<vmem>>, vector<1x256x64xf32>
    %64 = vector.shape_cast %63 : vector<1x256x64xf32> to vector<256x64xf32>
    %c1_40 = arith.constant 1 : index
    %c0_41 = arith.constant 0 : index
    %c0_42 = arith.constant 0 : index
    %65 = vector.load %arg3[%c1_40, %c0_41, %c0_42] : memref<6x256x64xf32, #tpu.memory_space<vmem>>, vector<1x256x64xf32>
    %66 = vector.shape_cast %65 : vector<1x256x64xf32> to vector<256x64xf32>
    %c1_43 = arith.constant 1 : index
    %c0_44 = arith.constant 0 : index
    %c0_45 = arith.constant 0 : index
    %67 = vector.load %arg4[%c1_43, %c0_44, %c0_45] : memref<6x256x64xf32, #tpu.memory_space<vmem>>, vector<1x256x64xf32>
    %68 = vector.shape_cast %67 : vector<1x256x64xf32> to vector<256x64xf32>
    %c1_46 = arith.constant 1 : index
    %c0_47 = arith.constant 0 : index
    %c0_48 = arith.constant 0 : index
    %69 = vector.load %arg5[%c1_46, %c0_47, %c0_48] : memref<6x64x256xf32, #tpu.memory_space<vmem>>, vector<1x64x256xf32>
    %70 = vector.shape_cast %69 : vector<1x64x256xf32> to vector<64x256xf32>
    %cst_49 = arith.constant dense<0.000000e+00> : vector<16x64xf32>
    %71 = tpu.matmul %1, %64, %cst_49 {dimension_numbers = #tpu.dot_dimension_numbers<[1], [0], [0], [1], [0, 0, 1, 1], [], []>} : vector<16x256xf32>, vector<256x64xf32>, vector<16x64xf32> -> vector<16x64xf32>
    %72 = vector.shape_cast %71 : vector<16x64xf32> to vector<2x8x64xf32>
    %cst_50 = arith.constant dense<0.000000e+00> : vector<16x64xf32>
    %73 = tpu.matmul %1, %66, %cst_50 {dimension_numbers = #tpu.dot_dimension_numbers<[1], [0], [0], [1], [0, 0, 1, 1], [], []>} : vector<16x256xf32>, vector<256x64xf32>, vector<16x64xf32> -> vector<16x64xf32>
    %74 = vector.shape_cast %73 : vector<16x64xf32> to vector<2x8x64xf32>
    %cst_51 = arith.constant dense<0.000000e+00> : vector<16x64xf32>
    %75 = tpu.matmul %1, %68, %cst_51 {dimension_numbers = #tpu.dot_dimension_numbers<[1], [0], [0], [1], [0, 0, 1, 1], [], []>} : vector<16x256xf32>, vector<256x64xf32>, vector<16x64xf32> -> vector<16x64xf32>
    %76 = vector.shape_cast %75 : vector<16x64xf32> to vector<2x8x64xf32>
    "tpu.trace_start"() <{level = 10 : i32, message = "bqe,bke->bqk"}> : () -> ()
    %cst_52 = arith.constant dense<0.000000e+00> : vector<2x8x8xf32>
    %77 = tpu.matmul %72, %74, %cst_52 {dimension_numbers = #tpu.dot_dimension_numbers<[2], [2], [1], [1], [0, 0, 0, 1, 1, 1], [0], [0]>} : vector<2x8x64xf32>, vector<2x8x64xf32>, vector<2x8x8xf32> -> vector<2x8x8xf32>
    "tpu.trace_stop"() : () -> ()
    %cst_53 = arith.constant 1.250000e-01 : f32
    %78 = vector.broadcast %cst_53 : f32 to vector<2x8x8xf32>
    %79 = arith.mulf %77, %78 : vector<2x8x8xf32>
    %cst_54 = arith.constant 1.000000e+00 : f32
    %80 = vector.broadcast %cst_54 : f32 to vector<2x8x8xf32>
    %81 = arith.subf %62, %80 : vector<2x8x8xf32>
    %cst_55 = arith.constant 1.000000e+09 : f32
    %82 = vector.broadcast %cst_55 : f32 to vector<2x8x8xf32>
    %83 = arith.mulf %81, %82 : vector<2x8x8xf32>
    %84 = arith.addf %79, %83 : vector<2x8x8xf32>
    %cst_56 = arith.constant dense<0xFF800000> : vector<2x8xf32>
    %85 = vector.multi_reduction <maximumf>, %84, %cst_56 [2] : vector<2x8x8xf32> to vector<2x8xf32>
    %86 = vector.shape_cast %85 : vector<2x8xf32> to vector<2x8x1xf32>
    %87 = vector.broadcast %86 : vector<2x8x1xf32> to vector<2x8x8xf32>
    %88 = arith.subf %84, %87 : vector<2x8x8xf32>
    %89 = math.exp %88 : vector<2x8x8xf32>
    %cst_57 = arith.constant dense<0.000000e+00> : vector<2x8xf32>
    %90 = vector.multi_reduction <add>, %89, %cst_57 [2] : vector<2x8x8xf32> to vector<2x8xf32>
    %91 = vector.shape_cast %90 : vector<2x8xf32> to vector<2x8x1xf32>
    %92 = tpu.reciprocal %91 {approx = true} : vector<2x8x1xf32> -> vector<2x8x1xf32>
    %93 = vector.broadcast %92 : vector<2x8x1xf32> to vector<2x8x8xf32>
    %94 = arith.mulf %89, %93 : vector<2x8x8xf32>
    %95 = arith.mulf %94, %62 : vector<2x8x8xf32>
    "tpu.trace_start"() <{level = 10 : i32, message = "bqk,bke->bqe"}> : () -> ()
    %cst_58 = arith.constant dense<0.000000e+00> : vector<2x8x64xf32>
    %96 = tpu.matmul %95, %76, %cst_58 {dimension_numbers = #tpu.dot_dimension_numbers<[2], [1], [1], [2], [0, 0, 0, 1, 1, 2], [0], [0]>} : vector<2x8x8xf32>, vector<2x8x64xf32>, vector<2x8x64xf32> -> vector<2x8x64xf32>
    "tpu.trace_stop"() : () -> ()
    %97 = vector.shape_cast %96 : vector<2x8x64xf32> to vector<16x64xf32>
    %cst_59 = arith.constant dense<0.000000e+00> : vector<16x256xf32>
    %98 = tpu.matmul %97, %70, %cst_59 {dimension_numbers = #tpu.dot_dimension_numbers<[1], [0], [0], [1], [0, 0, 1, 1], [], []>} : vector<16x64xf32>, vector<64x256xf32>, vector<16x256xf32> -> vector<16x256xf32>
    %99 = arith.addf %98, %1 : vector<16x256xf32>
    %cst_60 = arith.constant dense<0.000000e+00> : vector<16xf32>
    %100 = vector.multi_reduction <add>, %99, %cst_60 [1] : vector<16x256xf32> to vector<16xf32>
    %101 = vector.shape_cast %100 : vector<16xf32> to vector<16x1xf32>
    %cst_61 = arith.constant 2.560000e+02 : f32
    %102 = vector.broadcast %cst_61 : f32 to vector<16x1xf32>
    %103 = arith.divf %101, %102 : vector<16x1xf32>
    %104 = vector.broadcast %103 : vector<16x1xf32> to vector<16x256xf32>
    %105 = arith.subf %99, %104 : vector<16x256xf32>
    %106 = arith.mulf %105, %105 : vector<16x256xf32>
    %cst_62 = arith.constant dense<0.000000e+00> : vector<16xf32>
    %107 = vector.multi_reduction <add>, %106, %cst_62 [1] : vector<16x256xf32> to vector<16xf32>
    %108 = vector.shape_cast %107 : vector<16xf32> to vector<16x1xf32>
    %cst_63 = arith.constant 2.560000e+02 : f32
    %109 = vector.broadcast %cst_63 : f32 to vector<16x1xf32>
    %110 = arith.divf %108, %109 : vector<16x1xf32>
    %111 = vector.broadcast %103 : vector<16x1xf32> to vector<16x256xf32>
    %112 = arith.subf %99, %111 : vector<16x256xf32>
    %cst_64 = arith.constant 9.99999974E-6 : f32
    %113 = vector.broadcast %cst_64 : f32 to vector<16x1xf32>
    %114 = arith.addf %110, %113 : vector<16x1xf32>
    %115 = math.rsqrt %114 : vector<16x1xf32>
    %116 = vector.broadcast %115 : vector<16x1xf32> to vector<16x256xf32>
    %117 = arith.mulf %112, %116 : vector<16x256xf32>
    %118 = arith.addf %60, %117 : vector<16x256xf32>
    %c2 = arith.constant 2 : index
    %c0_65 = arith.constant 0 : index
    %c0_66 = arith.constant 0 : index
    %c0_67 = arith.constant 0 : index
    %119 = vector.load %arg1[%c2, %c0_65, %c0_66, %c0_67] : memref<6x2x8x8xf32, #tpu.memory_space<vmem>>, vector<1x2x8x8xf32>
    %120 = vector.shape_cast %119 : vector<1x2x8x8xf32> to vector<2x8x8xf32>
    %c2_68 = arith.constant 2 : index
    %c0_69 = arith.constant 0 : index
    %c0_70 = arith.constant 0 : index
    %121 = vector.load %arg2[%c2_68, %c0_69, %c0_70] : memref<6x256x64xf32, #tpu.memory_space<vmem>>, vector<1x256x64xf32>
    %122 = vector.shape_cast %121 : vector<1x256x64xf32> to vector<256x64xf32>
    %c2_71 = arith.constant 2 : index
    %c0_72 = arith.constant 0 : index
    %c0_73 = arith.constant 0 : index
    %123 = vector.load %arg3[%c2_71, %c0_72, %c0_73] : memref<6x256x64xf32, #tpu.memory_space<vmem>>, vector<1x256x64xf32>
    %124 = vector.shape_cast %123 : vector<1x256x64xf32> to vector<256x64xf32>
    %c2_74 = arith.constant 2 : index
    %c0_75 = arith.constant 0 : index
    %c0_76 = arith.constant 0 : index
    %125 = vector.load %arg4[%c2_74, %c0_75, %c0_76] : memref<6x256x64xf32, #tpu.memory_space<vmem>>, vector<1x256x64xf32>
    %126 = vector.shape_cast %125 : vector<1x256x64xf32> to vector<256x64xf32>
    %c2_77 = arith.constant 2 : index
    %c0_78 = arith.constant 0 : index
    %c0_79 = arith.constant 0 : index
    %127 = vector.load %arg5[%c2_77, %c0_78, %c0_79] : memref<6x64x256xf32, #tpu.memory_space<vmem>>, vector<1x64x256xf32>
    %128 = vector.shape_cast %127 : vector<1x64x256xf32> to vector<64x256xf32>
    %cst_80 = arith.constant dense<0.000000e+00> : vector<16x64xf32>
    %129 = tpu.matmul %1, %122, %cst_80 {dimension_numbers = #tpu.dot_dimension_numbers<[1], [0], [0], [1], [0, 0, 1, 1], [], []>} : vector<16x256xf32>, vector<256x64xf32>, vector<16x64xf32> -> vector<16x64xf32>
    %130 = vector.shape_cast %129 : vector<16x64xf32> to vector<2x8x64xf32>
    %cst_81 = arith.constant dense<0.000000e+00> : vector<16x64xf32>
    %131 = tpu.matmul %1, %124, %cst_81 {dimension_numbers = #tpu.dot_dimension_numbers<[1], [0], [0], [1], [0, 0, 1, 1], [], []>} : vector<16x256xf32>, vector<256x64xf32>, vector<16x64xf32> -> vector<16x64xf32>
    %132 = vector.shape_cast %131 : vector<16x64xf32> to vector<2x8x64xf32>
    %cst_82 = arith.constant dense<0.000000e+00> : vector<16x64xf32>
    %133 = tpu.matmul %1, %126, %cst_82 {dimension_numbers = #tpu.dot_dimension_numbers<[1], [0], [0], [1], [0, 0, 1, 1], [], []>} : vector<16x256xf32>, vector<256x64xf32>, vector<16x64xf32> -> vector<16x64xf32>
    %134 = vector.shape_cast %133 : vector<16x64xf32> to vector<2x8x64xf32>
    "tpu.trace_start"() <{level = 10 : i32, message = "bqe,bke->bqk"}> : () -> ()
    %cst_83 = arith.constant dense<0.000000e+00> : vector<2x8x8xf32>
    %135 = tpu.matmul %130, %132, %cst_83 {dimension_numbers = #tpu.dot_dimension_numbers<[2], [2], [1], [1], [0, 0, 0, 1, 1, 1], [0], [0]>} : vector<2x8x64xf32>, vector<2x8x64xf32>, vector<2x8x8xf32> -> vector<2x8x8xf32>
    "tpu.trace_stop"() : () -> ()
    %cst_84 = arith.constant 1.250000e-01 : f32
    %136 = vector.broadcast %cst_84 : f32 to vector<2x8x8xf32>
    %137 = arith.mulf %135, %136 : vector<2x8x8xf32>
    %cst_85 = arith.constant 1.000000e+00 : f32
    %138 = vector.broadcast %cst_85 : f32 to vector<2x8x8xf32>
    %139 = arith.subf %120, %138 : vector<2x8x8xf32>
    %cst_86 = arith.constant 1.000000e+09 : f32
    %140 = vector.broadcast %cst_86 : f32 to vector<2x8x8xf32>
    %141 = arith.mulf %139, %140 : vector<2x8x8xf32>
    %142 = arith.addf %137, %141 : vector<2x8x8xf32>
    %cst_87 = arith.constant dense<0xFF800000> : vector<2x8xf32>
    %143 = vector.multi_reduction <maximumf>, %142, %cst_87 [2] : vector<2x8x8xf32> to vector<2x8xf32>
    %144 = vector.shape_cast %143 : vector<2x8xf32> to vector<2x8x1xf32>
    %145 = vector.broadcast %144 : vector<2x8x1xf32> to vector<2x8x8xf32>
    %146 = arith.subf %142, %145 : vector<2x8x8xf32>
    %147 = math.exp %146 : vector<2x8x8xf32>
    %cst_88 = arith.constant dense<0.000000e+00> : vector<2x8xf32>
    %148 = vector.multi_reduction <add>, %147, %cst_88 [2] : vector<2x8x8xf32> to vector<2x8xf32>
    %149 = vector.shape_cast %148 : vector<2x8xf32> to vector<2x8x1xf32>
    %150 = tpu.reciprocal %149 {approx = true} : vector<2x8x1xf32> -> vector<2x8x1xf32>
    %151 = vector.broadcast %150 : vector<2x8x1xf32> to vector<2x8x8xf32>
    %152 = arith.mulf %147, %151 : vector<2x8x8xf32>
    %153 = arith.mulf %152, %120 : vector<2x8x8xf32>
    "tpu.trace_start"() <{level = 10 : i32, message = "bqk,bke->bqe"}> : () -> ()
    %cst_89 = arith.constant dense<0.000000e+00> : vector<2x8x64xf32>
    %154 = tpu.matmul %153, %134, %cst_89 {dimension_numbers = #tpu.dot_dimension_numbers<[2], [1], [1], [2], [0, 0, 0, 1, 1, 2], [0], [0]>} : vector<2x8x8xf32>, vector<2x8x64xf32>, vector<2x8x64xf32> -> vector<2x8x64xf32>
    "tpu.trace_stop"() : () -> ()
    %155 = vector.shape_cast %154 : vector<2x8x64xf32> to vector<16x64xf32>
    %cst_90 = arith.constant dense<0.000000e+00> : vector<16x256xf32>
    %156 = tpu.matmul %155, %128, %cst_90 {dimension_numbers = #tpu.dot_dimension_numbers<[1], [0], [0], [1], [0, 0, 1, 1], [], []>} : vector<16x64xf32>, vector<64x256xf32>, vector<16x256xf32> -> vector<16x256xf32>
    %157 = arith.addf %156, %1 : vector<16x256xf32>
    %cst_91 = arith.constant dense<0.000000e+00> : vector<16xf32>
    %158 = vector.multi_reduction <add>, %157, %cst_91 [1] : vector<16x256xf32> to vector<16xf32>
    %159 = vector.shape_cast %158 : vector<16xf32> to vector<16x1xf32>
    %cst_92 = arith.constant 2.560000e+02 : f32
    %160 = vector.broadcast %cst_92 : f32 to vector<16x1xf32>
    %161 = arith.divf %159, %160 : vector<16x1xf32>
    %162 = vector.broadcast %161 : vector<16x1xf32> to vector<16x256xf32>
    %163 = arith.subf %157, %162 : vector<16x256xf32>
    %164 = arith.mulf %163, %163 : vector<16x256xf32>
    %cst_93 = arith.constant dense<0.000000e+00> : vector<16xf32>
    %165 = vector.multi_reduction <add>, %164, %cst_93 [1] : vector<16x256xf32> to vector<16xf32>
    %166 = vector.shape_cast %165 : vector<16xf32> to vector<16x1xf32>
    %cst_94 = arith.constant 2.560000e+02 : f32
    %167 = vector.broadcast %cst_94 : f32 to vector<16x1xf32>
    %168 = arith.divf %166, %167 : vector<16x1xf32>
    %169 = vector.broadcast %161 : vector<16x1xf32> to vector<16x256xf32>
    %170 = arith.subf %157, %169 : vector<16x256xf32>
    %cst_95 = arith.constant 9.99999974E-6 : f32
    %171 = vector.broadcast %cst_95 : f32 to vector<16x1xf32>
    %172 = arith.addf %168, %171 : vector<16x1xf32>
    %173 = math.rsqrt %172 : vector<16x1xf32>
    %174 = vector.broadcast %173 : vector<16x1xf32> to vector<16x256xf32>
    %175 = arith.mulf %170, %174 : vector<16x256xf32>
    %176 = arith.addf %118, %175 : vector<16x256xf32>
    %c3 = arith.constant 3 : index
    %c0_96 = arith.constant 0 : index
    %c0_97 = arith.constant 0 : index
    %c0_98 = arith.constant 0 : index
    %177 = vector.load %arg1[%c3, %c0_96, %c0_97, %c0_98] : memref<6x2x8x8xf32, #tpu.memory_space<vmem>>, vector<1x2x8x8xf32>
    %178 = vector.shape_cast %177 : vector<1x2x8x8xf32> to vector<2x8x8xf32>
    %c3_99 = arith.constant 3 : index
    %c0_100 = arith.constant 0 : index
    %c0_101 = arith.constant 0 : index
    %179 = vector.load %arg2[%c3_99, %c0_100, %c0_101] : memref<6x256x64xf32, #tpu.memory_space<vmem>>, vector<1x256x64xf32>
    %180 = vector.shape_cast %179 : vector<1x256x64xf32> to vector<256x64xf32>
    %c3_102 = arith.constant 3 : index
    %c0_103 = arith.constant 0 : index
    %c0_104 = arith.constant 0 : index
    %181 = vector.load %arg3[%c3_102, %c0_103, %c0_104] : memref<6x256x64xf32, #tpu.memory_space<vmem>>, vector<1x256x64xf32>
    %182 = vector.shape_cast %181 : vector<1x256x64xf32> to vector<256x64xf32>
    %c3_105 = arith.constant 3 : index
    %c0_106 = arith.constant 0 : index
    %c0_107 = arith.constant 0 : index
    %183 = vector.load %arg4[%c3_105, %c0_106, %c0_107] : memref<6x256x64xf32, #tpu.memory_space<vmem>>, vector<1x256x64xf32>
    %184 = vector.shape_cast %183 : vector<1x256x64xf32> to vector<256x64xf32>
    %c3_108 = arith.constant 3 : index
    %c0_109 = arith.constant 0 : index
    %c0_110 = arith.constant 0 : index
    %185 = vector.load %arg5[%c3_108, %c0_109, %c0_110] : memref<6x64x256xf32, #tpu.memory_space<vmem>>, vector<1x64x256xf32>
    %186 = vector.shape_cast %185 : vector<1x64x256xf32> to vector<64x256xf32>
    %cst_111 = arith.constant dense<0.000000e+00> : vector<16x64xf32>
    %187 = tpu.matmul %1, %180, %cst_111 {dimension_numbers = #tpu.dot_dimension_numbers<[1], [0], [0], [1], [0, 0, 1, 1], [], []>} : vector<16x256xf32>, vector<256x64xf32>, vector<16x64xf32> -> vector<16x64xf32>
    %188 = vector.shape_cast %187 : vector<16x64xf32> to vector<2x8x64xf32>
    %cst_112 = arith.constant dense<0.000000e+00> : vector<16x64xf32>
    %189 = tpu.matmul %1, %182, %cst_112 {dimension_numbers = #tpu.dot_dimension_numbers<[1], [0], [0], [1], [0, 0, 1, 1], [], []>} : vector<16x256xf32>, vector<256x64xf32>, vector<16x64xf32> -> vector<16x64xf32>
    %190 = vector.shape_cast %189 : vector<16x64xf32> to vector<2x8x64xf32>
    %cst_113 = arith.constant dense<0.000000e+00> : vector<16x64xf32>
    %191 = tpu.matmul %1, %184, %cst_113 {dimension_numbers = #tpu.dot_dimension_numbers<[1], [0], [0], [1], [0, 0, 1, 1], [], []>} : vector<16x256xf32>, vector<256x64xf32>, vector<16x64xf32> -> vector<16x64xf32>
    %192 = vector.shape_cast %191 : vector<16x64xf32> to vector<2x8x64xf32>
    "tpu.trace_start"() <{level = 10 : i32, message = "bqe,bke->bqk"}> : () -> ()
    %cst_114 = arith.constant dense<0.000000e+00> : vector<2x8x8xf32>
    %193 = tpu.matmul %188, %190, %cst_114 {dimension_numbers = #tpu.dot_dimension_numbers<[2], [2], [1], [1], [0, 0, 0, 1, 1, 1], [0], [0]>} : vector<2x8x64xf32>, vector<2x8x64xf32>, vector<2x8x8xf32> -> vector<2x8x8xf32>
    "tpu.trace_stop"() : () -> ()
    %cst_115 = arith.constant 1.250000e-01 : f32
    %194 = vector.broadcast %cst_115 : f32 to vector<2x8x8xf32>
    %195 = arith.mulf %193, %194 : vector<2x8x8xf32>
    %cst_116 = arith.constant 1.000000e+00 : f32
    %196 = vector.broadcast %cst_116 : f32 to vector<2x8x8xf32>
    %197 = arith.subf %178, %196 : vector<2x8x8xf32>
    %cst_117 = arith.constant 1.000000e+09 : f32
    %198 = vector.broadcast %cst_117 : f32 to vector<2x8x8xf32>
    %199 = arith.mulf %197, %198 : vector<2x8x8xf32>
    %200 = arith.addf %195, %199 : vector<2x8x8xf32>
    %cst_118 = arith.constant dense<0xFF800000> : vector<2x8xf32>
    %201 = vector.multi_reduction <maximumf>, %200, %cst_118 [2] : vector<2x8x8xf32> to vector<2x8xf32>
    %202 = vector.shape_cast %201 : vector<2x8xf32> to vector<2x8x1xf32>
    %203 = vector.broadcast %202 : vector<2x8x1xf32> to vector<2x8x8xf32>
    %204 = arith.subf %200, %203 : vector<2x8x8xf32>
    %205 = math.exp %204 : vector<2x8x8xf32>
    %cst_119 = arith.constant dense<0.000000e+00> : vector<2x8xf32>
    %206 = vector.multi_reduction <add>, %205, %cst_119 [2] : vector<2x8x8xf32> to vector<2x8xf32>
    %207 = vector.shape_cast %206 : vector<2x8xf32> to vector<2x8x1xf32>
    %208 = tpu.reciprocal %207 {approx = true} : vector<2x8x1xf32> -> vector<2x8x1xf32>
    %209 = vector.broadcast %208 : vector<2x8x1xf32> to vector<2x8x8xf32>
    %210 = arith.mulf %205, %209 : vector<2x8x8xf32>
    %211 = arith.mulf %210, %178 : vector<2x8x8xf32>
    "tpu.trace_start"() <{level = 10 : i32, message = "bqk,bke->bqe"}> : () -> ()
    %cst_120 = arith.constant dense<0.000000e+00> : vector<2x8x64xf32>
    %212 = tpu.matmul %211, %192, %cst_120 {dimension_numbers = #tpu.dot_dimension_numbers<[2], [1], [1], [2], [0, 0, 0, 1, 1, 2], [0], [0]>} : vector<2x8x8xf32>, vector<2x8x64xf32>, vector<2x8x64xf32> -> vector<2x8x64xf32>
    "tpu.trace_stop"() : () -> ()
    %213 = vector.shape_cast %212 : vector<2x8x64xf32> to vector<16x64xf32>
    %cst_121 = arith.constant dense<0.000000e+00> : vector<16x256xf32>
    %214 = tpu.matmul %213, %186, %cst_121 {dimension_numbers = #tpu.dot_dimension_numbers<[1], [0], [0], [1], [0, 0, 1, 1], [], []>} : vector<16x64xf32>, vector<64x256xf32>, vector<16x256xf32> -> vector<16x256xf32>
    %215 = arith.addf %214, %1 : vector<16x256xf32>
    %cst_122 = arith.constant dense<0.000000e+00> : vector<16xf32>
    %216 = vector.multi_reduction <add>, %215, %cst_122 [1] : vector<16x256xf32> to vector<16xf32>
    %217 = vector.shape_cast %216 : vector<16xf32> to vector<16x1xf32>
    %cst_123 = arith.constant 2.560000e+02 : f32
    %218 = vector.broadcast %cst_123 : f32 to vector<16x1xf32>
    %219 = arith.divf %217, %218 : vector<16x1xf32>
    %220 = vector.broadcast %219 : vector<16x1xf32> to vector<16x256xf32>
    %221 = arith.subf %215, %220 : vector<16x256xf32>
    %222 = arith.mulf %221, %221 : vector<16x256xf32>
    %cst_124 = arith.constant dense<0.000000e+00> : vector<16xf32>
    %223 = vector.multi_reduction <add>, %222, %cst_124 [1] : vector<16x256xf32> to vector<16xf32>
    %224 = vector.shape_cast %223 : vector<16xf32> to vector<16x1xf32>
    %cst_125 = arith.constant 2.560000e+02 : f32
    %225 = vector.broadcast %cst_125 : f32 to vector<16x1xf32>
    %226 = arith.divf %224, %225 : vector<16x1xf32>
    %227 = vector.broadcast %219 : vector<16x1xf32> to vector<16x256xf32>
    %228 = arith.subf %215, %227 : vector<16x256xf32>
    %cst_126 = arith.constant 9.99999974E-6 : f32
    %229 = vector.broadcast %cst_126 : f32 to vector<16x1xf32>
    %230 = arith.addf %226, %229 : vector<16x1xf32>
    %231 = math.rsqrt %230 : vector<16x1xf32>
    %232 = vector.broadcast %231 : vector<16x1xf32> to vector<16x256xf32>
    %233 = arith.mulf %228, %232 : vector<16x256xf32>
    %234 = arith.addf %176, %233 : vector<16x256xf32>
    %c4 = arith.constant 4 : index
    %c0_127 = arith.constant 0 : index
    %c0_128 = arith.constant 0 : index
    %c0_129 = arith.constant 0 : index
    %235 = vector.load %arg1[%c4, %c0_127, %c0_128, %c0_129] : memref<6x2x8x8xf32, #tpu.memory_space<vmem>>, vector<1x2x8x8xf32>
    %236 = vector.shape_cast %235 : vector<1x2x8x8xf32> to vector<2x8x8xf32>
    %c4_130 = arith.constant 4 : index
    %c0_131 = arith.constant 0 : index
    %c0_132 = arith.constant 0 : index
    %237 = vector.load %arg2[%c4_130, %c0_131, %c0_132] : memref<6x256x64xf32, #tpu.memory_space<vmem>>, vector<1x256x64xf32>
    %238 = vector.shape_cast %237 : vector<1x256x64xf32> to vector<256x64xf32>
    %c4_133 = arith.constant 4 : index
    %c0_134 = arith.constant 0 : index
    %c0_135 = arith.constant 0 : index
    %239 = vector.load %arg3[%c4_133, %c0_134, %c0_135] : memref<6x256x64xf32, #tpu.memory_space<vmem>>, vector<1x256x64xf32>
    %240 = vector.shape_cast %239 : vector<1x256x64xf32> to vector<256x64xf32>
    %c4_136 = arith.constant 4 : index
    %c0_137 = arith.constant 0 : index
    %c0_138 = arith.constant 0 : index
    %241 = vector.load %arg4[%c4_136, %c0_137, %c0_138] : memref<6x256x64xf32, #tpu.memory_space<vmem>>, vector<1x256x64xf32>
    %242 = vector.shape_cast %241 : vector<1x256x64xf32> to vector<256x64xf32>
    %c4_139 = arith.constant 4 : index
    %c0_140 = arith.constant 0 : index
    %c0_141 = arith.constant 0 : index
    %243 = vector.load %arg5[%c4_139, %c0_140, %c0_141] : memref<6x64x256xf32, #tpu.memory_space<vmem>>, vector<1x64x256xf32>
    %244 = vector.shape_cast %243 : vector<1x64x256xf32> to vector<64x256xf32>
    %cst_142 = arith.constant dense<0.000000e+00> : vector<16x64xf32>
    %245 = tpu.matmul %1, %238, %cst_142 {dimension_numbers = #tpu.dot_dimension_numbers<[1], [0], [0], [1], [0, 0, 1, 1], [], []>} : vector<16x256xf32>, vector<256x64xf32>, vector<16x64xf32> -> vector<16x64xf32>
    %246 = vector.shape_cast %245 : vector<16x64xf32> to vector<2x8x64xf32>
    %cst_143 = arith.constant dense<0.000000e+00> : vector<16x64xf32>
    %247 = tpu.matmul %1, %240, %cst_143 {dimension_numbers = #tpu.dot_dimension_numbers<[1], [0], [0], [1], [0, 0, 1, 1], [], []>} : vector<16x256xf32>, vector<256x64xf32>, vector<16x64xf32> -> vector<16x64xf32>
    %248 = vector.shape_cast %247 : vector<16x64xf32> to vector<2x8x64xf32>
    %cst_144 = arith.constant dense<0.000000e+00> : vector<16x64xf32>
    %249 = tpu.matmul %1, %242, %cst_144 {dimension_numbers = #tpu.dot_dimension_numbers<[1], [0], [0], [1], [0, 0, 1, 1], [], []>} : vector<16x256xf32>, vector<256x64xf32>, vector<16x64xf32> -> vector<16x64xf32>
    %250 = vector.shape_cast %249 : vector<16x64xf32> to vector<2x8x64xf32>
    "tpu.trace_start"() <{level = 10 : i32, message = "bqe,bke->bqk"}> : () -> ()
    %cst_145 = arith.constant dense<0.000000e+00> : vector<2x8x8xf32>
    %251 = tpu.matmul %246, %248, %cst_145 {dimension_numbers = #tpu.dot_dimension_numbers<[2], [2], [1], [1], [0, 0, 0, 1, 1, 1], [0], [0]>} : vector<2x8x64xf32>, vector<2x8x64xf32>, vector<2x8x8xf32> -> vector<2x8x8xf32>
    "tpu.trace_stop"() : () -> ()
    %cst_146 = arith.constant 1.250000e-01 : f32
    %252 = vector.broadcast %cst_146 : f32 to vector<2x8x8xf32>
    %253 = arith.mulf %251, %252 : vector<2x8x8xf32>
    %cst_147 = arith.constant 1.000000e+00 : f32
    %254 = vector.broadcast %cst_147 : f32 to vector<2x8x8xf32>
    %255 = arith.subf %236, %254 : vector<2x8x8xf32>
    %cst_148 = arith.constant 1.000000e+09 : f32
    %256 = vector.broadcast %cst_148 : f32 to vector<2x8x8xf32>
    %257 = arith.mulf %255, %256 : vector<2x8x8xf32>
    %258 = arith.addf %253, %257 : vector<2x8x8xf32>
    %cst_149 = arith.constant dense<0xFF800000> : vector<2x8xf32>
    %259 = vector.multi_reduction <maximumf>, %258, %cst_149 [2] : vector<2x8x8xf32> to vector<2x8xf32>
    %260 = vector.shape_cast %259 : vector<2x8xf32> to vector<2x8x1xf32>
    %261 = vector.broadcast %260 : vector<2x8x1xf32> to vector<2x8x8xf32>
    %262 = arith.subf %258, %261 : vector<2x8x8xf32>
    %263 = math.exp %262 : vector<2x8x8xf32>
    %cst_150 = arith.constant dense<0.000000e+00> : vector<2x8xf32>
    %264 = vector.multi_reduction <add>, %263, %cst_150 [2] : vector<2x8x8xf32> to vector<2x8xf32>
    %265 = vector.shape_cast %264 : vector<2x8xf32> to vector<2x8x1xf32>
    %266 = tpu.reciprocal %265 {approx = true} : vector<2x8x1xf32> -> vector<2x8x1xf32>
    %267 = vector.broadcast %266 : vector<2x8x1xf32> to vector<2x8x8xf32>
    %268 = arith.mulf %263, %267 : vector<2x8x8xf32>
    %269 = arith.mulf %268, %236 : vector<2x8x8xf32>
    "tpu.trace_start"() <{level = 10 : i32, message = "bqk,bke->bqe"}> : () -> ()
    %cst_151 = arith.constant dense<0.000000e+00> : vector<2x8x64xf32>
    %270 = tpu.matmul %269, %250, %cst_151 {dimension_numbers = #tpu.dot_dimension_numbers<[2], [1], [1], [2], [0, 0, 0, 1, 1, 2], [0], [0]>} : vector<2x8x8xf32>, vector<2x8x64xf32>, vector<2x8x64xf32> -> vector<2x8x64xf32>
    "tpu.trace_stop"() : () -> ()
    %271 = vector.shape_cast %270 : vector<2x8x64xf32> to vector<16x64xf32>
    %cst_152 = arith.constant dense<0.000000e+00> : vector<16x256xf32>
    %272 = tpu.matmul %271, %244, %cst_152 {dimension_numbers = #tpu.dot_dimension_numbers<[1], [0], [0], [1], [0, 0, 1, 1], [], []>} : vector<16x64xf32>, vector<64x256xf32>, vector<16x256xf32> -> vector<16x256xf32>
    %273 = arith.addf %272, %1 : vector<16x256xf32>
    %cst_153 = arith.constant dense<0.000000e+00> : vector<16xf32>
    %274 = vector.multi_reduction <add>, %273, %cst_153 [1] : vector<16x256xf32> to vector<16xf32>
    %275 = vector.shape_cast %274 : vector<16xf32> to vector<16x1xf32>
    %cst_154 = arith.constant 2.560000e+02 : f32
    %276 = vector.broadcast %cst_154 : f32 to vector<16x1xf32>
    %277 = arith.divf %275, %276 : vector<16x1xf32>
    %278 = vector.broadcast %277 : vector<16x1xf32> to vector<16x256xf32>
    %279 = arith.subf %273, %278 : vector<16x256xf32>
    %280 = arith.mulf %279, %279 : vector<16x256xf32>
    %cst_155 = arith.constant dense<0.000000e+00> : vector<16xf32>
    %281 = vector.multi_reduction <add>, %280, %cst_155 [1] : vector<16x256xf32> to vector<16xf32>
    %282 = vector.shape_cast %281 : vector<16xf32> to vector<16x1xf32>
    %cst_156 = arith.constant 2.560000e+02 : f32
    %283 = vector.broadcast %cst_156 : f32 to vector<16x1xf32>
    %284 = arith.divf %282, %283 : vector<16x1xf32>
    %285 = vector.broadcast %277 : vector<16x1xf32> to vector<16x256xf32>
    %286 = arith.subf %273, %285 : vector<16x256xf32>
    %cst_157 = arith.constant 9.99999974E-6 : f32
    %287 = vector.broadcast %cst_157 : f32 to vector<16x1xf32>
    %288 = arith.addf %284, %287 : vector<16x1xf32>
    %289 = math.rsqrt %288 : vector<16x1xf32>
    %290 = vector.broadcast %289 : vector<16x1xf32> to vector<16x256xf32>
    %291 = arith.mulf %286, %290 : vector<16x256xf32>
    %292 = arith.addf %234, %291 : vector<16x256xf32>
    %c5 = arith.constant 5 : index
    %c0_158 = arith.constant 0 : index
    %c0_159 = arith.constant 0 : index
    %c0_160 = arith.constant 0 : index
    %293 = vector.load %arg1[%c5, %c0_158, %c0_159, %c0_160] : memref<6x2x8x8xf32, #tpu.memory_space<vmem>>, vector<1x2x8x8xf32>
    %294 = vector.shape_cast %293 : vector<1x2x8x8xf32> to vector<2x8x8xf32>
    %c5_161 = arith.constant 5 : index
    %c0_162 = arith.constant 0 : index
    %c0_163 = arith.constant 0 : index
    %295 = vector.load %arg2[%c5_161, %c0_162, %c0_163] : memref<6x256x64xf32, #tpu.memory_space<vmem>>, vector<1x256x64xf32>
    %296 = vector.shape_cast %295 : vector<1x256x64xf32> to vector<256x64xf32>
    %c5_164 = arith.constant 5 : index
    %c0_165 = arith.constant 0 : index
    %c0_166 = arith.constant 0 : index
    %297 = vector.load %arg3[%c5_164, %c0_165, %c0_166] : memref<6x256x64xf32, #tpu.memory_space<vmem>>, vector<1x256x64xf32>
    %298 = vector.shape_cast %297 : vector<1x256x64xf32> to vector<256x64xf32>
    %c5_167 = arith.constant 5 : index
    %c0_168 = arith.constant 0 : index
    %c0_169 = arith.constant 0 : index
    %299 = vector.load %arg4[%c5_167, %c0_168, %c0_169] : memref<6x256x64xf32, #tpu.memory_space<vmem>>, vector<1x256x64xf32>
    %300 = vector.shape_cast %299 : vector<1x256x64xf32> to vector<256x64xf32>
    %c5_170 = arith.constant 5 : index
    %c0_171 = arith.constant 0 : index
    %c0_172 = arith.constant 0 : index
    %301 = vector.load %arg5[%c5_170, %c0_171, %c0_172] : memref<6x64x256xf32, #tpu.memory_space<vmem>>, vector<1x64x256xf32>
    %302 = vector.shape_cast %301 : vector<1x64x256xf32> to vector<64x256xf32>
    %cst_173 = arith.constant dense<0.000000e+00> : vector<16x64xf32>
    %303 = tpu.matmul %1, %296, %cst_173 {dimension_numbers = #tpu.dot_dimension_numbers<[1], [0], [0], [1], [0, 0, 1, 1], [], []>} : vector<16x256xf32>, vector<256x64xf32>, vector<16x64xf32> -> vector<16x64xf32>
    %304 = vector.shape_cast %303 : vector<16x64xf32> to vector<2x8x64xf32>
    %cst_174 = arith.constant dense<0.000000e+00> : vector<16x64xf32>
    %305 = tpu.matmul %1, %298, %cst_174 {dimension_numbers = #tpu.dot_dimension_numbers<[1], [0], [0], [1], [0, 0, 1, 1], [], []>} : vector<16x256xf32>, vector<256x64xf32>, vector<16x64xf32> -> vector<16x64xf32>
    %306 = vector.shape_cast %305 : vector<16x64xf32> to vector<2x8x64xf32>
    %cst_175 = arith.constant dense<0.000000e+00> : vector<16x64xf32>
    %307 = tpu.matmul %1, %300, %cst_175 {dimension_numbers = #tpu.dot_dimension_numbers<[1], [0], [0], [1], [0, 0, 1, 1], [], []>} : vector<16x256xf32>, vector<256x64xf32>, vector<16x64xf32> -> vector<16x64xf32>
    %308 = vector.shape_cast %307 : vector<16x64xf32> to vector<2x8x64xf32>
    "tpu.trace_start"() <{level = 10 : i32, message = "bqe,bke->bqk"}> : () -> ()
    %cst_176 = arith.constant dense<0.000000e+00> : vector<2x8x8xf32>
    %309 = tpu.matmul %304, %306, %cst_176 {dimension_numbers = #tpu.dot_dimension_numbers<[2], [2], [1], [1], [0, 0, 0, 1, 1, 1], [0], [0]>} : vector<2x8x64xf32>, vector<2x8x64xf32>, vector<2x8x8xf32> -> vector<2x8x8xf32>
    "tpu.trace_stop"() : () -> ()
    %cst_177 = arith.constant 1.250000e-01 : f32
    %310 = vector.broadcast %cst_177 : f32 to vector<2x8x8xf32>
    %311 = arith.mulf %309, %310 : vector<2x8x8xf32>
    %cst_178 = arith.constant 1.000000e+00 : f32
    %312 = vector.broadcast %cst_178 : f32 to vector<2x8x8xf32>
    %313 = arith.subf %294, %312 : vector<2x8x8xf32>
    %cst_179 = arith.constant 1.000000e+09 : f32
    %314 = vector.broadcast %cst_179 : f32 to vector<2x8x8xf32>
    %315 = arith.mulf %313, %314 : vector<2x8x8xf32>
    %316 = arith.addf %311, %315 : vector<2x8x8xf32>
    %cst_180 = arith.constant dense<0xFF800000> : vector<2x8xf32>
    %317 = vector.multi_reduction <maximumf>, %316, %cst_180 [2] : vector<2x8x8xf32> to vector<2x8xf32>
    %318 = vector.shape_cast %317 : vector<2x8xf32> to vector<2x8x1xf32>
    %319 = vector.broadcast %318 : vector<2x8x1xf32> to vector<2x8x8xf32>
    %320 = arith.subf %316, %319 : vector<2x8x8xf32>
    %321 = math.exp %320 : vector<2x8x8xf32>
    %cst_181 = arith.constant dense<0.000000e+00> : vector<2x8xf32>
    %322 = vector.multi_reduction <add>, %321, %cst_181 [2] : vector<2x8x8xf32> to vector<2x8xf32>
    %323 = vector.shape_cast %322 : vector<2x8xf32> to vector<2x8x1xf32>
    %324 = tpu.reciprocal %323 {approx = true} : vector<2x8x1xf32> -> vector<2x8x1xf32>
    %325 = vector.broadcast %324 : vector<2x8x1xf32> to vector<2x8x8xf32>
    %326 = arith.mulf %321, %325 : vector<2x8x8xf32>
    %327 = arith.mulf %326, %294 : vector<2x8x8xf32>
    "tpu.trace_start"() <{level = 10 : i32, message = "bqk,bke->bqe"}> : () -> ()
    %cst_182 = arith.constant dense<0.000000e+00> : vector<2x8x64xf32>
    %328 = tpu.matmul %327, %308, %cst_182 {dimension_numbers = #tpu.dot_dimension_numbers<[2], [1], [1], [2], [0, 0, 0, 1, 1, 2], [0], [0]>} : vector<2x8x8xf32>, vector<2x8x64xf32>, vector<2x8x64xf32> -> vector<2x8x64xf32>
    "tpu.trace_stop"() : () -> ()
    %329 = vector.shape_cast %328 : vector<2x8x64xf32> to vector<16x64xf32>
    %cst_183 = arith.constant dense<0.000000e+00> : vector<16x256xf32>
    %330 = tpu.matmul %329, %302, %cst_183 {dimension_numbers = #tpu.dot_dimension_numbers<[1], [0], [0], [1], [0, 0, 1, 1], [], []>} : vector<16x64xf32>, vector<64x256xf32>, vector<16x256xf32> -> vector<16x256xf32>
    %331 = arith.addf %330, %1 : vector<16x256xf32>
    %cst_184 = arith.constant dense<0.000000e+00> : vector<16xf32>
    %332 = vector.multi_reduction <add>, %331, %cst_184 [1] : vector<16x256xf32> to vector<16xf32>
    %333 = vector.shape_cast %332 : vector<16xf32> to vector<16x1xf32>
    %cst_185 = arith.constant 2.560000e+02 : f32
    %334 = vector.broadcast %cst_185 : f32 to vector<16x1xf32>
    %335 = arith.divf %333, %334 : vector<16x1xf32>
    %336 = vector.broadcast %335 : vector<16x1xf32> to vector<16x256xf32>
    %337 = arith.subf %331, %336 : vector<16x256xf32>
    %338 = arith.mulf %337, %337 : vector<16x256xf32>
    %cst_186 = arith.constant dense<0.000000e+00> : vector<16xf32>
    %339 = vector.multi_reduction <add>, %338, %cst_186 [1] : vector<16x256xf32> to vector<16xf32>
    %340 = vector.shape_cast %339 : vector<16xf32> to vector<16x1xf32>
    %cst_187 = arith.constant 2.560000e+02 : f32
    %341 = vector.broadcast %cst_187 : f32 to vector<16x1xf32>
    %342 = arith.divf %340, %341 : vector<16x1xf32>
    %343 = vector.broadcast %335 : vector<16x1xf32> to vector<16x256xf32>
    %344 = arith.subf %331, %343 : vector<16x256xf32>
    %cst_188 = arith.constant 9.99999974E-6 : f32
    %345 = vector.broadcast %cst_188 : f32 to vector<16x1xf32>
    %346 = arith.addf %342, %345 : vector<16x1xf32>
    %347 = math.rsqrt %346 : vector<16x1xf32>
    %348 = vector.broadcast %347 : vector<16x1xf32> to vector<16x256xf32>
    %349 = arith.mulf %344, %348 : vector<16x256xf32>
    %350 = arith.addf %292, %349 : vector<16x256xf32>
    %c0_189 = arith.constant 0 : index
    %c0_190 = arith.constant 0 : index
    %351 = vector.load %arg6[%c0_189, %c0_190] : memref<256x256xf32, #tpu.memory_space<vmem>>, vector<256x256xf32>
    %c0_191 = arith.constant 0 : index
    %c0_192 = arith.constant 0 : index
    %352 = vector.load %arg7[%c0_191, %c0_192] : memref<256x256xf32, #tpu.memory_space<vmem>>, vector<256x256xf32>
    %cst_193 = arith.constant dense<0.000000e+00> : vector<16x256xf32>
    %353 = tpu.matmul %350, %351, %cst_193 {dimension_numbers = #tpu.dot_dimension_numbers<[1], [0], [0], [1], [0, 0, 1, 1], [], []>} : vector<16x256xf32>, vector<256x256xf32>, vector<16x256xf32> -> vector<16x256xf32>
    %cst_194 = arith.constant 0.000000e+00 : f32
    %354 = vector.broadcast %cst_194 : f32 to vector<16x256xf32>
    %355 = arith.maximumf %353, %354 : vector<16x256xf32>
    %cst_195 = arith.constant dense<0.000000e+00> : vector<16x256xf32>
    %356 = tpu.matmul %355, %352, %cst_195 {dimension_numbers = #tpu.dot_dimension_numbers<[1], [0], [0], [1], [0, 0, 1, 1], [], []>} : vector<16x256xf32>, vector<256x256xf32>, vector<16x256xf32> -> vector<16x256xf32>
    %357 = arith.addf %356, %350 : vector<16x256xf32>
    %cst_196 = arith.constant dense<0.000000e+00> : vector<16xf32>
    %358 = vector.multi_reduction <add>, %357, %cst_196 [1] : vector<16x256xf32> to vector<16xf32>
    %359 = vector.shape_cast %358 : vector<16xf32> to vector<16x1xf32>
    %cst_197 = arith.constant 2.560000e+02 : f32
    %360 = vector.broadcast %cst_197 : f32 to vector<16x1xf32>
    %361 = arith.divf %359, %360 : vector<16x1xf32>
    %362 = vector.broadcast %361 : vector<16x1xf32> to vector<16x256xf32>
    %363 = arith.subf %357, %362 : vector<16x256xf32>
    %364 = arith.mulf %363, %363 : vector<16x256xf32>
    %cst_198 = arith.constant dense<0.000000e+00> : vector<16xf32>
    %365 = vector.multi_reduction <add>, %364, %cst_198 [1] : vector<16x256xf32> to vector<16xf32>
    %366 = vector.shape_cast %365 : vector<16xf32> to vector<16x1xf32>
    %cst_199 = arith.constant 2.560000e+02 : f32
    %367 = vector.broadcast %cst_199 : f32 to vector<16x1xf32>
    %368 = arith.divf %366, %367 : vector<16x1xf32>
    %369 = vector.broadcast %361 : vector<16x1xf32> to vector<16x256xf32>
    %370 = arith.subf %357, %369 : vector<16x256xf32>
    %cst_200 = arith.constant 9.99999974E-6 : f32
    %371 = vector.broadcast %cst_200 : f32 to vector<16x1xf32>
    %372 = arith.addf %368, %371 : vector<16x1xf32>
    %373 = math.rsqrt %372 : vector<16x1xf32>
    %374 = vector.broadcast %373 : vector<16x1xf32> to vector<16x256xf32>
    %375 = arith.mulf %370, %374 : vector<16x256xf32>
    %376 = vector.shape_cast %375 : vector<16x256xf32> to vector<2x8x256xf32>
    %c0_201 = arith.constant 0 : index
    %c0_202 = arith.constant 0 : index
    %c0_203 = arith.constant 0 : index
    %377 = vector.load %arg8[%c0_201, %c0_202, %c0_203] : memref<2x8x256xf32, #tpu.memory_space<vmem>>, vector<2x8x256xf32>
    tpu.vector_store %arg8[%c0_201, %c0_202, %c0_203], %376 {strides = array<i32>} : memref<2x8x256xf32, #tpu.memory_space<vmem>>, vector<2x8x256xf32>,
    return
  }
}

module attributes {stable_mosaic.version = 11 : i64} {
  func.func @dec_stack_kernel(%arg0: i32, %arg1: memref<2x8x256xf32, #tpu.memory_space<vmem>>, %arg2: memref<2x8x256xf32, #tpu.memory_space<vmem>>, %arg3: memref<2x8x8xf32, #tpu.memory_space<vmem>>, %arg4: memref<2x8x8xf32, #tpu.memory_space<vmem>>, %arg5: memref<1x256x64xf32, #tpu.memory_space<vmem>>, %arg6: memref<1x256x64xf32, #tpu.memory_space<vmem>>, %arg7: memref<1x256x64xf32, #tpu.memory_space<vmem>>, %arg8: memref<1x64x256xf32, #tpu.memory_space<vmem>>, %arg9: memref<1x256x64xf32, #tpu.memory_space<vmem>>, %arg10: memref<1x256x64xf32, #tpu.memory_space<vmem>>, %arg11: memref<1x256x64xf32, #tpu.memory_space<vmem>>, %arg12: memref<1x64x256xf32, #tpu.memory_space<vmem>>, %arg13: memref<1x256x256xf32, #tpu.memory_space<vmem>>, %arg14: memref<1x256x256xf32, #tpu.memory_space<vmem>>, %arg15: memref<2x8x256xf32, #tpu.memory_space<vmem>>, %arg16: memref<16x256xf32, #tpu.memory_space<vmem>>) attributes {dimension_semantics = [#tpu.dimension_semantics<arbitrary>], iteration_bounds = array<i64: 6>, scalar_prefetch = 0 : i64, scratch_operands = 1 : i64, tpu.core_type = #tpu.core_type<tc>, window_params = [{pipeline_mode = #tpu.pipeline_mode<synchronous>, transform_indices = @transform_0, window_bounds = array<i64: 2, 8, 256>}, {pipeline_mode = #tpu.pipeline_mode<synchronous>, transform_indices = @transform_1, window_bounds = array<i64: 2, 8, 256>}, {pipeline_mode = #tpu.pipeline_mode<synchronous>, transform_indices = @transform_2, window_bounds = array<i64: 2, 8, 8>}, {pipeline_mode = #tpu.pipeline_mode<synchronous>, transform_indices = @transform_3, window_bounds = array<i64: 2, 8, 8>}, {transform_indices = @transform_4, window_bounds = array<i64: 1, 256, 64>}, {transform_indices = @transform_5, window_bounds = array<i64: 1, 256, 64>}, {transform_indices = @transform_6, window_bounds = array<i64: 1, 256, 64>}, {transform_indices = @transform_7, window_bounds = array<i64: 1, 64, 256>}, {transform_indices = @transform_8, window_bounds = array<i64: 1, 256, 64>}, {transform_indices = @transform_9, window_bounds = array<i64: 1, 256, 64>}, {transform_indices = @transform_10, window_bounds = array<i64: 1, 256, 64>}, {transform_indices = @transform_11, window_bounds = array<i64: 1, 64, 256>}, {transform_indices = @transform_12, window_bounds = array<i64: 1, 256, 256>}, {transform_indices = @transform_13, window_bounds = array<i64: 1, 256, 256>}, {pipeline_mode = #tpu.pipeline_mode<synchronous>, transform_indices = @transform_14, window_bounds = array<i64: 2, 8, 256>}]} {
    %c0_i32 = arith.constant 0 : i32
    %0 = arith.cmpi eq, %arg0, %c0_i32 : i32
    %1 = arith.extui %0 : i1 to i32
    %c0_i32_0 = arith.constant 0 : i32
    %2 = arith.cmpi ne, %1, %c0_i32_0 : i32
    scf.if %2 {
      %c0_85 = arith.constant 0 : index
      %c0_86 = arith.constant 0 : index
      %c0_87 = arith.constant 0 : index
      %148 = vector.load %arg1[%c0_85, %c0_86, %c0_87] : memref<2x8x256xf32, #tpu.memory_space<vmem>>, vector<2x8x256xf32>
      %149 = vector.shape_cast %148 : vector<2x8x256xf32> to vector<16x256xf32>
      %c0_88 = arith.constant 0 : index
      %c0_89 = arith.constant 0 : index
      %150 = vector.load %arg16[%c0_88, %c0_89] : memref<16x256xf32, #tpu.memory_space<vmem>>, vector<16x256xf32>
      tpu.vector_store %arg16[%c0_88, %c0_89], %149 {strides = array<i32>} : memref<16x256xf32, #tpu.memory_space<vmem>>, vector<16x256xf32>,
    } else {
    }
    %c0 = arith.constant 0 : index
    %c0_1 = arith.constant 0 : index
    %3 = vector.load %arg16[%c0, %c0_1] : memref<16x256xf32, #tpu.memory_space<vmem>>, vector<16x256xf32>
    %c0_2 = arith.constant 0 : index
    %c0_3 = arith.constant 0 : index
    %c0_4 = arith.constant 0 : index
    %4 = vector.load %arg2[%c0_2, %c0_3, %c0_4] : memref<2x8x256xf32, #tpu.memory_space<vmem>>, vector<2x8x256xf32>
    %5 = vector.shape_cast %4 : vector<2x8x256xf32> to vector<16x256xf32>
    %c0_5 = arith.constant 0 : index
    %c0_6 = arith.constant 0 : index
    %c0_7 = arith.constant 0 : index
    %6 = vector.load %arg3[%c0_5, %c0_6, %c0_7] : memref<2x8x8xf32, #tpu.memory_space<vmem>>, vector<2x8x8xf32>
    %c0_8 = arith.constant 0 : index
    %c0_9 = arith.constant 0 : index
    %c0_10 = arith.constant 0 : index
    %7 = vector.load %arg5[%c0_8, %c0_9, %c0_10] : memref<1x256x64xf32, #tpu.memory_space<vmem>>, vector<1x256x64xf32>
    %8 = vector.shape_cast %7 : vector<1x256x64xf32> to vector<256x64xf32>
    %c0_11 = arith.constant 0 : index
    %c0_12 = arith.constant 0 : index
    %c0_13 = arith.constant 0 : index
    %9 = vector.load %arg6[%c0_11, %c0_12, %c0_13] : memref<1x256x64xf32, #tpu.memory_space<vmem>>, vector<1x256x64xf32>
    %10 = vector.shape_cast %9 : vector<1x256x64xf32> to vector<256x64xf32>
    %c0_14 = arith.constant 0 : index
    %c0_15 = arith.constant 0 : index
    %c0_16 = arith.constant 0 : index
    %11 = vector.load %arg7[%c0_14, %c0_15, %c0_16] : memref<1x256x64xf32, #tpu.memory_space<vmem>>, vector<1x256x64xf32>
    %12 = vector.shape_cast %11 : vector<1x256x64xf32> to vector<256x64xf32>
    %c0_17 = arith.constant 0 : index
    %c0_18 = arith.constant 0 : index
    %c0_19 = arith.constant 0 : index
    %13 = vector.load %arg8[%c0_17, %c0_18, %c0_19] : memref<1x64x256xf32, #tpu.memory_space<vmem>>, vector<1x64x256xf32>
    %14 = vector.shape_cast %13 : vector<1x64x256xf32> to vector<64x256xf32>
    %cst = arith.constant dense<0.000000e+00> : vector<16x64xf32>
    %15 = tpu.matmul %3, %8, %cst {dimension_numbers = #tpu.dot_dimension_numbers<[1], [0], [0], [1], [0, 0, 1, 1], [], []>} : vector<16x256xf32>, vector<256x64xf32>, vector<16x64xf32> -> vector<16x64xf32>
    %16 = vector.shape_cast %15 : vector<16x64xf32> to vector<2x8x64xf32>
    %cst_20 = arith.constant dense<0.000000e+00> : vector<16x64xf32>
    %17 = tpu.matmul %3, %10, %cst_20 {dimension_numbers = #tpu.dot_dimension_numbers<[1], [0], [0], [1], [0, 0, 1, 1], [], []>} : vector<16x256xf32>, vector<256x64xf32>, vector<16x64xf32> -> vector<16x64xf32>
    %18 = vector.shape_cast %17 : vector<16x64xf32> to vector<2x8x64xf32>
    %cst_21 = arith.constant dense<0.000000e+00> : vector<16x64xf32>
    %19 = tpu.matmul %3, %12, %cst_21 {dimension_numbers = #tpu.dot_dimension_numbers<[1], [0], [0], [1], [0, 0, 1, 1], [], []>} : vector<16x256xf32>, vector<256x64xf32>, vector<16x64xf32> -> vector<16x64xf32>
    %20 = vector.shape_cast %19 : vector<16x64xf32> to vector<2x8x64xf32>
    "tpu.trace_start"() <{level = 10 : i32, message = "bqe,bke->bqk"}> : () -> ()
    %cst_22 = arith.constant dense<0.000000e+00> : vector<2x8x8xf32>
    %21 = tpu.matmul %16, %18, %cst_22 {dimension_numbers = #tpu.dot_dimension_numbers<[2], [2], [1], [1], [0, 0, 0, 1, 1, 1], [0], [0]>} : vector<2x8x64xf32>, vector<2x8x64xf32>, vector<2x8x8xf32> -> vector<2x8x8xf32>
    "tpu.trace_stop"() : () -> ()
    %cst_23 = arith.constant 1.250000e-01 : f32
    %22 = vector.broadcast %cst_23 : f32 to vector<2x8x8xf32>
    %23 = arith.mulf %21, %22 : vector<2x8x8xf32>
    %cst_24 = arith.constant 1.000000e+00 : f32
    %24 = vector.broadcast %cst_24 : f32 to vector<2x8x8xf32>
    %25 = arith.subf %6, %24 : vector<2x8x8xf32>
    %cst_25 = arith.constant 1.000000e+09 : f32
    %26 = vector.broadcast %cst_25 : f32 to vector<2x8x8xf32>
    %27 = arith.mulf %25, %26 : vector<2x8x8xf32>
    %28 = arith.addf %23, %27 : vector<2x8x8xf32>
    %cst_26 = arith.constant dense<0xFF800000> : vector<2x8xf32>
    %29 = vector.multi_reduction <maximumf>, %28, %cst_26 [2] : vector<2x8x8xf32> to vector<2x8xf32>
    %30 = vector.shape_cast %29 : vector<2x8xf32> to vector<2x8x1xf32>
    %31 = vector.broadcast %30 : vector<2x8x1xf32> to vector<2x8x8xf32>
    %32 = arith.subf %28, %31 : vector<2x8x8xf32>
    %33 = math.exp %32 : vector<2x8x8xf32>
    %cst_27 = arith.constant dense<0.000000e+00> : vector<2x8xf32>
    %34 = vector.multi_reduction <add>, %33, %cst_27 [2] : vector<2x8x8xf32> to vector<2x8xf32>
    %35 = vector.shape_cast %34 : vector<2x8xf32> to vector<2x8x1xf32>
    %36 = tpu.reciprocal %35 {approx = true} : vector<2x8x1xf32> -> vector<2x8x1xf32>
    %37 = vector.broadcast %36 : vector<2x8x1xf32> to vector<2x8x8xf32>
    %38 = arith.mulf %33, %37 : vector<2x8x8xf32>
    %39 = arith.mulf %38, %6 : vector<2x8x8xf32>
    "tpu.trace_start"() <{level = 10 : i32, message = "bqk,bke->bqe"}> : () -> ()
    %cst_28 = arith.constant dense<0.000000e+00> : vector<2x8x64xf32>
    %40 = tpu.matmul %39, %20, %cst_28 {dimension_numbers = #tpu.dot_dimension_numbers<[2], [1], [1], [2], [0, 0, 0, 1, 1, 2], [0], [0]>} : vector<2x8x8xf32>, vector<2x8x64xf32>, vector<2x8x64xf32> -> vector<2x8x64xf32>
    "tpu.trace_stop"() : () -> ()
    %41 = vector.shape_cast %40 : vector<2x8x64xf32> to vector<16x64xf32>
    %cst_29 = arith.constant dense<0.000000e+00> : vector<16x256xf32>
    %42 = tpu.matmul %41, %14, %cst_29 {dimension_numbers = #tpu.dot_dimension_numbers<[1], [0], [0], [1], [0, 0, 1, 1], [], []>} : vector<16x64xf32>, vector<64x256xf32>, vector<16x256xf32> -> vector<16x256xf32>
    %43 = arith.addf %42, %3 : vector<16x256xf32>
    %cst_30 = arith.constant dense<0.000000e+00> : vector<16xf32>
    %44 = vector.multi_reduction <add>, %43, %cst_30 [1] : vector<16x256xf32> to vector<16xf32>
    %45 = vector.shape_cast %44 : vector<16xf32> to vector<16x1xf32>
    %cst_31 = arith.constant 2.560000e+02 : f32
    %46 = vector.broadcast %cst_31 : f32 to vector<16x1xf32>
    %47 = arith.divf %45, %46 : vector<16x1xf32>
    %48 = vector.broadcast %47 : vector<16x1xf32> to vector<16x256xf32>
    %49 = arith.subf %43, %48 : vector<16x256xf32>
    %50 = arith.mulf %49, %49 : vector<16x256xf32>
    %cst_32 = arith.constant dense<0.000000e+00> : vector<16xf32>
    %51 = vector.multi_reduction <add>, %50, %cst_32 [1] : vector<16x256xf32> to vector<16xf32>
    %52 = vector.shape_cast %51 : vector<16xf32> to vector<16x1xf32>
    %cst_33 = arith.constant 2.560000e+02 : f32
    %53 = vector.broadcast %cst_33 : f32 to vector<16x1xf32>
    %54 = arith.divf %52, %53 : vector<16x1xf32>
    %55 = vector.broadcast %47 : vector<16x1xf32> to vector<16x256xf32>
    %56 = arith.subf %43, %55 : vector<16x256xf32>
    %cst_34 = arith.constant 9.99999974E-6 : f32
    %57 = vector.broadcast %cst_34 : f32 to vector<16x1xf32>
    %58 = arith.addf %54, %57 : vector<16x1xf32>
    %59 = math.rsqrt %58 : vector<16x1xf32>
    %60 = vector.broadcast %59 : vector<16x1xf32> to vector<16x256xf32>
    %61 = arith.mulf %56, %60 : vector<16x256xf32>
    %c0_35 = arith.constant 0 : index
    %c0_36 = arith.constant 0 : index
    %c0_37 = arith.constant 0 : index
    %62 = vector.load %arg4[%c0_35, %c0_36, %c0_37] : memref<2x8x8xf32, #tpu.memory_space<vmem>>, vector<2x8x8xf32>
    %c0_38 = arith.constant 0 : index
    %c0_39 = arith.constant 0 : index
    %c0_40 = arith.constant 0 : index
    %63 = vector.load %arg9[%c0_38, %c0_39, %c0_40] : memref<1x256x64xf32, #tpu.memory_space<vmem>>, vector<1x256x64xf32>
    %64 = vector.shape_cast %63 : vector<1x256x64xf32> to vector<256x64xf32>
    %c0_41 = arith.constant 0 : index
    %c0_42 = arith.constant 0 : index
    %c0_43 = arith.constant 0 : index
    %65 = vector.load %arg10[%c0_41, %c0_42, %c0_43] : memref<1x256x64xf32, #tpu.memory_space<vmem>>, vector<1x256x64xf32>
    %66 = vector.shape_cast %65 : vector<1x256x64xf32> to vector<256x64xf32>
    %c0_44 = arith.constant 0 : index
    %c0_45 = arith.constant 0 : index
    %c0_46 = arith.constant 0 : index
    %67 = vector.load %arg11[%c0_44, %c0_45, %c0_46] : memref<1x256x64xf32, #tpu.memory_space<vmem>>, vector<1x256x64xf32>
    %68 = vector.shape_cast %67 : vector<1x256x64xf32> to vector<256x64xf32>
    %c0_47 = arith.constant 0 : index
    %c0_48 = arith.constant 0 : index
    %c0_49 = arith.constant 0 : index
    %69 = vector.load %arg12[%c0_47, %c0_48, %c0_49] : memref<1x64x256xf32, #tpu.memory_space<vmem>>, vector<1x64x256xf32>
    %70 = vector.shape_cast %69 : vector<1x64x256xf32> to vector<64x256xf32>
    %cst_50 = arith.constant dense<0.000000e+00> : vector<16x64xf32>
    %71 = tpu.matmul %61, %64, %cst_50 {dimension_numbers = #tpu.dot_dimension_numbers<[1], [0], [0], [1], [0, 0, 1, 1], [], []>} : vector<16x256xf32>, vector<256x64xf32>, vector<16x64xf32> -> vector<16x64xf32>
    %72 = vector.shape_cast %71 : vector<16x64xf32> to vector<2x8x64xf32>
    %cst_51 = arith.constant dense<0.000000e+00> : vector<16x64xf32>
    %73 = tpu.matmul %5, %66, %cst_51 {dimension_numbers = #tpu.dot_dimension_numbers<[1], [0], [0], [1], [0, 0, 1, 1], [], []>} : vector<16x256xf32>, vector<256x64xf32>, vector<16x64xf32> -> vector<16x64xf32>
    %74 = vector.shape_cast %73 : vector<16x64xf32> to vector<2x8x64xf32>
    %cst_52 = arith.constant dense<0.000000e+00> : vector<16x64xf32>
    %75 = tpu.matmul %5, %68, %cst_52 {dimension_numbers = #tpu.dot_dimension_numbers<[1], [0], [0], [1], [0, 0, 1, 1], [], []>} : vector<16x256xf32>, vector<256x64xf32>, vector<16x64xf32> -> vector<16x64xf32>
    %76 = vector.shape_cast %75 : vector<16x64xf32> to vector<2x8x64xf32>
    "tpu.trace_start"() <{level = 10 : i32, message = "bqe,bke->bqk"}> : () -> ()
    %cst_53 = arith.constant dense<0.000000e+00> : vector<2x8x8xf32>
    %77 = tpu.matmul %72, %74, %cst_53 {dimension_numbers = #tpu.dot_dimension_numbers<[2], [2], [1], [1], [0, 0, 0, 1, 1, 1], [0], [0]>} : vector<2x8x64xf32>, vector<2x8x64xf32>, vector<2x8x8xf32> -> vector<2x8x8xf32>
    "tpu.trace_stop"() : () -> ()
    %cst_54 = arith.constant 1.250000e-01 : f32
    %78 = vector.broadcast %cst_54 : f32 to vector<2x8x8xf32>
    %79 = arith.mulf %77, %78 : vector<2x8x8xf32>
    %cst_55 = arith.constant 1.000000e+00 : f32
    %80 = vector.broadcast %cst_55 : f32 to vector<2x8x8xf32>
    %81 = arith.subf %62, %80 : vector<2x8x8xf32>
    %cst_56 = arith.constant 1.000000e+09 : f32
    %82 = vector.broadcast %cst_56 : f32 to vector<2x8x8xf32>
    %83 = arith.mulf %81, %82 : vector<2x8x8xf32>
    %84 = arith.addf %79, %83 : vector<2x8x8xf32>
    %cst_57 = arith.constant dense<0xFF800000> : vector<2x8xf32>
    %85 = vector.multi_reduction <maximumf>, %84, %cst_57 [2] : vector<2x8x8xf32> to vector<2x8xf32>
    %86 = vector.shape_cast %85 : vector<2x8xf32> to vector<2x8x1xf32>
    %87 = vector.broadcast %86 : vector<2x8x1xf32> to vector<2x8x8xf32>
    %88 = arith.subf %84, %87 : vector<2x8x8xf32>
    %89 = math.exp %88 : vector<2x8x8xf32>
    %cst_58 = arith.constant dense<0.000000e+00> : vector<2x8xf32>
    %90 = vector.multi_reduction <add>, %89, %cst_58 [2] : vector<2x8x8xf32> to vector<2x8xf32>
    %91 = vector.shape_cast %90 : vector<2x8xf32> to vector<2x8x1xf32>
    %92 = tpu.reciprocal %91 {approx = true} : vector<2x8x1xf32> -> vector<2x8x1xf32>
    %93 = vector.broadcast %92 : vector<2x8x1xf32> to vector<2x8x8xf32>
    %94 = arith.mulf %89, %93 : vector<2x8x8xf32>
    %95 = arith.mulf %94, %62 : vector<2x8x8xf32>
    "tpu.trace_start"() <{level = 10 : i32, message = "bqk,bke->bqe"}> : () -> ()
    %cst_59 = arith.constant dense<0.000000e+00> : vector<2x8x64xf32>
    %96 = tpu.matmul %95, %76, %cst_59 {dimension_numbers = #tpu.dot_dimension_numbers<[2], [1], [1], [2], [0, 0, 0, 1, 1, 2], [0], [0]>} : vector<2x8x8xf32>, vector<2x8x64xf32>, vector<2x8x64xf32> -> vector<2x8x64xf32>
    "tpu.trace_stop"() : () -> ()
    %97 = vector.shape_cast %96 : vector<2x8x64xf32> to vector<16x64xf32>
    %cst_60 = arith.constant dense<0.000000e+00> : vector<16x256xf32>
    %98 = tpu.matmul %97, %70, %cst_60 {dimension_numbers = #tpu.dot_dimension_numbers<[1], [0], [0], [1], [0, 0, 1, 1], [], []>} : vector<16x64xf32>, vector<64x256xf32>, vector<16x256xf32> -> vector<16x256xf32>
    %99 = arith.addf %98, %61 : vector<16x256xf32>
    %cst_61 = arith.constant dense<0.000000e+00> : vector<16xf32>
    %100 = vector.multi_reduction <add>, %99, %cst_61 [1] : vector<16x256xf32> to vector<16xf32>
    %101 = vector.shape_cast %100 : vector<16xf32> to vector<16x1xf32>
    %cst_62 = arith.constant 2.560000e+02 : f32
    %102 = vector.broadcast %cst_62 : f32 to vector<16x1xf32>
    %103 = arith.divf %101, %102 : vector<16x1xf32>
    %104 = vector.broadcast %103 : vector<16x1xf32> to vector<16x256xf32>
    %105 = arith.subf %99, %104 : vector<16x256xf32>
    %106 = arith.mulf %105, %105 : vector<16x256xf32>
    %cst_63 = arith.constant dense<0.000000e+00> : vector<16xf32>
    %107 = vector.multi_reduction <add>, %106, %cst_63 [1] : vector<16x256xf32> to vector<16xf32>
    %108 = vector.shape_cast %107 : vector<16xf32> to vector<16x1xf32>
    %cst_64 = arith.constant 2.560000e+02 : f32
    %109 = vector.broadcast %cst_64 : f32 to vector<16x1xf32>
    %110 = arith.divf %108, %109 : vector<16x1xf32>
    %111 = vector.broadcast %103 : vector<16x1xf32> to vector<16x256xf32>
    %112 = arith.subf %99, %111 : vector<16x256xf32>
    %cst_65 = arith.constant 9.99999974E-6 : f32
    %113 = vector.broadcast %cst_65 : f32 to vector<16x1xf32>
    %114 = arith.addf %110, %113 : vector<16x1xf32>
    %115 = math.rsqrt %114 : vector<16x1xf32>
    %116 = vector.broadcast %115 : vector<16x1xf32> to vector<16x256xf32>
    %117 = arith.mulf %112, %116 : vector<16x256xf32>
    %c0_66 = arith.constant 0 : index
    %c0_67 = arith.constant 0 : index
    %c0_68 = arith.constant 0 : index
    %118 = vector.load %arg13[%c0_66, %c0_67, %c0_68] : memref<1x256x256xf32, #tpu.memory_space<vmem>>, vector<1x256x256xf32>
    %119 = vector.shape_cast %118 : vector<1x256x256xf32> to vector<256x256xf32>
    %c0_69 = arith.constant 0 : index
    %c0_70 = arith.constant 0 : index
    %c0_71 = arith.constant 0 : index
    %120 = vector.load %arg14[%c0_69, %c0_70, %c0_71] : memref<1x256x256xf32, #tpu.memory_space<vmem>>, vector<1x256x256xf32>
    %121 = vector.shape_cast %120 : vector<1x256x256xf32> to vector<256x256xf32>
    %cst_72 = arith.constant dense<0.000000e+00> : vector<16x256xf32>
    %122 = tpu.matmul %117, %119, %cst_72 {dimension_numbers = #tpu.dot_dimension_numbers<[1], [0], [0], [1], [0, 0, 1, 1], [], []>} : vector<16x256xf32>, vector<256x256xf32>, vector<16x256xf32> -> vector<16x256xf32>
    %cst_73 = arith.constant 0.000000e+00 : f32
    %123 = vector.broadcast %cst_73 : f32 to vector<16x256xf32>
    %124 = arith.maximumf %122, %123 : vector<16x256xf32>
    %cst_74 = arith.constant dense<0.000000e+00> : vector<16x256xf32>
    %125 = tpu.matmul %124, %121, %cst_74 {dimension_numbers = #tpu.dot_dimension_numbers<[1], [0], [0], [1], [0, 0, 1, 1], [], []>} : vector<16x256xf32>, vector<256x256xf32>, vector<16x256xf32> -> vector<16x256xf32>
    %126 = arith.addf %125, %117 : vector<16x256xf32>
    %cst_75 = arith.constant dense<0.000000e+00> : vector<16xf32>
    %127 = vector.multi_reduction <add>, %126, %cst_75 [1] : vector<16x256xf32> to vector<16xf32>
    %128 = vector.shape_cast %127 : vector<16xf32> to vector<16x1xf32>
    %cst_76 = arith.constant 2.560000e+02 : f32
    %129 = vector.broadcast %cst_76 : f32 to vector<16x1xf32>
    %130 = arith.divf %128, %129 : vector<16x1xf32>
    %131 = vector.broadcast %130 : vector<16x1xf32> to vector<16x256xf32>
    %132 = arith.subf %126, %131 : vector<16x256xf32>
    %133 = arith.mulf %132, %132 : vector<16x256xf32>
    %cst_77 = arith.constant dense<0.000000e+00> : vector<16xf32>
    %134 = vector.multi_reduction <add>, %133, %cst_77 [1] : vector<16x256xf32> to vector<16xf32>
    %135 = vector.shape_cast %134 : vector<16xf32> to vector<16x1xf32>
    %cst_78 = arith.constant 2.560000e+02 : f32
    %136 = vector.broadcast %cst_78 : f32 to vector<16x1xf32>
    %137 = arith.divf %135, %136 : vector<16x1xf32>
    %138 = vector.broadcast %130 : vector<16x1xf32> to vector<16x256xf32>
    %139 = arith.subf %126, %138 : vector<16x256xf32>
    %cst_79 = arith.constant 9.99999974E-6 : f32
    %140 = vector.broadcast %cst_79 : f32 to vector<16x1xf32>
    %141 = arith.addf %137, %140 : vector<16x1xf32>
    %142 = math.rsqrt %141 : vector<16x1xf32>
    %143 = vector.broadcast %142 : vector<16x1xf32> to vector<16x256xf32>
    %144 = arith.mulf %139, %143 : vector<16x256xf32>
    %c0_80 = arith.constant 0 : index
    %c0_81 = arith.constant 0 : index
    %145 = vector.load %arg16[%c0_80, %c0_81] : memref<16x256xf32, #tpu.memory_space<vmem>>, vector<16x256xf32>
    tpu.vector_store %arg16[%c0_80, %c0_81], %144 {strides = array<i32>} : memref<16x256xf32, #tpu.memory_space<vmem>>, vector<16x256xf32>,
    %146 = vector.shape_cast %144 : vector<16x256xf32> to vector<2x8x256xf32>
    %c0_82 = arith.constant 0 : index
    %c0_83 = arith.constant 0 : index
    %c0_84 = arith.constant 0 : index
    %147 = vector.load %arg15[%c0_82, %c0_83, %c0_84] : memref<2x8x256xf32, #tpu.memory_space<vmem>>, vector<2x8x256xf32>
    tpu.vector_store %arg15[%c0_82, %c0_83, %c0_84], %146 {strides = array<i32>} : memref<2x8x256xf32, #tpu.memory_space<vmem>>, vector<2x8x256xf32>,
    return
  }
  func.func @transform_0(%arg0: i32) -> (i32, i32, i32) {
    %c0_i32 = arith.constant 0 : i32
    %c0_i32_0 = arith.constant 0 : i32
    %c0_i32_1 = arith.constant 0 : i32
    %c0_i32_2 = arith.constant 0 : i32
    return %c0_i32, %c0_i32_0, %c0_i32_1 : i32, i32, i32
  }
  func.func @transform_1(%arg0: i32) -> (i32, i32, i32) {
    %c0_i32 = arith.constant 0 : i32
    %c0_i32_0 = arith.constant 0 : i32
    %c0_i32_1 = arith.constant 0 : i32
    %c0_i32_2 = arith.constant 0 : i32
    return %c0_i32, %c0_i32_0, %c0_i32_1 : i32, i32, i32
  }
  func.func @transform_2(%arg0: i32) -> (i32, i32, i32) {
    %c0_i32 = arith.constant 0 : i32
    %c0_i32_0 = arith.constant 0 : i32
    %c0_i32_1 = arith.constant 0 : i32
    %c0_i32_2 = arith.constant 0 : i32
    return %c0_i32, %c0_i32_0, %c0_i32_1 : i32, i32, i32
  }
  func.func @transform_3(%arg0: i32) -> (i32, i32, i32) {
    %c0_i32 = arith.constant 0 : i32
    %c0_i32_0 = arith.constant 0 : i32
    %c0_i32_1 = arith.constant 0 : i32
    %c0_i32_2 = arith.constant 0 : i32
    return %c0_i32, %c0_i32_0, %c0_i32_1 : i32, i32, i32
  }
  func.func @transform_4(%arg0: i32) -> (i32, i32, i32) {
    %c0_i32 = arith.constant 0 : i32
    %c0_i32_0 = arith.constant 0 : i32
    %c0_i32_1 = arith.constant 0 : i32
    return %arg0, %c0_i32, %c0_i32_0 : i32, i32, i32
  }
  func.func @transform_5(%arg0: i32) -> (i32, i32, i32) {
    %c0_i32 = arith.constant 0 : i32
    %c0_i32_0 = arith.constant 0 : i32
    %c0_i32_1 = arith.constant 0 : i32
    return %arg0, %c0_i32, %c0_i32_0 : i32, i32, i32
  }
  func.func @transform_6(%arg0: i32) -> (i32, i32, i32) {
    %c0_i32 = arith.constant 0 : i32
    %c0_i32_0 = arith.constant 0 : i32
    %c0_i32_1 = arith.constant 0 : i32
    return %arg0, %c0_i32, %c0_i32_0 : i32, i32, i32
  }
  func.func @transform_7(%arg0: i32) -> (i32, i32, i32) {
    %c0_i32 = arith.constant 0 : i32
    %c0_i32_0 = arith.constant 0 : i32
    %c0_i32_1 = arith.constant 0 : i32
    return %arg0, %c0_i32, %c0_i32_0 : i32, i32, i32
  }
  func.func @transform_8(%arg0: i32) -> (i32, i32, i32) {
    %c0_i32 = arith.constant 0 : i32
    %c0_i32_0 = arith.constant 0 : i32
    %c0_i32_1 = arith.constant 0 : i32
    return %arg0, %c0_i32, %c0_i32_0 : i32, i32, i32
  }
  func.func @transform_9(%arg0: i32) -> (i32, i32, i32) {
    %c0_i32 = arith.constant 0 : i32
    %c0_i32_0 = arith.constant 0 : i32
    %c0_i32_1 = arith.constant 0 : i32
    return %arg0, %c0_i32, %c0_i32_0 : i32, i32, i32
  }
  func.func @transform_10(%arg0: i32) -> (i32, i32, i32) {
    %c0_i32 = arith.constant 0 : i32
    %c0_i32_0 = arith.constant 0 : i32
    %c0_i32_1 = arith.constant 0 : i32
    return %arg0, %c0_i32, %c0_i32_0 : i32, i32, i32
  }
  func.func @transform_11(%arg0: i32) -> (i32, i32, i32) {
    %c0_i32 = arith.constant 0 : i32
    %c0_i32_0 = arith.constant 0 : i32
    %c0_i32_1 = arith.constant 0 : i32
    return %arg0, %c0_i32, %c0_i32_0 : i32, i32, i32
  }
  func.func @transform_12(%arg0: i32) -> (i32, i32, i32) {
    %c0_i32 = arith.constant 0 : i32
    %c0_i32_0 = arith.constant 0 : i32
    %c0_i32_1 = arith.constant 0 : i32
    return %arg0, %c0_i32, %c0_i32_0 : i32, i32, i32
  }
  func.func @transform_13(%arg0: i32) -> (i32, i32, i32) {
    %c0_i32 = arith.constant 0 : i32
    %c0_i32_0 = arith.constant 0 : i32
    %c0_i32_1 = arith.constant 0 : i32
    return %arg0, %c0_i32, %c0_i32_0 : i32, i32, i32
  }
  func.func @transform_14(%arg0: i32) -> (i32, i32, i32) {
    %c0_i32 = arith.constant 0 : i32
    %c0_i32_0 = arith.constant 0 : i32
    %c0_i32_1 = arith.constant 0 : i32
    %c0_i32_2 = arith.constant 0 : i32
    return %c0_i32, %c0_i32_0, %c0_i32_1 : i32, i32, i32
  }
}

</mosaic_0001>

<bundles_post_ra>
// kernel: forward.3
= control target key start
LH: loop header
LB: loop body
LE: loop exit
PB: predicated region body
PF: predicated region fallthrough
CT: control target
= control target key end

     0   :  { %s3502_s29 = smov 0   ;;  %s4139_s0 = inlined_call_operand.vmem [shape: f32[2,8,256], index: 0, kind: input, shape index: {}]   ;;  %s4140_s1 = inlined_call_operand.vmem [shape: f32[2,8,256], index: 1, kind: input, shape index: {}]   ;;  %s4141_s2 = inlined_call_operand.vmem [shape: f32[2,8,8], index: 2, kind: input, shape index: {}]   ;;  %s4142_s3 = inlined_call_operand.vmem [shape: f32[2,8,8], index: 3, kind: input, shape index: {}]   ;;  %s4143_s4 = inlined_call_operand.vmem [shape: f32[6,256,64], index: 4, kind: input, shape index: {}]   ;;  %s4144_s5 = inlined_call_operand.vmem [shape: f32[6,256,64], index: 5, kind: input, shape index: {}]   ;;  %s4145_s6 = inlined_call_operand.vmem [shape: f32[6,256,64], index: 6, kind: input, shape index: {}]   ;;  %s4146_s7 = inlined_call_operand.vmem [shape: f32[6,64,256], index: 7, kind: input, shape index: {}]   ;;  %s4147_s8 = inlined_call_operand.vmem [shape: f32[6,256,64], index: 8, kind: input, shape index: {}]   ;;  %s4148_s9 = inlined_call_operand.vmem [shape: f32[6,256,64], index: 9, kind: input, shape index: {}]   ;;  %s4149_s10 = inlined_call_operand.vmem [shape: f32[6,256,64], index: 10, kind: input, shape index: {}]   ;;  %s4150_s11 = inlined_call_operand.vmem [shape: f32[6,64,256], index: 11, kind: input, shape index: {}]   ;;  %s4151_s12 = inlined_call_operand.vmem [shape: f32[6,256,256], index: 12, kind: input, shape index: {}]   ;;  %s4152_s13 = inlined_call_operand.vmem [shape: f32[6,256,256], index: 13, kind: input, shape index: {}]   ;;  %s4153_s14 = inlined_call_operand.vmem [shape: f32[2,8,256], index: 14, kind: output, shape index: {}]  }
   0x1   :  { %4157 = sst [smem:[#allocation4_spill]] %s4142_s3 }
   0x2   :  { %4158 = sst [smem:[#allocation5_spill]] %s4143_s4 }
   0x3   :  { %4159 = sst [smem:[#allocation6_spill]] %s4144_s5 }
   0x4   :  { %4160 = sst [smem:[#allocation7_spill]] %s4145_s6 }
   0x5   :  { %4161 = sst [smem:[#allocation8_spill]] %s4146_s7 }
   0x6   :  { %4162 = sst [smem:[#allocation9_spill]] %s4147_s8 }
   0x7   :  { %4163 = sst [smem:[#allocation10_spill]] %s4153_s14 }
   0x8 LB: > { %4164 = sst [smem:[#allocation3_spill]] %s3423_s29  ;;  %s2686_s30 = sadd.s32 4294967295, %s3423_s29   ;;  %s3423_s29 = sphi %s3502_s29, %s24_s29  }
   0x9   : > { %p2689_p0 = scmp.ge.s32.totalorder %s3423_s29, 1  ;;  %p497_p1 = scmp.lt.s32.totalorder %s3423_s29, 7 }
   0xb   : > { %p498_p2 = pnand %p2689_p0, %p497_p1 }
   0xc   : > { %p583_p3 = scmp.lt.s32.totalorder (!%p498_p2), %s2686_s30, 5  ;;  %s4165_s4 = sld [smem:[#allocation5_spill]] (!%p498_p2) }
   0xd   : > { %501 = sbr.rel (%p498_p2) target bundleno = 3792 (0xed0), region = 76  ;;  %s4166_s5 = sld [smem:[#allocation6_spill]] (!%p498_p2) }
   0xe   : > { %s4167_s6 = sld [smem:[#allocation7_spill]] (!%p498_p2)  ;;  %s4168_s7 = sld [smem:[#allocation8_spill]] (!%p498_p2) }
   0xf   : > { %s4169_s8 = sld [smem:[#allocation9_spill]] (!%p498_p2)  ;;  %p2710_p4 = scmp.ne.s32.totalorder (!%p498_p2), %s2686_s30, 0 }
  0x14   : > { %s584_s15 = scalar_select %p583_p3, %s2686_s30, 5 }
  0x15   : > { %v637_v0 = vld [vmem:[%s4139_s0] sm:$0xff] (!%p2710_p4)  ;;  %v638_v1 = vld [vmem:[%s4139_s0 + $0x8] sm:$0xff] (!%p2710_p4)  ;;  %v639_v2 = vld [vmem:[%s4139_s0 + $0x10] sm:$0xff] (!%p2710_p4) }
  0x16   : > { %s2733_s16 = sshll.u32 %s584_s15, 8  ;;  %s2736_s17 = sshll.u32 %s584_s15, 7  ;;  %641 = vst [vmem:[#allocation2] sm:$0xff] (!%p2710_p4), %v637_v0  ;;  %642 = vst [vmem:[#allocation2 + $0x8] sm:$0xff] (!%p2710_p4), %v638_v1  ;;  %v640_v3 = vld [vmem:[%s4139_s0 + $0x18] sm:$0xff] (!%p2710_p4) }
  0x17   : > { %s3513_s20 = scalar_lea.vmem %s4165_s4, %s2733_s16  ;;  %s3518_s23 = scalar_lea.vmem %s4166_s5, %s2733_s16  ;;  %643 = vst [vmem:[#allocation2 + $0x10] sm:$0xff] (!%p2710_p4), %v639_v2  ;;  %644 = vst [vmem:[#allocation2 + $0x18] sm:$0xff] (!%p2710_p4), %v640_v3 }
  0x18   : > { %s3523_s26 = scalar_lea.vmem %s4167_s6, %s2733_s16  ;;  %s3528_s29 = scalar_lea.vmem %s4168_s7, %s2736_s17 }
  0x19   : > { %s3533_s18 = scalar_lea.vmem %s4169_s8, %s2733_s16  ;;  %s3538_s21 = scalar_lea.vmem %s4148_s9, %s2733_s16 }
  0x1a   : > { %s3543_s24 = scalar_lea.vmem %s4149_s10, %s2733_s16  ;;  %s3548_s27 = scalar_lea.vmem %s4150_s11, %s2736_s17 }
  0x1b   : > { %s2741_s28 = sshll.u32 %s584_s15, 9  ;;  %636 = sbr.rel (%p2710_p4) target bundleno = 34 (0x22), region = 80 }
  0x1c   : > { %s3553_s14 = scalar_lea.vmem %s4151_s12, %s2741_s28  ;;  %s3558_s19 = scalar_lea.vmem %s4152_s13, %s2741_s28 }
  0x22 PF: > { %v703_v4 = vld [vmem:[%s3518_s23 + $0x80] sm:$0xff]  ;;  %v704_v5 = vld [vmem:[%s3518_s23 + $0x88] sm:$0xff]  ;;  %v705_v15 = vld [vmem:[%s3518_s23 + $0x90] sm:$0xff]  ;;  %vm3426_vm0 = vmmov 0   ;;  %vm992_vm1 = vcmask 523264   ;;  %vm1153_vm2 = vcmask 64512  }
  0x23   : > { %v687_v6 = vld [vmem:[%s3518_s23] sm:$0xff]  ;;  %v3059_v7 = vpack.c.bf16 %v704_v5, %v703_v4  ;;  %v688_v8 = vld [vmem:[%s3518_s23 + $0x8] sm:$0xff]  ;;  %v706_v17 = vld [vmem:[%s3518_s23 + $0x98] sm:$0xff]  ;;  %s4170_s17 = sld [smem:[#allocation4_spill]] }
  0x24   : > { %v671_v9 = vld [vmem:[%s3513_s20 + $0x80] sm:$0xff]  ;;  %v672_v10 = vld [vmem:[%s3513_s20 + $0x88] sm:$0xff]  ;;  %v3061_v11 = vpack.c.bf16 %v688_v8, %v687_v6  ;;  %v689_v18 = vld [vmem:[%s3518_s23 + $0x10] sm:$0xff]  ;;  %v3063_v20 = vpack.c.bf16 %v706_v17, %v705_v15 }
  0x25   : > { %v3027_v12 = vpack.c.bf16 %v672_v10, %v671_v9  ;;  %v655_v13 = vld [vmem:[%s3513_s20] sm:$0xff]  ;;  %v656_v14 = vld [vmem:[%s3513_s20 + $0x8] sm:$0xff]  ;;  %3060 = vmatprep.subr.bf16.mxu1 %v3059_v7  ;;  %v690_v19 = vld [vmem:[%s3518_s23 + $0x18] sm:$0xff] }
  0x26   : > { %v3029_v16 = vpack.c.bf16 %v656_v14, %v655_v13  ;;  %3062 = vmatpush3.bf16.msra.mxu1 %v3061_v11  ;;  %v3065_v21 = vpack.c.bf16 %v690_v19, %v689_v18  ;;  %v673_v22 = vld [vmem:[%s3513_s20 + $0x90] sm:$0xff]  ;;  %v674_v23 = vld [vmem:[%s3513_s20 + $0x98] sm:$0xff]  ;;  %v707_v27 = vld [vmem:[%s3518_s23 + $0xa0] sm:$0xff] }
  0x27   : > { %3028 = vmatprep.subr.bf16.mxu0 %v3027_v12  ;;  %v657_v24 = vld [vmem:[%s3513_s20 + $0x10] sm:$0xff]  ;;  %v3031_v25 = vpack.c.bf16 %v674_v23, %v673_v22  ;;  %v658_v26 = vld [vmem:[%s3513_s20 + $0x18] sm:$0xff]  ;;  %v708_v28 = vld [vmem:[%s3518_s23 + $0xa8] sm:$0xff]  ;;  %3064 = vmatprep.subr.bf16.mxu1 %v3063_v20 }
  0x28   : > { %3030 = vmatpush3.bf16.msra.mxu0 %v3029_v16  ;;  %v3033_v29 = vpack.c.bf16 %v658_v26, %v657_v24  ;;  %v3067_v30 = vpack.c.bf16 %v708_v28, %v707_v27  ;;  %v691_v31 = vld [vmem:[%s3518_s23 + $0x20] sm:$0xff]  ;;  %v692_v32 = vld [vmem:[%s3518_s23 + $0x28] sm:$0xff]  ;;  %v709_v39 = vld [vmem:[%s3518_s23 + $0xb0] sm:$0xff] }
  0x29   : > { %v675_v33 = vld [vmem:[%s3513_s20 + $0xa0] sm:$0xff]  ;;  %3032 = vmatprep.subr.bf16.mxu0 %v3031_v25  ;;  %v676_v34 = vld [vmem:[%s3513_s20 + $0xa8] sm:$0xff]  ;;  %v3069_v37 = vpack.c.bf16 %v692_v32, %v691_v31  ;;  %v710_v40 = vld [vmem:[%s3518_s23 + $0xb8] sm:$0xff] }
  0x2a   : > { %v659_v35 = vld [vmem:[%s3513_s20 + $0x20] sm:$0xff]  ;;  %v660_v36 = vld [vmem:[%s3513_s20 + $0x28] sm:$0xff]  ;;  %3066 = vmatpush3.bf16.msra.mxu1 %v3065_v21  ;;  %v3035_v38 = vpack.c.bf16 %v676_v34, %v675_v33  ;;  %v693_v41 = vld [vmem:[%s3518_s23 + $0x30] sm:$0xff]  ;;  %v3071_v43 = vpack.c.bf16 %v710_v40, %v709_v39  ;;  %v3425_v40 = vmov 0.0  }
  0x2b   : > { %3068 = vmatprep.subr.bf16.mxu1 %v3067_v30  ;;  %v3037_v42 = vpack.c.bf16 %v660_v36, %v659_v35  ;;  %v694_v44 = vld [vmem:[%s3518_s23 + $0x38] sm:$0xff]  ;;  %v677_v45 = vld [vmem:[%s3513_s20 + $0xb0] sm:$0xff]  ;;  %v711_v50 = vld [vmem:[%s3518_s23 + $0xc0] sm:$0xff] }
  0x2c   : > { %3034 = vmatpush3.bf16.msra.mxu0 %v3033_v29  ;;  %v678_v46 = vld [vmem:[%s3513_s20 + $0xb8] sm:$0xff]  ;;  %v661_v48 = vld [vmem:[%s3513_s20 + $0x30] sm:$0xff]  ;;  %v712_v51 = vld [vmem:[%s3518_s23 + $0xc8] sm:$0xff]  ;;  %v3073_v52 = vpack.c.bf16 %v694_v44, %v693_v41 }
  0x2d   : > { %3036 = vmatprep.subr.bf16.mxu0 %v3035_v38  ;;  %v3039_v47 = vpack.c.bf16 %v678_v46, %v677_v45  ;;  %v662_v49 = vld [vmem:[%s3513_s20 + $0x38] sm:$0xff]  ;;  %v679_v53 = vld [vmem:[%s3513_s20 + $0xc0] sm:$0xff]  ;;  %v680_v54 = vld [vmem:[%s3513_s20 + $0xc8] sm:$0xff]  ;;  %v3075_v56 = vpack.c.bf16 %v712_v51, %v711_v50 }
  0x2e   : > { %3070 = vmatpush3.bf16.msra.mxu1 %v3069_v37  ;;  %v3041_v55 = vpack.c.bf16 %v662_v49, %v661_v48  ;;  %v695_v57 = vld [vmem:[%s3518_s23 + $0x40] sm:$0xff]  ;;  %v696_v58 = vld [vmem:[%s3518_s23 + $0x48] sm:$0xff]  ;;  %v3043_v60 = vpack.c.bf16 %v680_v54, %v679_v53  ;;  %v713_v62 = vld [vmem:[%s3518_s23 + $0xd0] sm:$0xff] }
  0x2f   : > { %3072 = vmatprep.subr.bf16.mxu1 %v3071_v43  ;;  %v663_v59 = vld [vmem:[%s3513_s20 + $0x40] sm:$0xff]  ;;  %v664_v61 = vld [vmem:[%s3513_s20 + $0x48] sm:$0xff]  ;;  %v714_v63 = vld [vmem:[%s3518_s23 + $0xd8] sm:$0xff]  ;;  %v3077_v2 = vpack.c.bf16 %v696_v58, %v695_v57 }
  0x30   : > { %3038 = vmatpush3.bf16.msra.mxu0 %v3037_v42  ;;  %v681_v0 = vld [vmem:[%s3513_s20 + $0xd0] sm:$0xff]  ;;  %v682_v1 = vld [vmem:[%s3513_s20 + $0xd8] sm:$0xff]  ;;  %v3045_v3 = vpack.c.bf16 %v664_v61, %v663_v59  ;;  %v3079_v4 = vpack.c.bf16 %v714_v63, %v713_v62  ;;  %v715_v10 = vld [vmem:[%s3518_s23 + $0xe0] sm:$0xff] }
  0x31   : > { %3040 = vmatprep.subr.bf16.mxu0 %v3039_v47  ;;  %v697_v5 = vld [vmem:[%s3518_s23 + $0x50] sm:$0xff]  ;;  %v698_v6 = vld [vmem:[%s3518_s23 + $0x58] sm:$0xff]  ;;  %v3047_v8 = vpack.c.bf16 %v682_v1, %v681_v0  ;;  %v716_v11 = vld [vmem:[%s3518_s23 + $0xe8] sm:$0xff] }
  0x32   : > { %3074 = vmatpush3.bf16.msra.mxu1 %v3073_v52  ;;  %v665_v7 = vld [vmem:[%s3513_s20 + $0x50] sm:$0xff]  ;;  %v666_v9 = vld [vmem:[%s3513_s20 + $0x58] sm:$0xff]  ;;  %v683_v12 = vld [vmem:[%s3513_s20 + $0xe0] sm:$0xff]  ;;  %v3081_v14 = vpack.c.bf16 %v698_v6, %v697_v5  ;;  %v3083_v17 = vpack.c.bf16 %v716_v11, %v715_v10 }
  0x33   : > { %3076 = vmatprep.subr.bf16.mxu1 %v3075_v56  ;;  %v684_v13 = vld [vmem:[%s3513_s20 + $0xe8] sm:$0xff]  ;;  %v3049_v16 = vpack.c.bf16 %v666_v9, %v665_v7  ;;  %v699_v18 = vld [vmem:[%s3518_s23 + $0x60] sm:$0xff]  ;;  %v717_v23 = vld [vmem:[%s3518_s23 + $0xf0] sm:$0xff] }
  0x34   : > { %3042 = vmatpush3.bf16.msra.mxu0 %v3041_v55  ;;  %v3624_v15 = vld [vmem:[#allocation2 + $0x8] sm:$0xff]  ;;  %v667_v20 = vld [vmem:[%s3513_s20 + $0x60] sm:$0xff]  ;;  %v3051_v21 = vpack.c.bf16 %v684_v13, %v683_v12  ;;  %v718_v24 = vld [vmem:[%s3518_s23 + $0xf8] sm:$0xff] }
  0x35   : > { %3044 = vmatprep.subr.bf16.mxu0 %v3043_v60  ;;  %v700_v19 = vld [vmem:[%s3518_s23 + $0x68] sm:$0xff]  ;;  %906 = vmatprep.mubr.f32.mxu1 %v3624_v15  ;;  %v685_v25 = vld [vmem:[%s3513_s20 + $0xf0] sm:$0xff]  ;;  %v686_v26 = vld [vmem:[%s3513_s20 + $0xf8] sm:$0xff]  ;;  %v3087_v29 = vpack.c.bf16 %v718_v24, %v717_v23 }
  0x36   : > { %3078 = vmatpush3.bf16.msra.mxu1 %v3077_v2  ;;  %v668_v22 = vld [vmem:[%s3513_s20 + $0x68] sm:$0xff]  ;;  %831 = vmatprep.mubr.f32.mxu0 %v3624_v15  ;;  %v3085_v27 = vpack.c.bf16 %v700_v19, %v699_v18  ;;  %v701_v30 = vld [vmem:[%s3518_s23 + $0x70] sm:$0xff]  ;;  %v702_v31 = vld [vmem:[%s3518_s23 + $0x78] sm:$0xff]  ;;  %v3055_v32 = vpack.c.bf16 %v686_v26, %v685_v25 }
  0x37   : > { %3080 = vmatprep.subr.bf16.mxu1 %v3079_v4  ;;  %v3053_v28 = vpack.c.bf16 %v668_v22, %v667_v20  ;;  %v669_v33 = vld [vmem:[%s3513_s20 + $0x70] sm:$0xff]  ;;  %v670_v34 = vld [vmem:[%s3513_s20 + $0x78] sm:$0xff]  ;;  %v3089_v35 = vpack.c.bf16 %v702_v31, %v701_v30  ;;  %v3640_v37 = vld [vmem:[#allocation2] sm:$0xff] }
  0x38   : > { %3046 = vmatpush3.bf16.msra.mxu0 %v3045_v3  ;;  %v3057_v36 = vpack.c.bf16 %v670_v34, %v669_v33  ;;  %v3642_v38 = vld [vmem:[#allocation2 + $0x18] sm:$0xff]  ;;  %v3647_v39 = vld [vmem:[#allocation2 + $0x10] sm:$0xff]  ;;  %v735_v53 = vld [vmem:[%s3523_s26 + $0x80] sm:$0xff] }
  0x39   : > { %3048 = vmatprep.subr.bf16.mxu0 %v3047_v8  ;;  %v736_v54 = vld [vmem:[%s3523_s26 + $0x88] sm:$0xff]  ;;  %v719_v55 = vld [vmem:[%s3523_s26] sm:$0xff]  ;;  %v737_v58 = vld [vmem:[%s3523_s26 + $0x90] sm:$0xff] }
  0x3a   : > { %3082 = vmatpush3.bf16.msra.mxu1 %v3081_v14  ;;  %v3091_v56 = vpack.c.bf16 %v736_v54, %v735_v53  ;;  %v720_v57 = vld [vmem:[%s3523_s26 + $0x8] sm:$0xff]  ;;  %v738_v59 = vld [vmem:[%s3523_s26 + $0x98] sm:$0xff]  ;;  %v721_v62 = vld [vmem:[%s3523_s26 + $0x10] sm:$0xff] }
  0x3b   : > { %3084 = vmatprep.subr.bf16.mxu1 %v3083_v17  ;;  %v3093_v60 = vpack.c.bf16 %v720_v57, %v719_v55  ;;  %v3095_v61 = vpack.c.bf16 %v738_v59, %v737_v58  ;;  %v722_v63 = vld [vmem:[%s3523_s26 + $0x18] sm:$0xff]  ;;  %v739_v0 = vld [vmem:[%s3523_s26 + $0xa0] sm:$0xff]  ;;  %v740_v1 = vld [vmem:[%s3523_s26 + $0xa8] sm:$0xff] }
  0x3c   : > { %3050 = vmatpush3.bf16.msra.mxu0 %v3049_v16  ;;  %v3097_v2 = vpack.c.bf16 %v722_v63, %v721_v62  ;;  %v3099_v3 = vpack.c.bf16 %v740_v1, %v739_v0  ;;  %v723_v4 = vld [vmem:[%s3523_s26 + $0x20] sm:$0xff]  ;;  %v724_v5 = vld [vmem:[%s3523_s26 + $0x28] sm:$0xff]  ;;  %v741_v6 = vld [vmem:[%s3523_s26 + $0xb0] sm:$0xff] }
  0x3d   : > { %3052 = vmatprep.subr.bf16.mxu0 %v3051_v21  ;;  %v742_v7 = vld [vmem:[%s3523_s26 + $0xb8] sm:$0xff]  ;;  %v3101_v8 = vpack.c.bf16 %v724_v5, %v723_v4  ;;  %v725_v10 = vld [vmem:[%s3523_s26 + $0x30] sm:$0xff]  ;;  %v743_v12 = vld [vmem:[%s3523_s26 + $0xc0] sm:$0xff] }
  0x3e   : > { %3086 = vmatpush3.bf16.msra.mxu1 %v3085_v27  ;;  %v3103_v9 = vpack.c.bf16 %v742_v7, %v741_v6  ;;  %v726_v11 = vld [vmem:[%s3523_s26 + $0x38] sm:$0xff]  ;;  %v744_v13 = vld [vmem:[%s3523_s26 + $0xc8] sm:$0xff]  ;;  %v727_v17 = vld [vmem:[%s3523_s26 + $0x40] sm:$0xff] }
  0x3f   : > { %3088 = vmatprep.subr.bf16.mxu1 %v3087_v29  ;;  %v3105_v14 = vpack.c.bf16 %v726_v11, %v725_v10  ;;  %v3107_v16 = vpack.c.bf16 %v744_v13, %v743_v12  ;;  %v728_v18 = vld [vmem:[%s3523_s26 + $0x48] sm:$0xff]  ;;  %v745_v19 = vld [vmem:[%s3523_s26 + $0xd0] sm:$0xff]  ;;  %v746_v20 = vld [vmem:[%s3523_s26 + $0xd8] sm:$0xff] }
  0x40   : > { %3054 = vmatpush3.bf16.msra.mxu0 %v3053_v28  ;;  %v3109_v21 = vpack.c.bf16 %v728_v18, %v727_v17  ;;  %v3111_v22 = vpack.c.bf16 %v746_v20, %v745_v19  ;;  %v729_v23 = vld [vmem:[%s3523_s26 + $0x50] sm:$0xff]  ;;  %v730_v24 = vld [vmem:[%s3523_s26 + $0x58] sm:$0xff]  ;;  %v747_v25 = vld [vmem:[%s3523_s26 + $0xe0] sm:$0xff] }
  0x41   : > { %3056 = vmatprep.subr.bf16.mxu0 %v3055_v32  ;;  %v748_v26 = vld [vmem:[%s3523_s26 + $0xe8] sm:$0xff]  ;;  %v3113_v27 = vpack.c.bf16 %v730_v24, %v729_v23  ;;  %v731_v29 = vld [vmem:[%s3523_s26 + $0x60] sm:$0xff]  ;;  %v749_v31 = vld [vmem:[%s3523_s26 + $0xf0] sm:$0xff] }
  0x42   : > { %3090 = vmatpush3.bf16.msra.mxu1 %v3089_v35  ;;  %v3115_v28 = vpack.c.bf16 %v748_v26, %v747_v25  ;;  %v732_v30 = vld [vmem:[%s3523_s26 + $0x68] sm:$0xff]  ;;  %v750_v32 = vld [vmem:[%s3523_s26 + $0xf8] sm:$0xff]  ;;  %v733_v35 = vld [vmem:[%s3523_s26 + $0x70] sm:$0xff] }
  0x43   : > { %2987 = vmatprep.subr.mxu1 %v3425_v40  ;;  %v3117_v33 = vpack.c.bf16 %v732_v30, %v731_v29  ;;  %v3119_v34 = vpack.c.bf16 %v750_v32, %v749_v31  ;;  %v752_v13 = vld [vmem:[%s3528_s29 + $0x8] sm:$0xff]  ;;  %v751_v19 = vld [vmem:[%s3528_s29] sm:$0xff]  ;;  %v753_v20 = vld [vmem:[%s3528_s29 + $0x10] sm:$0xff] }
  0x44   : > { %3058 = vmatpush3.bf16.msra.mxu0 %v3057_v36  ;;  %v734_v36 = vld [vmem:[%s3523_s26 + $0x78] sm:$0xff]  ;;  %v3125_v25 = vpack.c.bf16 %v753_v20, %v751_v19  ;;  %v757_v29 = vld [vmem:[%s3528_s29 + $0x30] sm:$0xff]  ;;  %v760_v30 = vld [vmem:[%s3528_s29 + $0x48] sm:$0xff] }
  0x45   : > { %907 = vmatmul.mubr.f32.vlgmr.msra.gmra.mrb[0].mxu1 %v3640_v37  ;;  %3092 = vmatprep.subr.bf16.mxu0 %v3091_v56  ;;  %v758_v23 = vld [vmem:[%s3528_s29 + $0x38] sm:$0xff] }
  0x46   : > { %911 = vmatprep.mubr.f32.mxu1 %v3642_v38  ;;  %v762_v31 = vld [vmem:[%s3528_s29 + $0x58] sm:$0xff] }
  0x47   : > { %832 = vmatmul.mubr.f32.vlgmr.msra.gmra.mrb[0].mxu0 %v3640_v37 }
  0x48   : > { %836 = vmatprep.mubr.f32.mxu0 %v3642_v38  ;;  %3094 = vmatpush3.bf16.msra.mxu0 %v3093_v60 }
  0x49   : > { %912 = vmatmul.mubr.f32.gmra.mrb[2].mxu1 %v3647_v39  ;;  %3096 = vmatprep.subr.bf16.mxu0 %v3095_v61 }
  0x4a   : > { %2989 = vmatprep.mubr.msk.f32.mxu1 %vm3426_vm0, %v3425_v40 }
  0x4b   : > { %837 = vmatmul.mubr.f32.gmra.mrb[2].mxu0 %v3647_v39 }
  0x4c   : > { %981 = vmatprep.mubr.f32.mxu0 %v3624_v15  ;;  %3098 = vmatpush3.bf16.msra.mxu0 %v3097_v2 }
  0x4d   : > { %3100 = vmatprep.subr.bf16.mxu0 %v3099_v3 }
  0x50   : > { %3102 = vmatpush3.bf16.msra.mxu0 %v3101_v8 }
  0x51   : > { %3104 = vmatprep.subr.bf16.mxu0 %v3103_v9 }
  0x54   : > { %3106 = vmatpush3.bf16.msra.mxu0 %v3105_v14  ;;  %v754_v14 = vld [vmem:[%s3528_s29 + $0x18] sm:$0xff] }
  0x55   : > { %3108 = vmatprep.subr.bf16.mxu0 %v3107_v16  ;;  %v3123_v18 = vpack.c.bf16 %v754_v14, %v752_v13  ;;  %v1494_v13 = vld [vmem:[%s3538_s21 + $0xa0] sm:$0xff] }
  0x58   : > { %3110 = vmatpush3.bf16.msra.mxu0 %v3109_v21 }
  0x59   : > { %3112 = vmatprep.subr.bf16.mxu0 %v3111_v22  ;;  %v756_v22 = vld [vmem:[%s3528_s29 + $0x28] sm:$0xff] }
  0x5c   : > { %3114 = vmatpush3.bf16.msra.mxu0 %v3113_v27  ;;  %v3127_v27 = vpack.c.bf16 %v758_v23, %v756_v22  ;;  %v1479_v22 = vld [vmem:[%s3538_s21 + $0x28] sm:$0xff]  ;;  %v1462_v23 = vld [vmem:[%s3533_s18 + $0xa0] sm:$0xff] }
  0x5d   : > { %3116 = vmatprep.subr.bf16.mxu0 %v3115_v28  ;;  %v755_v28 = vld [vmem:[%s3528_s29 + $0x20] sm:$0xff] }
  0x5e   : > { %v3129_v32 = vpack.c.bf16 %v757_v29, %v755_v28  ;;  %v1446_v29 = vld [vmem:[%s3533_s18 + $0x20] sm:$0xff] }
  0x60   : > { %3118 = vmatpush3.bf16.msra.mxu0 %v3117_v33  ;;  %v3131_v33 = vpack.c.bf16 %v762_v31, %v760_v30  ;;  %v1447_v30 = vld [vmem:[%s3533_s18 + $0x28] sm:$0xff]  ;;  %v1480_v31 = vld [vmem:[%s3538_s21 + $0x30] sm:$0xff] }
  0x61   : > { %3120 = vmatprep.subr.bf16.mxu0 %v3119_v34  ;;  %v759_v34 = vld [vmem:[%s3528_s29 + $0x40] sm:$0xff] }
 0x118   : > { %v2813_v41 = vpop.f32.mrb[0].mxu1 }
 0x119   : > { %v2814_v42 = vpop.f32.mrb[1].mxu1 }
 0x11a   : > { %v2775_v43 = vpop.f32.mrb[0].mxu0  ;;  %v2815_v44 = vadd.f32 %v2814_v42, %v2813_v41  ;;  %v3121_v41 = vpack.c.bf16 %v734_v36, %v733_v35  ;;  %v653_v42 = vld [vmem:[%s4141_s2] sm:$0xff]  ;;  %v761_v35 = vld [vmem:[%s3528_s29 + $0x50] sm:$0xff]  ;;  %v764_v36 = vld [vmem:[%s3528_s29 + $0x68] sm:$0xff] }
 0x11b   : > { %v2776_v45 = vpop.f32.mrb[1].mxu0 }
 0x11c   : > { %v2777_v46 = vadd.f32 %v2776_v45, %v2775_v43  ;;  %v2816_v47 = vpop.f32.mrb[2].mxu1  ;;  %2988 = vmatpush3.xpose.msk.msra.mxu1 %vm992_vm1, %v2815_v44  ;;  %3122 = vmatpush3.bf16.msra.mxu0 %v3121_v41  ;;  %v2715_v43 = vadd.f32 -1.0, %v653_v42  ;;  %v654_v44 = vld [vmem:[%s4141_s2 + $0x8] sm:$0xff]  ;;  %v766_v41 = vld [vmem:[%s3528_s29 + $0x78] sm:$0xff] }
 0x11d   : > { %v2817_v48 = vpop.f32.mrb[3].mxu1  ;;  %2992 = vmatprep.subr.mxu1 %v3425_v40 }
 0x11e   : > { %v2778_v49 = vpop.f32.mrb[2].mxu0  ;;  %v2818_v50 = vadd.f32 %v2817_v48, %v2816_v47  ;;  %v1149_v45 = vmul.f32 1e+09, %v2715_v43  ;;  %v3135_v43 = vpack.c.bf16 %v766_v41, %v764_v36  ;;  %v3149_v36 = vpack.c.bf16 %v1447_v30, %v1446_v29  ;;  %v1498_v41 = vld [vmem:[%s3538_s21 + $0xc0] sm:$0xff]  ;;  %v1455_v29 = vld [vmem:[%s3533_s18 + $0x68] sm:$0xff] }
 0x11f   : > { %v2779_v51 = vpop.f32.mrb[3].mxu0  ;;  %2990 = vmatmul.mubr.msk.f32.vlgmr.msra.gmra.mrb[4].mxu1 %vm992_vm1, %v2777_v46  ;;  %982 = vmatmul.mubr.f32.vlgmr.msra.gmra.mrb[4].mxu0 %v3640_v37  ;;  %v2716_v46 = vadd.f32 -1.0, %v654_v44 }
 0x120   : > { %v2780_v52 = vadd.f32 %v2779_v51, %v2778_v49  ;;  %2993 = vmatpush3.xpose.msk.msra.mxu1 %vm992_vm1, %v2818_v50  ;;  %2994 = vmatprep.mubr.msk.f32.mxu1 %vm3426_vm0, %v3425_v40 }
 0x121   : > { %2997 = vmatprep.subr.mxu1 %v3425_v40  ;;  %986 = vmatprep.mubr.f32.mxu0 %v3642_v38  ;;  %v1150_v51 = vmul.f32 1e+09, %v2716_v46 }
 0x123   : > { %2995 = vmatmul.mubr.msk.f32.vlgmr.msra.gmra.mrb[6].mxu1 %vm992_vm1, %v2780_v52  ;;  %987 = vmatmul.mubr.f32.gmra.mrb[6].mxu0 %v3647_v39 }
 0x124   : > { %2999 = vmatprep.mubr.msk.f32.mxu1 %vm3426_vm0, %v3425_v40 }
 0x1f2   : > { %v1065_v47 = vpop.f32.mrb[4].mxu1  ;;  %v2851_v4 = vpop.f32.mrb[4].mxu0 }
 0x1f3   : > { %v1145_v48 = vmul.f32 0.125, %v1065_v47  ;;  %v2991_v49 = vpop.f32.mrb[5].mxu1  ;;  %v2852_v5 = vpop.f32.mrb[5].mxu0 }
 0x1f4   : > { %v2853_v6 = vadd.f32 %v2852_v5, %v2851_v4  ;;  %v1442_v4 = vld [vmem:[%s3533_s18] sm:$0xff] }
 0x1f5   : > { %v1151_v50 = vadd.f32 %v1149_v45, %v1145_v48  ;;  %v765_v45 = vld [vmem:[%s3528_s29 + $0x70] sm:$0xff] }
 0x1f6   : > { %v1141_v52 = vpop.f32.mrb[6].mxu1  ;;  %v2854_v7 = vpop.f32.mrb[6].mxu0  ;;  %2998 = vmatpush3.msra.mxu1 %v2853_v6  ;;  %v1443_v6 = vld [vmem:[%s3533_s18 + $0x8] sm:$0xff] }
 0x1f7   : > { %v1146_v53 = vmul.f32 0.125, %v1141_v52  ;;  %v1154_v54 = vsel %vm1153_vm2, %v1151_v50, -inf  ;;  %v2996_v55 = vpop.f32.mrb[7].mxu1  ;;  %v2855_v8 = vpop.f32.mrb[7].mxu0  ;;  %3002 = vmatprep.subr.mxu1 %v3425_v40 }
 0x1f8   : > { %1155 = vmax.xlane.f32.xlu0 %v1154_v54  ;;  %v2856_v9 = vadd.f32 %v2855_v8, %v2854_v7  ;;  %v1476_v7 = vld [vmem:[%s3538_s21 + $0x10] sm:$0xff]  ;;  %v1477_v8 = vld [vmem:[%s3538_s21 + $0x18] sm:$0xff] }
 0x1f9   : > { %v1152_v56 = vadd.f32 %v1150_v51, %v1146_v53 }
 0x1fb   : > { %v1157_v57 = vsel %vm1153_vm2, %v1152_v56, -inf }
 0x1fc   : > { %1158 = vmax.xlane.f32.xlu0 %v1157_v57 }
 0x285   : > { %v1156_v58 = vpop.xlane.xlu0 %1155 }
 0x286   : > { %v1160_v59 = vsub.f32 %v1151_v50, %v1156_v58 }
 0x288   : > { %v1162_v60 = vmul.f32 1.442695, %v1160_v59 }
 0x289   : > { %v1159_v61 = vpop.xlane.xlu0 %1158 }
 0x28a   : > { %3389 = vpow2.f32 %v1162_v60  ;;  %v1161_v62 = vsub.f32 %v1152_v56, %v1159_v61  ;;  %v1491_v60 = vld [vmem:[%s3538_s21 + $0x88] sm:$0xff]  ;;  %v1474_v61 = vld [vmem:[%s3538_s21] sm:$0xff] }
 0x28c   : > { %v1164_v63 = vmul.f32 1.442695, %v1161_v62 }
 0x28e   : > { %3391 = vpow2.f32 %v1164_v63  ;;  %v1458_v63 = vld [vmem:[%s3533_s18 + $0x80] sm:$0xff] }
 0x294   : > { %v3390_v0 = vpop.eup %3389 }
 0x295   : > { %v1166_v1 = vsel %vm1153_vm2, %v3390_v0, 0.0 }
 0x296   : > { %1167 = vadd.xlane.f32.xlu1 %v1166_v1 }
 0x298   : > { %v3392_v2 = vpop.eup %3391 }
 0x299   : > { %v1169_v3 = vsel %vm1153_vm2, %v3392_v2, 0.0 }
 0x29a   : > { %1170 = vadd.xlane.f32.xlu1 %v1169_v3  ;;  %v1493_v3 = vld [vmem:[%s3538_s21 + $0x98] sm:$0xff] }
 0x323   : > { %v1168_v10 = vpop.xlane.xlu1 %1167 }
 0x324   : > { %3393 = vrcp.f32 %v1168_v10  ;;  %v3177_v10 = vpack.c.bf16 %v1477_v8, %v1476_v7  ;;  %v1484_v7 = vld [vmem:[%s3538_s21 + $0x50] sm:$0xff]  ;;  %v1485_v8 = vld [vmem:[%s3538_s21 + $0x58] sm:$0xff] }
 0x327   : > { %v1171_v11 = vpop.xlane.xlu1 %1170 }
 0x328   : > { %3395 = vrcp.f32 %v1171_v11  ;;  %v1460_v11 = vld [vmem:[%s3533_s18 + $0x90] sm:$0xff] }
 0x32e   : > { %v3394_v12 = vpop.eup %3393 }
 0x32f   : > { %v1174_v16 = vmul.f32 %v3394_v12, %v3390_v0  ;;  %v1459_v0 = vld [vmem:[%s3533_s18 + $0x88] sm:$0xff]  ;;  %v1461_v12 = vld [vmem:[%s3533_s18 + $0x98] sm:$0xff] }
 0x330   : > { %v3143_v14 = vpack.c.bf16 %v1461_v12, %v1460_v11  ;;  %v1469_v11 = vld [vmem:[%s3533_s18 + $0xd8] sm:$0xff]  ;;  %v1502_v12 = vld [vmem:[%s3538_s21 + $0xe0] sm:$0xff] }
 0x331   : > { %v1176_v17 = vmul.f32 %v1174_v16, %v653_v42  ;;  %v3133_v42 = vpack.c.bf16 %v761_v35, %v759_v34  ;;  %v1495_v16 = vld [vmem:[%s3538_s21 + $0xa8] sm:$0xff]  ;;  %v1464_v34 = vld [vmem:[%s3533_s18 + $0xb0] sm:$0xff]  ;;  %v1465_v35 = vld [vmem:[%s3533_s18 + $0xb8] sm:$0xff] }
 0x332   : > { %v3396_v21 = vpop.eup %3395  ;;  %v3179_v19 = vpack.c.bf16 %v1495_v16, %v1494_v13  ;;  %v1452_v16 = vld [vmem:[%s3533_s18 + $0x50] sm:$0xff] }
 0x333   : > { %v1175_v24 = vmul.f32 %v3396_v21, %v3392_v2  ;;  %3000 = vmatmul.mubr.msk.f32.vlgmr.msra.gmra.mrb[8].mxu1 %vm1153_vm2, %v1176_v17  ;;  %v1492_v2 = vld [vmem:[%s3538_s21 + $0x90] sm:$0xff]  ;;  %v1478_v21 = vld [vmem:[%s3538_s21 + $0x20] sm:$0xff] }
 0x334   : > { %3003 = vmatpush3.msra.mxu1 %v2856_v9  ;;  %3004 = vmatprep.mubr.msk.f32.mxu1 %vm3426_vm0, %v3425_v40  ;;  %v3175_v5 = vpack.c.bf16 %v1493_v3, %v1492_v2  ;;  %v3141_v9 = vpack.c.bf16 %v1443_v6, %v1442_v4  ;;  %v1444_v17 = vld [vmem:[%s3533_s18 + $0x10] sm:$0xff]  ;;  %v1501_v2 = vld [vmem:[%s3538_s21 + $0xd8] sm:$0xff]  ;;  %v1450_v3 = vld [vmem:[%s3533_s18 + $0x40] sm:$0xff] }
 0x335   : > { %v1177_v26 = vmul.f32 %v1175_v24, %v654_v44  ;;  %3124 = vmatprep.subr.bf16.mxu1 %v3123_v18  ;;  %v763_v44 = vld [vmem:[%s3528_s29 + $0x60] sm:$0xff]  ;;  %v1445_v18 = vld [vmem:[%s3533_s18 + $0x18] sm:$0xff]  ;;  %v1463_v24 = vld [vmem:[%s3533_s18 + $0xa8] sm:$0xff] }
 0x336   : > { %v3137_v46 = vpack.c.bf16 %v765_v45, %v763_v44  ;;  %v3145_v20 = vpack.c.bf16 %v1445_v18, %v1444_v17  ;;  %v3147_v28 = vpack.c.bf16 %v1463_v24, %v1462_v23  ;;  %v1448_v44 = vld [vmem:[%s3533_s18 + $0x30] sm:$0xff]  ;;  %v1449_v45 = vld [vmem:[%s3533_s18 + $0x38] sm:$0xff]  ;;  %v1451_v4 = vld [vmem:[%s3533_s18 + $0x48] sm:$0xff] }
 0x337   : > { %3005 = vmatmul.mubr.msk.f32.vlgmr.msra.gmra.mrb[10].mxu1 %vm1153_vm2, %v1177_v26  ;;  %v1497_v26 = vld [vmem:[%s3538_s21 + $0xb8] sm:$0xff]  ;;  %v3157_v6 = vpack.c.bf16 %v1451_v4, %v1450_v3  ;;  %v1470_v23 = vld [vmem:[%s3533_s18 + $0xe0] sm:$0xff]  ;;  %v1471_v24 = vld [vmem:[%s3533_s18 + $0xe8] sm:$0xff] }
 0x338   : > { %3126 = vmatpush1.bf16.msra.mxu1 %v3125_v25  ;;  %1394 = vmatprep.mubr.f32.mxu1 %v3425_v40  ;;  %v1496_v25 = vld [vmem:[%s3538_s21 + $0xb0] sm:$0xff]  ;;  %v1453_v17 = vld [vmem:[%s3533_s18 + $0x58] sm:$0xff] }
 0x339   : > { %3128 = vmatprep.subr.bf16.mxu1 %v3127_v27  ;;  %v3181_v27 = vpack.c.bf16 %v1479_v22, %v1478_v21  ;;  %v1487_v21 = vld [vmem:[%s3538_s21 + $0x68] sm:$0xff] }
 0x33c   : > { %3130 = vmatpush1.bf16.msra.mxu1 %v3129_v32  ;;  %v3183_v32 = vpack.c.bf16 %v1497_v26, %v1496_v25  ;;  %v1504_v25 = vld [vmem:[%s3538_s21 + $0xf0] sm:$0xff]  ;;  %v3163_v26 = vpack.c.bf16 %v1471_v24, %v1470_v23  ;;  %v1529_v24 = vld [vmem:[%s3543_s24 + $0xb8] sm:$0xff] }
 0x33d   : > { %3132 = vmatprep.subr.bf16.mxu1 %v3131_v33  ;;  %v1481_v33 = vld [vmem:[%s3538_s21 + $0x38] sm:$0xff]  ;;  %v1528_v23 = vld [vmem:[%s3543_s24 + $0xb0] sm:$0xff] }
 0x340   : > { %3134 = vmatpush1.bf16.msra.mxu1 %v3133_v42  ;;  %v1499_v42 = vld [vmem:[%s3538_s21 + $0xc8] sm:$0xff] }
 0x341   : > { %3136 = vmatprep.subr.bf16.mxu1 %v3135_v43  ;;  %v3151_v43 = vpack.c.bf16 %v1465_v35, %v1464_v34  ;;  %v650_v34 = vld [vmem:[%s4140_s1 + $0x8] sm:$0xff] }
 0x344   : > { %3138 = vmatpush1.bf16.msra.mxu1 %v3137_v46  ;;  %v3185_v46 = vpack.c.bf16 %v1481_v33, %v1480_v31  ;;  %v1489_v33 = vld [vmem:[%s3538_s21 + $0x78] sm:$0xff] }
 0x406   : > { %v1247_v47 = vpop.f32.mrb[8].mxu1 }
 0x407   : > { %v3001_v48 = vpop.f32.mrb[9].mxu1  ;;  %2719 = vmatmul.mubr.msk.f32.vlgmr.msra.gmra.mrb[12].mxu1 %vm992_vm1, %v1247_v47  ;;  %v3187_v47 = vpack.c.bf16 %v1499_v42, %v1498_v41  ;;  %v1473_v41 = vld [vmem:[%s3533_s18 + $0xf8] sm:$0xff] }
 0x408   : > { %1400 = vmatprep.mubr.f32.mxu1 %v3425_v40  ;;  %v1482_v48 = vld [vmem:[%s3538_s21 + $0x40] sm:$0xff] }
 0x40a   : > { %v1320_v49 = vpop.f32.mrb[10].mxu1 }
 0x40b   : > { %v3006_v50 = vpop.f32.mrb[11].mxu1  ;;  %2720 = vmatmul.mubr.msk.f32.gmra.mrb[14].mxu1 %vm992_vm1, %v1320_v49  ;;  %v1483_v49 = vld [vmem:[%s3538_s21 + $0x48] sm:$0xff] }
 0x40c   : > { %v3153_v50 = vpack.c.bf16 %v1449_v45, %v1448_v44  ;;  %1693 = vmatprep.mubr.f32.mxu1 %v650_v34  ;;  %v1457_v44 = vld [vmem:[%s3533_s18 + $0x78] sm:$0xff]  ;;  %v3842_v45 = vld [vmem:[%s4140_s1] sm:$0xff] }
 0x4da   : > { %v1396_v51 = vpop.f32.mrb[12].mxu1 }
 0x4db   : > { %v3737_v52 = vadd.f32 %v1396_v51, %v3640_v37  ;;  %v1398_v53 = vpop.f32.mrb[13].mxu1  ;;  %v3189_v51 = vpack.c.bf16 %v1483_v49, %v1482_v48  ;;  %v3855_v48 = vld [vmem:[%s4140_s1 + $0x10] sm:$0xff] }
 0x4dc   : > { %v3740_v54 = vadd.f32 %v1398_v53, %v3624_v15  ;;  %v1490_v15 = vld [vmem:[%s3538_s21 + $0x80] sm:$0xff] }
 0x4dd   : > { %v3171_v62 = vpack.c.bf16 %v1491_v60, %v1490_v15 }
 0x4de   : > { %v1402_v55 = vpop.f32.mrb[14].mxu1  ;;  %v1407_v56 = vadd.f32 %v3740_v54, %v3737_v52 }
 0x4df   : > { %v3745_v57 = vadd.f32 %v1402_v55, %v3647_v39  ;;  %v1404_v58 = vpop.f32.mrb[15].mxu1  ;;  %v1475_v39 = vld [vmem:[%s3538_s21 + $0x8] sm:$0xff]  ;;  %3172 = vmatprep.subr.bf16.mxu1 %v3171_v62 }
 0x4e0   : > { %v3748_v37 = vadd.f32 %v1404_v58, %v3642_v38  ;;  %1408 = vadd.xlane.f32.xlu0 %v1407_v56  ;;  %v3173_v1 = vpack.c.bf16 %v1475_v39, %v1474_v61  ;;  %v3139_v38 = vpack.c.bf16 %v1459_v0, %v1458_v63 }
 0x4e2   : > { %v1410_v59 = vadd.f32 %v3748_v37, %v3745_v57  ;;  %3174 = vmatpush3.bf16.msra.mxu1 %v3173_v1  ;;  %3140 = vmatprep.subr.bf16.mxu0 %v3139_v38  ;;  %v1466_v1 = vld [vmem:[%s3533_s18 + $0xc0] sm:$0xff]  ;;  %v1500_v38 = vld [vmem:[%s3538_s21 + $0xd0] sm:$0xff] }
 0x4e3   : > { %3176 = vmatprep.subr.bf16.mxu1 %v3175_v5  ;;  %3142 = vmatpush3.bf16.msra.mxu0 %v3141_v9  ;;  %v3191_v5 = vpack.c.bf16 %v1501_v2, %v1500_v38  ;;  %v3193_v9 = vpack.c.bf16 %v1485_v8, %v1484_v7  ;;  %v1506_v7 = vld [vmem:[%s3543_s24] sm:$0xff] }
 0x4e4   : > { %1411 = vadd.xlane.f32.xlu1 %v1410_v59  ;;  %3144 = vmatprep.subr.bf16.mxu0 %v3143_v14  ;;  %v1503_v14 = vld [vmem:[%s3538_s21 + $0xe8] sm:$0xff] }
 0x4e5   : > { %v3195_v18 = vpack.c.bf16 %v1503_v14, %v1502_v12  ;;  %v1508_v14 = vld [vmem:[%s3543_s24 + $0x10] sm:$0xff] }
 0x4e6   : > { %3178 = vmatpush3.bf16.msra.mxu1 %v3177_v10  ;;  %v1468_v10 = vld [vmem:[%s3533_s18 + $0xd0] sm:$0xff] }
 0x4e7   : > { %3180 = vmatprep.subr.bf16.mxu1 %v3179_v19  ;;  %3146 = vmatpush3.bf16.msra.mxu0 %v3145_v20  ;;  %v3159_v13 = vpack.c.bf16 %v1469_v11, %v1468_v10  ;;  %v3161_v19 = vpack.c.bf16 %v1453_v17, %v1452_v16  ;;  %v1486_v20 = vld [vmem:[%s3538_s21 + $0x60] sm:$0xff]  ;;  %v1524_v10 = vld [vmem:[%s3543_s24 + $0x90] sm:$0xff]  ;;  %v1525_v11 = vld [vmem:[%s3543_s24 + $0x98] sm:$0xff] }
 0x4e8   : > { %3148 = vmatprep.subr.bf16.mxu0 %v3147_v28  ;;  %v3197_v22 = vpack.c.bf16 %v1487_v21, %v1486_v20  ;;  %v1454_v28 = vld [vmem:[%s3533_s18 + $0x60] sm:$0xff]  ;;  %v1509_v16 = vld [vmem:[%s3543_s24 + $0x18] sm:$0xff] }
 0x4e9   : > { %v3165_v31 = vpack.c.bf16 %v1455_v29, %v1454_v28  ;;  %v1526_v17 = vld [vmem:[%s3543_s24 + $0xa0] sm:$0xff]  ;;  %v1513_v28 = vld [vmem:[%s3543_s24 + $0x38] sm:$0xff] }
 0x4ea   : > { %3182 = vmatpush3.bf16.msra.mxu1 %v3181_v27  ;;  %v1505_v27 = vld [vmem:[%s3538_s21 + $0xf8] sm:$0xff]  ;;  %v1510_v21 = vld [vmem:[%s3543_s24 + $0x20] sm:$0xff] }
 0x4eb   : > { %3184 = vmatprep.subr.bf16.mxu1 %v3183_v32  ;;  %3150 = vmatpush3.bf16.msra.mxu0 %v3149_v36  ;;  %v3199_v30 = vpack.c.bf16 %v1505_v27, %v1504_v25  ;;  %v1488_v32 = vld [vmem:[%s3538_s21 + $0x70] sm:$0xff]  ;;  %v1530_v29 = vld [vmem:[%s3543_s24 + $0xc0] sm:$0xff] }
 0x4ec   : > { %3152 = vmatprep.subr.bf16.mxu0 %v3151_v43  ;;  %v3201_v35 = vpack.c.bf16 %v1489_v33, %v1488_v32  ;;  %v1472_v36 = vld [vmem:[%s3533_s18 + $0xf0] sm:$0xff]  ;;  %v1514_v33 = vld [vmem:[%s3543_s24 + $0x40] sm:$0xff] }
 0x4ed   : > { %v3167_v42 = vpack.c.bf16 %v1473_v41, %v1472_v36  ;;  %v1456_v43 = vld [vmem:[%s3533_s18 + $0x70] sm:$0xff]  ;;  %v1533_v36 = vld [vmem:[%s3543_s24 + $0xd8] sm:$0xff] }
 0x4ee   : > { %3186 = vmatpush3.bf16.msra.mxu1 %v3185_v46  ;;  %v3169_v46 = vpack.c.bf16 %v1457_v44, %v1456_v43  ;;  %v1512_v27 = vld [vmem:[%s3543_s24 + $0x30] sm:$0xff]  ;;  %v1517_v44 = vld [vmem:[%s3543_s24 + $0x58] sm:$0xff] }
 0x4ef   : > { %3188 = vmatprep.subr.bf16.mxu1 %v3187_v47  ;;  %3154 = vmatpush3.bf16.msra.mxu0 %v3153_v50  ;;  %v3849_v47 = vld [vmem:[%s4140_s1 + $0x18] sm:$0xff]  ;;  %v1516_v43 = vld [vmem:[%s3543_s24 + $0x50] sm:$0xff] }
 0x4f2   : > { %3190 = vmatpush3.bf16.msra.mxu1 %v3189_v51 }
 0x4f3   : > { %3192 = vmatprep.subr.bf16.mxu1 %v3191_v5  ;;  %v1522_v5 = vld [vmem:[%s3543_s24 + $0x80] sm:$0xff] }
 0x4f6   : > { %3194 = vmatpush3.bf16.msra.mxu1 %v3193_v9  ;;  %v1507_v9 = vld [vmem:[%s3543_s24 + $0x8] sm:$0xff] }
 0x4f7   : > { %3196 = vmatprep.subr.bf16.mxu1 %v3195_v18  ;;  %v3205_v12 = vpack.c.bf16 %v1507_v9, %v1506_v7  ;;  %v1527_v18 = vld [vmem:[%s3543_s24 + $0xa8] sm:$0xff] }
 0x4f8   : > { %v3211_v20 = vpack.c.bf16 %v1527_v18, %v1526_v17 }
 0x4fa   : > { %3198 = vmatpush3.bf16.msra.mxu1 %v3197_v22  ;;  %v1511_v22 = vld [vmem:[%s3543_s24 + $0x28] sm:$0xff] }
 0x4fb   : > { %3200 = vmatprep.subr.bf16.mxu1 %v3199_v30  ;;  %v3213_v25 = vpack.c.bf16 %v1511_v22, %v1510_v21  ;;  %v1531_v30 = vld [vmem:[%s3543_s24 + $0xc8] sm:$0xff] }
 0x4fc   : > { %v3219_v32 = vpack.c.bf16 %v1531_v30, %v1530_v29  ;;  %v1539_v30 = vld [vmem:[%s3548_s27 + $0x8] sm:$0xff] }
 0x4fe   : > { %3202 = vmatpush3.bf16.msra.mxu1 %v3201_v35  ;;  %v1532_v35 = vld [vmem:[%s3543_s24 + $0xd0] sm:$0xff] }
 0x4ff   : > { %3007 = vmatprep.subr.mxu1 %v3425_v40 }
 0x501   : > { %1694 = vmatmul.mubr.f32.vlgmr.msra.gmra.mrb[16].mxu1 %v3842_v45 }
 0x502   : > { %1698 = vmatprep.mubr.f32.mxu1 %v3849_v47 }
 0x505   : > { %1699 = vmatmul.mubr.f32.gmra.mrb[18].mxu1 %v3855_v48 }
 0x506   : > { %3009 = vmatprep.mubr.msk.f32.mxu1 %vm3426_vm0, %v3425_v40 }
 0x56d   : > { %v1409_v53 = vpop.xlane.xlu0 %1408 }
 0x56e   : > { %v1414_v55 = vmul.f32 0.00390625, %v1409_v53 }
 0x570   : > { %v3789_v56 = vsub.f32 %v3737_v52, %v1414_v55  ;;  %v3792_v58 = vsub.f32 %v3740_v54, %v1414_v55 }
 0x571   : > { %v1412_v59 = vpop.xlane.xlu1 %1411 }
 0x572   : > { %v1415_v15 = vmul.f32 0.00390625, %v1412_v59  ;;  %v1420_v60 = vmul.f32 %v3789_v56, %v3789_v56  ;;  %v1421_v61 = vmul.f32 %v3792_v58, %v3792_v58 }
 0x574   : > { %v3799_v62 = vsub.f32 %v3745_v57, %v1415_v15  ;;  %v3802_v52 = vsub.f32 %v3748_v37, %v1415_v15  ;;  %v1424_v54 = vadd.f32 %v1421_v61, %v1420_v60  ;;  %v1467_v57 = vld [vmem:[%s3533_s18 + $0xc8] sm:$0xff] }
 0x575   : > { %v3155_v37 = vpack.c.bf16 %v1467_v57, %v1466_v1 }
 0x576   : > { %1425 = vadd.xlane.f32.xlu0 %v1424_v54  ;;  %v1422_v39 = vmul.f32 %v3799_v62, %v3799_v62  ;;  %v1423_v63 = vmul.f32 %v3802_v52, %v3802_v52 }
 0x577   : > { %3156 = vmatprep.subr.bf16.mxu0 %v3155_v37 }
 0x578   : > { %v1427_v0 = vadd.f32 %v1423_v63, %v1422_v39  ;;  %3158 = vmatpush3.bf16.msra.mxu0 %v3157_v6  ;;  %v1523_v6 = vld [vmem:[%s3543_s24 + $0x88] sm:$0xff] }
 0x579   : > { %3160 = vmatprep.subr.bf16.mxu0 %v3159_v13  ;;  %v3203_v8 = vpack.c.bf16 %v1523_v6, %v1522_v5  ;;  %v3207_v13 = vpack.c.bf16 %v1525_v11, %v1524_v10 }
 0x57a   : > { %1428 = vadd.xlane.f32.xlu1 %v1427_v0 }
 0x57c   : > { %3162 = vmatpush3.bf16.msra.mxu0 %v3161_v19  ;;  %v3209_v19 = vpack.c.bf16 %v1509_v16, %v1508_v14 }
 0x57d   : > { %3164 = vmatprep.subr.bf16.mxu0 %v3163_v26  ;;  %v3215_v26 = vpack.c.bf16 %v1529_v24, %v1528_v23 }
 0x580   : > { %3166 = vmatpush3.bf16.msra.mxu0 %v3165_v31  ;;  %v3217_v31 = vpack.c.bf16 %v1513_v28, %v1512_v27 }
 0x581   : > { %3168 = vmatprep.subr.bf16.mxu0 %v3167_v42  ;;  %v3223_v42 = vpack.c.bf16 %v1533_v36, %v1532_v35  ;;  %v1538_v35 = vld [vmem:[%s3548_s27] sm:$0xff]  ;;  %v1540_v36 = vld [vmem:[%s3548_s27 + $0x10] sm:$0xff] }
 0x584   : > { %3170 = vmatpush3.bf16.msra.mxu0 %v3169_v46  ;;  %v1534_v46 = vld [vmem:[%s3543_s24 + $0xe0] sm:$0xff] }
 0x585   : > { %3204 = vmatprep.subr.bf16.mxu0 %v3203_v8 }
 0x603   : > { %v1426_v49 = vpop.xlane.xlu0 %1425 }
 0x604   : > { %v1430_v50 = vmul.f32 0.00390625, %v1426_v49  ;;  %v1535_v49 = vld [vmem:[%s3543_s24 + $0xe8] sm:$0xff] }
 0x606   : > { %v1432_v51 = vadd.f32 1e-05, %v1430_v50  ;;  %v3225_v50 = vpack.c.bf16 %v1517_v44, %v1516_v43  ;;  %v1545_v43 = vld [vmem:[%s3548_s27 + $0x38] sm:$0xff] }
 0x607   : > { %v1429_v53 = vpop.xlane.xlu1 %1428 }
 0x608   : > { %3397 = vrsqrt.f32 %v1432_v51  ;;  %v1431_v55 = vmul.f32 0.00390625, %v1429_v53  ;;  %v3227_v51 = vpack.c.bf16 %v1535_v49, %v1534_v46  ;;  %v1518_v53 = vld [vmem:[%s3543_s24 + $0x60] sm:$0xff]  ;;  %v3237_v46 = vpack.c.bf16 %v1540_v36, %v1538_v35 }
 0x609   : > { %v2240_v36 = vld [vmem:[%s3553_s14 + $0x80] sm:$0xff] }
 0x60a   : > { %v1433_v59 = vadd.f32 1e-05, %v1431_v55  ;;  %v1519_v55 = vld [vmem:[%s3543_s24 + $0x68] sm:$0xff] }
 0x60c   : > { %3399 = vrsqrt.f32 %v1433_v59  ;;  %v1536_v59 = vld [vmem:[%s3543_s24 + $0xf0] sm:$0xff] }
 0x612   : > { %v3398_v15 = vpop.eup %3397 }
 0x613   : > { %v3861_v60 = vmul.f32 %v3398_v15, %v3792_v58  ;;  %v3864_v61 = vmul.f32 %v3398_v15, %v3789_v56  ;;  %v2935_v58 = vpop.f32.mrb[16].mxu1  ;;  %v1537_v15 = vld [vmem:[%s3543_s24 + $0xf8] sm:$0xff] }
 0x614   : > { %v2936_v0 = vpop.f32.mrb[17].mxu1 }
 0x615   : > { %1618 = vmatprep.mubr.f32.mxu0 %v3861_v60  ;;  %v2937_v56 = vadd.f32 %v2936_v0, %v2935_v58  ;;  %v2938_v1 = vpop.f32.mrb[18].mxu1  ;;  %v3231_v58 = vpack.c.bf16 %v1537_v15, %v1536_v59  ;;  %v1520_v0 = vld [vmem:[%s3543_s24 + $0x70] sm:$0xff]  ;;  %v1549_v59 = vld [vmem:[%s3548_s27 + $0x58] sm:$0xff] }
 0x616   : > { %v3400_v54 = vpop.eup %3399  ;;  %1619 = vmatmul.mubr.f32.vlgmr.msra.gmra.mrb[8].mxu0 %v3864_v61  ;;  %v2939_v57 = vpop.f32.mrb[19].mxu1 }
 0x617   : > { %v3869_v39 = vmul.f32 %v3400_v54, %v3802_v52  ;;  %v3872_v63 = vmul.f32 %v3400_v54, %v3799_v62  ;;  %3008 = vmatpush3.xpose.msk.msra.mxu1 %vm992_vm1, %v2937_v56  ;;  %v2940_v52 = vadd.f32 %v2939_v57, %v2938_v1  ;;  %3206 = vmatpush3.bf16.msra.mxu0 %v3205_v12  ;;  %v1521_v56 = vld [vmem:[%s3543_s24 + $0x78] sm:$0xff]  ;;  %v1440_v57 = vld [vmem:[%s4170_s17] sm:$0xff] }
 0x618   : > { %3012 = vmatprep.subr.mxu1 %v3425_v40  ;;  %3208 = vmatprep.subr.bf16.mxu0 %v3207_v13  ;;  %v3229_v54 = vpack.c.bf16 %v1519_v55, %v1518_v53  ;;  %v3233_v1 = vpack.c.bf16 %v1521_v56, %v1520_v0  ;;  %v1544_v53 = vld [vmem:[%s3548_s27 + $0x30] sm:$0xff]  ;;  %v1547_v55 = vld [vmem:[%s3548_s27 + $0x48] sm:$0xff] }
 0x619   : > { %1623 = vmatprep.mubr.f32.mxu0 %v3869_v39  ;;  %v1548_v0 = vld [vmem:[%s3548_s27 + $0x50] sm:$0xff]  ;;  %v1551_v56 = vld [vmem:[%s3548_s27 + $0x68] sm:$0xff] }
 0x61a   : > { %1624 = vmatmul.mubr.f32.gmra.mrb[10].mxu0 %v3872_v63 }
 0x61b   : > { %1768 = vmatprep.mubr.f32.mxu0 %v650_v34  ;;  %3210 = vmatpush3.bf16.msra.mxu0 %v3209_v19  ;;  %v1515_v34 = vld [vmem:[%s3543_s24 + $0x48] sm:$0xff] }
 0x61c   : > { %3212 = vmatprep.subr.bf16.mxu0 %v3211_v20  ;;  %v3221_v41 = vpack.c.bf16 %v1515_v34, %v1514_v33 }
 0x61f   : > { %3214 = vmatpush3.bf16.msra.mxu0 %v3213_v25 }
 0x620   : > { %3216 = vmatprep.subr.bf16.mxu0 %v3215_v26 }
 0x623   : > { %3218 = vmatpush3.bf16.msra.mxu0 %v3217_v31  ;;  %v1541_v31 = vld [vmem:[%s3548_s27 + $0x18] sm:$0xff] }
 0x624   : > { %3220 = vmatprep.subr.bf16.mxu0 %v3219_v32  ;;  %v3235_v34 = vpack.c.bf16 %v1541_v31, %v1539_v30  ;;  %v2236_v30 = vld [vmem:[%s3553_s14 + $0x60] sm:$0xff]  ;;  %v2238_v31 = vld [vmem:[%s3553_s14 + $0x70] sm:$0xff] }
 0x627   : > { %3222 = vmatpush3.bf16.msra.mxu0 %v3221_v41 }
 0x628   : > { %3224 = vmatprep.subr.bf16.mxu0 %v3223_v42  ;;  %v1543_v42 = vld [vmem:[%s3548_s27 + $0x28] sm:$0xff] }
 0x62b   : > { %3226 = vmatpush3.bf16.msra.mxu0 %v3225_v50  ;;  %v3239_v50 = vpack.c.bf16 %v1545_v43, %v1543_v42  ;;  %v2245_v42 = vld [vmem:[%s3553_s14 + $0xa8] sm:$0xff]  ;;  %v2247_v43 = vld [vmem:[%s3553_s14 + $0xb8] sm:$0xff] }
 0x62c   : > { %3228 = vmatprep.subr.bf16.mxu0 %v3227_v51  ;;  %v1542_v51 = vld [vmem:[%s3548_s27 + $0x20] sm:$0xff] }
 0x62d   : > { %v3241_v15 = vpack.c.bf16 %v1544_v53, %v1542_v51  ;;  %v2249_v51 = vld [vmem:[%s3553_s14 + $0xc8] sm:$0xff]  ;;  %v2251_v53 = vld [vmem:[%s3553_s14 + $0xd8] sm:$0xff] }
 0x62f   : > { %3230 = vmatpush3.bf16.msra.mxu0 %v3229_v54  ;;  %v3243_v54 = vpack.c.bf16 %v1549_v59, %v1547_v55  ;;  %v3275_v59 = vpack.c.bf16 %v2251_v53, %v2249_v51  ;;  %v2283_v51 = vld [vmem:[%s3553_s14 + $0x1d8] sm:$0xff]  ;;  %v2280_v53 = vld [vmem:[%s3553_s14 + $0x1c0] sm:$0xff] }
 0x630   : > { %3232 = vmatprep.subr.bf16.mxu0 %v3231_v58  ;;  %v1546_v58 = vld [vmem:[%s3548_s27 + $0x40] sm:$0xff] }
 0x633   : > { %3234 = vmatpush3.bf16.msra.mxu0 %v3233_v1  ;;  %v1553_v1 = vld [vmem:[%s3548_s27 + $0x78] sm:$0xff] }
 0x636   : > { %1769 = vmatmul.mubr.f32.vlgmr.msra.gmra.mrb[12].mxu0 %v3842_v45 }
 0x637   : > { %1773 = vmatprep.mubr.f32.mxu0 %v3849_v47 }
 0x63a   : > { %1774 = vmatmul.mubr.f32.gmra.mrb[14].mxu0 %v3855_v48 }
 0x6e9   : > { %v2897_v62 = vpop.f32.mrb[8].mxu0 }
 0x6ea   : > { %v2898_v38 = vpop.f32.mrb[9].mxu0 }
 0x6eb   : > { %v2899_v37 = vadd.f32 %v2898_v38, %v2897_v62  ;;  %v1441_v62 = vld [vmem:[%s4170_s17 + $0x8] sm:$0xff] }
 0x6ed   : > { %v2900_v2 = vpop.f32.mrb[10].mxu0  ;;  %3010 = vmatmul.mubr.msk.f32.vlgmr.msra.gmra.mrb[20].mxu1 %vm992_vm1, %v2899_v37  ;;  %v2726_v37 = vadd.f32 -1.0, %v1441_v62 }
 0x6ee   : > { %v2901_v3 = vpop.f32.mrb[11].mxu0  ;;  %3013 = vmatpush3.xpose.msk.msra.mxu1 %vm992_vm1, %v2940_v52  ;;  %3014 = vmatprep.mubr.msk.f32.mxu1 %vm3426_vm0, %v3425_v40  ;;  %v2725_v52 = vadd.f32 -1.0, %v1440_v57 }
 0x6ef   : > { %v2902_v4 = vadd.f32 %v2901_v3, %v2900_v2  ;;  %3017 = vmatprep.subr.mxu1 %v3425_v40  ;;  %v1936_v45 = vmul.f32 1e+09, %v2726_v37 }
 0x6f0   : > { %v1935_v38 = vmul.f32 1e+09, %v2725_v52  ;;  %v3247_v52 = vpack.c.bf16 %v1553_v1, %v1551_v56 }
 0x6f1   : > { %3015 = vmatmul.mubr.msk.f32.vlgmr.msra.gmra.mrb[22].mxu1 %vm992_vm1, %v2902_v4 }
 0x6f2   : > { %3019 = vmatprep.mubr.msk.f32.mxu1 %vm3426_vm0, %v3425_v40 }
 0x709   : > { %v2973_v21 = vpop.f32.mrb[12].mxu0 }
 0x70a   : > { %v2974_v22 = vpop.f32.mrb[13].mxu0 }
 0x70b   : > { %v2975_v23 = vadd.f32 %v2974_v22, %v2973_v21  ;;  %v2235_v21 = vld [vmem:[%s3553_s14 + $0x58] sm:$0xff] }
 0x70d   : > { %v2976_v24 = vpop.f32.mrb[14].mxu0  ;;  %3018 = vmatpush3.msra.mxu1 %v2975_v23 }
 0x70e   : > { %v2977_v25 = vpop.f32.mrb[15].mxu0  ;;  %3022 = vmatprep.subr.mxu1 %v3425_v40 }
 0x70f   : > { %v2978_v26 = vadd.f32 %v2977_v25, %v2976_v24  ;;  %v2232_v24 = vld [vmem:[%s3553_s14 + $0x40] sm:$0xff]  ;;  %v2234_v25 = vld [vmem:[%s3553_s14 + $0x50] sm:$0xff] }
 0x7c0   : > { %v1851_v2 = vpop.f32.mrb[20].mxu1 }
 0x7c1   : > { %v1931_v3 = vmul.f32 0.125, %v1851_v2  ;;  %v3011_v4 = vpop.f32.mrb[21].mxu1 }
 0x7c3   : > { %v1937_v5 = vadd.f32 %v1935_v38, %v1931_v3  ;;  %v1552_v38 = vld [vmem:[%s3548_s27 + $0x70] sm:$0xff] }
 0x7c4   : > { %v1927_v6 = vpop.f32.mrb[22].mxu1 }
 0x7c5   : > { %v1932_v47 = vmul.f32 0.125, %v1927_v6  ;;  %v3016_v7 = vpop.f32.mrb[23].mxu1  ;;  %v1939_v48 = vsel %vm1153_vm2, %v1937_v5, -inf }
 0x7c6   : > { %1940 = vmax.xlane.f32.xlu0 %v1939_v48 }
 0x7c7   : > { %v1938_v8 = vadd.f32 %v1936_v45, %v1932_v47 }
 0x7c9   : > { %v1942_v9 = vsel %vm1153_vm2, %v1938_v8, -inf }
 0x7ca   : > { %1943 = vmax.xlane.f32.xlu1 %v1942_v9 }
 0x853   : > { %v1941_v10 = vpop.xlane.xlu0 %1940 }
 0x854   : > { %v1945_v11 = vsub.f32 %v1937_v5, %v1941_v10  ;;  %v2225_v10 = vld [vmem:[%s3553_s14 + $0x8] sm:$0xff] }
 0x856   : > { %v1947_v12 = vmul.f32 1.442695, %v1945_v11  ;;  %v2227_v11 = vld [vmem:[%s3553_s14 + $0x18] sm:$0xff] }
 0x857   : > { %v1944_v13 = vpop.xlane.xlu1 %1943 }
 0x858   : > { %3401 = vpow2.f32 %v1947_v12  ;;  %v1946_v14 = vsub.f32 %v1938_v8, %v1944_v13  ;;  %v2224_v12 = vld [vmem:[%s3553_s14] sm:$0xff]  ;;  %v3251_v13 = vpack.c.bf16 %v2227_v11, %v2225_v10  ;;  %v2267_v10 = vld [vmem:[%s3553_s14 + $0x158] sm:$0xff] }
 0x85a   : > { %v1949_v16 = vmul.f32 1.442695, %v1946_v14  ;;  %v2229_v14 = vld [vmem:[%s3553_s14 + $0x28] sm:$0xff]  ;;  %3252 = vmatprep.subr.bf16.mxu0 %v3251_v13  ;;  %v2264_v13 = vld [vmem:[%s3553_s14 + $0x140] sm:$0xff] }
 0x85c   : > { %3403 = vpow2.f32 %v1949_v16  ;;  %v2231_v16 = vld [vmem:[%s3553_s14 + $0x38] sm:$0xff] }
 0x862   : > { %v3402_v17 = vpop.eup %3401 }
 0x863   : > { %v1951_v18 = vsel %vm1153_vm2, %v3402_v17, 0.0 }
 0x864   : > { %1952 = vadd.xlane.f32.xlu0 %v1951_v18  ;;  %v2228_v18 = vld [vmem:[%s3553_s14 + $0x20] sm:$0xff] }
 0x866   : > { %v3404_v19 = vpop.eup %3403 }
 0x867   : > { %v1954_v20 = vsel %vm1153_vm2, %v3404_v19, 0.0 }
 0x868   : > { %1955 = vadd.xlane.f32.xlu1 %v1954_v20  ;;  %v2233_v20 = vld [vmem:[%s3553_s14 + $0x48] sm:$0xff] }
 0x869   : > { %v3259_v23 = vpack.c.bf16 %v2235_v21, %v2233_v20 }
 0x8f1   : > { %v1953_v27 = vpop.xlane.xlu0 %1952 }
 0x8f2   : > { %3405 = vrcp.f32 %v1953_v27  ;;  %v2239_v27 = vld [vmem:[%s3553_s14 + $0x78] sm:$0xff] }
 0x8f5   : > { %v1956_v28 = vpop.xlane.xlu1 %1955 }
 0x8f6   : > { %3407 = vrcp.f32 %v1956_v28  ;;  %v3261_v28 = vpack.c.bf16 %v2234_v25, %v2232_v24 }
 0x8fc   : > { %v3406_v29 = vpop.eup %3405 }
 0x8fd   : > { %v1959_v32 = vmul.f32 %v3406_v29, %v3402_v17 }
 0x8ff   : > { %v1961_v33 = vmul.f32 %v1959_v32, %v1440_v57  ;;  %v3245_v57 = vpack.c.bf16 %v1548_v0, %v1546_v58  ;;  %v2241_v32 = vld [vmem:[%s3553_s14 + $0x88] sm:$0xff]  ;;  %v2255_v0 = vld [vmem:[%s3553_s14 + $0xf8] sm:$0xff] }
 0x900   : > { %v3408_v41 = vpop.eup %3407  ;;  %v2253_v58 = vld [vmem:[%s3553_s14 + $0xe8] sm:$0xff] }
 0x901   : > { %v1960_v44 = vmul.f32 %v3408_v41, %v3404_v19  ;;  %3020 = vmatmul.mubr.msk.f32.vlgmr.msra.gmra.mrb[24].mxu1 %vm1153_vm2, %v1961_v33  ;;  %v2230_v19 = vld [vmem:[%s3553_s14 + $0x30] sm:$0xff]  ;;  %v2243_v33 = vld [vmem:[%s3553_s14 + $0x98] sm:$0xff]  ;;  %v3279_v1 = vpack.c.bf16 %v2255_v0, %v2253_v58 }
 0x902   : > { %3023 = vmatpush3.msra.mxu1 %v2978_v26  ;;  %3024 = vmatprep.mubr.msk.f32.mxu1 %vm3426_vm0, %v3425_v40  ;;  %v3257_v22 = vpack.c.bf16 %v2230_v19, %v2228_v18  ;;  %v2237_v26 = vld [vmem:[%s3553_s14 + $0x68] sm:$0xff]  ;;  %v3267_v35 = vpack.c.bf16 %v2243_v33, %v2241_v32  ;;  %v2242_v41 = vld [vmem:[%s3553_s14 + $0x90] sm:$0xff]  ;;  %v2268_v18 = vld [vmem:[%s3553_s14 + $0x160] sm:$0xff] }
 0x903   : > { %v1962_v49 = vmul.f32 %v1960_v44, %v1441_v62  ;;  %3236 = vmatprep.subr.bf16.mxu1 %v3235_v34  ;;  %v1550_v62 = vld [vmem:[%s3548_s27 + $0x60] sm:$0xff]  ;;  %v3263_v29 = vpack.c.bf16 %v2239_v27, %v2237_v26  ;;  %v3265_v34 = vpack.c.bf16 %v2238_v31, %v2236_v30  ;;  %v3269_v44 = vpack.c.bf16 %v2242_v41, %v2240_v36  ;;  %v2270_v19 = vld [vmem:[%s3553_s14 + $0x170] sm:$0xff]  ;;  %v2273_v33 = vld [vmem:[%s3553_s14 + $0x188] sm:$0xff] }
 0x904   : > { %v3249_v37 = vpack.c.bf16 %v1552_v38, %v1550_v62  ;;  %v2257_v62 = vld [vmem:[%s3553_s14 + $0x108] sm:$0xff]  ;;  %v2259_v38 = vld [vmem:[%s3553_s14 + $0x118] sm:$0xff]  ;;  %v3297_v20 = vpack.c.bf16 %v2270_v19, %v2268_v18 }
 0x905   : > { %3025 = vmatmul.mubr.msk.f32.vlgmr.msra.gmra.mrb[26].mxu1 %vm1153_vm2, %v1962_v49  ;;  %v2244_v49 = vld [vmem:[%s3553_s14 + $0xa0] sm:$0xff]  ;;  %v2277_v41 = vld [vmem:[%s3553_s14 + $0x1a8] sm:$0xff]  ;;  %v2307_v19 = vld [vmem:[%s3558_s19 + $0x98] sm:$0xff] }
 0x906   : > { %3238 = vmatpush1.bf16.msra.mxu1 %v3237_v46  ;;  %2179 = vmatprep.mubr.f32.mxu1 %v3425_v40  ;;  %v3271_v46 = vpack.c.bf16 %v2247_v43, %v2245_v42  ;;  %v2279_v42 = vld [vmem:[%s3553_s14 + $0x1b8] sm:$0xff]  ;;  %v2305_v18 = vld [vmem:[%s3558_s19 + $0x88] sm:$0xff] }
 0x907   : > { %3240 = vmatprep.subr.bf16.mxu1 %v3239_v50  ;;  %v2246_v50 = vld [vmem:[%s3553_s14 + $0xb0] sm:$0xff]  ;;  %v3303_v43 = vpack.c.bf16 %v2279_v42, %v2277_v41  ;;  %v2319_v41 = vld [vmem:[%s3558_s19 + $0xf8] sm:$0xff] }
 0x908   : > { %v3273_v55 = vpack.c.bf16 %v2246_v50, %v2244_v49  ;;  %v2281_v50 = vld [vmem:[%s3553_s14 + $0x1c8] sm:$0xff] }
 0x90a   : > { %3242 = vmatpush1.bf16.msra.mxu1 %v3241_v15  ;;  %v2248_v15 = vld [vmem:[%s3553_s14 + $0xc0] sm:$0xff] }
 0x90b   : > { %3244 = vmatprep.subr.bf16.mxu1 %v3243_v54  ;;  %v2250_v54 = vld [vmem:[%s3553_s14 + $0xd0] sm:$0xff] }
 0x90c   : > { %v3277_v56 = vpack.c.bf16 %v2250_v54, %v2248_v15  ;;  %v2285_v15 = vld [vmem:[%s3553_s14 + $0x1e8] sm:$0xff]  ;;  %v2287_v54 = vld [vmem:[%s3553_s14 + $0x1f8] sm:$0xff] }
 0x90d   : > { %v3311_v0 = vpack.c.bf16 %v2287_v54, %v2285_v15  ;;  %v2325_v15 = vld [vmem:[%s3558_s19 + $0x128] sm:$0xff]  ;;  %v2327_v54 = vld [vmem:[%s3558_s19 + $0x138] sm:$0xff] }
 0x90e   : > { %3246 = vmatpush1.bf16.msra.mxu1 %v3245_v57  ;;  %v2252_v57 = vld [vmem:[%s3553_s14 + $0xe0] sm:$0xff] }
 0x90f   : > { %3248 = vmatprep.subr.bf16.mxu1 %v3247_v52  ;;  %v2254_v52 = vld [vmem:[%s3553_s14 + $0xf0] sm:$0xff] }
 0x912   : > { %3250 = vmatpush1.bf16.msra.mxu1 %v3249_v37  ;;  %v3281_v37 = vpack.c.bf16 %v2254_v52, %v2252_v57  ;;  %v2289_v52 = vld [vmem:[%s3558_s19 + $0x8] sm:$0xff] }
 0x9d4   : > { %v2032_v2 = vpop.f32.mrb[24].mxu1 }
 0x9d5   : > { %v3021_v3 = vpop.f32.mrb[25].mxu1  ;;  %2729 = vmatmul.mubr.msk.f32.vlgmr.msra.gmra.mrb[28].mxu1 %vm992_vm1, %v2032_v2  ;;  %v3283_v2 = vpack.c.bf16 %v2259_v38, %v2257_v62  ;;  %v2291_v62 = vld [vmem:[%s3558_s19 + $0x18] sm:$0xff]  ;;  %v2288_v38 = vld [vmem:[%s3558_s19] sm:$0xff] }
 0x9d6   : > { %2185 = vmatprep.mubr.f32.mxu1 %v3425_v40  ;;  %v2256_v3 = vld [vmem:[%s3553_s14 + $0x100] sm:$0xff] }
 0x9d8   : > { %v2105_v4 = vpop.f32.mrb[26].mxu1 }
 0x9d9   : > { %v3026_v5 = vpop.f32.mrb[27].mxu1  ;;  %2730 = vmatmul.mubr.msk.f32.gmra.mrb[30].mxu1 %vm992_vm1, %v2105_v4  ;;  %v2258_v4 = vld [vmem:[%s3553_s14 + $0x110] sm:$0xff] }
 0x9da   : > { %v2261_v5 = vld [vmem:[%s3553_s14 + $0x128] sm:$0xff] }
 0xaa8   : > { %v2181_v45 = vpop.f32.mrb[28].mxu1 }
 0xaa9   : > { %v3957_v6 = vadd.f32 %v2181_v45, %v3864_v61  ;;  %v2183_v47 = vpop.f32.mrb[29].mxu1  ;;  %v2263_v45 = vld [vmem:[%s3553_s14 + $0x138] sm:$0xff] }
 0xaaa   : > { %v3960_v7 = vadd.f32 %v2183_v47, %v3861_v60  ;;  %v3285_v47 = vpack.c.bf16 %v2258_v4, %v2256_v3  ;;  %v2293_v3 = vld [vmem:[%s3558_s19 + $0x28] sm:$0xff]  ;;  %v2295_v4 = vld [vmem:[%s3558_s19 + $0x38] sm:$0xff] }
 0xaac   : > { %v2187_v48 = vpop.f32.mrb[30].mxu1  ;;  %v2192_v40 = vadd.f32 %v3960_v7, %v3957_v6 }
 0xaad   : > { %v3965_v8 = vadd.f32 %v2187_v48, %v3872_v63  ;;  %v2189_v9 = vpop.f32.mrb[31].mxu1  ;;  %v2226_v63 = vld [vmem:[%s3553_s14 + $0x10] sm:$0xff]  ;;  %v3287_v48 = vpack.c.bf16 %v2263_v45, %v2261_v5  ;;  %v3319_v45 = vpack.c.bf16 %v2295_v4, %v2293_v3  ;;  %v2333_v3 = vld [vmem:[%s3558_s19 + $0x168] sm:$0xff]  ;;  %v2335_v4 = vld [vmem:[%s3558_s19 + $0x178] sm:$0xff] }
 0xaae   : > { %v3968_v61 = vadd.f32 %v2189_v9, %v3869_v39  ;;  %2193 = vadd.xlane.f32.xlu0 %v2192_v40  ;;  %v3253_v17 = vpack.c.bf16 %v2226_v63, %v2224_v12  ;;  %v3255_v39 = vpack.c.bf16 %v2231_v16, %v2229_v14  ;;  %v2260_v40 = vld [vmem:[%s3553_s14 + $0x120] sm:$0xff]  ;;  %v2262_v9 = vld [vmem:[%s3553_s14 + $0x130] sm:$0xff]  ;;  %v2269_v14 = vld [vmem:[%s3553_s14 + $0x168] sm:$0xff] }
 0xaaf   : > { %v3289_v11 = vpack.c.bf16 %v2262_v9, %v2260_v40  ;;  %v2266_v63 = vld [vmem:[%s3553_s14 + $0x150] sm:$0xff]  ;;  %v2271_v16 = vld [vmem:[%s3553_s14 + $0x178] sm:$0xff]  ;;  %v2297_v40 = vld [vmem:[%s3558_s19 + $0x48] sm:$0xff] }
 0xab0   : > { %v2195_v60 = vadd.f32 %v3968_v61, %v3965_v8  ;;  %3254 = vmatpush1.bf16.msra.mxu0 %v3253_v17  ;;  %v3293_v17 = vpack.c.bf16 %v2266_v63, %v2264_v13  ;;  %v2299_v9 = vld [vmem:[%s3558_s19 + $0x58] sm:$0xff]  ;;  %v2301_v13 = vld [vmem:[%s3558_s19 + $0x68] sm:$0xff] }
 0xab1   : > { %3256 = vmatprep.subr.bf16.mxu0 %v3255_v39  ;;  %v3295_v39 = vpack.c.bf16 %v2271_v16, %v2269_v14  ;;  %v2303_v63 = vld [vmem:[%s3558_s19 + $0x78] sm:$0xff] }
 0xab2   : > { %2196 = vadd.xlane.f32.xlu1 %v2195_v60  ;;  %v2265_v60 = vld [vmem:[%s3553_s14 + $0x148] sm:$0xff]  ;;  %v3327_v16 = vpack.c.bf16 %v2303_v63, %v2301_v13  ;;  %v2343_v63 = vld [vmem:[%s3558_s19 + $0x1b8] sm:$0xff] }
 0xab3   : > { %v3291_v12 = vpack.c.bf16 %v2267_v10, %v2265_v60  ;;  %v3323_v10 = vpack.c.bf16 %v2299_v9, %v2297_v40  ;;  %v2337_v40 = vld [vmem:[%s3558_s19 + $0x188] sm:$0xff]  ;;  %v2339_v9 = vld [vmem:[%s3558_s19 + $0x198] sm:$0xff] }
 0xab4   : > { %3258 = vmatpush1.bf16.msra.mxu0 %v3257_v22  ;;  %v2341_v13 = vld [vmem:[%s3558_s19 + $0x1a8] sm:$0xff] }
 0xab5   : > { %3260 = vmatprep.subr.bf16.mxu0 %v3259_v23 }
 0xab8   : > { %3262 = vmatpush1.bf16.msra.mxu0 %v3261_v28 }
 0xab9   : > { %3264 = vmatprep.subr.bf16.mxu0 %v3263_v29 }
 0xabc   : > { %3266 = vmatpush1.bf16.msra.mxu0 %v3265_v34 }
 0xabd   : > { %3268 = vmatprep.subr.bf16.mxu0 %v3267_v35  ;;  %v2274_v35 = vld [vmem:[%s3553_s14 + $0x190] sm:$0xff] }
 0xac0   : > { %3270 = vmatpush1.bf16.msra.mxu0 %v3269_v44  ;;  %v2276_v44 = vld [vmem:[%s3553_s14 + $0x1a0] sm:$0xff] }
 0xac1   : > { %3272 = vmatprep.subr.bf16.mxu0 %v3271_v46  ;;  %v2278_v46 = vld [vmem:[%s3553_s14 + $0x1b0] sm:$0xff] }
 0xac2   : > { %v3305_v49 = vpack.c.bf16 %v2278_v46, %v2276_v44  ;;  %v2316_v44 = vld [vmem:[%s3558_s19 + $0xe0] sm:$0xff]  ;;  %v2318_v46 = vld [vmem:[%s3558_s19 + $0xf0] sm:$0xff] }
 0xac4   : > { %3274 = vmatpush1.bf16.msra.mxu0 %v3273_v55  ;;  %v3307_v55 = vpack.c.bf16 %v2283_v51, %v2281_v50  ;;  %v2323_v50 = vld [vmem:[%s3558_s19 + $0x118] sm:$0xff]  ;;  %v3345_v51 = vpack.c.bf16 %v2318_v46, %v2316_v44  ;;  %v2348_v44 = vld [vmem:[%s3558_s19 + $0x1e0] sm:$0xff]  ;;  %v2350_v46 = vld [vmem:[%s3558_s19 + $0x1f0] sm:$0xff] }
 0xac5   : > { %3276 = vmatprep.subr.bf16.mxu0 %v3275_v59  ;;  %v2282_v59 = vld [vmem:[%s3553_s14 + $0x1d0] sm:$0xff] }
 0xac6   : > { %v3309_v58 = vpack.c.bf16 %v2282_v59, %v2280_v53  ;;  %v2322_v59 = vld [vmem:[%s3558_s19 + $0x110] sm:$0xff] }
 0xac8   : > { %3278 = vmatpush1.bf16.msra.mxu0 %v3277_v56  ;;  %v2284_v56 = vld [vmem:[%s3553_s14 + $0x1e0] sm:$0xff] }
 0xac9   : > { %3280 = vmatprep.subr.bf16.mxu0 %v3279_v1  ;;  %v2286_v1 = vld [vmem:[%s3553_s14 + $0x1f0] sm:$0xff] }
 0xaca   : > { %v3313_v57 = vpack.c.bf16 %v2286_v1, %v2284_v56  ;;  %v2324_v56 = vld [vmem:[%s3558_s19 + $0x120] sm:$0xff]  ;;  %v2326_v1 = vld [vmem:[%s3558_s19 + $0x130] sm:$0xff] }
 0xacc   : > { %3282 = vmatpush1.bf16.msra.mxu0 %v3281_v37  ;;  %v3315_v37 = vpack.c.bf16 %v2291_v62, %v2289_v52  ;;  %v2331_v52 = vld [vmem:[%s3558_s19 + $0x158] sm:$0xff]  ;;  %v3353_v62 = vpack.c.bf16 %v2326_v1, %v2324_v56 }
 0xacd   : > { %3284 = vmatprep.subr.bf16.mxu0 %v3283_v2  ;;  %v2290_v2 = vld [vmem:[%s3558_s19 + $0x10] sm:$0xff] }
 0xace   : > { %v3317_v5 = vpack.c.bf16 %v2290_v2, %v2288_v38  ;;  %3316 = vmatprep.subr.bf16.mxu1 %v3315_v37  ;;  %v2328_v37 = vld [vmem:[%s3558_s19 + $0x140] sm:$0xff]  ;;  %v2330_v2 = vld [vmem:[%s3558_s19 + $0x150] sm:$0xff] }
 0xad0   : > { %3286 = vmatpush1.bf16.msra.mxu0 %v3285_v47  ;;  %v2292_v47 = vld [vmem:[%s3558_s19 + $0x20] sm:$0xff]  ;;  %3318 = vmatpush1.bf16.msra.mxu1 %v3317_v5  ;;  %v3357_v5 = vpack.c.bf16 %v2330_v2, %v2328_v37 }
 0xad1   : > { %3288 = vmatprep.subr.bf16.mxu0 %v3287_v48  ;;  %v2294_v48 = vld [vmem:[%s3558_s19 + $0x30] sm:$0xff]  ;;  %3320 = vmatprep.subr.bf16.mxu1 %v3319_v45  ;;  %v3359_v45 = vpack.c.bf16 %v2335_v4, %v2333_v3 }
 0xad2   : > { %v3321_v60 = vpack.c.bf16 %v2294_v48, %v2292_v47  ;;  %v2332_v47 = vld [vmem:[%s3558_s19 + $0x160] sm:$0xff]  ;;  %v2334_v48 = vld [vmem:[%s3558_s19 + $0x170] sm:$0xff] }
 0xad4   : > { %3290 = vmatpush1.bf16.msra.mxu0 %v3289_v11  ;;  %v2296_v11 = vld [vmem:[%s3558_s19 + $0x40] sm:$0xff]  ;;  %3322 = vmatpush1.bf16.msra.mxu1 %v3321_v60  ;;  %v3361_v60 = vpack.c.bf16 %v2334_v48, %v2332_v47 }
 0xad5   : > { %3292 = vmatprep.subr.bf16.mxu0 %v3291_v12  ;;  %v2298_v12 = vld [vmem:[%s3558_s19 + $0x50] sm:$0xff]  ;;  %3324 = vmatprep.subr.bf16.mxu1 %v3323_v10  ;;  %v3363_v10 = vpack.c.bf16 %v2339_v9, %v2337_v40 }
 0xad6   : > { %v3325_v14 = vpack.c.bf16 %v2298_v12, %v2296_v11  ;;  %v2336_v11 = vld [vmem:[%s3558_s19 + $0x180] sm:$0xff]  ;;  %v2338_v12 = vld [vmem:[%s3558_s19 + $0x190] sm:$0xff] }
 0xad8   : > { %3294 = vmatpush1.bf16.msra.mxu0 %v3293_v17  ;;  %v2300_v17 = vld [vmem:[%s3558_s19 + $0x60] sm:$0xff]  ;;  %3326 = vmatpush1.bf16.msra.mxu1 %v3325_v14  ;;  %v3365_v14 = vpack.c.bf16 %v2338_v12, %v2336_v11 }
 0xad9   : > { %3296 = vmatprep.subr.bf16.mxu0 %v3295_v39  ;;  %v2302_v39 = vld [vmem:[%s3558_s19 + $0x70] sm:$0xff]  ;;  %3328 = vmatprep.subr.bf16.mxu1 %v3327_v16  ;;  %v3367_v16 = vpack.c.bf16 %v2343_v63, %v2341_v13 }
 0xadc   : > { %3298 = vmatpush1.bf16.msra.mxu0 %v3297_v20  ;;  %v3329_v20 = vpack.c.bf16 %v2302_v39, %v2300_v17  ;;  %v2340_v17 = vld [vmem:[%s3558_s19 + $0x1a0] sm:$0xff]  ;;  %v2342_v39 = vld [vmem:[%s3558_s19 + $0x1b0] sm:$0xff] }
 0xade   : > { %3330 = vmatpush1.bf16.msra.mxu1 %v3329_v20  ;;  %v3369_v20 = vpack.c.bf16 %v2342_v39, %v2340_v17 }
 0xb3b   : > { %v2194_v21 = vpop.xlane.xlu0 %2193 }
 0xb3c   : > { %v2198_v22 = vmul.f32 0.00390625, %v2194_v21  ;;  %v3331_v21 = vpack.c.bf16 %v2307_v19, %v2305_v18  ;;  %v2345_v18 = vld [vmem:[%s3558_s19 + $0x1c8] sm:$0xff]  ;;  %v2347_v19 = vld [vmem:[%s3558_s19 + $0x1d8] sm:$0xff] }
 0xb3e   : > { %v4021_v23 = vsub.f32 %v3957_v6, %v2198_v22  ;;  %v4024_v24 = vsub.f32 %v3960_v7, %v2198_v22  ;;  %v2304_v22 = vld [vmem:[%s3558_s19 + $0x80] sm:$0xff]  ;;  %3332 = vmatprep.subr.bf16.mxu1 %v3331_v21  ;;  %v3371_v21 = vpack.c.bf16 %v2347_v19, %v2345_v18 }
 0xb3f   : > { %v2197_v25 = vpop.xlane.xlu1 %2196 }
 0xb40   : > { %v2199_v26 = vmul.f32 0.00390625, %v2197_v25  ;;  %v2204_v27 = vmul.f32 %v4021_v23, %v4021_v23  ;;  %v2205_v28 = vmul.f32 %v4024_v24, %v4024_v24  ;;  %v2306_v25 = vld [vmem:[%s3558_s19 + $0x90] sm:$0xff] }
 0xb42   : > { %v4031_v29 = vsub.f32 %v3965_v8, %v2199_v26  ;;  %v4034_v6 = vsub.f32 %v3968_v61, %v2199_v26  ;;  %v2208_v7 = vadd.f32 %v2205_v28, %v2204_v27  ;;  %v2275_v8 = vld [vmem:[%s3553_s14 + $0x198] sm:$0xff]  ;;  %v2272_v61 = vld [vmem:[%s3553_s14 + $0x180] sm:$0xff]  ;;  %v2309_v26 = vld [vmem:[%s3558_s19 + $0xa8] sm:$0xff]  ;;  %v3333_v28 = vpack.c.bf16 %v2306_v25, %v2304_v22  ;;  %s4171_s14 = sld [smem:[#allocation10_spill]] }
 0xb43   : > { %v3299_v34 = vpack.c.bf16 %v2275_v8, %v2273_v33  ;;  %v3301_v36 = vpack.c.bf16 %v2274_v35, %v2272_v61  ;;  %v2311_v27 = vld [vmem:[%s3558_s19 + $0xb8] sm:$0xff]  ;;  %v2312_v61 = vld [vmem:[%s3558_s19 + $0xc0] sm:$0xff]  ;;  %v2314_v35 = vld [vmem:[%s3558_s19 + $0xd0] sm:$0xff] }
 0xb44   : > { %2209 = vadd.xlane.f32.xlu0 %v2208_v7  ;;  %v2206_v30 = vmul.f32 %v4031_v29, %v4031_v29  ;;  %v2207_v31 = vmul.f32 %v4034_v6, %v4034_v6  ;;  %v3335_v7 = vpack.c.bf16 %v2311_v27, %v2309_v26  ;;  %v2315_v33 = vld [vmem:[%s3558_s19 + $0xd8] sm:$0xff]  ;;  %3334 = vmatpush1.bf16.msra.mxu1 %v3333_v28  ;;  %v2344_v22 = vld [vmem:[%s3558_s19 + $0x1c0] sm:$0xff]  ;;  %v2346_v25 = vld [vmem:[%s3558_s19 + $0x1d0] sm:$0xff] }
 0xb45   : > { %3300 = vmatprep.subr.bf16.mxu0 %v3299_v34  ;;  %v3341_v42 = vpack.c.bf16 %v2314_v35, %v2312_v61  ;;  %v3373_v26 = vpack.c.bf16 %v2346_v25, %v2344_v22 }
 0xb46   : > { %v2211_v32 = vadd.f32 %v2207_v31, %v2206_v30  ;;  %3302 = vmatpush1.bf16.msra.mxu0 %v3301_v36  ;;  %v2308_v30 = vld [vmem:[%s3558_s19 + $0xa0] sm:$0xff]  ;;  %v2310_v31 = vld [vmem:[%s3558_s19 + $0xb0] sm:$0xff]  ;;  %3336 = vmatprep.subr.bf16.mxu1 %v3335_v7  ;;  %v2317_v36 = vld [vmem:[%s3558_s19 + $0xe8] sm:$0xff] }
 0xb47   : > { %3304 = vmatprep.subr.bf16.mxu0 %v3303_v43  ;;  %v3337_v8 = vpack.c.bf16 %v2310_v31, %v2308_v30  ;;  %v3343_v43 = vpack.c.bf16 %v2319_v41, %v2317_v36  ;;  %v2349_v41 = vld [vmem:[%s3558_s19 + $0x1e8] sm:$0xff] }
 0xb48   : > { %2212 = vadd.xlane.f32.xlu1 %v2211_v32  ;;  %v2313_v32 = vld [vmem:[%s3558_s19 + $0xc8] sm:$0xff] }
 0xb49   : > { %v3339_v34 = vpack.c.bf16 %v2315_v33, %v2313_v32  ;;  %3338 = vmatpush1.bf16.msra.mxu1 %v3337_v8 }
 0xb4a   : > { %3306 = vmatpush1.bf16.msra.mxu0 %v3305_v49  ;;  %v2321_v49 = vld [vmem:[%s3558_s19 + $0x108] sm:$0xff] }
 0xb4b   : > { %3308 = vmatprep.subr.bf16.mxu0 %v3307_v55  ;;  %3340 = vmatprep.subr.bf16.mxu1 %v3339_v34  ;;  %v3347_v53 = vpack.c.bf16 %v2323_v50, %v2321_v49  ;;  %v2320_v55 = vld [vmem:[%s3558_s19 + $0x100] sm:$0xff]  ;;  %v3377_v49 = vpack.c.bf16 %v2350_v46, %v2348_v44 }
 0xb4d   : > { %3342 = vmatpush1.bf16.msra.mxu1 %v3341_v42  ;;  %v2351_v42 = vld [vmem:[%s3558_s19 + $0x1f8] sm:$0xff] }
 0xb4e   : > { %3310 = vmatpush1.bf16.msra.mxu0 %v3309_v58  ;;  %3344 = vmatprep.subr.bf16.mxu1 %v3343_v43  ;;  %v3349_v58 = vpack.c.bf16 %v2322_v59, %v2320_v55  ;;  %v3375_v43 = vpack.c.bf16 %v2351_v42, %v2349_v41 }
 0xb4f   : > { %3312 = vmatprep.subr.bf16.mxu0 %v3311_v0  ;;  %v3351_v0 = vpack.c.bf16 %v2327_v54, %v2325_v15 }
 0xb51   : > { %3346 = vmatpush1.bf16.msra.mxu1 %v3345_v51 }
 0xb52   : > { %3314 = vmatpush1.bf16.msra.mxu0 %v3313_v57  ;;  %3348 = vmatprep.subr.bf16.mxu1 %v3347_v53  ;;  %v2329_v57 = vld [vmem:[%s3558_s19 + $0x148] sm:$0xff] }
 0xb53   : > { %v3355_v38 = vpack.c.bf16 %v2331_v52, %v2329_v57 }
 0xb55   : > { %3350 = vmatpush1.bf16.msra.mxu1 %v3349_v58 }
 0xb56   : > { %3352 = vmatprep.subr.bf16.mxu1 %v3351_v0 }
 0xb59   : > { %3354 = vmatpush1.bf16.msra.mxu1 %v3353_v62 }
 0xb5a   : > { %3356 = vmatprep.subr.bf16.mxu1 %v3355_v38 }
 0xb5d   : > { %3358 = vmatpush1.bf16.msra.mxu1 %v3357_v5 }
 0xb5e   : > { %3360 = vmatprep.subr.bf16.mxu1 %v3359_v45 }
 0xb61   : > { %3362 = vmatpush1.bf16.msra.mxu1 %v3361_v60 }
 0xb62   : > { %3364 = vmatprep.subr.bf16.mxu1 %v3363_v10 }
 0xb65   : > { %3366 = vmatpush1.bf16.msra.mxu1 %v3365_v14 }
 0xb66   : > { %3368 = vmatprep.subr.bf16.mxu1 %v3367_v16 }
 0xb69   : > { %3370 = vmatpush1.bf16.msra.mxu1 %v3369_v20 }
 0xb6a   : > { %3372 = vmatprep.subr.bf16.mxu1 %v3371_v21 }
 0xb6d   : > { %3374 = vmatpush1.bf16.msra.mxu1 %v3373_v26 }
 0xb6e   : > { %3376 = vmatprep.subr.bf16.mxu1 %v3375_v43 }
 0xb71   : > { %3378 = vmatpush1.bf16.msra.mxu1 %v3377_v49 }
 0xbd1   : > { %v2210_v27 = vpop.xlane.xlu0 %2209 }
 0xbd2   : > { %v2214_v28 = vmul.f32 0.00390625, %v2210_v27 }
 0xbd4   : > { %v2216_v7 = vadd.f32 1e-05, %v2214_v28 }
 0xbd5   : > { %v2213_v30 = vpop.xlane.xlu1 %2212 }
 0xbd6   : > { %3409 = vrsqrt.f32 %v2216_v7  ;;  %v2215_v31 = vmul.f32 0.00390625, %v2213_v30 }
 0xbd8   : > { %v2217_v32 = vadd.f32 1e-05, %v2215_v31 }
 0xbda   : > { %3411 = vrsqrt.f32 %v2217_v32 }
 0xbe0   : > { %v3410_v33 = vpop.eup %3409 }
 0xbe1   : > { %v2221_v8 = vmul.f32 %v3410_v33, %v4024_v24  ;;  %v2220_v34 = vmul.f32 %v3410_v33, %v4021_v23 }
 0xbe3   : > { %2416 = vmatprep.mubr.f32.mxu0 %v2221_v8 }
 0xbe4   : > { %v3412_v61 = vpop.eup %3411  ;;  %2417 = vmatmul.mubr.f32.vlgmr.msra.gmra.mrb[16].mxu0 %v2220_v34 }
 0xbe5   : > { %v2223_v35 = vmul.f32 %v3412_v61, %v4034_v6  ;;  %v2222_v36 = vmul.f32 %v3412_v61, %v4031_v29 }
 0xbe7   : > { %2422 = vmatprep.mubr.f32.mxu0 %v2223_v35 }
 0xbe8   : > { %2423 = vmatmul.mubr.f32.gmra.mrb[18].mxu0 %v2222_v36 }
 0xcb7   : > { %v2418_v24 = vpop.f32.mrb[16].mxu0 }
 0xcb8   : > { %v2420_v50 = vpop.f32.mrb[17].mxu0  ;;  %v2429_v51 = vmax.f32 %v2418_v24, 0.0 }
 0xcb9   : > { %v2430_v23 = vmax.f32 %v2420_v50, 0.0 }
 0xcbb   : > { %v2424_v53 = vpop.f32.mrb[18].mxu0  ;;  %2497 = vmatprep.mubr.f32.mxu1 %v2430_v23 }
 0xcbc   : > { %v2426_v55 = vpop.f32.mrb[19].mxu0  ;;  %2498 = vmatmul.mubr.f32.vlgmr.msra.gmra.mrb[32].mxu1 %v2429_v51  ;;  %v2431_v29 = vmax.f32 %v2424_v53, 0.0 }
 0xcbd   : > { %v2432_v6 = vmax.f32 %v2426_v55, 0.0 }
 0xcbf   : > { %2503 = vmatprep.mubr.f32.mxu1 %v2432_v6 }
 0xcc0   : > { %2504 = vmatmul.mubr.f32.gmra.mrb[34].mxu1 %v2431_v29 }
 0xd8f   : > { %v2499_v59 = vpop.f32.mrb[32].mxu1 }
 0xd90   : > { %v2500_v15 = vadd.f32 %v2499_v59, %v2220_v34  ;;  %v2501_v54 = vpop.f32.mrb[33].mxu1 }
 0xd91   : > { %v2502_v58 = vadd.f32 %v2501_v54, %v2221_v8 }
 0xd93   : > { %v2505_v0 = vpop.f32.mrb[34].mxu1  ;;  %v2510_v56 = vadd.f32 %v2502_v58, %v2500_v15 }
 0xd94   : > { %v2506_v1 = vadd.f32 %v2505_v0, %v2222_v36  ;;  %v2507_v57 = vpop.f32.mrb[35].mxu1 }
 0xd95   : > { %v2508_v52 = vadd.f32 %v2507_v57, %v2223_v35  ;;  %2511 = vadd.xlane.f32.xlu0 %v2510_v56 }
 0xd97   : > { %v2513_v62 = vadd.f32 %v2508_v52, %v2506_v1 }
 0xd99   : > { %2514 = vadd.xlane.f32.xlu1 %v2513_v62 }
 0xe22   : > { %v2512_v38 = vpop.xlane.xlu0 %2511 }
 0xe23   : > { %v2516_v37 = vmul.f32 0.00390625, %v2512_v38 }
 0xe25   : > { %v2518_v2 = vsub.f32 %v2500_v15, %v2516_v37  ;;  %v2519_v3 = vsub.f32 %v2502_v58, %v2516_v37 }
 0xe26   : > { %v2515_v4 = vpop.xlane.xlu1 %2514 }
 0xe27   : > { %v2517_v5 = vmul.f32 0.00390625, %v2515_v4  ;;  %v2522_v45 = vmul.f32 %v2518_v2, %v2518_v2  ;;  %v2523_v47 = vmul.f32 %v2519_v3, %v2519_v3 }
 0xe29   : > { %v2520_v48 = vsub.f32 %v2506_v1, %v2517_v5  ;;  %v2521_v40 = vsub.f32 %v2508_v52, %v2517_v5  ;;  %v2526_v9 = vadd.f32 %v2523_v47, %v2522_v45 }
 0xe2b   : > { %2527 = vadd.xlane.f32.xlu0 %v2526_v9  ;;  %v2524_v60 = vmul.f32 %v2520_v48, %v2520_v48  ;;  %v2525_v10 = vmul.f32 %v2521_v40, %v2521_v40 }
 0xe2d   : > { %v2529_v11 = vadd.f32 %v2525_v10, %v2524_v60 }
 0xe2f   : > { %2530 = vadd.xlane.f32.xlu1 %v2529_v11 }
 0xeb8   : > { %v2528_v12 = vpop.xlane.xlu0 %2527 }
 0xeb9   : > { %v2532_v13 = vmul.f32 0.00390625, %v2528_v12 }
 0xebb   : > { %v2534_v63 = vadd.f32 1e-05, %v2532_v13 }
 0xebc   : > { %v2531_v14 = vpop.xlane.xlu1 %2530 }
 0xebd   : > { %3413 = vrsqrt.f32 %v2534_v63  ;;  %v2533_v16 = vmul.f32 0.00390625, %v2531_v14 }
 0xebf   : > { %v2535_v17 = vadd.f32 1e-05, %v2533_v16 }
 0xec1   : > { %3415 = vrsqrt.f32 %v2535_v17 }
 0xec7   : > { %v3414_v39 = vpop.eup %3413 }
 0xec8   : > { %v2538_v18 = vmul.f32 %v3414_v39, %v2518_v2  ;;  %v2539_v19 = vmul.f32 %v3414_v39, %v2519_v3 }
 0xeca   : > { %2542 = vst [vmem:[#allocation2] sm:$0xff] %v2538_v18  ;;  %2543 = vst [vmem:[#allocation2 + $0x8] sm:$0xff] %v2539_v19 }
 0xecb   : > { %2546 = vst [vmem:[%s4171_s14] sm:$0xff] %v2538_v18  ;;  %2547 = vst [vmem:[%s4171_s14 + $0x8] sm:$0xff] %v2539_v19  ;;  %v3416_v20 = vpop.eup %3415 }
 0xecc   : > { %v2540_v21 = vmul.f32 %v3416_v20, %v2520_v48  ;;  %v2541_v22 = vmul.f32 %v3416_v20, %v2521_v40 }
 0xece   : > { %2544 = vst [vmem:[#allocation2 + $0x10] sm:$0xff] %v2540_v21  ;;  %2545 = vst [vmem:[#allocation2 + $0x18] sm:$0xff] %v2541_v22 }
 0xecf   : > { %2548 = vst [vmem:[%s4171_s14 + $0x10] sm:$0xff] %v2540_v21  ;;  %2549 = vst [vmem:[%s4171_s14 + $0x18] sm:$0xff] %v2541_v22 }
 0xed0 PF: > { %s4172_s25 = sld [smem:[#allocation3_spill]] }
 0xed6   : > { %s24_s29 = sadd.s32 1, %s4172_s25  }
 0xed7   : > { %p21_p5 = scmp.ge.s32.totalorder %s24_s29, 8  }
 0xed9   :  { %23 = sbr.rel (!%p21_p5) target bundleno = 8 (0x8), region = 133 }

// kernel: forward.2
= control target key start
LH: loop header
LB: loop body
LE: loop exit
PB: predicated region body
PF: predicated region fallthrough
CT: control target
= control target key end

     0   :  { %vm7488_vm0 = vmmov 0   ;;  %vm372_vm1 = vcmask 523264   ;;  %vm533_vm2 = vcmask 64512   ;;  %s10605_s3 = inlined_call_operand.vmem [shape: f32[6,256,64], index: 3, kind: input, shape index: {}]   ;;  %s10606_s2 = inlined_call_operand.vmem [shape: f32[6,256,64], index: 2, kind: input, shape index: {}]   ;;  %s10607_s0 = inlined_call_operand.vmem [shape: f32[2,8,256], index: 0, kind: input, shape index: {}]   ;;  %s10608_s4 = inlined_call_operand.vmem [shape: f32[6,256,64], index: 4, kind: input, shape index: {}]   ;;  %s10609_s1 = inlined_call_operand.vmem [shape: f32[6,2,8,8], index: 1, kind: input, shape index: {}]   ;;  %s10610_s5 = inlined_call_operand.vmem [shape: f32[6,64,256], index: 5, kind: input, shape index: {}]   ;;  %s10611_s6 = inlined_call_operand.vmem [shape: f32[256,256], index: 6, kind: input, shape index: {}]   ;;  %s10612_s7 = inlined_call_operand.vmem [shape: f32[256,256], index: 7, kind: input, shape index: {}]   ;;  %s10613_s8 = inlined_call_operand.vmem [shape: f32[2,8,256], index: 8, kind: output, shape index: {}]  }
   0x1   :  { %v83_v0 = vld [vmem:[%s10605_s3 + $0x80] sm:$0xff]  ;;  %v84_v1 = vld [vmem:[%s10605_s3 + $0x88] sm:$0xff]  ;;  %v85_v11 = vld [vmem:[%s10605_s3 + $0x90] sm:$0xff] }
   0x2   :  { %v67_v2 = vld [vmem:[%s10605_s3] sm:$0xff]  ;;  %v6629_v3 = vpack.c.bf16 %v84_v1, %v83_v0  ;;  %v68_v4 = vld [vmem:[%s10605_s3 + $0x8] sm:$0xff]  ;;  %v86_v13 = vld [vmem:[%s10605_s3 + $0x98] sm:$0xff] }
   0x3   :  { %v51_v5 = vld [vmem:[%s10606_s2 + $0x80] sm:$0xff]  ;;  %v52_v6 = vld [vmem:[%s10606_s2 + $0x88] sm:$0xff]  ;;  %v6631_v7 = vpack.c.bf16 %v68_v4, %v67_v2  ;;  %v69_v14 = vld [vmem:[%s10605_s3 + $0x10] sm:$0xff]  ;;  %v6633_v16 = vpack.c.bf16 %v86_v13, %v85_v11 }
   0x4   :  { %v6597_v8 = vpack.c.bf16 %v52_v6, %v51_v5  ;;  %v35_v9 = vld [vmem:[%s10606_s2] sm:$0xff]  ;;  %v36_v10 = vld [vmem:[%s10606_s2 + $0x8] sm:$0xff]  ;;  %6630 = vmatprep.subr.bf16.mxu1 %v6629_v3  ;;  %v70_v15 = vld [vmem:[%s10605_s3 + $0x18] sm:$0xff] }
   0x5   :  { %v6599_v12 = vpack.c.bf16 %v36_v10, %v35_v9  ;;  %6632 = vmatpush3.bf16.msra.mxu1 %v6631_v7  ;;  %v6635_v17 = vpack.c.bf16 %v70_v15, %v69_v14  ;;  %v53_v18 = vld [vmem:[%s10606_s2 + $0x90] sm:$0xff]  ;;  %v54_v19 = vld [vmem:[%s10606_s2 + $0x98] sm:$0xff]  ;;  %v87_v23 = vld [vmem:[%s10605_s3 + $0xa0] sm:$0xff] }
   0x6   :  { %6598 = vmatprep.subr.bf16.mxu0 %v6597_v8  ;;  %v37_v20 = vld [vmem:[%s10606_s2 + $0x10] sm:$0xff]  ;;  %v6601_v21 = vpack.c.bf16 %v54_v19, %v53_v18  ;;  %v38_v22 = vld [vmem:[%s10606_s2 + $0x18] sm:$0xff]  ;;  %v88_v24 = vld [vmem:[%s10605_s3 + $0xa8] sm:$0xff]  ;;  %6634 = vmatprep.subr.bf16.mxu1 %v6633_v16 }
   0x7   :  { %6600 = vmatpush3.bf16.msra.mxu0 %v6599_v12  ;;  %v6603_v25 = vpack.c.bf16 %v38_v22, %v37_v20  ;;  %v6637_v26 = vpack.c.bf16 %v88_v24, %v87_v23  ;;  %v71_v27 = vld [vmem:[%s10605_s3 + $0x20] sm:$0xff]  ;;  %v72_v28 = vld [vmem:[%s10605_s3 + $0x28] sm:$0xff]  ;;  %v89_v35 = vld [vmem:[%s10605_s3 + $0xb0] sm:$0xff] }
   0x8   :  { %v55_v29 = vld [vmem:[%s10606_s2 + $0xa0] sm:$0xff]  ;;  %6602 = vmatprep.subr.bf16.mxu0 %v6601_v21  ;;  %v56_v30 = vld [vmem:[%s10606_s2 + $0xa8] sm:$0xff]  ;;  %v6639_v33 = vpack.c.bf16 %v72_v28, %v71_v27  ;;  %v90_v36 = vld [vmem:[%s10605_s3 + $0xb8] sm:$0xff] }
   0x9   :  { %v39_v31 = vld [vmem:[%s10606_s2 + $0x20] sm:$0xff]  ;;  %v40_v32 = vld [vmem:[%s10606_s2 + $0x28] sm:$0xff]  ;;  %6636 = vmatpush3.bf16.msra.mxu1 %v6635_v17  ;;  %v6605_v34 = vpack.c.bf16 %v56_v30, %v55_v29  ;;  %v73_v37 = vld [vmem:[%s10605_s3 + $0x30] sm:$0xff]  ;;  %v6641_v39 = vpack.c.bf16 %v90_v36, %v89_v35  ;;  %v7487_v36 = vmov 0.0  }
   0xa   :  { %6638 = vmatprep.subr.bf16.mxu1 %v6637_v26  ;;  %v6607_v38 = vpack.c.bf16 %v40_v32, %v39_v31  ;;  %v74_v40 = vld [vmem:[%s10605_s3 + $0x38] sm:$0xff]  ;;  %v57_v41 = vld [vmem:[%s10606_s2 + $0xb0] sm:$0xff]  ;;  %v91_v46 = vld [vmem:[%s10605_s3 + $0xc0] sm:$0xff] }
   0xb   :  { %6604 = vmatpush3.bf16.msra.mxu0 %v6603_v25  ;;  %v58_v42 = vld [vmem:[%s10606_s2 + $0xb8] sm:$0xff]  ;;  %v41_v44 = vld [vmem:[%s10606_s2 + $0x30] sm:$0xff]  ;;  %v92_v47 = vld [vmem:[%s10605_s3 + $0xc8] sm:$0xff]  ;;  %v6643_v48 = vpack.c.bf16 %v74_v40, %v73_v37 }
   0xc   :  { %6606 = vmatprep.subr.bf16.mxu0 %v6605_v34  ;;  %v6609_v43 = vpack.c.bf16 %v58_v42, %v57_v41  ;;  %v42_v45 = vld [vmem:[%s10606_s2 + $0x38] sm:$0xff]  ;;  %v59_v49 = vld [vmem:[%s10606_s2 + $0xc0] sm:$0xff]  ;;  %v60_v50 = vld [vmem:[%s10606_s2 + $0xc8] sm:$0xff]  ;;  %v6645_v52 = vpack.c.bf16 %v92_v47, %v91_v46 }
   0xd   :  { %6640 = vmatpush3.bf16.msra.mxu1 %v6639_v33  ;;  %v6611_v51 = vpack.c.bf16 %v42_v45, %v41_v44  ;;  %v75_v53 = vld [vmem:[%s10605_s3 + $0x40] sm:$0xff]  ;;  %v76_v54 = vld [vmem:[%s10605_s3 + $0x48] sm:$0xff]  ;;  %v6613_v56 = vpack.c.bf16 %v60_v50, %v59_v49  ;;  %v93_v58 = vld [vmem:[%s10605_s3 + $0xd0] sm:$0xff] }
   0xe   :  { %6642 = vmatprep.subr.bf16.mxu1 %v6641_v39  ;;  %v43_v55 = vld [vmem:[%s10606_s2 + $0x40] sm:$0xff]  ;;  %v44_v57 = vld [vmem:[%s10606_s2 + $0x48] sm:$0xff]  ;;  %v94_v59 = vld [vmem:[%s10605_s3 + $0xd8] sm:$0xff]  ;;  %v6647_v62 = vpack.c.bf16 %v76_v54, %v75_v53 }
   0xf   :  { %6608 = vmatpush3.bf16.msra.mxu0 %v6607_v38  ;;  %v61_v60 = vld [vmem:[%s10606_s2 + $0xd0] sm:$0xff]  ;;  %v62_v61 = vld [vmem:[%s10606_s2 + $0xd8] sm:$0xff]  ;;  %v6615_v63 = vpack.c.bf16 %v44_v57, %v43_v55  ;;  %v6649_v0 = vpack.c.bf16 %v94_v59, %v93_v58  ;;  %v95_v6 = vld [vmem:[%s10605_s3 + $0xe0] sm:$0xff] }
  0x10   :  { %6610 = vmatprep.subr.bf16.mxu0 %v6609_v43  ;;  %v77_v1 = vld [vmem:[%s10605_s3 + $0x50] sm:$0xff]  ;;  %v78_v2 = vld [vmem:[%s10605_s3 + $0x58] sm:$0xff]  ;;  %v6617_v4 = vpack.c.bf16 %v62_v61, %v61_v60  ;;  %v96_v7 = vld [vmem:[%s10605_s3 + $0xe8] sm:$0xff] }
  0x11   :  { %6644 = vmatpush3.bf16.msra.mxu1 %v6643_v48  ;;  %v45_v3 = vld [vmem:[%s10606_s2 + $0x50] sm:$0xff]  ;;  %v46_v5 = vld [vmem:[%s10606_s2 + $0x58] sm:$0xff]  ;;  %v63_v8 = vld [vmem:[%s10606_s2 + $0xe0] sm:$0xff]  ;;  %v6651_v10 = vpack.c.bf16 %v78_v2, %v77_v1  ;;  %v6653_v13 = vpack.c.bf16 %v96_v7, %v95_v6 }
  0x12   :  { %6646 = vmatprep.subr.bf16.mxu1 %v6645_v52  ;;  %v64_v9 = vld [vmem:[%s10606_s2 + $0xe8] sm:$0xff]  ;;  %v79_v11 = vld [vmem:[%s10605_s3 + $0x60] sm:$0xff]  ;;  %v6619_v12 = vpack.c.bf16 %v46_v5, %v45_v3  ;;  %v97_v19 = vld [vmem:[%s10605_s3 + $0xf0] sm:$0xff] }
  0x13   :  { %6612 = vmatpush3.bf16.msra.mxu0 %v6611_v51  ;;  %v80_v14 = vld [vmem:[%s10605_s3 + $0x68] sm:$0xff]  ;;  %v47_v15 = vld [vmem:[%s10606_s2 + $0x60] sm:$0xff]  ;;  %v6621_v17 = vpack.c.bf16 %v64_v9, %v63_v8  ;;  %v98_v20 = vld [vmem:[%s10605_s3 + $0xf8] sm:$0xff] }
  0x14   :  { %6614 = vmatprep.subr.bf16.mxu0 %v6613_v56  ;;  %v7702_v16 = vld [vmem:[%s10607_s0 + $0x8] sm:$0xff]  ;;  %v65_v21 = vld [vmem:[%s10606_s2 + $0xf0] sm:$0xff]  ;;  %v66_v22 = vld [vmem:[%s10606_s2 + $0xf8] sm:$0xff]  ;;  %v6655_v23 = vpack.c.bf16 %v80_v14, %v79_v11  ;;  %v6657_v25 = vpack.c.bf16 %v98_v20, %v97_v19 }
  0x15   :  { %6648 = vmatpush3.bf16.msra.mxu1 %v6647_v62  ;;  %v48_v18 = vld [vmem:[%s10606_s2 + $0x68] sm:$0xff]  ;;  %286 = vmatprep.mubr.f32.mxu1 %v7702_v16  ;;  %v81_v26 = vld [vmem:[%s10605_s3 + $0x70] sm:$0xff]  ;;  %v82_v27 = vld [vmem:[%s10605_s3 + $0x78] sm:$0xff]  ;;  %v6625_v28 = vpack.c.bf16 %v66_v22, %v65_v21 }
  0x16   :  { %6650 = vmatprep.subr.bf16.mxu1 %v6649_v0  ;;  %211 = vmatprep.mubr.f32.mxu0 %v7702_v16  ;;  %v6623_v24 = vpack.c.bf16 %v48_v18, %v47_v15  ;;  %v49_v29 = vld [vmem:[%s10606_s2 + $0x70] sm:$0xff]  ;;  %v50_v30 = vld [vmem:[%s10606_s2 + $0x78] sm:$0xff]  ;;  %v6659_v31 = vpack.c.bf16 %v82_v27, %v81_v26  ;;  %v7736_v33 = vld [vmem:[%s10607_s0] sm:$0xff] }
  0x17   :  { %6616 = vmatpush3.bf16.msra.mxu0 %v6615_v63  ;;  %v6627_v32 = vpack.c.bf16 %v50_v30, %v49_v29  ;;  %v7741_v34 = vld [vmem:[%s10607_s0 + $0x18] sm:$0xff]  ;;  %v7749_v35 = vld [vmem:[%s10607_s0 + $0x10] sm:$0xff]  ;;  %v115_v49 = vld [vmem:[%s10608_s4 + $0x80] sm:$0xff] }
  0x18   :  { %6618 = vmatprep.subr.bf16.mxu0 %v6617_v4  ;;  %v116_v50 = vld [vmem:[%s10608_s4 + $0x88] sm:$0xff]  ;;  %v99_v51 = vld [vmem:[%s10608_s4] sm:$0xff]  ;;  %v117_v54 = vld [vmem:[%s10608_s4 + $0x90] sm:$0xff] }
  0x19   :  { %6652 = vmatpush3.bf16.msra.mxu1 %v6651_v10  ;;  %v6661_v52 = vpack.c.bf16 %v116_v50, %v115_v49  ;;  %v100_v53 = vld [vmem:[%s10608_s4 + $0x8] sm:$0xff]  ;;  %v118_v55 = vld [vmem:[%s10608_s4 + $0x98] sm:$0xff]  ;;  %v101_v58 = vld [vmem:[%s10608_s4 + $0x10] sm:$0xff] }
  0x1a   :  { %6654 = vmatprep.subr.bf16.mxu1 %v6653_v13  ;;  %v6663_v56 = vpack.c.bf16 %v100_v53, %v99_v51  ;;  %v6665_v57 = vpack.c.bf16 %v118_v55, %v117_v54  ;;  %v102_v59 = vld [vmem:[%s10608_s4 + $0x18] sm:$0xff]  ;;  %v119_v60 = vld [vmem:[%s10608_s4 + $0xa0] sm:$0xff]  ;;  %v120_v61 = vld [vmem:[%s10608_s4 + $0xa8] sm:$0xff] }
  0x1b   :  { %6620 = vmatpush3.bf16.msra.mxu0 %v6619_v12  ;;  %v6667_v62 = vpack.c.bf16 %v102_v59, %v101_v58  ;;  %v6669_v63 = vpack.c.bf16 %v120_v61, %v119_v60  ;;  %v103_v0 = vld [vmem:[%s10608_s4 + $0x20] sm:$0xff]  ;;  %v104_v1 = vld [vmem:[%s10608_s4 + $0x28] sm:$0xff]  ;;  %v121_v2 = vld [vmem:[%s10608_s4 + $0xb0] sm:$0xff] }
  0x1c   :  { %6622 = vmatprep.subr.bf16.mxu0 %v6621_v17  ;;  %v122_v3 = vld [vmem:[%s10608_s4 + $0xb8] sm:$0xff]  ;;  %v6671_v4 = vpack.c.bf16 %v104_v1, %v103_v0  ;;  %v105_v6 = vld [vmem:[%s10608_s4 + $0x30] sm:$0xff]  ;;  %v123_v8 = vld [vmem:[%s10608_s4 + $0xc0] sm:$0xff] }
  0x1d   :  { %6656 = vmatpush3.bf16.msra.mxu1 %v6655_v23  ;;  %v6673_v5 = vpack.c.bf16 %v122_v3, %v121_v2  ;;  %v106_v7 = vld [vmem:[%s10608_s4 + $0x38] sm:$0xff]  ;;  %v124_v9 = vld [vmem:[%s10608_s4 + $0xc8] sm:$0xff]  ;;  %v107_v12 = vld [vmem:[%s10608_s4 + $0x40] sm:$0xff] }
  0x1e   :  { %6658 = vmatprep.subr.bf16.mxu1 %v6657_v25  ;;  %v6675_v10 = vpack.c.bf16 %v106_v7, %v105_v6  ;;  %v6677_v11 = vpack.c.bf16 %v124_v9, %v123_v8  ;;  %v108_v13 = vld [vmem:[%s10608_s4 + $0x48] sm:$0xff]  ;;  %v125_v14 = vld [vmem:[%s10608_s4 + $0xd0] sm:$0xff]  ;;  %v126_v15 = vld [vmem:[%s10608_s4 + $0xd8] sm:$0xff] }
  0x1f   :  { %6624 = vmatpush3.bf16.msra.mxu0 %v6623_v24  ;;  %v6679_v17 = vpack.c.bf16 %v108_v13, %v107_v12  ;;  %v6681_v18 = vpack.c.bf16 %v126_v15, %v125_v14  ;;  %v109_v19 = vld [vmem:[%s10608_s4 + $0x50] sm:$0xff]  ;;  %v110_v20 = vld [vmem:[%s10608_s4 + $0x58] sm:$0xff]  ;;  %v127_v21 = vld [vmem:[%s10608_s4 + $0xe0] sm:$0xff] }
  0x20   :  { %6626 = vmatprep.subr.bf16.mxu0 %v6625_v28  ;;  %v128_v22 = vld [vmem:[%s10608_s4 + $0xe8] sm:$0xff]  ;;  %v6683_v23 = vpack.c.bf16 %v110_v20, %v109_v19  ;;  %v111_v25 = vld [vmem:[%s10608_s4 + $0x60] sm:$0xff]  ;;  %v129_v27 = vld [vmem:[%s10608_s4 + $0xf0] sm:$0xff] }
  0x21   :  { %6660 = vmatpush3.bf16.msra.mxu1 %v6659_v31  ;;  %v6685_v24 = vpack.c.bf16 %v128_v22, %v127_v21  ;;  %v112_v26 = vld [vmem:[%s10608_s4 + $0x68] sm:$0xff]  ;;  %v130_v28 = vld [vmem:[%s10608_s4 + $0xf8] sm:$0xff]  ;;  %v113_v31 = vld [vmem:[%s10608_s4 + $0x70] sm:$0xff] }
  0x22   :  { %6477 = vmatprep.subr.mxu1 %v7487_v36  ;;  %v6687_v29 = vpack.c.bf16 %v112_v26, %v111_v25  ;;  %v6689_v30 = vpack.c.bf16 %v130_v28, %v129_v27  ;;  %v132_v9 = vld [vmem:[%s10610_s5 + $0x8] sm:$0xff]  ;;  %v131_v14 = vld [vmem:[%s10610_s5] sm:$0xff]  ;;  %v133_v15 = vld [vmem:[%s10610_s5 + $0x10] sm:$0xff] }
  0x23   :  { %6628 = vmatpush3.bf16.msra.mxu0 %v6627_v32  ;;  %v114_v32 = vld [vmem:[%s10608_s4 + $0x78] sm:$0xff]  ;;  %v6695_v21 = vpack.c.bf16 %v133_v15, %v131_v14  ;;  %v137_v25 = vld [vmem:[%s10610_s5 + $0x30] sm:$0xff]  ;;  %v140_v26 = vld [vmem:[%s10610_s5 + $0x48] sm:$0xff] }
  0x24   :  { %287 = vmatmul.mubr.f32.vlgmr.msra.gmra.mrb[0].mxu1 %v7736_v33  ;;  %6662 = vmatprep.subr.bf16.mxu0 %v6661_v52  ;;  %v138_v19 = vld [vmem:[%s10610_s5 + $0x38] sm:$0xff]  ;;  %v5137_v15 = vld [vmem:[%s10606_s2 + $0x150] sm:$0xff] }
  0x25   :  { %291 = vmatprep.mubr.f32.mxu1 %v7741_v34  ;;  %v142_v27 = vld [vmem:[%s10610_s5 + $0x58] sm:$0xff] }
  0x26   :  { %212 = vmatmul.mubr.f32.vlgmr.msra.gmra.mrb[0].mxu0 %v7736_v33 }
  0x27   :  { %216 = vmatprep.mubr.f32.mxu0 %v7741_v34  ;;  %6664 = vmatpush3.bf16.msra.mxu0 %v6663_v56 }
  0x28   :  { %292 = vmatmul.mubr.f32.gmra.mrb[2].mxu1 %v7749_v35  ;;  %6666 = vmatprep.subr.bf16.mxu0 %v6665_v57 }
  0x29   :  { %6479 = vmatprep.mubr.msk.f32.mxu1 %vm7488_vm0, %v7487_v36 }
  0x2a   :  { %217 = vmatmul.mubr.f32.gmra.mrb[2].mxu0 %v7749_v35 }
  0x2b   :  { %361 = vmatprep.mubr.f32.mxu0 %v7702_v16  ;;  %6668 = vmatpush3.bf16.msra.mxu0 %v6667_v62 }
  0x2c   :  { %6670 = vmatprep.subr.bf16.mxu0 %v6669_v63 }
  0x2f   :  { %6672 = vmatpush3.bf16.msra.mxu0 %v6671_v4 }
  0x30   :  { %6674 = vmatprep.subr.bf16.mxu0 %v6673_v5 }
  0x33   :  { %6676 = vmatpush3.bf16.msra.mxu0 %v6675_v10  ;;  %v134_v10 = vld [vmem:[%s10610_s5 + $0x18] sm:$0xff] }
  0x34   :  { %6678 = vmatprep.subr.bf16.mxu0 %v6677_v11  ;;  %v6693_v13 = vpack.c.bf16 %v134_v10, %v132_v9  ;;  %v5135_v9 = vld [vmem:[%s10606_s2 + $0x140] sm:$0xff]  ;;  %v5136_v10 = vld [vmem:[%s10606_s2 + $0x148] sm:$0xff] }
  0x37   :  { %6680 = vmatpush3.bf16.msra.mxu0 %v6679_v17 }
  0x38   :  { %6682 = vmatprep.subr.bf16.mxu0 %v6681_v18  ;;  %v136_v18 = vld [vmem:[%s10610_s5 + $0x28] sm:$0xff] }
  0x3b   :  { %6684 = vmatpush3.bf16.msra.mxu0 %v6683_v23  ;;  %v6697_v23 = vpack.c.bf16 %v138_v19, %v136_v18  ;;  %v5155_v19 = vld [vmem:[%s10606_s2 + $0x1e0] sm:$0xff] }
  0x3c   :  { %6686 = vmatprep.subr.bf16.mxu0 %v6685_v24  ;;  %v135_v24 = vld [vmem:[%s10610_s5 + $0x20] sm:$0xff] }
  0x3d   :  { %v6699_v28 = vpack.c.bf16 %v137_v25, %v135_v24  ;;  %v5157_v25 = vld [vmem:[%s10606_s2 + $0x1f0] sm:$0xff] }
  0x3f   :  { %6688 = vmatpush3.bf16.msra.mxu0 %v6687_v29  ;;  %v6701_v29 = vpack.c.bf16 %v142_v27, %v140_v26  ;;  %v5158_v26 = vld [vmem:[%s10606_s2 + $0x1f8] sm:$0xff] }
  0x40   :  { %6690 = vmatprep.subr.bf16.mxu0 %v6689_v30  ;;  %v139_v30 = vld [vmem:[%s10610_s5 + $0x40] sm:$0xff]  ;;  %v6737_v27 = vpack.c.bf16 %v5158_v26, %v5157_v25 }
  0xf7   :  { %v5815_v37 = vpop.f32.mrb[0].mxu1 }
  0xf8   :  { %v5816_v38 = vpop.f32.mrb[1].mxu1 }
  0xf9   :  { %v5777_v39 = vpop.f32.mrb[0].mxu0  ;;  %v5817_v40 = vadd.f32 %v5816_v38, %v5815_v37  ;;  %v6691_v37 = vpack.c.bf16 %v114_v32, %v113_v31  ;;  %v33_v38 = vld [vmem:[%s10609_s1] sm:$0xff]  ;;  %v141_v31 = vld [vmem:[%s10610_s5 + $0x50] sm:$0xff]  ;;  %v144_v32 = vld [vmem:[%s10610_s5 + $0x68] sm:$0xff] }
  0xfa   :  { %v5778_v41 = vpop.f32.mrb[1].mxu0 }
  0xfb   :  { %v5779_v42 = vadd.f32 %v5778_v41, %v5777_v39  ;;  %v5818_v43 = vpop.f32.mrb[2].mxu1  ;;  %6478 = vmatpush3.xpose.msk.msra.mxu1 %vm372_vm1, %v5817_v40  ;;  %6692 = vmatpush3.bf16.msra.mxu0 %v6691_v37  ;;  %v5119_v39 = vadd.f32 -1.0, %v33_v38  ;;  %v34_v40 = vld [vmem:[%s10609_s1 + $0x8] sm:$0xff]  ;;  %v146_v37 = vld [vmem:[%s10610_s5 + $0x78] sm:$0xff] }
  0xfc   :  { %v5819_v44 = vpop.f32.mrb[3].mxu1  ;;  %6482 = vmatprep.subr.mxu1 %v7487_v36 }
  0xfd   :  { %v5780_v45 = vpop.f32.mrb[2].mxu0  ;;  %v5820_v46 = vadd.f32 %v5819_v44, %v5818_v43  ;;  %v529_v41 = vmul.f32 1e+09, %v5119_v39  ;;  %v6705_v39 = vpack.c.bf16 %v146_v37, %v144_v32  ;;  %v5160_v32 = vld [vmem:[%s10605_s3 + $0x108] sm:$0xff]  ;;  %v5177_v37 = vld [vmem:[%s10605_s3 + $0x190] sm:$0xff] }
  0xfe   :  { %v5781_v47 = vpop.f32.mrb[3].mxu0  ;;  %6480 = vmatmul.mubr.msk.f32.vlgmr.msra.gmra.mrb[4].mxu1 %vm372_vm1, %v5779_v42  ;;  %362 = vmatmul.mubr.f32.vlgmr.msra.gmra.mrb[4].mxu0 %v7736_v33  ;;  %v5120_v42 = vadd.f32 -1.0, %v34_v40 }
  0xff   :  { %v5782_v48 = vadd.f32 %v5781_v47, %v5780_v45  ;;  %6483 = vmatpush3.xpose.msk.msra.mxu1 %vm372_vm1, %v5820_v46  ;;  %6484 = vmatprep.mubr.msk.f32.mxu1 %vm7488_vm0, %v7487_v36 }
 0x100   :  { %6487 = vmatprep.subr.mxu1 %v7487_v36  ;;  %366 = vmatprep.mubr.f32.mxu0 %v7741_v34  ;;  %v530_v47 = vmul.f32 1e+09, %v5120_v42 }
 0x102   :  { %6485 = vmatmul.mubr.msk.f32.vlgmr.msra.gmra.mrb[6].mxu1 %vm372_vm1, %v5782_v48  ;;  %367 = vmatmul.mubr.f32.gmra.mrb[6].mxu0 %v7749_v35 }
 0x103   :  { %6489 = vmatprep.mubr.msk.f32.mxu1 %vm7488_vm0, %v7487_v36  ;;  %1007 = vmatprep.mubr.f32.mxu0 %v7702_v16 }
 0x1d1   :  { %v445_v43 = vpop.f32.mrb[4].mxu1  ;;  %v5853_v0 = vpop.f32.mrb[4].mxu0 }
 0x1d2   :  { %v525_v44 = vmul.f32 0.125, %v445_v43  ;;  %v6481_v45 = vpop.f32.mrb[5].mxu1  ;;  %v5854_v1 = vpop.f32.mrb[5].mxu0  ;;  %v5175_v43 = vld [vmem:[%s10605_s3 + $0x180] sm:$0xff] }
 0x1d3   :  { %v5855_v2 = vadd.f32 %v5854_v1, %v5853_v0  ;;  %v5149_v0 = vld [vmem:[%s10606_s2 + $0x1b0] sm:$0xff]  ;;  %v5150_v1 = vld [vmem:[%s10606_s2 + $0x1b8] sm:$0xff] }
 0x1d4   :  { %v531_v46 = vadd.f32 %v529_v41, %v525_v44  ;;  %v145_v41 = vld [vmem:[%s10610_s5 + $0x70] sm:$0xff]  ;;  %v5176_v44 = vld [vmem:[%s10605_s3 + $0x188] sm:$0xff] }
 0x1d5   :  { %v521_v48 = vpop.f32.mrb[6].mxu1  ;;  %6488 = vmatpush3.msra.mxu1 %v5855_v2  ;;  %v5856_v3 = vpop.f32.mrb[6].mxu0  ;;  %v6741_v45 = vpack.c.bf16 %v5176_v44, %v5175_v43  ;;  %v6721_v2 = vpack.c.bf16 %v5150_v1, %v5149_v0  ;;  %v5179_v44 = vld [vmem:[%s10605_s3 + $0x1a0] sm:$0xff]  ;;  %v5168_v0 = vld [vmem:[%s10605_s3 + $0x148] sm:$0xff]  ;;  %v5185_v1 = vld [vmem:[%s10605_s3 + $0x1d0] sm:$0xff] }
 0x1d6   :  { %v526_v49 = vmul.f32 0.125, %v521_v48  ;;  %v534_v50 = vsel %vm533_vm2, %v531_v46, -inf  ;;  %v6486_v51 = vpop.f32.mrb[7].mxu1  ;;  %6492 = vmatprep.subr.mxu1 %v7487_v36  ;;  %v5857_v4 = vpop.f32.mrb[7].mxu0 }
 0x1d7   :  { %535 = vmax.xlane.f32.xlu0 %v534_v50  ;;  %v5858_v5 = vadd.f32 %v5857_v4, %v5856_v3  ;;  %v5128_v50 = vld [vmem:[%s10606_s2 + $0x108] sm:$0xff]  ;;  %v5133_v3 = vld [vmem:[%s10606_s2 + $0x130] sm:$0xff]  ;;  %v5134_v4 = vld [vmem:[%s10606_s2 + $0x138] sm:$0xff] }
 0x1d8   :  { %v532_v52 = vadd.f32 %v530_v47, %v526_v49  ;;  %v5144_v47 = vld [vmem:[%s10606_s2 + $0x188] sm:$0xff]  ;;  %v5127_v49 = vld [vmem:[%s10606_s2 + $0x100] sm:$0xff] }
 0x1d9   :  { %v6711_v51 = vpack.c.bf16 %v5128_v50, %v5127_v49  ;;  %v5163_v49 = vld [vmem:[%s10605_s3 + $0x120] sm:$0xff]  ;;  %v5164_v50 = vld [vmem:[%s10605_s3 + $0x128] sm:$0xff] }
 0x1da   :  { %v537_v53 = vsel %vm533_vm2, %v532_v52, -inf }
 0x1db   :  { %538 = vmax.xlane.f32.xlu0 %v537_v53  ;;  %v5146_v53 = vld [vmem:[%s10606_s2 + $0x198] sm:$0xff] }
 0x264   :  { %v536_v54 = vpop.xlane.xlu0 %535 }
 0x265   :  { %v540_v55 = vsub.f32 %v531_v46, %v536_v54  ;;  %v5143_v46 = vld [vmem:[%s10606_s2 + $0x180] sm:$0xff] }
 0x266   :  { %v6709_v48 = vpack.c.bf16 %v5144_v47, %v5143_v46 }
 0x267   :  { %v542_v56 = vmul.f32 1.442695, %v540_v55  ;;  %v5129_v55 = vld [vmem:[%s10606_s2 + $0x110] sm:$0xff] }
 0x268   :  { %v539_v57 = vpop.xlane.xlu0 %538  ;;  %6710 = vmatprep.subr.bf16.mxu0 %v6709_v48 }
 0x269   :  { %7399 = vpow2.f32 %v542_v56  ;;  %v541_v58 = vsub.f32 %v532_v52, %v539_v57  ;;  %6712 = vmatpush3.bf16.msra.mxu0 %v6711_v51  ;;  %v5145_v52 = vld [vmem:[%s10606_s2 + $0x190] sm:$0xff]  ;;  %v5130_v56 = vld [vmem:[%s10606_s2 + $0x118] sm:$0xff] }
 0x26a   :  { %v6713_v54 = vpack.c.bf16 %v5146_v53, %v5145_v52  ;;  %v6715_v57 = vpack.c.bf16 %v5130_v56, %v5129_v55  ;;  %v5181_v52 = vld [vmem:[%s10605_s3 + $0x1b0] sm:$0xff]  ;;  %v5182_v53 = vld [vmem:[%s10605_s3 + $0x1b8] sm:$0xff]  ;;  %v6751_v55 = vpack.c.bf16 %v5164_v50, %v5163_v49 }
 0x26b   :  { %v544_v59 = vmul.f32 1.442695, %v541_v58  ;;  %v5147_v58 = vld [vmem:[%s10606_s2 + $0x1a0] sm:$0xff]  ;;  %v6753_v56 = vpack.c.bf16 %v5182_v53, %v5181_v52  ;;  %v5193_v50 = vld [vmem:[%s10608_s4 + $0x110] sm:$0xff]  ;;  %v5212_v53 = vld [vmem:[%s10608_s4 + $0x1a8] sm:$0xff] }
 0x26c   :  { %6714 = vmatprep.subr.bf16.mxu0 %v6713_v54  ;;  %v5211_v52 = vld [vmem:[%s10608_s4 + $0x1a0] sm:$0xff] }
 0x26d   :  { %7401 = vpow2.f32 %v544_v59  ;;  %6716 = vmatpush3.bf16.msra.mxu0 %v6715_v57  ;;  %v5148_v59 = vld [vmem:[%s10606_s2 + $0x1a8] sm:$0xff]  ;;  %v5165_v57 = vld [vmem:[%s10605_s3 + $0x130] sm:$0xff] }
 0x273   :  { %v7400_v60 = vpop.eup %7399 }
 0x274   :  { %v546_v61 = vsel %vm533_vm2, %v7400_v60, 0.0 }
 0x275   :  { %547 = vadd.xlane.f32.xlu1 %v546_v61  ;;  %v5131_v61 = vld [vmem:[%s10606_s2 + $0x120] sm:$0xff] }
 0x277   :  { %v7402_v62 = vpop.eup %7401 }
 0x278   :  { %v549_v63 = vsel %vm533_vm2, %v7402_v62, 0.0 }
 0x279   :  { %550 = vadd.xlane.f32.xlu1 %v549_v63 }
 0x302   :  { %v548_v6 = vpop.xlane.xlu1 %547 }
 0x303   :  { %7403 = vrcp.f32 %v548_v6  ;;  %v5151_v6 = vld [vmem:[%s10606_s2 + $0x1c0] sm:$0xff] }
 0x306   :  { %v551_v7 = vpop.xlane.xlu1 %550 }
 0x307   :  { %7405 = vrcp.f32 %v551_v7  ;;  %v5152_v7 = vld [vmem:[%s10606_s2 + $0x1c8] sm:$0xff] }
 0x30d   :  { %v7404_v8 = vpop.eup %7403 }
 0x30e   :  { %v554_v11 = vmul.f32 %v7404_v8, %v7400_v60  ;;  %v6717_v60 = vpack.c.bf16 %v5148_v59, %v5147_v58  ;;  %v6725_v8 = vpack.c.bf16 %v5152_v7, %v5151_v6  ;;  %v5166_v58 = vld [vmem:[%s10605_s3 + $0x138] sm:$0xff]  ;;  %v5183_v59 = vld [vmem:[%s10605_s3 + $0x1c0] sm:$0xff] }
 0x30f   :  { %v5170_v6 = vld [vmem:[%s10605_s3 + $0x158] sm:$0xff]  ;;  %v5187_v7 = vld [vmem:[%s10605_s3 + $0x1e0] sm:$0xff] }
 0x310   :  { %v556_v12 = vmul.f32 %v554_v11, %v33_v38  ;;  %v6703_v38 = vpack.c.bf16 %v141_v31, %v139_v30  ;;  %6718 = vmatprep.subr.bf16.mxu0 %v6717_v60  ;;  %v6727_v11 = vpack.c.bf16 %v5136_v10, %v5135_v9  ;;  %v5159_v31 = vld [vmem:[%s10605_s3 + $0x100] sm:$0xff]  ;;  %v5184_v60 = vld [vmem:[%s10605_s3 + $0x1c8] sm:$0xff] }
 0x311   :  { %v7406_v17 = vpop.eup %7405 }
 0x312   :  { %v555_v20 = vmul.f32 %v7406_v17, %v7402_v62  ;;  %6490 = vmatmul.mubr.msk.f32.vlgmr.msra.gmra.mrb[8].mxu1 %vm533_vm2, %v556_v12  ;;  %v5132_v62 = vld [vmem:[%s10606_s2 + $0x128] sm:$0xff]  ;;  %v5153_v12 = vld [vmem:[%s10606_s2 + $0x1d0] sm:$0xff]  ;;  %v5138_v17 = vld [vmem:[%s10606_s2 + $0x158] sm:$0xff] }
 0x313   :  { %6493 = vmatpush3.msra.mxu1 %v5858_v5  ;;  %6494 = vmatprep.mubr.msk.f32.mxu1 %vm7488_vm0, %v7487_v36  ;;  %v6719_v63 = vpack.c.bf16 %v5132_v62, %v5131_v61  ;;  %v6723_v5 = vpack.c.bf16 %v5134_v4, %v5133_v3  ;;  %v6731_v18 = vpack.c.bf16 %v5138_v17, %v5137_v15 }
 0x314   :  { %v557_v22 = vmul.f32 %v555_v20, %v34_v40  ;;  %6694 = vmatprep.subr.bf16.mxu1 %v6693_v13  ;;  %v143_v40 = vld [vmem:[%s10610_s5 + $0x60] sm:$0xff]  ;;  %v5154_v13 = vld [vmem:[%s10606_s2 + $0x1d8] sm:$0xff]  ;;  %v5156_v20 = vld [vmem:[%s10606_s2 + $0x1e8] sm:$0xff]  ;;  %v6755_v61 = vpack.c.bf16 %v5166_v58, %v5165_v57  ;;  %v6757_v62 = vpack.c.bf16 %v5184_v60, %v5183_v59 }
 0x315   :  { %v6707_v42 = vpack.c.bf16 %v145_v41, %v143_v40  ;;  %6720 = vmatpush3.bf16.msra.mxu0 %v6719_v63  ;;  %v6729_v14 = vpack.c.bf16 %v5154_v13, %v5153_v12  ;;  %v5161_v41 = vld [vmem:[%s10605_s3 + $0x110] sm:$0xff]  ;;  %v5167_v63 = vld [vmem:[%s10605_s3 + $0x140] sm:$0xff]  ;;  %v5172_v12 = vld [vmem:[%s10605_s3 + $0x168] sm:$0xff] }
 0x316   :  { %6495 = vmatmul.mubr.msk.f32.vlgmr.msra.gmra.mrb[10].mxu1 %vm533_vm2, %v557_v22  ;;  %6722 = vmatprep.subr.bf16.mxu0 %v6721_v2  ;;  %v5139_v22 = vld [vmem:[%s10606_s2 + $0x160] sm:$0xff]  ;;  %v5186_v2 = vld [vmem:[%s10605_s3 + $0x1d8] sm:$0xff]  ;;  %v6759_v3 = vpack.c.bf16 %v5168_v0, %v5167_v63  ;;  %v5189_v13 = vld [vmem:[%s10605_s3 + $0x1f0] sm:$0xff] }
 0x317   :  { %6696 = vmatpush1.bf16.msra.mxu1 %v6695_v21  ;;  %774 = vmatprep.mubr.f32.mxu1 %v7487_v36  ;;  %v6733_v21 = vpack.c.bf16 %v5156_v20, %v5155_v19  ;;  %v6761_v4 = vpack.c.bf16 %v5186_v2, %v5185_v1  ;;  %v5174_v19 = vld [vmem:[%s10605_s3 + $0x178] sm:$0xff]  ;;  %v5196_v57 = vld [vmem:[%s10608_s4 + $0x128] sm:$0xff]  ;;  %v5213_v58 = vld [vmem:[%s10608_s4 + $0x1b0] sm:$0xff] }
 0x318   :  { %6698 = vmatprep.subr.bf16.mxu1 %v6697_v23  ;;  %v5140_v23 = vld [vmem:[%s10606_s2 + $0x168] sm:$0xff]  ;;  %v5214_v59 = vld [vmem:[%s10608_s4 + $0x1b8] sm:$0xff]  ;;  %v5215_v0 = vld [vmem:[%s10608_s4 + $0x1c0] sm:$0xff] }
 0x319   :  { %6724 = vmatpush3.bf16.msra.mxu0 %v6723_v5  ;;  %v6735_v24 = vpack.c.bf16 %v5140_v23, %v5139_v22  ;;  %v5169_v5 = vld [vmem:[%s10605_s3 + $0x150] sm:$0xff]  ;;  %v5198_v63 = vld [vmem:[%s10608_s4 + $0x138] sm:$0xff]  ;;  %v5216_v1 = vld [vmem:[%s10608_s4 + $0x1c8] sm:$0xff] }
 0x31a   :  { %6726 = vmatprep.subr.bf16.mxu0 %v6725_v8  ;;  %v5188_v8 = vld [vmem:[%s10605_s3 + $0x1e8] sm:$0xff]  ;;  %v6763_v9 = vpack.c.bf16 %v5170_v6, %v5169_v5  ;;  %v5217_v6 = vld [vmem:[%s10608_s4 + $0x1d0] sm:$0xff] }
 0x31b   :  { %6700 = vmatpush1.bf16.msra.mxu1 %v6699_v28  ;;  %v5141_v28 = vld [vmem:[%s10606_s2 + $0x170] sm:$0xff]  ;;  %v6765_v10 = vpack.c.bf16 %v5188_v8, %v5187_v7  ;;  %v5200_v5 = vld [vmem:[%s10608_s4 + $0x148] sm:$0xff]  ;;  %v5218_v7 = vld [vmem:[%s10608_s4 + $0x1d8] sm:$0xff] }
 0x31c   :  { %6702 = vmatprep.subr.bf16.mxu1 %v6701_v29  ;;  %v5142_v29 = vld [vmem:[%s10606_s2 + $0x178] sm:$0xff] }
 0x31d   :  { %6728 = vmatpush3.bf16.msra.mxu0 %v6727_v11  ;;  %v6739_v30 = vpack.c.bf16 %v5142_v29, %v5141_v28  ;;  %v5171_v11 = vld [vmem:[%s10605_s3 + $0x160] sm:$0xff] }
 0x31e   :  { %6730 = vmatprep.subr.bf16.mxu0 %v6729_v14  ;;  %v5190_v14 = vld [vmem:[%s10605_s3 + $0x1f8] sm:$0xff]  ;;  %v6767_v15 = vpack.c.bf16 %v5172_v12, %v5171_v11  ;;  %v5219_v12 = vld [vmem:[%s10608_s4 + $0x1e0] sm:$0xff] }
 0x31f   :  { %6704 = vmatpush1.bf16.msra.mxu1 %v6703_v38  ;;  %v5178_v38 = vld [vmem:[%s10605_s3 + $0x198] sm:$0xff]  ;;  %v6769_v17 = vpack.c.bf16 %v5190_v14, %v5189_v13  ;;  %v5220_v13 = vld [vmem:[%s10608_s4 + $0x1e8] sm:$0xff] }
 0x320   :  { %6706 = vmatprep.subr.bf16.mxu1 %v6705_v39  ;;  %v6743_v39 = vpack.c.bf16 %v5160_v32, %v5159_v31  ;;  %v6745_v40 = vpack.c.bf16 %v5178_v38, %v5177_v37  ;;  %v5202_v11 = vld [vmem:[%s10608_s4 + $0x158] sm:$0xff] }
 0x321   :  { %6732 = vmatpush3.bf16.msra.mxu0 %v6731_v18  ;;  %v5173_v18 = vld [vmem:[%s10605_s3 + $0x170] sm:$0xff] }
 0x322   :  { %6734 = vmatprep.subr.bf16.mxu0 %v6733_v21  ;;  %v6771_v20 = vpack.c.bf16 %v5174_v19, %v5173_v18  ;;  %v5204_v18 = vld [vmem:[%s10608_s4 + $0x168] sm:$0xff]  ;;  %v5221_v19 = vld [vmem:[%s10608_s4 + $0x1f0] sm:$0xff] }
 0x323   :  { %6708 = vmatpush1.bf16.msra.mxu1 %v6707_v42  ;;  %v5162_v42 = vld [vmem:[%s10605_s3 + $0x118] sm:$0xff] }
 0x324   :  { %6742 = vmatprep.subr.bf16.mxu1 %v6741_v45  ;;  %v5180_v45 = vld [vmem:[%s10605_s3 + $0x1a8] sm:$0xff]  ;;  %v6747_v47 = vpack.c.bf16 %v5162_v42, %v5161_v41  ;;  %v5207_v41 = vld [vmem:[%s10608_s4 + $0x180] sm:$0xff] }
 0x325   :  { %6736 = vmatpush3.bf16.msra.mxu0 %v6735_v24  ;;  %v6749_v48 = vpack.c.bf16 %v5180_v45, %v5179_v44  ;;  %v5208_v42 = vld [vmem:[%s10608_s4 + $0x188] sm:$0xff] }
 0x326   :  { %6738 = vmatprep.subr.bf16.mxu0 %v6737_v27  ;;  %v6773_v44 = vpack.c.bf16 %v5208_v42, %v5207_v41  ;;  %v5192_v45 = vld [vmem:[%s10608_s4 + $0x108] sm:$0xff] }
 0x329   :  { %6740 = vmatpush3.bf16.msra.mxu0 %v6739_v30 }
 0x32a   :  { %6774 = vmatprep.subr.bf16.mxu0 %v6773_v44 }
 0x32c   :  { %1008 = vmatmul.mubr.f32.vlgmr.msra.gmra.mrb[8].mxu0 %v7736_v33 }
 0x32d   :  { %1012 = vmatprep.mubr.f32.mxu0 %v7741_v34 }
 0x330   :  { %1013 = vmatmul.mubr.f32.gmra.mrb[10].mxu0 %v7749_v35 }
 0x331   :  { %1157 = vmatprep.mubr.f32.mxu0 %v7702_v16 }
 0x3e5   :  { %v627_v43 = vpop.f32.mrb[8].mxu1 }
 0x3e6   :  { %v6491_v46 = vpop.f32.mrb[9].mxu1  ;;  %5123 = vmatmul.mubr.msk.f32.vlgmr.msra.gmra.mrb[12].mxu1 %vm372_vm1, %v627_v43  ;;  %v5191_v43 = vld [vmem:[%s10608_s4 + $0x100] sm:$0xff] }
 0x3e7   :  { %6744 = vmatpush3.bf16.msra.mxu1 %v6743_v39  ;;  %780 = vmatprep.mubr.f32.mxu1 %v7487_v36  ;;  %v5209_v46 = vld [vmem:[%s10608_s4 + $0x190] sm:$0xff] }
 0x3e8   :  { %6746 = vmatprep.subr.bf16.mxu1 %v6745_v40 }
 0x3e9   :  { %v700_v51 = vpop.f32.mrb[10].mxu1 }
 0x3ea   :  { %v6496_v54 = vpop.f32.mrb[11].mxu1  ;;  %5124 = vmatmul.mubr.msk.f32.gmra.mrb[14].mxu1 %vm372_vm1, %v700_v51  ;;  %v5194_v51 = vld [vmem:[%s10608_s4 + $0x118] sm:$0xff] }
 0x3eb   :  { %6748 = vmatpush3.bf16.msra.mxu1 %v6747_v47  ;;  %1082 = vmatprep.mubr.f32.mxu1 %v7702_v16  ;;  %v5210_v47 = vld [vmem:[%s10608_s4 + $0x198] sm:$0xff]  ;;  %v6779_v54 = vpack.c.bf16 %v5194_v51, %v5193_v50 }
 0x3ec   :  { %6750 = vmatprep.subr.bf16.mxu1 %v6749_v48  ;;  %v6775_v48 = vpack.c.bf16 %v5192_v45, %v5191_v43  ;;  %v6777_v49 = vpack.c.bf16 %v5210_v47, %v5209_v46 }
 0x3ee   :  { %6776 = vmatpush3.bf16.msra.mxu0 %v6775_v48 }
 0x3ef   :  { %6752 = vmatpush3.bf16.msra.mxu1 %v6751_v55  ;;  %6778 = vmatprep.subr.bf16.mxu0 %v6777_v49  ;;  %v6781_v55 = vpack.c.bf16 %v5212_v53, %v5211_v52 }
 0x3f0   :  { %6754 = vmatprep.subr.bf16.mxu1 %v6753_v56  ;;  %v5195_v56 = vld [vmem:[%s10608_s4 + $0x120] sm:$0xff] }
 0x3f1   :  { %v6783_v60 = vpack.c.bf16 %v5196_v57, %v5195_v56 }
 0x3f2   :  { %6780 = vmatpush3.bf16.msra.mxu0 %v6779_v54 }
 0x3f3   :  { %6756 = vmatpush3.bf16.msra.mxu1 %v6755_v61  ;;  %6782 = vmatprep.subr.bf16.mxu0 %v6781_v55  ;;  %v6785_v61 = vpack.c.bf16 %v5214_v59, %v5213_v58 }
 0x3f4   :  { %6758 = vmatprep.subr.bf16.mxu1 %v6757_v62  ;;  %v5197_v62 = vld [vmem:[%s10608_s4 + $0x130] sm:$0xff] }
 0x3f5   :  { %v6787_v2 = vpack.c.bf16 %v5198_v63, %v5197_v62 }
 0x3f6   :  { %6784 = vmatpush3.bf16.msra.mxu0 %v6783_v60 }
 0x3f7   :  { %6760 = vmatpush3.bf16.msra.mxu1 %v6759_v3  ;;  %6786 = vmatprep.subr.bf16.mxu0 %v6785_v61  ;;  %v6789_v3 = vpack.c.bf16 %v5216_v1, %v5215_v0  ;;  %v5224_v1 = vld [vmem:[%s10610_s5 + $0x88] sm:$0xff] }
 0x3f8   :  { %6762 = vmatprep.subr.bf16.mxu1 %v6761_v4  ;;  %v5199_v4 = vld [vmem:[%s10608_s4 + $0x140] sm:$0xff] }
 0x3f9   :  { %v6791_v8 = vpack.c.bf16 %v5200_v5, %v5199_v4 }
 0x3fa   :  { %6788 = vmatpush3.bf16.msra.mxu0 %v6787_v2  ;;  %v5226_v2 = vld [vmem:[%s10610_s5 + $0x98] sm:$0xff] }
 0x3fb   :  { %6764 = vmatpush3.bf16.msra.mxu1 %v6763_v9  ;;  %6790 = vmatprep.subr.bf16.mxu0 %v6789_v3  ;;  %v6793_v9 = vpack.c.bf16 %v5218_v7, %v5217_v6  ;;  %v6805_v5 = vpack.c.bf16 %v5226_v2, %v5224_v1  ;;  %v5223_v6 = vld [vmem:[%s10610_s5 + $0x80] sm:$0xff]  ;;  %v5225_v7 = vld [vmem:[%s10610_s5 + $0x90] sm:$0xff]  ;;  %v5260_v2 = vld [vmem:[%s10606_s2 + $0x248] sm:$0xff] }
 0x3fc   :  { %6766 = vmatprep.subr.bf16.mxu1 %v6765_v10  ;;  %v5201_v10 = vld [vmem:[%s10608_s4 + $0x150] sm:$0xff]  ;;  %v5259_v1 = vld [vmem:[%s10606_s2 + $0x240] sm:$0xff] }
 0x3fd   :  { %v6795_v14 = vpack.c.bf16 %v5202_v11, %v5201_v10  ;;  %v5230_v10 = vld [vmem:[%s10610_s5 + $0xb8] sm:$0xff] }
 0x3fe   :  { %6792 = vmatpush3.bf16.msra.mxu0 %v6791_v8 }
 0x3ff   :  { %6768 = vmatpush3.bf16.msra.mxu1 %v6767_v15  ;;  %v5899_v21 = vpop.f32.mrb[8].mxu0  ;;  %6794 = vmatprep.subr.bf16.mxu0 %v6793_v9  ;;  %v6797_v15 = vpack.c.bf16 %v5220_v13, %v5219_v12  ;;  %v5228_v9 = vld [vmem:[%s10610_s5 + $0xa8] sm:$0xff]  ;;  %v6807_v12 = vpack.c.bf16 %v5225_v7, %v5223_v6  ;;  %v5261_v7 = vld [vmem:[%s10606_s2 + $0x250] sm:$0xff] }
 0x400   :  { %6770 = vmatprep.subr.bf16.mxu1 %v6769_v17  ;;  %v5900_v22 = vpop.f32.mrb[9].mxu0  ;;  %v5203_v17 = vld [vmem:[%s10608_s4 + $0x160] sm:$0xff] }
 0x401   :  { %v5901_v23 = vadd.f32 %v5900_v22, %v5899_v21  ;;  %v6799_v21 = vpack.c.bf16 %v5204_v18, %v5203_v17  ;;  %v5229_v17 = vld [vmem:[%s10610_s5 + $0xb0] sm:$0xff]  ;;  %v5232_v18 = vld [vmem:[%s10610_s5 + $0xc8] sm:$0xff] }
 0x402   :  { %6796 = vmatpush3.bf16.msra.mxu0 %v6795_v14  ;;  %v6809_v14 = vpack.c.bf16 %v5230_v10, %v5228_v9  ;;  %v5279_v10 = vld [vmem:[%s10606_s2 + $0x2e0] sm:$0xff] }
 0x403   :  { %6772 = vmatpush3.bf16.msra.mxu1 %v6771_v20  ;;  %v5902_v24 = vpop.f32.mrb[10].mxu0  ;;  %v5222_v20 = vld [vmem:[%s10608_s4 + $0x1f8] sm:$0xff]  ;;  %6798 = vmatprep.subr.bf16.mxu0 %v6797_v15  ;;  %v5227_v15 = vld [vmem:[%s10610_s5 + $0xa0] sm:$0xff] }
 0x404   :  { %6497 = vmatprep.subr.mxu1 %v7487_v36  ;;  %v5903_v25 = vpop.f32.mrb[11].mxu0  ;;  %v6801_v22 = vpack.c.bf16 %v5222_v20, %v5221_v19  ;;  %v5234_v19 = vld [vmem:[%s10610_s5 + $0xd8] sm:$0xff]  ;;  %v6811_v20 = vpack.c.bf16 %v5229_v17, %v5227_v15  ;;  %v5281_v17 = vld [vmem:[%s10606_s2 + $0x2f0] sm:$0xff] }
 0x405   :  { %v5904_v26 = vadd.f32 %v5903_v25, %v5902_v24  ;;  %v5206_v24 = vld [vmem:[%s10608_s4 + $0x178] sm:$0xff] }
 0x406   :  { %1083 = vmatmul.mubr.f32.vlgmr.msra.gmra.mrb[16].mxu1 %v7736_v33  ;;  %6800 = vmatpush3.bf16.msra.mxu0 %v6799_v21  ;;  %v6813_v21 = vpack.c.bf16 %v5234_v19, %v5232_v18  ;;  %v5282_v18 = vld [vmem:[%s10606_s2 + $0x2f8] sm:$0xff] }
 0x407   :  { %1087 = vmatprep.mubr.f32.mxu1 %v7741_v34  ;;  %6802 = vmatprep.subr.bf16.mxu0 %v6801_v22  ;;  %v5231_v22 = vld [vmem:[%s10610_s5 + $0xc0] sm:$0xff]  ;;  %v6849_v19 = vpack.c.bf16 %v5282_v18, %v5281_v17 }
 0x40a   :  { %1088 = vmatmul.mubr.f32.gmra.mrb[18].mxu1 %v7749_v35 }
 0x40b   :  { %6499 = vmatprep.mubr.msk.f32.mxu1 %vm7488_vm0, %v7487_v36 }
 0x4b9   :  { %v8138_v27 = vpop.f32.mrb[12].mxu1 }
 0x4ba   :  { %v8140_v28 = vpop.f32.mrb[13].mxu1 }
 0x4bd   :  { %v8142_v29 = vpop.f32.mrb[14].mxu1 }
 0x4be   :  { %v8144_v30 = vpop.f32.mrb[15].mxu1 }
 0x4d9   :  { %v5937_v31 = vpop.f32.mrb[16].mxu1 }
 0x4da   :  { %v5938_v32 = vpop.f32.mrb[17].mxu1 }
 0x4db   :  { %v5939_v37 = vadd.f32 %v5938_v32, %v5937_v31  ;;  %v5126_v32 = vld [vmem:[%s10609_s1 + $0x18] sm:$0xff] }
 0x4dd   :  { %v5940_v38 = vpop.f32.mrb[18].mxu1  ;;  %6498 = vmatpush3.xpose.msk.msra.mxu1 %vm372_vm1, %v5939_v37 }
 0x4de   :  { %v5941_v39 = vpop.f32.mrb[19].mxu1  ;;  %6502 = vmatprep.subr.mxu1 %v7487_v36 }
 0x4df   :  { %v5942_v40 = vadd.f32 %v5941_v39, %v5940_v38  ;;  %v5244_v38 = vadd.f32 -1.0, %v5126_v32 }
 0x4e0   :  { %6500 = vmatmul.mubr.msk.f32.vlgmr.msra.gmra.mrb[20].mxu1 %vm372_vm1, %v5901_v23  ;;  %v5205_v23 = vld [vmem:[%s10608_s4 + $0x170] sm:$0xff] }
 0x4e1   :  { %6503 = vmatpush3.xpose.msk.msra.mxu1 %vm372_vm1, %v5942_v40  ;;  %6504 = vmatprep.mubr.msk.f32.mxu1 %vm7488_vm0, %v7487_v36  ;;  %v6803_v25 = vpack.c.bf16 %v5206_v24, %v5205_v23  ;;  %v5233_v23 = vld [vmem:[%s10610_s5 + $0xd0] sm:$0xff]  ;;  %v5236_v24 = vld [vmem:[%s10610_s5 + $0xe8] sm:$0xff] }
 0x4e2   :  { %6507 = vmatprep.subr.mxu1 %v7487_v36 }
 0x4e3   :  { %6804 = vmatpush3.bf16.msra.mxu0 %v6803_v25  ;;  %v5238_v25 = vld [vmem:[%s10610_s5 + $0xf8] sm:$0xff] }
 0x4e4   :  { %6505 = vmatmul.mubr.msk.f32.vlgmr.msra.gmra.mrb[22].mxu1 %vm372_vm1, %v5904_v26  ;;  %v5125_v26 = vld [vmem:[%s10609_s1 + $0x10] sm:$0xff] }
 0x4e5   :  { %6509 = vmatprep.mubr.msk.f32.mxu1 %vm7488_vm0, %v7487_v36  ;;  %v5243_v31 = vadd.f32 -1.0, %v5125_v26 }
 0x4e6   :  { %1158 = vmatmul.mubr.f32.vlgmr.msra.gmra.mrb[12].mxu0 %v7736_v33 }
 0x4e7   :  { %1162 = vmatprep.mubr.f32.mxu0 %v7741_v34  ;;  %v1324_v37 = vmul.f32 1e+09, %v5243_v31  ;;  %v1325_v34 = vmul.f32 1e+09, %v5244_v38  ;;  %v6817_v31 = vpack.c.bf16 %v5238_v25, %v5236_v24  ;;  %v8431_v24 = vld [vmem:[%s10607_s0 + $0x18] sm:$0xff]  ;;  %v8437_v25 = vld [vmem:[%s10607_s0 + $0x10] sm:$0xff] }
 0x4ea   :  { %1163 = vmatmul.mubr.f32.gmra.mrb[14].mxu0 %v7749_v35 }
 0x4eb   :  { %1800 = vmatprep.mubr.f32.mxu0 %v7702_v16 }
 0x5b3   :  { %v1240_v39 = vpop.f32.mrb[20].mxu1 }
 0x5b4   :  { %v1320_v40 = vmul.f32 0.125, %v1240_v39  ;;  %v6501_v33 = vpop.f32.mrb[21].mxu1  ;;  %v5299_v39 = vld [vmem:[%s10605_s3 + $0x280] sm:$0xff] }
 0x5b6   :  { %v1326_v41 = vadd.f32 %v1324_v37, %v1320_v40  ;;  %v5237_v37 = vld [vmem:[%s10610_s5 + $0xf0] sm:$0xff]  ;;  %v5300_v40 = vld [vmem:[%s10605_s3 + $0x288] sm:$0xff] }
 0x5b7   :  { %v1316_v42 = vpop.f32.mrb[22].mxu1  ;;  %v6853_v33 = vpack.c.bf16 %v5300_v40, %v5299_v39 }
 0x5b8   :  { %v1321_v35 = vmul.f32 0.125, %v1316_v42  ;;  %v1328_v16 = vsel %vm533_vm2, %v1326_v41, -inf  ;;  %v6506_v43 = vpop.f32.mrb[23].mxu1 }
 0x5b9   :  { %1329 = vmax.xlane.f32.xlu0 %v1328_v16  ;;  %v5975_v56 = vpop.f32.mrb[12].mxu0  ;;  %v5252_v16 = vld [vmem:[%s10606_s2 + $0x208] sm:$0xff] }
 0x5ba   :  { %v1327_v44 = vadd.f32 %v1325_v34, %v1321_v35  ;;  %v5976_v57 = vpop.f32.mrb[13].mxu0  ;;  %v5268_v34 = vld [vmem:[%s10606_s2 + $0x288] sm:$0xff]  ;;  %v5251_v35 = vld [vmem:[%s10606_s2 + $0x200] sm:$0xff] }
 0x5bb   :  { %v5977_v58 = vadd.f32 %v5976_v57, %v5975_v56  ;;  %v6823_v43 = vpack.c.bf16 %v5252_v16, %v5251_v35  ;;  %v5273_v56 = vld [vmem:[%s10606_s2 + $0x2b0] sm:$0xff]  ;;  %v5274_v57 = vld [vmem:[%s10606_s2 + $0x2b8] sm:$0xff]  ;;  %v5304_v35 = vld [vmem:[%s10605_s3 + $0x2a8] sm:$0xff] }
 0x5bc   :  { %v1331_v45 = vsel %vm533_vm2, %v1327_v44, -inf }
 0x5bd   :  { %1332 = vmax.xlane.f32.xlu1 %v1331_v45  ;;  %6508 = vmatpush3.msra.mxu1 %v5977_v58  ;;  %v5978_v59 = vpop.f32.mrb[14].mxu0  ;;  %v5270_v45 = vld [vmem:[%s10606_s2 + $0x298] sm:$0xff]  ;;  %v6833_v58 = vpack.c.bf16 %v5274_v57, %v5273_v56  ;;  %v5308_v56 = vld [vmem:[%s10605_s3 + $0x2c8] sm:$0xff] }
 0x5be   :  { %6512 = vmatprep.subr.mxu1 %v7487_v36  ;;  %v5979_v60 = vpop.f32.mrb[15].mxu0 }
 0x5bf   :  { %v5980_v61 = vadd.f32 %v5979_v60, %v5978_v59  ;;  %v5257_v59 = vld [vmem:[%s10606_s2 + $0x230] sm:$0xff]  ;;  %v5258_v60 = vld [vmem:[%s10606_s2 + $0x238] sm:$0xff] }
 0x646   :  { %v1330_v46 = vpop.xlane.xlu0 %1329 }
 0x647   :  { %v1334_v47 = vsub.f32 %v1326_v41, %v1330_v46  ;;  %v5267_v41 = vld [vmem:[%s10606_s2 + $0x280] sm:$0xff] }
 0x648   :  { %v6821_v42 = vpack.c.bf16 %v5268_v34, %v5267_v41  ;;  %v5286_v41 = vld [vmem:[%s10605_s3 + $0x218] sm:$0xff] }
 0x649   :  { %v1336_v48 = vmul.f32 1.442695, %v1334_v47  ;;  %v5253_v47 = vld [vmem:[%s10606_s2 + $0x210] sm:$0xff] }
 0x64a   :  { %v1333_v49 = vpop.xlane.xlu1 %1332  ;;  %6822 = vmatprep.subr.bf16.mxu0 %v6821_v42  ;;  %v5303_v42 = vld [vmem:[%s10605_s3 + $0x2a0] sm:$0xff] }
 0x64b   :  { %7407 = vpow2.f32 %v1336_v48  ;;  %v1335_v50 = vsub.f32 %v1327_v44, %v1333_v49  ;;  %6824 = vmatpush3.bf16.msra.mxu0 %v6823_v43  ;;  %v5269_v44 = vld [vmem:[%s10606_s2 + $0x290] sm:$0xff]  ;;  %v5254_v48 = vld [vmem:[%s10606_s2 + $0x218] sm:$0xff] }
 0x64c   :  { %v6825_v46 = vpack.c.bf16 %v5270_v45, %v5269_v44  ;;  %v6827_v49 = vpack.c.bf16 %v5254_v48, %v5253_v47  ;;  %v6861_v44 = vpack.c.bf16 %v5304_v35, %v5303_v42  ;;  %v5287_v45 = vld [vmem:[%s10605_s3 + $0x220] sm:$0xff]  ;;  %v5305_v48 = vld [vmem:[%s10605_s3 + $0x2b0] sm:$0xff] }
 0x64d   :  { %v1338_v51 = vmul.f32 1.442695, %v1335_v50  ;;  %v5271_v50 = vld [vmem:[%s10606_s2 + $0x2a0] sm:$0xff] }
 0x64e   :  { %6826 = vmatprep.subr.bf16.mxu0 %v6825_v46  ;;  %v5288_v46 = vld [vmem:[%s10605_s3 + $0x228] sm:$0xff]  ;;  %v5331_v35 = vld [vmem:[%s10608_s4 + $0x280] sm:$0xff] }
 0x64f   :  { %7409 = vpow2.f32 %v1338_v51  ;;  %6828 = vmatpush3.bf16.msra.mxu0 %v6827_v49  ;;  %v5272_v51 = vld [vmem:[%s10606_s2 + $0x2a8] sm:$0xff]  ;;  %v5306_v49 = vld [vmem:[%s10605_s3 + $0x2b8] sm:$0xff] }
 0x655   :  { %v7408_v52 = vpop.eup %7407 }
 0x656   :  { %v1340_v53 = vsel %vm533_vm2, %v7408_v52, 0.0 }
 0x657   :  { %1341 = vadd.xlane.f32.xlu0 %v1340_v53  ;;  %v5255_v53 = vld [vmem:[%s10606_s2 + $0x220] sm:$0xff] }
 0x659   :  { %v7410_v54 = vpop.eup %7409 }
 0x65a   :  { %v1343_v55 = vsel %vm533_vm2, %v7410_v54, 0.0 }
 0x65b   :  { %1344 = vadd.xlane.f32.xlu1 %v1343_v55 }
 0x6e4   :  { %v1342_v62 = vpop.xlane.xlu0 %1341 }
 0x6e5   :  { %7411 = vrcp.f32 %v1342_v62  ;;  %v5275_v62 = vld [vmem:[%s10606_s2 + $0x2c0] sm:$0xff] }
 0x6e8   :  { %v1345_v63 = vpop.xlane.xlu1 %1344 }
 0x6e9   :  { %7413 = vrcp.f32 %v1345_v63  ;;  %v5276_v63 = vld [vmem:[%s10606_s2 + $0x2c8] sm:$0xff] }
 0x6ef   :  { %v7412_v0 = vpop.eup %7411 }
 0x6f0   :  { %v1348_v3 = vmul.f32 %v7412_v0, %v7408_v52  ;;  %v6829_v52 = vpack.c.bf16 %v5272_v51, %v5271_v50  ;;  %v6837_v0 = vpack.c.bf16 %v5276_v63, %v5275_v62  ;;  %v6863_v51 = vpack.c.bf16 %v5288_v46, %v5287_v45  ;;  %v5310_v62 = vld [vmem:[%s10605_s3 + $0x2d8] sm:$0xff]  ;;  %v5316_v45 = vld [vmem:[%s10608_s4 + $0x208] sm:$0xff]  ;;  %v5333_v46 = vld [vmem:[%s10608_s4 + $0x290] sm:$0xff] }
 0x6f2   :  { %v1350_v4 = vmul.f32 %v5125_v26, %v1348_v3  ;;  %v6815_v26 = vpack.c.bf16 %v5233_v23, %v5231_v22  ;;  %6830 = vmatprep.subr.bf16.mxu0 %v6829_v52  ;;  %v6839_v3 = vpack.c.bf16 %v5260_v2, %v5259_v1  ;;  %v8425_v23 = vld [vmem:[%s10607_s0] sm:$0xff]  ;;  %v6865_v52 = vpack.c.bf16 %v5306_v49, %v5305_v48  ;;  %v5293_v1 = vld [vmem:[%s10605_s3 + $0x250] sm:$0xff]  ;;  %v5294_v2 = vld [vmem:[%s10605_s3 + $0x258] sm:$0xff] }
 0x6f3   :  { %v7414_v8 = vpop.eup %7413 }
 0x6f4   :  { %v1349_v11 = vmul.f32 %v7414_v8, %v7410_v54  ;;  %6510 = vmatmul.mubr.msk.f32.vlgmr.msra.gmra.mrb[24].mxu1 %vm533_vm2, %v1350_v4  ;;  %v5256_v54 = vld [vmem:[%s10606_s2 + $0x228] sm:$0xff]  ;;  %v5277_v4 = vld [vmem:[%s10606_s2 + $0x2d0] sm:$0xff]  ;;  %v5262_v8 = vld [vmem:[%s10606_s2 + $0x258] sm:$0xff] }
 0x6f5   :  { %6513 = vmatpush3.msra.mxu1 %v5980_v61  ;;  %6514 = vmatprep.mubr.msk.f32.mxu1 %vm7488_vm0, %v7487_v36  ;;  %v6831_v55 = vpack.c.bf16 %v5256_v54, %v5255_v53  ;;  %v6835_v61 = vpack.c.bf16 %v5258_v60, %v5257_v59  ;;  %v6843_v9 = vpack.c.bf16 %v5262_v8, %v5261_v7  ;;  %v5289_v53 = vld [vmem:[%s10605_s3 + $0x230] sm:$0xff]  ;;  %v5290_v54 = vld [vmem:[%s10605_s3 + $0x238] sm:$0xff]  ;;  %v5291_v59 = vld [vmem:[%s10605_s3 + $0x240] sm:$0xff] }
 0x6f6   :  { %v1351_v13 = vmul.f32 %v5126_v32, %v1349_v11  ;;  %6806 = vmatprep.subr.bf16.mxu1 %v6805_v5  ;;  %v5235_v32 = vld [vmem:[%s10610_s5 + $0xe0] sm:$0xff]  ;;  %v5278_v5 = vld [vmem:[%s10606_s2 + $0x2d8] sm:$0xff]  ;;  %v5280_v11 = vld [vmem:[%s10606_s2 + $0x2e8] sm:$0xff]  ;;  %v6867_v57 = vpack.c.bf16 %v5290_v54, %v5289_v53 }
 0x6f7   :  { %v6819_v38 = vpack.c.bf16 %v5237_v37, %v5235_v32  ;;  %6832 = vmatpush3.bf16.msra.mxu0 %v6831_v55  ;;  %v6841_v6 = vpack.c.bf16 %v5278_v5, %v5277_v4  ;;  %v5284_v32 = vld [vmem:[%s10605_s3 + $0x208] sm:$0xff]  ;;  %v5301_v37 = vld [vmem:[%s10605_s3 + $0x290] sm:$0xff]  ;;  %v5307_v55 = vld [vmem:[%s10605_s3 + $0x2c0] sm:$0xff]  ;;  %v6875_v5 = vpack.c.bf16 %v5294_v2, %v5293_v1 }
 0x6f8   :  { %6515 = vmatmul.mubr.msk.f32.vlgmr.msra.gmra.mrb[26].mxu1 %vm533_vm2, %v1351_v13  ;;  %6834 = vmatprep.subr.bf16.mxu0 %v6833_v58  ;;  %v5263_v13 = vld [vmem:[%s10606_s2 + $0x260] sm:$0xff]  ;;  %v6869_v58 = vpack.c.bf16 %v5308_v56, %v5307_v55  ;;  %v5292_v60 = vld [vmem:[%s10605_s3 + $0x248] sm:$0xff] }
 0x6f9   :  { %6808 = vmatpush1.bf16.msra.mxu1 %v6807_v12  ;;  %1568 = vmatprep.mubr.f32.mxu1 %v7487_v36  ;;  %v6845_v12 = vpack.c.bf16 %v5280_v11, %v5279_v10  ;;  %v6871_v63 = vpack.c.bf16 %v5292_v60, %v5291_v59  ;;  %v5312_v4 = vld [vmem:[%s10605_s3 + $0x2e8] sm:$0xff]  ;;  %v5295_v7 = vld [vmem:[%s10605_s3 + $0x260] sm:$0xff]  ;;  %v5314_v10 = vld [vmem:[%s10605_s3 + $0x2f8] sm:$0xff] }
 0x6fa   :  { %6810 = vmatprep.subr.bf16.mxu1 %v6809_v14  ;;  %v5264_v14 = vld [vmem:[%s10606_s2 + $0x268] sm:$0xff]  ;;  %v5319_v56 = vld [vmem:[%s10608_s4 + $0x220] sm:$0xff]  ;;  %v5338_v59 = vld [vmem:[%s10608_s4 + $0x2b8] sm:$0xff] }
 0x6fb   :  { %6836 = vmatpush3.bf16.msra.mxu0 %v6835_v61  ;;  %v6847_v15 = vpack.c.bf16 %v5264_v14, %v5263_v13  ;;  %v5309_v61 = vld [vmem:[%s10605_s3 + $0x2d0] sm:$0xff]  ;;  %v5296_v8 = vld [vmem:[%s10605_s3 + $0x268] sm:$0xff]  ;;  %v5298_v14 = vld [vmem:[%s10605_s3 + $0x278] sm:$0xff] }
 0x6fc   :  { %6838 = vmatprep.subr.bf16.mxu0 %v6837_v0  ;;  %v6873_v0 = vpack.c.bf16 %v5310_v62, %v5309_v61  ;;  %v6879_v11 = vpack.c.bf16 %v5296_v8, %v5295_v7  ;;  %v5297_v13 = vld [vmem:[%s10605_s3 + $0x270] sm:$0xff]  ;;  %v5336_v53 = vld [vmem:[%s10608_s4 + $0x2a8] sm:$0xff]  ;;  %v5342_v7 = vld [vmem:[%s10608_s4 + $0x2d8] sm:$0xff] }
 0x6fd   :  { %6812 = vmatpush1.bf16.msra.mxu1 %v6811_v20  ;;  %v5265_v20 = vld [vmem:[%s10606_s2 + $0x270] sm:$0xff]  ;;  %v5340_v1 = vld [vmem:[%s10608_s4 + $0x2c8] sm:$0xff] }
 0x6fe   :  { %6814 = vmatprep.subr.bf16.mxu1 %v6813_v21  ;;  %v5266_v21 = vld [vmem:[%s10606_s2 + $0x278] sm:$0xff]  ;;  %v5321_v62 = vld [vmem:[%s10608_s4 + $0x230] sm:$0xff] }
 0x6ff   :  { %6840 = vmatpush3.bf16.msra.mxu0 %v6839_v3  ;;  %v6851_v22 = vpack.c.bf16 %v5266_v21, %v5265_v20  ;;  %v5311_v3 = vld [vmem:[%s10605_s3 + $0x2e0] sm:$0xff] }
 0x700   :  { %6842 = vmatprep.subr.bf16.mxu0 %v6841_v6  ;;  %v6877_v6 = vpack.c.bf16 %v5312_v4, %v5311_v3  ;;  %v5323_v4 = vld [vmem:[%s10608_s4 + $0x240] sm:$0xff] }
 0x701   :  { %6816 = vmatpush1.bf16.msra.mxu1 %v6815_v26  ;;  %v8443_v26 = vld [vmem:[%s10607_s0 + $0x8] sm:$0xff] }
 0x702   :  { %6818 = vmatprep.subr.bf16.mxu1 %v6817_v31  ;;  %v5283_v31 = vld [vmem:[%s10605_s3 + $0x200] sm:$0xff] }
 0x703   :  { %6844 = vmatpush3.bf16.msra.mxu0 %v6843_v9  ;;  %v6855_v39 = vpack.c.bf16 %v5284_v32, %v5283_v31  ;;  %v5313_v9 = vld [vmem:[%s10605_s3 + $0x2f0] sm:$0xff] }
 0x704   :  { %6846 = vmatprep.subr.bf16.mxu0 %v6845_v12  ;;  %v6881_v12 = vpack.c.bf16 %v5314_v10, %v5313_v9  ;;  %v5325_v10 = vld [vmem:[%s10608_s4 + $0x250] sm:$0xff] }
 0x705   :  { %6820 = vmatpush1.bf16.msra.mxu1 %v6819_v38  ;;  %v5302_v38 = vld [vmem:[%s10605_s3 + $0x298] sm:$0xff] }
 0x706   :  { %6854 = vmatprep.subr.bf16.mxu1 %v6853_v33  ;;  %v6857_v40 = vpack.c.bf16 %v5302_v38, %v5301_v37  ;;  %v5285_v33 = vld [vmem:[%s10605_s3 + $0x210] sm:$0xff] }
 0x707   :  { %6848 = vmatpush3.bf16.msra.mxu0 %v6847_v15  ;;  %v6859_v43 = vpack.c.bf16 %v5286_v41, %v5285_v33  ;;  %v6883_v15 = vpack.c.bf16 %v5298_v14, %v5297_v13  ;;  %v5344_v13 = vld [vmem:[%s10608_s4 + $0x2e8] sm:$0xff] }
 0x708   :  { %6850 = vmatprep.subr.bf16.mxu0 %v6849_v19 }
 0x70b   :  { %6852 = vmatpush3.bf16.msra.mxu0 %v6851_v22 }
 0x70e   :  { %1801 = vmatmul.mubr.f32.vlgmr.msra.gmra.mrb[16].mxu0 %v8425_v23 }
 0x70f   :  { %1805 = vmatprep.mubr.f32.mxu0 %v8431_v24 }
 0x712   :  { %1806 = vmatmul.mubr.f32.gmra.mrb[18].mxu0 %v8437_v25 }
 0x713   :  { %1950 = vmatprep.mubr.f32.mxu0 %v8443_v26 }
 0x7c7   :  { %v1421_v34 = vpop.f32.mrb[24].mxu1 }
 0x7c8   :  { %v6511_v16 = vpop.f32.mrb[25].mxu1  ;;  %5247 = vmatmul.mubr.msk.f32.vlgmr.msra.gmra.mrb[28].mxu1 %vm372_vm1, %v1421_v34 }
 0x7c9   :  { %6856 = vmatpush3.bf16.msra.mxu1 %v6855_v39  ;;  %1574 = vmatprep.mubr.f32.mxu1 %v7487_v36  ;;  %v5332_v16 = vld [vmem:[%s10608_s4 + $0x288] sm:$0xff] }
 0x7ca   :  { %6858 = vmatprep.subr.bf16.mxu1 %v6857_v40 }
 0x7cb   :  { %v1494_v47 = vpop.f32.mrb[26].mxu1 }
 0x7cc   :  { %v6516_v50 = vpop.f32.mrb[27].mxu1  ;;  %5248 = vmatmul.mubr.msk.f32.gmra.mrb[30].mxu1 %vm372_vm1, %v1494_v47  ;;  %v5334_v47 = vld [vmem:[%s10608_s4 + $0x298] sm:$0xff] }
 0x7cd   :  { %6860 = vmatpush3.bf16.msra.mxu1 %v6859_v43  ;;  %1875 = vmatprep.mubr.f32.mxu1 %v8443_v26  ;;  %v5315_v43 = vld [vmem:[%s10608_s4 + $0x200] sm:$0xff]  ;;  %v6889_v49 = vpack.c.bf16 %v5334_v47, %v5333_v46  ;;  %v5317_v50 = vld [vmem:[%s10608_s4 + $0x210] sm:$0xff] }
 0x7ce   :  { %6862 = vmatprep.subr.bf16.mxu1 %v6861_v44  ;;  %v6885_v44 = vpack.c.bf16 %v5332_v16, %v5331_v35  ;;  %v6887_v48 = vpack.c.bf16 %v5316_v45, %v5315_v43 }
 0x7d0   :  { %6886 = vmatprep.subr.bf16.mxu0 %v6885_v44 }
 0x7d1   :  { %6864 = vmatpush3.bf16.msra.mxu1 %v6863_v51  ;;  %v5318_v51 = vld [vmem:[%s10608_s4 + $0x218] sm:$0xff]  ;;  %6888 = vmatpush3.bf16.msra.mxu0 %v6887_v48 }
 0x7d2   :  { %6866 = vmatprep.subr.bf16.mxu1 %v6865_v52  ;;  %v5335_v52 = vld [vmem:[%s10608_s4 + $0x2a0] sm:$0xff]  ;;  %v6891_v54 = vpack.c.bf16 %v5318_v51, %v5317_v50  ;;  %6890 = vmatprep.subr.bf16.mxu0 %v6889_v49 }
 0x7d3   :  { %v6893_v55 = vpack.c.bf16 %v5336_v53, %v5335_v52 }
 0x7d5   :  { %6868 = vmatpush3.bf16.msra.mxu1 %v6867_v57  ;;  %v5320_v57 = vld [vmem:[%s10608_s4 + $0x228] sm:$0xff]  ;;  %6892 = vmatpush3.bf16.msra.mxu0 %v6891_v54 }
 0x7d6   :  { %6870 = vmatprep.subr.bf16.mxu1 %v6869_v58  ;;  %v5337_v58 = vld [vmem:[%s10608_s4 + $0x2b0] sm:$0xff]  ;;  %v6895_v60 = vpack.c.bf16 %v5320_v57, %v5319_v56  ;;  %6894 = vmatprep.subr.bf16.mxu0 %v6893_v55 }
 0x7d7   :  { %v6897_v61 = vpack.c.bf16 %v5338_v59, %v5337_v58 }
 0x7d9   :  { %6872 = vmatpush3.bf16.msra.mxu1 %v6871_v63  ;;  %v5322_v63 = vld [vmem:[%s10608_s4 + $0x238] sm:$0xff]  ;;  %6896 = vmatpush3.bf16.msra.mxu0 %v6895_v60 }
 0x7da   :  { %6874 = vmatprep.subr.bf16.mxu1 %v6873_v0  ;;  %v5339_v0 = vld [vmem:[%s10608_s4 + $0x2c0] sm:$0xff]  ;;  %v6899_v2 = vpack.c.bf16 %v5322_v63, %v5321_v62  ;;  %6898 = vmatprep.subr.bf16.mxu0 %v6897_v61 }
 0x7db   :  { %v6901_v3 = vpack.c.bf16 %v5340_v1, %v5339_v0 }
 0x7dd   :  { %6876 = vmatpush3.bf16.msra.mxu1 %v6875_v5  ;;  %v5324_v5 = vld [vmem:[%s10608_s4 + $0x248] sm:$0xff]  ;;  %6900 = vmatpush3.bf16.msra.mxu0 %v6899_v2 }
 0x7de   :  { %6878 = vmatprep.subr.bf16.mxu1 %v6877_v6  ;;  %v5341_v6 = vld [vmem:[%s10608_s4 + $0x2d0] sm:$0xff]  ;;  %v6903_v8 = vpack.c.bf16 %v5324_v5, %v5323_v4  ;;  %6902 = vmatprep.subr.bf16.mxu0 %v6901_v3 }
 0x7df   :  { %v6905_v9 = vpack.c.bf16 %v5342_v7, %v5341_v6 }
 0x7e1   :  { %6880 = vmatpush3.bf16.msra.mxu1 %v6879_v11  ;;  %v6021_v17 = vpop.f32.mrb[16].mxu0  ;;  %v5326_v11 = vld [vmem:[%s10608_s4 + $0x258] sm:$0xff]  ;;  %6904 = vmatpush3.bf16.msra.mxu0 %v6903_v8 }
 0x7e2   :  { %6882 = vmatprep.subr.bf16.mxu1 %v6881_v12  ;;  %v6022_v18 = vpop.f32.mrb[17].mxu0  ;;  %v5343_v12 = vld [vmem:[%s10608_s4 + $0x2e0] sm:$0xff]  ;;  %v6907_v14 = vpack.c.bf16 %v5326_v11, %v5325_v10  ;;  %6906 = vmatprep.subr.bf16.mxu0 %v6905_v9  ;;  %v5348_v9 = vld [vmem:[%s10610_s5 + $0x108] sm:$0xff]  ;;  %v5350_v10 = vld [vmem:[%s10610_s5 + $0x118] sm:$0xff] }
 0x7e3   :  { %v6023_v19 = vadd.f32 %v6022_v18, %v6021_v17  ;;  %v5327_v17 = vld [vmem:[%s10608_s4 + $0x260] sm:$0xff]  ;;  %v5328_v18 = vld [vmem:[%s10608_s4 + $0x268] sm:$0xff] }
 0x7e5   :  { %6884 = vmatpush3.bf16.msra.mxu1 %v6883_v15  ;;  %v6024_v20 = vpop.f32.mrb[18].mxu0  ;;  %v6909_v15 = vpack.c.bf16 %v5344_v13, %v5343_v12  ;;  %6908 = vmatpush3.bf16.msra.mxu0 %v6907_v14  ;;  %v6917_v13 = vpack.c.bf16 %v5350_v10, %v5348_v9  ;;  %v5347_v14 = vld [vmem:[%s10610_s5 + $0x100] sm:$0xff]  ;;  %v5398_v9 = vld [vmem:[%s10606_s2 + $0x3b8] sm:$0xff] }
 0x7e6   :  { %6517 = vmatprep.subr.mxu1 %v7487_v36  ;;  %v6025_v21 = vpop.f32.mrb[19].mxu0 }
 0x7e7   :  { %v6026_v22 = vadd.f32 %v6025_v21, %v6024_v20  ;;  %v5346_v20 = vld [vmem:[%s10608_s4 + $0x2f8] sm:$0xff]  ;;  %v6911_v21 = vpack.c.bf16 %v5328_v18, %v5327_v17  ;;  %6910 = vmatprep.subr.bf16.mxu0 %v6909_v15  ;;  %v5349_v15 = vld [vmem:[%s10610_s5 + $0x110] sm:$0xff]  ;;  %v5352_v18 = vld [vmem:[%s10610_s5 + $0x128] sm:$0xff] }
 0x7e8   :  { %1876 = vmatmul.mubr.f32.vlgmr.msra.gmra.mrb[32].mxu1 %v8425_v23 }
 0x7e9   :  { %1880 = vmatprep.mubr.f32.mxu1 %v8431_v24  ;;  %6912 = vmatpush3.bf16.msra.mxu0 %v6911_v21  ;;  %v6919_v21 = vpack.c.bf16 %v5349_v15, %v5347_v14  ;;  %v5399_v14 = vld [vmem:[%s10606_s2 + $0x3c0] sm:$0xff]  ;;  %v5400_v15 = vld [vmem:[%s10606_s2 + $0x3c8] sm:$0xff] }
 0x7ec   :  { %1881 = vmatmul.mubr.f32.gmra.mrb[34].mxu1 %v8437_v25 }
 0x7ed   :  { %6519 = vmatprep.mubr.msk.f32.mxu1 %vm7488_vm0, %v7487_v36 }
 0x89b   :  { %v8546_v31 = vpop.f32.mrb[28].mxu1 }
 0x89c   :  { %v8548_v32 = vpop.f32.mrb[29].mxu1 }
 0x89f   :  { %v8550_v37 = vpop.f32.mrb[30].mxu1 }
 0x8a0   :  { %v8552_v38 = vpop.f32.mrb[31].mxu1 }
 0x8bb   :  { %v6059_v39 = vpop.f32.mrb[32].mxu1 }
 0x8bc   :  { %v6060_v40 = vpop.f32.mrb[33].mxu1 }
 0x8bd   :  { %v6061_v33 = vadd.f32 %v6060_v40, %v6059_v39  ;;  %v5329_v39 = vld [vmem:[%s10608_s4 + $0x270] sm:$0xff]  ;;  %v5330_v40 = vld [vmem:[%s10608_s4 + $0x278] sm:$0xff] }
 0x8bf   :  { %v6062_v41 = vpop.f32.mrb[34].mxu1  ;;  %6518 = vmatpush3.xpose.msk.msra.mxu1 %vm372_vm1, %v6061_v33  ;;  %v6915_v33 = vpack.c.bf16 %v5330_v40, %v5329_v39  ;;  %v5351_v40 = vld [vmem:[%s10610_s5 + $0x120] sm:$0xff] }
 0x8c0   :  { %v6063_v34 = vpop.f32.mrb[35].mxu1  ;;  %6522 = vmatprep.subr.mxu1 %v7487_v36 }
 0x8c1   :  { %v6064_v42 = vadd.f32 %v6063_v34, %v6062_v41  ;;  %v5249_v41 = vld [vmem:[%s10609_s1 + $0x20] sm:$0xff] }
 0x8c2   :  { %6520 = vmatmul.mubr.msk.f32.vlgmr.msra.gmra.mrb[36].mxu1 %vm372_vm1, %v6023_v19  ;;  %v5345_v19 = vld [vmem:[%s10608_s4 + $0x2f0] sm:$0xff]  ;;  %v5367_v34 = vadd.f32 -1.0, %v5249_v41 }
 0x8c3   :  { %6523 = vmatpush3.xpose.msk.msra.mxu1 %vm372_vm1, %v6064_v42  ;;  %6524 = vmatprep.mubr.msk.f32.mxu1 %vm7488_vm0, %v7487_v36  ;;  %v5250_v42 = vld [vmem:[%s10609_s1 + $0x28] sm:$0xff] }
 0x8c4   :  { %6527 = vmatprep.subr.mxu1 %v7487_v36  ;;  %v2117_v35 = vmul.f32 1e+09, %v5367_v34  ;;  %v5368_v16 = vadd.f32 -1.0, %v5250_v42  ;;  %v5358_v34 = vld [vmem:[%s10610_s5 + $0x158] sm:$0xff] }
 0x8c6   :  { %6525 = vmatmul.mubr.msk.f32.vlgmr.msra.gmra.mrb[38].mxu1 %vm372_vm1, %v6026_v22  ;;  %v6913_v22 = vpack.c.bf16 %v5346_v20, %v5345_v19  ;;  %v2118_v47 = vmul.f32 1e+09, %v5368_v16  ;;  %v5354_v19 = vld [vmem:[%s10610_s5 + $0x138] sm:$0xff]  ;;  %v5355_v16 = vld [vmem:[%s10610_s5 + $0x140] sm:$0xff] }
 0x8c7   :  { %6529 = vmatprep.mubr.msk.f32.mxu1 %vm7488_vm0, %v7487_v36  ;;  %v6921_v39 = vpack.c.bf16 %v5354_v19, %v5352_v18  ;;  %v5383_v18 = vld [vmem:[%s10606_s2 + $0x340] sm:$0xff]  ;;  %v5384_v19 = vld [vmem:[%s10606_s2 + $0x348] sm:$0xff] }
 0x8c8   :  { %6914 = vmatprep.subr.bf16.mxu0 %v6913_v22 }
 0x8c9   :  { %6916 = vmatpush3.bf16.msra.mxu0 %v6915_v33  ;;  %v5353_v33 = vld [vmem:[%s10610_s5 + $0x130] sm:$0xff] }
 0x8cc   :  { %1951 = vmatmul.mubr.f32.vlgmr.msra.gmra.mrb[20].mxu0 %v8425_v23 }
 0x8cd   :  { %1955 = vmatprep.mubr.f32.mxu0 %v8431_v24 }
 0x8d0   :  { %1956 = vmatmul.mubr.f32.gmra.mrb[22].mxu0 %v8437_v25 }
 0x8d1   :  { %2593 = vmatprep.mubr.f32.mxu0 %v8443_v26 }
 0x995   :  { %v2033_v43 = vpop.f32.mrb[36].mxu1 }
 0x996   :  { %v2113_v44 = vmul.f32 0.125, %v2033_v43  ;;  %v6521_v45 = vpop.f32.mrb[37].mxu1  ;;  %v5357_v43 = vld [vmem:[%s10610_s5 + $0x150] sm:$0xff] }
 0x997   :  { %v5362_v45 = vld [vmem:[%s10610_s5 + $0x178] sm:$0xff] }
 0x998   :  { %v2119_v46 = vadd.f32 %v2117_v35, %v2113_v44  ;;  %v5360_v44 = vld [vmem:[%s10610_s5 + $0x168] sm:$0xff] }
 0x999   :  { %v2109_v48 = vpop.f32.mrb[38].mxu1 }
 0x99a   :  { %v2114_v49 = vmul.f32 0.125, %v2109_v48  ;;  %v2121_v50 = vsel %vm533_vm2, %v2119_v46, -inf  ;;  %v6526_v51 = vpop.f32.mrb[39].mxu1  ;;  %v5359_v48 = vld [vmem:[%s10610_s5 + $0x160] sm:$0xff] }
 0x99b   :  { %2122 = vmax.xlane.f32.xlu0 %v2121_v50  ;;  %v5423_v51 = vld [vmem:[%s10605_s3 + $0x380] sm:$0xff] }
 0x99c   :  { %v2120_v52 = vadd.f32 %v2118_v47, %v2114_v49  ;;  %v6929_v47 = vpack.c.bf16 %v5362_v45, %v5360_v44  ;;  %v5361_v49 = vld [vmem:[%s10610_s5 + $0x170] sm:$0xff] }
 0x99d   :  { %v6931_v50 = vpack.c.bf16 %v5361_v49, %v5359_v48  ;;  %v5405_v45 = vld [vmem:[%s10606_s2 + $0x3f0] sm:$0xff]  ;;  %v5390_v49 = vld [vmem:[%s10606_s2 + $0x378] sm:$0xff] }
 0x99e   :  { %v2124_v53 = vsel %vm533_vm2, %v2120_v52, -inf  ;;  %v5389_v48 = vld [vmem:[%s10606_s2 + $0x370] sm:$0xff] }
 0x99f   :  { %2125 = vmax.xlane.f32.xlu1 %v2124_v53  ;;  %v6097_v0 = vpop.f32.mrb[20].mxu0 }
 0x9a0   :  { %v6098_v1 = vpop.f32.mrb[21].mxu0 }
 0x9a1   :  { %v6099_v2 = vadd.f32 %v6098_v1, %v6097_v0  ;;  %v5378_v0 = vld [vmem:[%s10606_s2 + $0x318] sm:$0xff] }
 0x9a3   :  { %6528 = vmatpush3.msra.mxu1 %v6099_v2  ;;  %v6100_v3 = vpop.f32.mrb[22].mxu0  ;;  %v5395_v2 = vld [vmem:[%s10606_s2 + $0x3a0] sm:$0xff] }
 0x9a4   :  { %6532 = vmatprep.subr.mxu1 %v7487_v36  ;;  %v6101_v4 = vpop.f32.mrb[23].mxu0 }
 0x9a5   :  { %v6102_v5 = vadd.f32 %v6101_v4, %v6100_v3  ;;  %v5396_v3 = vld [vmem:[%s10606_s2 + $0x3a8] sm:$0xff] }
 0x9a6   :  { %v6941_v4 = vpack.c.bf16 %v5396_v3, %v5395_v2  ;;  %v5412_v2 = vld [vmem:[%s10605_s3 + $0x328] sm:$0xff] }
 0xa28   :  { %v2123_v54 = vpop.xlane.xlu0 %2122 }
 0xa29   :  { %v2127_v55 = vsub.f32 %v2119_v46, %v2123_v54  ;;  %v6927_v46 = vpack.c.bf16 %v5357_v43, %v5355_v16  ;;  %v5391_v54 = vld [vmem:[%s10606_s2 + $0x380] sm:$0xff]  ;;  %v5388_v43 = vld [vmem:[%s10606_s2 + $0x368] sm:$0xff] }
 0xa2a   :  { %v5387_v16 = vld [vmem:[%s10606_s2 + $0x360] sm:$0xff] }
 0xa2b   :  { %v2129_v56 = vmul.f32 1.442695, %v2127_v55  ;;  %v5392_v55 = vld [vmem:[%s10606_s2 + $0x388] sm:$0xff]  ;;  %v6959_v44 = vpack.c.bf16 %v5388_v43, %v5387_v16  ;;  %v5438_v16 = vld [vmem:[%s10605_s3 + $0x3f8] sm:$0xff] }
 0xa2c   :  { %v2126_v57 = vpop.xlane.xlu1 %2125 }
 0xa2d   :  { %7415 = vpow2.f32 %v2129_v56  ;;  %v2128_v58 = vsub.f32 %v2120_v52, %v2126_v57  ;;  %v5424_v52 = vld [vmem:[%s10605_s3 + $0x388] sm:$0xff]  ;;  %v6933_v56 = vpack.c.bf16 %v5392_v55, %v5391_v54  ;;  %v5375_v57 = vld [vmem:[%s10606_s2 + $0x300] sm:$0xff]  ;;  %v5426_v54 = vld [vmem:[%s10605_s3 + $0x398] sm:$0xff] }
 0xa2e   :  { %v6965_v53 = vpack.c.bf16 %v5424_v52, %v5423_v51  ;;  %v5407_v51 = vld [vmem:[%s10605_s3 + $0x300] sm:$0xff]  ;;  %v5408_v52 = vld [vmem:[%s10605_s3 + $0x308] sm:$0xff] }
 0xa2f   :  { %v2131_v59 = vmul.f32 1.442695, %v2128_v58  ;;  %v5376_v58 = vld [vmem:[%s10606_s2 + $0x308] sm:$0xff]  ;;  %6934 = vmatprep.subr.bf16.mxu0 %v6933_v56  ;;  %v6967_v55 = vpack.c.bf16 %v5408_v52, %v5407_v51 }
 0xa31   :  { %7417 = vpow2.f32 %v2131_v59  ;;  %v6935_v59 = vpack.c.bf16 %v5376_v58, %v5375_v57  ;;  %v5409_v57 = vld [vmem:[%s10605_s3 + $0x310] sm:$0xff]  ;;  %v5410_v58 = vld [vmem:[%s10605_s3 + $0x318] sm:$0xff] }
 0xa33   :  { %6936 = vmatpush3.bf16.msra.mxu0 %v6935_v59 }
 0xa37   :  { %v7416_v60 = vpop.eup %7415 }
 0xa38   :  { %v2133_v61 = vsel %vm533_vm2, %v7416_v60, 0.0 }
 0xa39   :  { %2134 = vadd.xlane.f32.xlu0 %v2133_v61  ;;  %v5394_v61 = vld [vmem:[%s10606_s2 + $0x398] sm:$0xff] }
 0xa3b   :  { %v7418_v62 = vpop.eup %7417 }
 0xa3c   :  { %v2136_v63 = vsel %vm533_vm2, %v7418_v62, 0.0 }
 0xa3d   :  { %2137 = vadd.xlane.f32.xlu1 %v2136_v63  ;;  %v5377_v63 = vld [vmem:[%s10606_s2 + $0x310] sm:$0xff] }
 0xa3e   :  { %v6939_v1 = vpack.c.bf16 %v5378_v0, %v5377_v63  ;;  %v6971_v63 = vpack.c.bf16 %v5410_v58, %v5409_v57 }
 0xac6   :  { %v2135_v6 = vpop.xlane.xlu0 %2134 }
 0xac7   :  { %7419 = vrcp.f32 %v2135_v6  ;;  %v5380_v6 = vld [vmem:[%s10606_s2 + $0x328] sm:$0xff] }
 0xaca   :  { %v2138_v7 = vpop.xlane.xlu1 %2137 }
 0xacb   :  { %7421 = vrcp.f32 %v2138_v7 }
 0xad1   :  { %v7420_v8 = vpop.eup %7419 }
 0xad2   :  { %v2141_v11 = vmul.f32 %v7420_v8, %v7416_v60  ;;  %v5393_v60 = vld [vmem:[%s10606_s2 + $0x390] sm:$0xff] }
 0xad3   :  { %v5397_v8 = vld [vmem:[%s10606_s2 + $0x3b0] sm:$0xff] }
 0xad4   :  { %v2143_v12 = vmul.f32 %v5249_v41, %v2141_v11  ;;  %v5356_v41 = vld [vmem:[%s10610_s5 + $0x148] sm:$0xff]  ;;  %v6945_v10 = vpack.c.bf16 %v5398_v9, %v5397_v8  ;;  %v5381_v11 = vld [vmem:[%s10606_s2 + $0x330] sm:$0xff] }
 0xad5   :  { %v7422_v17 = vpop.eup %7421  ;;  %v6925_v35 = vpack.c.bf16 %v5358_v34, %v5356_v41  ;;  %v5403_v34 = vld [vmem:[%s10606_s2 + $0x3e0] sm:$0xff]  ;;  %v5413_v9 = vld [vmem:[%s10605_s3 + $0x330] sm:$0xff] }
 0xad6   :  { %v2142_v20 = vmul.f32 %v7422_v17, %v7418_v62  ;;  %6530 = vmatmul.mubr.msk.f32.vlgmr.msra.gmra.mrb[40].mxu1 %vm533_vm2, %v2143_v12  ;;  %v6937_v62 = vpack.c.bf16 %v5394_v61, %v5393_v60  ;;  %v5382_v12 = vld [vmem:[%s10606_s2 + $0x338] sm:$0xff]  ;;  %v6949_v17 = vpack.c.bf16 %v5400_v15, %v5399_v14  ;;  %v5427_v60 = vld [vmem:[%s10605_s3 + $0x3a0] sm:$0xff]  ;;  %v5428_v61 = vld [vmem:[%s10605_s3 + $0x3a8] sm:$0xff] }
 0xad7   :  { %6533 = vmatpush3.msra.mxu1 %v6102_v5  ;;  %6534 = vmatprep.mubr.msk.f32.mxu1 %vm7488_vm0, %v7487_v36  ;;  %v5379_v5 = vld [vmem:[%s10606_s2 + $0x320] sm:$0xff]  ;;  %v6973_v0 = vpack.c.bf16 %v5428_v61, %v5427_v60  ;;  %v5416_v15 = vld [vmem:[%s10605_s3 + $0x348] sm:$0xff] }
 0xad8   :  { %v2144_v22 = vmul.f32 %v5250_v42, %v2142_v20  ;;  %6918 = vmatprep.subr.bf16.mxu1 %v6917_v13  ;;  %v6923_v42 = vpack.c.bf16 %v5353_v33, %v5351_v40  ;;  %6938 = vmatprep.subr.bf16.mxu0 %v6937_v62  ;;  %v6943_v7 = vpack.c.bf16 %v5380_v6, %v5379_v5  ;;  %v5385_v40 = vld [vmem:[%s10606_s2 + $0x350] sm:$0xff]  ;;  %v5386_v33 = vld [vmem:[%s10606_s2 + $0x358] sm:$0xff]  ;;  %v5415_v14 = vld [vmem:[%s10605_s3 + $0x340] sm:$0xff] }
 0xad9   :  { %6940 = vmatpush3.bf16.msra.mxu0 %v6939_v1  ;;  %v6947_v13 = vpack.c.bf16 %v5382_v12, %v5381_v11  ;;  %v6951_v20 = vpack.c.bf16 %v5384_v19, %v5383_v18  ;;  %v6955_v41 = vpack.c.bf16 %v5386_v33, %v5385_v40  ;;  %v5411_v1 = vld [vmem:[%s10605_s3 + $0x320] sm:$0xff]  ;;  %v5430_v5 = vld [vmem:[%s10605_s3 + $0x3b8] sm:$0xff]  ;;  %v5432_v12 = vld [vmem:[%s10605_s3 + $0x3c8] sm:$0xff]  ;;  %v6983_v19 = vpack.c.bf16 %v5416_v15, %v5415_v14 }
 0xada   :  { %6535 = vmatmul.mubr.msk.f32.vlgmr.msra.gmra.mrb[42].mxu1 %vm533_vm2, %v2144_v22  ;;  %6942 = vmatprep.subr.bf16.mxu0 %v6941_v4  ;;  %v5402_v22 = vld [vmem:[%s10606_s2 + $0x3d8] sm:$0xff]  ;;  %v5429_v4 = vld [vmem:[%s10605_s3 + $0x3b0] sm:$0xff]  ;;  %v5431_v11 = vld [vmem:[%s10605_s3 + $0x3c0] sm:$0xff] }
 0xadb   :  { %6920 = vmatpush1.bf16.msra.mxu1 %v6919_v21  ;;  %2361 = vmatprep.mubr.f32.mxu1 %v7487_v36  ;;  %v5401_v21 = vld [vmem:[%s10606_s2 + $0x3d0] sm:$0xff]  ;;  %v6977_v8 = vpack.c.bf16 %v5430_v5, %v5429_v4  ;;  %v5434_v18 = vld [vmem:[%s10605_s3 + $0x3d8] sm:$0xff]  ;;  %v5436_v40 = vld [vmem:[%s10605_s3 + $0x3e8] sm:$0xff] }
 0xadc   :  { %6922 = vmatprep.subr.bf16.mxu1 %v6921_v39  ;;  %v6953_v39 = vpack.c.bf16 %v5402_v22, %v5401_v21  ;;  %v5417_v21 = vld [vmem:[%s10605_s3 + $0x350] sm:$0xff]  ;;  %v5418_v22 = vld [vmem:[%s10605_s3 + $0x358] sm:$0xff]  ;;  %v5440_v4 = vld [vmem:[%s10608_s4 + $0x308] sm:$0xff] }
 0xadd   :  { %6944 = vmatpush3.bf16.msra.mxu0 %v6943_v7  ;;  %v6975_v7 = vpack.c.bf16 %v5412_v2, %v5411_v1  ;;  %v6987_v33 = vpack.c.bf16 %v5418_v22, %v5417_v21  ;;  %v5456_v1 = vld [vmem:[%s10608_s4 + $0x388] sm:$0xff]  ;;  %v5439_v2 = vld [vmem:[%s10608_s4 + $0x300] sm:$0xff]  ;;  %v5457_v5 = vld [vmem:[%s10608_s4 + $0x390] sm:$0xff] }
 0xade   :  { %6946 = vmatprep.subr.bf16.mxu0 %v6945_v10  ;;  %v5414_v10 = vld [vmem:[%s10605_s3 + $0x338] sm:$0xff]  ;;  %v5443_v14 = vld [vmem:[%s10608_s4 + $0x320] sm:$0xff]  ;;  %v5444_v15 = vld [vmem:[%s10608_s4 + $0x328] sm:$0xff] }
 0xadf   :  { %6924 = vmatpush1.bf16.msra.mxu1 %v6923_v42  ;;  %v5404_v42 = vld [vmem:[%s10606_s2 + $0x3e8] sm:$0xff]  ;;  %v5445_v21 = vld [vmem:[%s10608_s4 + $0x330] sm:$0xff]  ;;  %v5446_v22 = vld [vmem:[%s10608_s4 + $0x338] sm:$0xff] }
 0xae0   :  { %6926 = vmatprep.subr.bf16.mxu1 %v6925_v35  ;;  %v6957_v35 = vpack.c.bf16 %v5404_v42, %v5403_v34  ;;  %v5419_v34 = vld [vmem:[%s10605_s3 + $0x360] sm:$0xff]  ;;  %v5420_v42 = vld [vmem:[%s10605_s3 + $0x368] sm:$0xff] }
 0xae1   :  { %6948 = vmatpush3.bf16.msra.mxu0 %v6947_v13  ;;  %v6981_v13 = vpack.c.bf16 %v5432_v12, %v5431_v11  ;;  %v6991_v43 = vpack.c.bf16 %v5420_v42, %v5419_v34  ;;  %v5459_v11 = vld [vmem:[%s10608_s4 + $0x3a0] sm:$0xff]  ;;  %v5460_v12 = vld [vmem:[%s10608_s4 + $0x3a8] sm:$0xff] }
 0xae2   :  { %6950 = vmatprep.subr.bf16.mxu0 %v6949_v17  ;;  %v5433_v17 = vld [vmem:[%s10605_s3 + $0x3d0] sm:$0xff]  ;;  %v5447_v34 = vld [vmem:[%s10608_s4 + $0x340] sm:$0xff]  ;;  %v5448_v42 = vld [vmem:[%s10608_s4 + $0x348] sm:$0xff] }
 0xae3   :  { %6928 = vmatpush1.bf16.msra.mxu1 %v6927_v46  ;;  %v5406_v46 = vld [vmem:[%s10606_s2 + $0x3f8] sm:$0xff] }
 0xae4   :  { %6930 = vmatprep.subr.bf16.mxu1 %v6929_v47  ;;  %v6961_v47 = vpack.c.bf16 %v5406_v46, %v5405_v45  ;;  %v5421_v45 = vld [vmem:[%s10605_s3 + $0x370] sm:$0xff]  ;;  %v5422_v46 = vld [vmem:[%s10605_s3 + $0x378] sm:$0xff] }
 0xae5   :  { %6952 = vmatpush3.bf16.msra.mxu0 %v6951_v20  ;;  %v6985_v20 = vpack.c.bf16 %v5434_v18, %v5433_v17  ;;  %v5461_v17 = vld [vmem:[%s10608_s4 + $0x3b0] sm:$0xff]  ;;  %v5462_v18 = vld [vmem:[%s10608_s4 + $0x3b8] sm:$0xff] }
 0xae6   :  { %6954 = vmatprep.subr.bf16.mxu0 %v6953_v39  ;;  %v5435_v39 = vld [vmem:[%s10605_s3 + $0x3e0] sm:$0xff] }
 0xae7   :  { %6932 = vmatpush1.bf16.msra.mxu1 %v6931_v50  ;;  %v6963_v50 = vpack.c.bf16 %v5390_v49, %v5389_v48 }
 0xae8   :  { %6966 = vmatprep.subr.bf16.mxu1 %v6965_v53  ;;  %v5425_v53 = vld [vmem:[%s10605_s3 + $0x390] sm:$0xff] }
 0xae9   :  { %6956 = vmatpush3.bf16.msra.mxu0 %v6955_v41  ;;  %v6969_v56 = vpack.c.bf16 %v5426_v54, %v5425_v53  ;;  %v6989_v41 = vpack.c.bf16 %v5436_v40, %v5435_v39  ;;  %v5463_v39 = vld [vmem:[%s10608_s4 + $0x3c0] sm:$0xff]  ;;  %v5464_v40 = vld [vmem:[%s10608_s4 + $0x3c8] sm:$0xff] }
 0xaea   :  { %6958 = vmatprep.subr.bf16.mxu0 %v6957_v35  ;;  %v5437_v35 = vld [vmem:[%s10605_s3 + $0x3f0] sm:$0xff] }
 0xaed   :  { %6960 = vmatpush3.bf16.msra.mxu0 %v6959_v44  ;;  %v6993_v44 = vpack.c.bf16 %v5438_v16, %v5437_v35  ;;  %v5465_v35 = vld [vmem:[%s10608_s4 + $0x3d0] sm:$0xff]  ;;  %v5466_v16 = vld [vmem:[%s10608_s4 + $0x3d8] sm:$0xff] }
 0xaee   :  { %6962 = vmatprep.subr.bf16.mxu0 %v6961_v47  ;;  %v6995_v47 = vpack.c.bf16 %v5422_v46, %v5421_v45  ;;  %v5449_v45 = vld [vmem:[%s10608_s4 + $0x350] sm:$0xff]  ;;  %v5450_v46 = vld [vmem:[%s10608_s4 + $0x358] sm:$0xff] }
 0xaf1   :  { %6964 = vmatpush3.bf16.msra.mxu0 %v6963_v50 }
 0xaf4   :  { %2594 = vmatmul.mubr.f32.vlgmr.msra.gmra.mrb[24].mxu0 %v8425_v23 }
 0xaf5   :  { %2598 = vmatprep.mubr.f32.mxu0 %v8431_v24 }
 0xaf8   :  { %2599 = vmatmul.mubr.f32.gmra.mrb[26].mxu0 %v8437_v25 }
 0xaf9   :  { %2743 = vmatprep.mubr.f32.mxu0 %v8443_v26 }
 0xba9   :  { %v2214_v59 = vpop.f32.mrb[40].mxu1 }
 0xbaa   :  { %v6531_v62 = vpop.f32.mrb[41].mxu1  ;;  %5371 = vmatmul.mubr.msk.f32.vlgmr.msra.gmra.mrb[44].mxu1 %vm372_vm1, %v2214_v59 }
 0xbab   :  { %6968 = vmatpush3.bf16.msra.mxu1 %v6967_v55  ;;  %2367 = vmatprep.mubr.f32.mxu1 %v7487_v36 }
 0xbac   :  { %6970 = vmatprep.subr.bf16.mxu1 %v6969_v56 }
 0xbad   :  { %v2287_v3 = vpop.f32.mrb[42].mxu1 }
 0xbae   :  { %v6536_v6 = vpop.f32.mrb[43].mxu1  ;;  %5372 = vmatmul.mubr.msk.f32.gmra.mrb[46].mxu1 %vm372_vm1, %v2287_v3 }
 0xbaf   :  { %6972 = vmatpush3.bf16.msra.mxu1 %v6971_v63  ;;  %2668 = vmatprep.mubr.f32.mxu1 %v8443_v26  ;;  %v6979_v26 = vpack.c.bf16 %v5414_v10, %v5413_v9  ;;  %v5458_v6 = vld [vmem:[%s10608_s4 + $0x398] sm:$0xff]  ;;  %v5441_v9 = vld [vmem:[%s10608_s4 + $0x310] sm:$0xff] }
 0xbb0   :  { %6974 = vmatprep.subr.bf16.mxu1 %v6973_v0  ;;  %v5455_v0 = vld [vmem:[%s10608_s4 + $0x380] sm:$0xff]  ;;  %v5442_v10 = vld [vmem:[%s10608_s4 + $0x318] sm:$0xff] }
 0xbb1   :  { %v6997_v3 = vpack.c.bf16 %v5456_v1, %v5455_v0  ;;  %v9055_v0 = vld [vmem:[%s10609_s1 + $0x30] sm:$0xff] }
 0xbb2   :  { %v5491_v1 = vadd.f32 -1.0, %v9055_v0 }
 0xbb3   :  { %6976 = vmatpush3.bf16.msra.mxu1 %v6975_v7  ;;  %v6999_v7 = vpack.c.bf16 %v5440_v4, %v5439_v2  ;;  %6998 = vmatprep.subr.bf16.mxu0 %v6997_v3  ;;  %v9061_v2 = vld [vmem:[%s10609_s1 + $0x38] sm:$0xff] }
 0xbb4   :  { %6978 = vmatprep.subr.bf16.mxu1 %v6977_v8  ;;  %v7001_v8 = vpack.c.bf16 %v5458_v6, %v5457_v5  ;;  %v2910_v3 = vmul.f32 1e+09, %v5491_v1 }
 0xbb5   :  { %7000 = vmatpush3.bf16.msra.mxu0 %v6999_v7 }
 0xbb6   :  { %7002 = vmatprep.subr.bf16.mxu0 %v7001_v8 }
 0xbb7   :  { %6980 = vmatpush3.bf16.msra.mxu1 %v6979_v26  ;;  %v7003_v26 = vpack.c.bf16 %v5442_v10, %v5441_v9 }
 0xbb8   :  { %6982 = vmatprep.subr.bf16.mxu1 %v6981_v13  ;;  %v7005_v13 = vpack.c.bf16 %v5460_v12, %v5459_v11 }
 0xbb9   :  { %7004 = vmatpush3.bf16.msra.mxu0 %v7003_v26 }
 0xbba   :  { %7006 = vmatprep.subr.bf16.mxu0 %v7005_v13 }
 0xbbb   :  { %6984 = vmatpush3.bf16.msra.mxu1 %v6983_v19  ;;  %v7007_v19 = vpack.c.bf16 %v5444_v15, %v5443_v14 }
 0xbbc   :  { %6986 = vmatprep.subr.bf16.mxu1 %v6985_v20  ;;  %v7009_v20 = vpack.c.bf16 %v5462_v18, %v5461_v17 }
 0xbbd   :  { %7008 = vmatpush3.bf16.msra.mxu0 %v7007_v19 }
 0xbbe   :  { %7010 = vmatprep.subr.bf16.mxu0 %v7009_v20 }
 0xbbf   :  { %6988 = vmatpush3.bf16.msra.mxu1 %v6987_v33  ;;  %v7011_v33 = vpack.c.bf16 %v5446_v22, %v5445_v21 }
 0xbc0   :  { %6990 = vmatprep.subr.bf16.mxu1 %v6989_v41  ;;  %v7013_v41 = vpack.c.bf16 %v5464_v40, %v5463_v39 }
 0xbc1   :  { %7012 = vmatpush3.bf16.msra.mxu0 %v7011_v33 }
 0xbc2   :  { %7014 = vmatprep.subr.bf16.mxu0 %v7013_v41 }
 0xbc3   :  { %6992 = vmatpush3.bf16.msra.mxu1 %v6991_v43  ;;  %v7015_v43 = vpack.c.bf16 %v5448_v42, %v5447_v34 }
 0xbc4   :  { %6994 = vmatprep.subr.bf16.mxu1 %v6993_v44  ;;  %v7017_v44 = vpack.c.bf16 %v5466_v16, %v5465_v35  ;;  %v5472_v35 = vld [vmem:[%s10610_s5 + $0x188] sm:$0xff]  ;;  %v5474_v16 = vld [vmem:[%s10610_s5 + $0x198] sm:$0xff] }
 0xbc5   :  { %7016 = vmatpush3.bf16.msra.mxu0 %v7015_v43  ;;  %v5471_v43 = vld [vmem:[%s10610_s5 + $0x180] sm:$0xff] }
 0xbc6   :  { %7018 = vmatprep.subr.bf16.mxu0 %v7017_v44  ;;  %v7029_v44 = vpack.c.bf16 %v5474_v16, %v5472_v35  ;;  %v5503_v35 = vld [vmem:[%s10606_s2 + $0x420] sm:$0xff]  ;;  %v5504_v16 = vld [vmem:[%s10606_s2 + $0x428] sm:$0xff] }
 0xbc7   :  { %6996 = vmatpush3.bf16.msra.mxu1 %v6995_v47  ;;  %v6143_v48 = vpop.f32.mrb[24].mxu0  ;;  %v5467_v47 = vld [vmem:[%s10608_s4 + $0x3e0] sm:$0xff] }
 0xbc8   :  { %6537 = vmatprep.subr.mxu1 %v7487_v36  ;;  %v6144_v49 = vpop.f32.mrb[25].mxu0 }
 0xbc9   :  { %v6145_v50 = vadd.f32 %v6144_v49, %v6143_v48  ;;  %v5468_v48 = vld [vmem:[%s10608_s4 + $0x3e8] sm:$0xff]  ;;  %v7019_v49 = vpack.c.bf16 %v5450_v46, %v5449_v45  ;;  %v5473_v45 = vld [vmem:[%s10610_s5 + $0x190] sm:$0xff] }
 0xbca   :  { %2669 = vmatmul.mubr.f32.vlgmr.msra.gmra.mrb[48].mxu1 %v8425_v23  ;;  %v5476_v46 = vld [vmem:[%s10610_s5 + $0x1a8] sm:$0xff] }
 0xbcb   :  { %2673 = vmatprep.mubr.f32.mxu1 %v8431_v24  ;;  %v6146_v51 = vpop.f32.mrb[26].mxu0  ;;  %7020 = vmatpush3.bf16.msra.mxu0 %v7019_v49 }
 0xbcc   :  { %v6147_v52 = vpop.f32.mrb[27].mxu0 }
 0xbcd   :  { %v6148_v53 = vadd.f32 %v6147_v52, %v6146_v51  ;;  %v5451_v51 = vld [vmem:[%s10608_s4 + $0x360] sm:$0xff]  ;;  %v5452_v52 = vld [vmem:[%s10608_s4 + $0x368] sm:$0xff] }
 0xbce   :  { %2674 = vmatmul.mubr.f32.gmra.mrb[50].mxu1 %v8437_v25 }
 0xbcf   :  { %6539 = vmatprep.mubr.msk.f32.mxu1 %vm7488_vm0, %v7487_v36 }
 0xc7d   :  { %v8934_v54 = vpop.f32.mrb[44].mxu1 }
 0xc7e   :  { %v8936_v55 = vpop.f32.mrb[45].mxu1 }
 0xc81   :  { %v8938_v56 = vpop.f32.mrb[46].mxu1 }
 0xc82   :  { %v8940_v57 = vpop.f32.mrb[47].mxu1 }
 0xc9d   :  { %v6181_v58 = vpop.f32.mrb[48].mxu1 }
 0xc9e   :  { %v6182_v59 = vpop.f32.mrb[49].mxu1 }
 0xc9f   :  { %v6183_v60 = vadd.f32 %v6182_v59, %v6181_v58  ;;  %v5470_v58 = vld [vmem:[%s10608_s4 + $0x3f8] sm:$0xff]  ;;  %v7023_v59 = vpack.c.bf16 %v5452_v52, %v5451_v51  ;;  %v5477_v51 = vld [vmem:[%s10610_s5 + $0x1b0] sm:$0xff]  ;;  %v5480_v52 = vld [vmem:[%s10610_s5 + $0x1c8] sm:$0xff] }
 0xca1   :  { %v6184_v61 = vpop.f32.mrb[50].mxu1  ;;  %6538 = vmatpush3.xpose.msk.msra.mxu1 %vm372_vm1, %v6183_v60 }
 0xca2   :  { %v6185_v62 = vpop.f32.mrb[51].mxu1  ;;  %6542 = vmatprep.subr.mxu1 %v7487_v36 }
 0xca3   :  { %v6186_v63 = vadd.f32 %v6185_v62, %v6184_v61  ;;  %v5453_v61 = vld [vmem:[%s10608_s4 + $0x370] sm:$0xff]  ;;  %v5454_v62 = vld [vmem:[%s10608_s4 + $0x378] sm:$0xff] }
 0xca4   :  { %6540 = vmatmul.mubr.msk.f32.vlgmr.msra.gmra.mrb[52].mxu1 %vm372_vm1, %v6145_v50  ;;  %v7021_v50 = vpack.c.bf16 %v5468_v48, %v5467_v47  ;;  %v5478_v47 = vld [vmem:[%s10610_s5 + $0x1b8] sm:$0xff]  ;;  %v7031_v48 = vpack.c.bf16 %v5473_v45, %v5471_v43  ;;  %v7055_v43 = vpack.c.bf16 %v5504_v16, %v5503_v35  ;;  %v5551_v16 = vld [vmem:[%s10605_s3 + $0x4a0] sm:$0xff] }
 0xca5   :  { %6543 = vmatpush3.xpose.msk.msra.mxu1 %vm372_vm1, %v6186_v63  ;;  %6544 = vmatprep.mubr.msk.f32.mxu1 %vm7488_vm0, %v7487_v36  ;;  %v7027_v63 = vpack.c.bf16 %v5454_v62, %v5453_v61  ;;  %v7033_v49 = vpack.c.bf16 %v5478_v47, %v5476_v46  ;;  %v5481_v61 = vld [vmem:[%s10610_s5 + $0x1d0] sm:$0xff]  ;;  %v5484_v62 = vld [vmem:[%s10610_s5 + $0x1e8] sm:$0xff]  ;;  %v5522_v45 = vld [vmem:[%s10606_s2 + $0x4b8] sm:$0xff] }
 0xca6   :  { %6547 = vmatprep.subr.mxu1 %v7487_v36  ;;  %7022 = vmatprep.subr.bf16.mxu0 %v7021_v50  ;;  %v5475_v50 = vld [vmem:[%s10610_s5 + $0x1a0] sm:$0xff]  ;;  %v5505_v47 = vld [vmem:[%s10606_s2 + $0x430] sm:$0xff] }
 0xca7   :  { %7024 = vmatpush3.bf16.msra.mxu0 %v7023_v59 }
 0xca8   :  { %6545 = vmatmul.mubr.msk.f32.vlgmr.msra.gmra.mrb[54].mxu1 %vm372_vm1, %v6148_v53  ;;  %v5469_v53 = vld [vmem:[%s10608_s4 + $0x3f0] sm:$0xff] }
 0xca9   :  { %6549 = vmatprep.mubr.msk.f32.mxu1 %vm7488_vm0, %v7487_v36  ;;  %v7025_v60 = vpack.c.bf16 %v5470_v58, %v5469_v53  ;;  %v5482_v53 = vld [vmem:[%s10610_s5 + $0x1d8] sm:$0xff]  ;;  %v7035_v58 = vpack.c.bf16 %v5477_v51, %v5475_v50  ;;  %v5523_v50 = vld [vmem:[%s10606_s2 + $0x4c0] sm:$0xff]  ;;  %v5524_v51 = vld [vmem:[%s10606_s2 + $0x4c8] sm:$0xff] }
 0xcaa   :  { %v7037_v59 = vpack.c.bf16 %v5482_v53, %v5480_v52  ;;  %v7061_v52 = vpack.c.bf16 %v5524_v51, %v5523_v50  ;;  %v5507_v53 = vld [vmem:[%s10606_s2 + $0x440] sm:$0xff]  ;;  %v5553_v50 = vld [vmem:[%s10605_s3 + $0x4b0] sm:$0xff]  ;;  %v5554_v51 = vld [vmem:[%s10605_s3 + $0x4b8] sm:$0xff] }
 0xcab   :  { %7026 = vmatprep.subr.bf16.mxu0 %v7025_v60  ;;  %v5479_v60 = vld [vmem:[%s10610_s5 + $0x1c0] sm:$0xff] }
 0xcac   :  { %7028 = vmatpush3.bf16.msra.mxu0 %v7027_v63  ;;  %v5486_v63 = vld [vmem:[%s10610_s5 + $0x1f8] sm:$0xff]  ;;  %v7039_v1 = vpack.c.bf16 %v5481_v61, %v5479_v60  ;;  %v5525_v60 = vld [vmem:[%s10606_s2 + $0x4d0] sm:$0xff] }
 0xcad   :  { %7030 = vmatprep.subr.bf16.mxu0 %v7029_v44  ;;  %v5521_v44 = vld [vmem:[%s10606_s2 + $0x4b0] sm:$0xff]  ;;  %v5526_v61 = vld [vmem:[%s10606_s2 + $0x4d8] sm:$0xff] }
 0xcae   :  { %v7057_v46 = vpack.c.bf16 %v5522_v45, %v5521_v44 }
 0xcaf   :  { %2744 = vmatmul.mubr.f32.vlgmr.msra.gmra.mrb[28].mxu0 %v8425_v23  ;;  %v5492_v23 = vadd.f32 -1.0, %v9061_v2 }
 0xcb0   :  { %2748 = vmatprep.mubr.f32.mxu0 %v8431_v24  ;;  %7032 = vmatpush1.bf16.msra.mxu0 %v7031_v48  ;;  %v5506_v48 = vld [vmem:[%s10606_s2 + $0x438] sm:$0xff] }
 0xcb1   :  { %v2911_v6 = vmul.f32 1e+09, %v5492_v23  ;;  %7034 = vmatprep.subr.bf16.mxu0 %v7033_v49  ;;  %v5483_v23 = vld [vmem:[%s10610_s5 + $0x1e0] sm:$0xff]  ;;  %v7059_v49 = vpack.c.bf16 %v5506_v48, %v5505_v47  ;;  %v5536_v48 = vld [vmem:[%s10605_s3 + $0x428] sm:$0xff] }
 0xcb2   :  { %v5535_v47 = vld [vmem:[%s10605_s3 + $0x420] sm:$0xff] }
 0xcb3   :  { %2749 = vmatmul.mubr.f32.gmra.mrb[30].mxu0 %v8437_v25 }
 0xcb4   :  { %3154 = vmatprep.mubr.f32.mxu0 %v7487_v36  ;;  %7036 = vmatpush1.bf16.msra.mxu0 %v7035_v58  ;;  %v5508_v58 = vld [vmem:[%s10606_s2 + $0x448] sm:$0xff] }
 0xcb5   :  { %7038 = vmatprep.subr.bf16.mxu0 %v7037_v59  ;;  %v7063_v59 = vpack.c.bf16 %v5508_v58, %v5507_v53  ;;  %v7087_v53 = vpack.c.bf16 %v5536_v48, %v5535_v47  ;;  %v7089_v58 = vpack.c.bf16 %v5554_v51, %v5553_v50  ;;  %v5585_v47 = vld [vmem:[%s10608_s4 + $0x4b0] sm:$0xff]  ;;  %v5586_v48 = vld [vmem:[%s10608_s4 + $0x4b8] sm:$0xff] }
 0xcb6   :  { %v7121_v50 = vpack.c.bf16 %v5586_v48, %v5585_v47  ;;  %v5570_v51 = vld [vmem:[%s10608_s4 + $0x438] sm:$0xff] }
 0xcb8   :  { %7040 = vmatpush1.bf16.msra.mxu0 %v7039_v1  ;;  %v5510_v1 = vld [vmem:[%s10606_s2 + $0x458] sm:$0xff] }
 0xd77   :  { %v2826_v24 = vpop.f32.mrb[52].mxu1 }
 0xd78   :  { %v2906_v4 = vmul.f32 0.125, %v2826_v24  ;;  %v6541_v25 = vpop.f32.mrb[53].mxu1  ;;  %v5485_v24 = vld [vmem:[%s10610_s5 + $0x1f0] sm:$0xff] }
 0xd7a   :  { %v2912_v5 = vadd.f32 %v2910_v3, %v2906_v4  ;;  %v7041_v3 = vpack.c.bf16 %v5486_v63, %v5484_v62  ;;  %v7043_v4 = vpack.c.bf16 %v5485_v24, %v5483_v23  ;;  %v7065_v62 = vpack.c.bf16 %v5526_v61, %v5525_v60  ;;  %v5509_v63 = vld [vmem:[%s10606_s2 + $0x450] sm:$0xff]  ;;  %v5527_v23 = vld [vmem:[%s10606_s2 + $0x4e0] sm:$0xff]  ;;  %v5528_v24 = vld [vmem:[%s10606_s2 + $0x4e8] sm:$0xff] }
 0xd7b   :  { %v2902_v7 = vpop.f32.mrb[54].mxu1  ;;  %v5538_v60 = vld [vmem:[%s10605_s3 + $0x438] sm:$0xff]  ;;  %v5555_v61 = vld [vmem:[%s10605_s3 + $0x4c0] sm:$0xff] }
 0xd7c   :  { %v2907_v8 = vmul.f32 0.125, %v2902_v7  ;;  %v2914_v9 = vsel %vm533_vm2, %v2912_v5, -inf  ;;  %v6546_v10 = vpop.f32.mrb[55].mxu1  ;;  %7042 = vmatprep.subr.bf16.mxu0 %v7041_v3  ;;  %v7067_v3 = vpack.c.bf16 %v5510_v1, %v5509_v63 }
 0xd7d   :  { %2915 = vmax.xlane.f32.xlu0 %v2914_v9  ;;  %7044 = vmatpush1.bf16.msra.mxu0 %v7043_v4  ;;  %v7069_v4 = vpack.c.bf16 %v5528_v24, %v5527_v23  ;;  %v5540_v23 = vld [vmem:[%s10605_s3 + $0x448] sm:$0xff]  ;;  %v5557_v24 = vld [vmem:[%s10605_s3 + $0x4d0] sm:$0xff] }
 0xd7e   :  { %v2913_v11 = vadd.f32 %v2911_v6, %v2907_v8 }
 0xd80   :  { %v2917_v12 = vsel %vm533_vm2, %v2913_v11, -inf }
 0xd81   :  { %2918 = vmax.xlane.f32.xlu1 %v2917_v12  ;;  %v9126_v12 = vld [vmem:[%s10607_s0 + $0x8] sm:$0xff] }
 0xd82   :  { %v6219_v39 = vpop.f32.mrb[28].mxu0 }
 0xd83   :  { %v6220_v40 = vpop.f32.mrb[29].mxu0 }
 0xd84   :  { %v6221_v33 = vadd.f32 %v6220_v40, %v6219_v39  ;;  %v5501_v39 = vld [vmem:[%s10606_s2 + $0x410] sm:$0xff]  ;;  %v5502_v40 = vld [vmem:[%s10606_s2 + $0x418] sm:$0xff] }
 0xd86   :  { %6548 = vmatpush3.msra.mxu1 %v6221_v33  ;;  %v6222_v41 = vpop.f32.mrb[30].mxu0  ;;  %v7051_v33 = vpack.c.bf16 %v5502_v40, %v5501_v39  ;;  %v5549_v39 = vld [vmem:[%s10605_s3 + $0x490] sm:$0xff]  ;;  %v5550_v40 = vld [vmem:[%s10605_s3 + $0x498] sm:$0xff] }
 0xd87   :  { %6552 = vmatprep.subr.mxu1 %v7487_v36  ;;  %v6223_v34 = vpop.f32.mrb[31].mxu0 }
 0xd88   :  { %v6224_v42 = vadd.f32 %v6223_v34, %v6222_v41  ;;  %v5519_v41 = vld [vmem:[%s10606_s2 + $0x4a0] sm:$0xff]  ;;  %v5520_v34 = vld [vmem:[%s10606_s2 + $0x4a8] sm:$0xff] }
 0xe0a   :  { %v2916_v26 = vpop.xlane.xlu0 %2915 }
 0xe0b   :  { %v2920_v13 = vsub.f32 %v2912_v5, %v2916_v26  ;;  %v5548_v26 = vld [vmem:[%s10605_s3 + $0x488] sm:$0xff] }
 0xe0d   :  { %v2922_v14 = vmul.f32 1.442695, %v2920_v13 }
 0xe0e   :  { %v2919_v15 = vpop.xlane.xlu1 %2918 }
 0xe0f   :  { %7423 = vpow2.f32 %v2922_v14  ;;  %v2921_v17 = vsub.f32 %v2913_v11, %v2919_v15  ;;  %v5516_v14 = vld [vmem:[%s10606_s2 + $0x488] sm:$0xff] }
 0xe11   :  { %v2924_v18 = vmul.f32 1.442695, %v2921_v17  ;;  %v5499_v17 = vld [vmem:[%s10606_s2 + $0x400] sm:$0xff] }
 0xe13   :  { %7425 = vpow2.f32 %v2924_v18  ;;  %v5500_v18 = vld [vmem:[%s10606_s2 + $0x408] sm:$0xff] }
 0xe19   :  { %v7424_v19 = vpop.eup %7423 }
 0xe1a   :  { %v2926_v20 = vsel %vm533_vm2, %v7424_v19, 0.0 }
 0xe1b   :  { %2927 = vadd.xlane.f32.xlu0 %v2926_v20  ;;  %v5517_v20 = vld [vmem:[%s10606_s2 + $0x490] sm:$0xff] }
 0xe1d   :  { %v7426_v21 = vpop.eup %7425 }
 0xe1e   :  { %v2929_v22 = vsel %vm533_vm2, %v7426_v21, 0.0 }
 0xe1f   :  { %2930 = vadd.xlane.f32.xlu1 %v2929_v22 }
 0xea8   :  { %v2928_v25 = vpop.xlane.xlu0 %2927 }
 0xea9   :  { %7427 = vrcp.f32 %v2928_v25  ;;  %v5511_v25 = vld [vmem:[%s10606_s2 + $0x460] sm:$0xff] }
 0xeac   :  { %v2931_v5 = vpop.xlane.xlu1 %2930 }
 0xead   :  { %7429 = vrcp.f32 %v2931_v5  ;;  %v5512_v5 = vld [vmem:[%s10606_s2 + $0x468] sm:$0xff] }
 0xeb3   :  { %v7428_v6 = vpop.eup %7427 }
 0xeb4   :  { %v2934_v7 = vmul.f32 %v7428_v6, %v7424_v19  ;;  %v7047_v19 = vpack.c.bf16 %v5500_v18, %v5499_v17  ;;  %v7071_v6 = vpack.c.bf16 %v5512_v5, %v5511_v25  ;;  %v5564_v18 = vld [vmem:[%s10608_s4 + $0x408] sm:$0xff] }
 0xeb6   :  { %v2936_v8 = vmul.f32 %v9055_v0, %v2934_v7  ;;  %v5547_v0 = vld [vmem:[%s10605_s3 + $0x480] sm:$0xff]  ;;  %v5529_v7 = vld [vmem:[%s10606_s2 + $0x4f0] sm:$0xff] }
 0xeb7   :  { %v7430_v9 = vpop.eup %7429  ;;  %v7077_v13 = vpack.c.bf16 %v5548_v26, %v5547_v0  ;;  %v9234_v26 = vld [vmem:[%s10607_s0] sm:$0xff] }
 0xeb8   :  { %v2935_v10 = vmul.f32 %v7430_v9, %v7426_v21  ;;  %6550 = vmatmul.mubr.msk.f32.vlgmr.msra.gmra.mrb[56].mxu1 %vm533_vm2, %v2936_v8  ;;  %v5518_v21 = vld [vmem:[%s10606_s2 + $0x498] sm:$0xff] }
 0xeb9   :  { %6553 = vmatpush3.msra.mxu1 %v6224_v42  ;;  %6554 = vmatprep.mubr.msk.f32.mxu1 %vm7488_vm0, %v7487_v36  ;;  %v7049_v22 = vpack.c.bf16 %v5518_v21, %v5517_v20  ;;  %v7053_v42 = vpack.c.bf16 %v5520_v34, %v5519_v41  ;;  %v5530_v8 = vld [vmem:[%s10606_s2 + $0x4f8] sm:$0xff]  ;;  %v5531_v21 = vld [vmem:[%s10605_s3 + $0x400] sm:$0xff]  ;;  %v7081_v41 = vpack.c.bf16 %v5550_v40, %v5549_v39  ;;  %v5533_v34 = vld [vmem:[%s10605_s3 + $0x410] sm:$0xff] }
 0xeba   :  { %v2937_v11 = vmul.f32 %v9061_v2, %v2935_v10  ;;  %7078 = vmatprep.subr.bf16.mxu0 %v7077_v13  ;;  %v5515_v2 = vld [vmem:[%s10606_s2 + $0x480] sm:$0xff]  ;;  %v7073_v9 = vpack.c.bf16 %v5530_v8, %v5529_v7  ;;  %v5513_v10 = vld [vmem:[%s10606_s2 + $0x470] sm:$0xff]  ;;  %v9240_v13 = vld [vmem:[%s10607_s0 + $0x18] sm:$0xff] }
 0xebb   :  { %v7045_v15 = vpack.c.bf16 %v5516_v14, %v5515_v2  ;;  %v5579_v2 = vld [vmem:[%s10608_s4 + $0x480] sm:$0xff]  ;;  %v5580_v14 = vld [vmem:[%s10608_s4 + $0x488] sm:$0xff]  ;;  %v5542_v7 = vld [vmem:[%s10605_s3 + $0x458] sm:$0xff] }
 0xebc   :  { %6555 = vmatmul.mubr.msk.f32.vlgmr.msra.gmra.mrb[58].mxu1 %vm533_vm2, %v2937_v11  ;;  %v5514_v11 = vld [vmem:[%s10606_s2 + $0x478] sm:$0xff]  ;;  %v7109_v17 = vpack.c.bf16 %v5580_v14, %v5579_v2  ;;  %v5559_v8 = vld [vmem:[%s10605_s3 + $0x4e0] sm:$0xff]  ;;  %v5544_v2 = vld [vmem:[%s10605_s3 + $0x468] sm:$0xff] }
 0xebd   :  { %3386 = vmatprep.mubr.f32.mxu1 %v9126_v12  ;;  %7046 = vmatprep.subr.bf16.mxu1 %v7045_v15  ;;  %v7075_v0 = vpack.c.bf16 %v5514_v11, %v5513_v10  ;;  %v5563_v15 = vld [vmem:[%s10608_s4 + $0x400] sm:$0xff]  ;;  %v5561_v14 = vld [vmem:[%s10605_s3 + $0x4f0] sm:$0xff]  ;;  %v5582_v40 = vld [vmem:[%s10608_s4 + $0x498] sm:$0xff] }
 0xebe   :  { %7048 = vmatpush3.bf16.msra.mxu1 %v7047_v19  ;;  %v9258_v19 = vld [vmem:[%s10607_s0 + $0x10] sm:$0xff]  ;;  %v7111_v20 = vpack.c.bf16 %v5564_v18, %v5563_v15  ;;  %v5562_v15 = vld [vmem:[%s10605_s3 + $0x4f8] sm:$0xff] }
 0xebf   :  { %7050 = vmatprep.subr.bf16.mxu1 %v7049_v22  ;;  %v5532_v22 = vld [vmem:[%s10605_s3 + $0x408] sm:$0xff]  ;;  %v7105_v18 = vpack.c.bf16 %v5562_v15, %v5561_v14  ;;  %v5581_v39 = vld [vmem:[%s10608_s4 + $0x490] sm:$0xff]  ;;  %v5578_v14 = vld [vmem:[%s10608_s4 + $0x478] sm:$0xff] }
 0xec2   :  { %7052 = vmatpush3.bf16.msra.mxu1 %v7051_v33  ;;  %v7079_v33 = vpack.c.bf16 %v5532_v22, %v5531_v21  ;;  %v5546_v21 = vld [vmem:[%s10605_s3 + $0x478] sm:$0xff] }
 0xec3   :  { %7054 = vmatprep.subr.bf16.mxu1 %v7053_v42  ;;  %v5534_v42 = vld [vmem:[%s10605_s3 + $0x418] sm:$0xff] }
 0xec4   :  { %v7083_v45 = vpack.c.bf16 %v5534_v42, %v5533_v34  ;;  %v5566_v34 = vld [vmem:[%s10608_s4 + $0x418] sm:$0xff] }
 0xec6   :  { %7056 = vmatpush3.bf16.msra.mxu1 %v7055_v43  ;;  %v5552_v43 = vld [vmem:[%s10605_s3 + $0x4a8] sm:$0xff] }
 0xec7   :  { %7058 = vmatprep.subr.bf16.mxu1 %v7057_v46  ;;  %v7085_v46 = vpack.c.bf16 %v5552_v43, %v5551_v16  ;;  %v5584_v16 = vld [vmem:[%s10608_s4 + $0x4a8] sm:$0xff] }
 0xeca   :  { %7060 = vmatpush3.bf16.msra.mxu1 %v7059_v49 }
 0xecb   :  { %7062 = vmatprep.subr.bf16.mxu1 %v7061_v52 }
 0xece   :  { %7064 = vmatpush3.bf16.msra.mxu1 %v7063_v59  ;;  %v5537_v59 = vld [vmem:[%s10605_s3 + $0x430] sm:$0xff] }
 0xecf   :  { %7066 = vmatprep.subr.bf16.mxu1 %v7065_v62  ;;  %v5556_v62 = vld [vmem:[%s10605_s3 + $0x4c8] sm:$0xff]  ;;  %v7091_v63 = vpack.c.bf16 %v5538_v60, %v5537_v59  ;;  %v5571_v60 = vld [vmem:[%s10608_s4 + $0x440] sm:$0xff] }
 0xed0   :  { %v7093_v1 = vpack.c.bf16 %v5556_v62, %v5555_v61  ;;  %v5572_v61 = vld [vmem:[%s10608_s4 + $0x448] sm:$0xff]  ;;  %v5589_v62 = vld [vmem:[%s10608_s4 + $0x4d0] sm:$0xff] }
 0xed2   :  { %7068 = vmatpush3.bf16.msra.mxu1 %v7067_v3  ;;  %v5539_v3 = vld [vmem:[%s10605_s3 + $0x440] sm:$0xff] }
 0xed3   :  { %7070 = vmatprep.subr.bf16.mxu1 %v7069_v4  ;;  %v5558_v4 = vld [vmem:[%s10605_s3 + $0x4d8] sm:$0xff]  ;;  %v7095_v25 = vpack.c.bf16 %v5540_v23, %v5539_v3  ;;  %v5573_v23 = vld [vmem:[%s10608_s4 + $0x450] sm:$0xff] }
 0xed4   :  { %v7097_v5 = vpack.c.bf16 %v5558_v4, %v5557_v24  ;;  %v5574_v24 = vld [vmem:[%s10608_s4 + $0x458] sm:$0xff]  ;;  %v5591_v4 = vld [vmem:[%s10608_s4 + $0x4e0] sm:$0xff] }
 0xed6   :  { %7072 = vmatpush3.bf16.msra.mxu1 %v7071_v6  ;;  %v5541_v6 = vld [vmem:[%s10605_s3 + $0x450] sm:$0xff] }
 0xed7   :  { %7074 = vmatprep.subr.bf16.mxu1 %v7073_v9  ;;  %v5560_v9 = vld [vmem:[%s10605_s3 + $0x4e8] sm:$0xff]  ;;  %v7099_v10 = vpack.c.bf16 %v5542_v7, %v5541_v6  ;;  %v5575_v7 = vld [vmem:[%s10608_s4 + $0x460] sm:$0xff] }
 0xed8   :  { %v7101_v11 = vpack.c.bf16 %v5560_v9, %v5559_v8  ;;  %v5576_v8 = vld [vmem:[%s10608_s4 + $0x468] sm:$0xff]  ;;  %v5593_v9 = vld [vmem:[%s10608_s4 + $0x4f0] sm:$0xff] }
 0xeda   :  { %7076 = vmatpush3.bf16.msra.mxu1 %v7075_v0  ;;  %v5543_v0 = vld [vmem:[%s10605_s3 + $0x460] sm:$0xff] }
 0xedb   :  { %7110 = vmatprep.subr.bf16.mxu1 %v7109_v17  ;;  %v7103_v17 = vpack.c.bf16 %v5544_v2, %v5543_v0  ;;  %v5577_v2 = vld [vmem:[%s10608_s4 + $0x470] sm:$0xff] }
 0xedc   :  { %v7139_v15 = vpack.c.bf16 %v5578_v14, %v5577_v2 }
 0xedd   :  { %3387 = vmatmul.mubr.f32.vlgmr.msra.gmra.mrb[60].mxu1 %v9234_v26 }
 0xede   :  { %3391 = vmatprep.mubr.f32.mxu1 %v9240_v13  ;;  %7112 = vmatpush3.bf16.msra.mxu1 %v7111_v20  ;;  %v5545_v20 = vld [vmem:[%s10605_s3 + $0x470] sm:$0xff] }
 0xedf   :  { %v7107_v22 = vpack.c.bf16 %v5546_v21, %v5545_v20 }
 0xee1   :  { %3392 = vmatmul.mubr.f32.gmra.mrb[62].mxu1 %v9258_v19 }
 0xee2   :  { %3536 = vmatprep.mubr.f32.mxu1 %v9126_v12 }
 0xf8b   :  { %v3007_v35 = vpop.f32.mrb[56].mxu1 }
 0xf8c   :  { %v6551_v44 = vpop.f32.mrb[57].mxu1  ;;  %5495 = vmatmul.mubr.msk.f32.vlgmr.msra.gmra.mrb[32].mxu0 %vm372_vm1, %v3007_v35  ;;  %v5583_v35 = vld [vmem:[%s10608_s4 + $0x4a0] sm:$0xff] }
 0xf8d   :  { %7080 = vmatpush3.bf16.msra.mxu0 %v7079_v33  ;;  %3160 = vmatprep.mubr.f32.mxu0 %v7487_v36  ;;  %v7113_v33 = vpack.c.bf16 %v5582_v40, %v5581_v39  ;;  %v7117_v43 = vpack.c.bf16 %v5584_v16, %v5583_v35  ;;  %v5567_v44 = vld [vmem:[%s10608_s4 + $0x420] sm:$0xff] }
 0xf8e   :  { %7082 = vmatprep.subr.bf16.mxu0 %v7081_v41  ;;  %v5565_v41 = vld [vmem:[%s10608_s4 + $0x410] sm:$0xff] }
 0xf8f   :  { %v3080_v49 = vpop.f32.mrb[58].mxu1  ;;  %v7115_v42 = vpack.c.bf16 %v5566_v34, %v5565_v41  ;;  %7114 = vmatprep.subr.bf16.mxu1 %v7113_v33 }
 0xf90   :  { %v6556_v52 = vpop.f32.mrb[59].mxu1  ;;  %5496 = vmatmul.mubr.msk.f32.gmra.mrb[34].mxu0 %vm372_vm1, %v3080_v49  ;;  %v5569_v49 = vld [vmem:[%s10608_s4 + $0x430] sm:$0xff] }
 0xf91   :  { %7084 = vmatpush3.bf16.msra.mxu0 %v7083_v45  ;;  %3461 = vmatprep.mubr.f32.mxu0 %v9126_v12  ;;  %v5568_v45 = vld [vmem:[%s10608_s4 + $0x428] sm:$0xff]  ;;  %v5587_v52 = vld [vmem:[%s10608_s4 + $0x4c0] sm:$0xff] }
 0xf92   :  { %7086 = vmatprep.subr.bf16.mxu0 %v7085_v46  ;;  %7116 = vmatpush3.bf16.msra.mxu1 %v7115_v42  ;;  %v7119_v46 = vpack.c.bf16 %v5568_v45, %v5567_v44 }
 0xf93   :  { %7118 = vmatprep.subr.bf16.mxu1 %v7117_v43 }
 0xf95   :  { %7088 = vmatpush3.bf16.msra.mxu0 %v7087_v53  ;;  %v5588_v53 = vld [vmem:[%s10608_s4 + $0x4c8] sm:$0xff] }
 0xf96   :  { %7090 = vmatprep.subr.bf16.mxu0 %v7089_v58  ;;  %7120 = vmatpush3.bf16.msra.mxu1 %v7119_v46  ;;  %v7123_v58 = vpack.c.bf16 %v5570_v51, %v5569_v49  ;;  %v7125_v59 = vpack.c.bf16 %v5588_v53, %v5587_v52  ;;  %v9474_v52 = vld [vmem:[%s10609_s1 + $0x40] sm:$0xff] }
 0xf97   :  { %7122 = vmatprep.subr.bf16.mxu1 %v7121_v50  ;;  %v5615_v53 = vadd.f32 -1.0, %v9474_v52 }
 0xf99   :  { %7092 = vmatpush3.bf16.msra.mxu0 %v7091_v63  ;;  %v5590_v63 = vld [vmem:[%s10608_s4 + $0x4d8] sm:$0xff] }
 0xf9a   :  { %7094 = vmatprep.subr.bf16.mxu0 %v7093_v1  ;;  %7124 = vmatpush3.bf16.msra.mxu1 %v7123_v58  ;;  %v7127_v1 = vpack.c.bf16 %v5572_v61, %v5571_v60  ;;  %v7129_v3 = vpack.c.bf16 %v5590_v63, %v5589_v62  ;;  %v9480_v58 = vld [vmem:[%s10609_s1 + $0x48] sm:$0xff] }
 0xf9b   :  { %7126 = vmatprep.subr.bf16.mxu1 %v7125_v59  ;;  %v3703_v59 = vmul.f32 1e+09, %v5615_v53  ;;  %v5616_v60 = vadd.f32 -1.0, %v9480_v58  ;;  %v5605_v53 = vld [vmem:[%s10610_s5 + $0x250] sm:$0xff] }
 0xf9d   :  { %7096 = vmatpush3.bf16.msra.mxu0 %v7095_v25  ;;  %v5592_v25 = vld [vmem:[%s10608_s4 + $0x4e8] sm:$0xff] }
 0xf9e   :  { %7098 = vmatprep.subr.bf16.mxu0 %v7097_v5  ;;  %7128 = vmatpush3.bf16.msra.mxu1 %v7127_v1  ;;  %v7131_v5 = vpack.c.bf16 %v5574_v24, %v5573_v23  ;;  %v7133_v6 = vpack.c.bf16 %v5592_v25, %v5591_v4 }
 0xf9f   :  { %7130 = vmatprep.subr.bf16.mxu1 %v7129_v3  ;;  %v3704_v3 = vmul.f32 1e+09, %v5616_v60  ;;  %v5610_v60 = vld [vmem:[%s10610_s5 + $0x278] sm:$0xff] }
 0xfa1   :  { %7100 = vmatpush3.bf16.msra.mxu0 %v7099_v10  ;;  %v5594_v10 = vld [vmem:[%s10608_s4 + $0x4f8] sm:$0xff] }
 0xfa2   :  { %7102 = vmatprep.subr.bf16.mxu0 %v7101_v11  ;;  %7132 = vmatpush3.bf16.msra.mxu1 %v7131_v5  ;;  %v7135_v11 = vpack.c.bf16 %v5576_v8, %v5575_v7  ;;  %v7137_v0 = vpack.c.bf16 %v5594_v10, %v5593_v9 }
 0xfa3   :  { %7134 = vmatprep.subr.bf16.mxu1 %v7133_v6 }
 0xfa5   :  { %7104 = vmatpush3.bf16.msra.mxu0 %v7103_v17 }
 0xfa6   :  { %7106 = vmatprep.subr.bf16.mxu0 %v7105_v18  ;;  %7136 = vmatpush3.bf16.msra.mxu1 %v7135_v11 }
 0xfa7   :  { %7138 = vmatprep.subr.bf16.mxu1 %v7137_v0 }
 0xfa9   :  { %7108 = vmatpush3.bf16.msra.mxu0 %v7107_v22 }
 0xfaa   :  { %6562 = vmatprep.subr.mxu0 %v7487_v36  ;;  %7140 = vmatpush3.bf16.msra.mxu1 %v7139_v15 }
 0xfab   :  { %6557 = vmatprep.subr.mxu1 %v7487_v36 }
 0xfac   :  { %3462 = vmatmul.mubr.f32.vlgmr.msra.gmra.mrb[36].mxu0 %v9234_v26 }
 0xfad   :  { %3466 = vmatprep.mubr.f32.mxu0 %v9240_v13  ;;  %3537 = vmatmul.mubr.f32.vlgmr.msra.gmra.mrb[64].mxu1 %v9234_v26 }
 0xfae   :  { %3541 = vmatprep.mubr.f32.mxu1 %v9240_v13 }
 0xfb0   :  { %3467 = vmatmul.mubr.f32.gmra.mrb[38].mxu0 %v9258_v19  ;;  %v6265_v17 = vpop.f32.mrb[60].mxu1 }
 0xfb1   :  { %6564 = vmatprep.mubr.msk.f32.mxu0 %vm7488_vm0, %v7487_v36  ;;  %3542 = vmatmul.mubr.f32.gmra.mrb[66].mxu1 %v9258_v19  ;;  %v6266_v18 = vpop.f32.mrb[61].mxu1 }
 0xfb2   :  { %6559 = vmatprep.mubr.msk.f32.mxu1 %vm7488_vm0, %v7487_v36  ;;  %v6267_v20 = vadd.f32 %v6266_v18, %v6265_v17  ;;  %v5596_v18 = vld [vmem:[%s10610_s5 + $0x208] sm:$0xff] }
 0xfb4   :  { %v6268_v21 = vpop.f32.mrb[62].mxu1 }
 0xfb5   :  { %v6269_v22 = vpop.f32.mrb[63].mxu1 }
 0xfb6   :  { %v6270_v39 = vadd.f32 %v6269_v22, %v6268_v21  ;;  %v5595_v21 = vld [vmem:[%s10610_s5 + $0x200] sm:$0xff] }
0x105f   :  { %v9452_v40 = vpop.f32.mrb[32].mxu0 }
0x1060   :  { %v9454_v33 = vpop.f32.mrb[33].mxu0 }
0x1063   :  { %v9456_v41 = vpop.f32.mrb[34].mxu0 }
0x1064   :  { %v9458_v34 = vpop.f32.mrb[35].mxu0 }
0x107f   :  { %v6303_v42 = vpop.f32.mrb[36].mxu0 }
0x1080   :  { %v6304_v35 = vpop.f32.mrb[37].mxu0  ;;  %v6341_v46 = vpop.f32.mrb[64].mxu1 }
0x1081   :  { %v6305_v16 = vadd.f32 %v6304_v35, %v6303_v42  ;;  %v6342_v47 = vpop.f32.mrb[65].mxu1  ;;  %v5600_v42 = vld [vmem:[%s10610_s5 + $0x228] sm:$0xff]  ;;  %v5602_v35 = vld [vmem:[%s10610_s5 + $0x238] sm:$0xff] }
0x1082   :  { %v6343_v48 = vadd.f32 %v6342_v47, %v6341_v46  ;;  %v5604_v46 = vld [vmem:[%s10610_s5 + $0x248] sm:$0xff]  ;;  %v5606_v47 = vld [vmem:[%s10610_s5 + $0x258] sm:$0xff] }
0x1083   :  { %v6306_v43 = vpop.f32.mrb[38].mxu0  ;;  %6558 = vmatpush3.xpose.msk.msra.mxu1 %vm372_vm1, %v6305_v16 }
0x1084   :  { %v6307_v44 = vpop.f32.mrb[39].mxu0  ;;  %v6344_v49 = vpop.f32.mrb[66].mxu1 }
0x1085   :  { %v6308_v45 = vadd.f32 %v6307_v44, %v6306_v43  ;;  %v6345_v50 = vpop.f32.mrb[67].mxu1  ;;  %v7145_v43 = vpack.c.bf16 %v5602_v35, %v5600_v42  ;;  %v5599_v44 = vld [vmem:[%s10610_s5 + $0x220] sm:$0xff]  ;;  %v5644_v42 = vld [vmem:[%s10606_s2 + $0x5a8] sm:$0xff] }
0x1086   :  { %6560 = vmatmul.mubr.msk.f32.vlgmr.msra.gmra.mrb[68].mxu1 %vm372_vm1, %v6267_v20  ;;  %v9469_v51 = vadd.f32 %v6345_v50, %v6344_v49  ;;  %v5598_v20 = vld [vmem:[%s10610_s5 + $0x218] sm:$0xff]  ;;  %v7149_v49 = vpack.c.bf16 %v5606_v47, %v5604_v46  ;;  %v5603_v50 = vld [vmem:[%s10610_s5 + $0x240] sm:$0xff] }
0x1087   :  { %6563 = vmatpush3.xpose.msk.msra.mxu0 %vm372_vm1, %v6308_v45  ;;  %3947 = vmatprep.mubr.f32.mxu1 %v7487_v36  ;;  %v7141_v22 = vpack.c.bf16 %v5598_v20, %v5596_v18  ;;  %v5601_v45 = vld [vmem:[%s10610_s5 + $0x230] sm:$0xff]  ;;  %v5646_v46 = vld [vmem:[%s10606_s2 + $0x5b8] sm:$0xff] }
0x1088   :  { %6567 = vmatprep.subr.mxu0 %v7487_v36  ;;  %v5625_v20 = vld [vmem:[%s10606_s2 + $0x510] sm:$0xff] }
0x1089   :  { %7142 = vmatprep.subr.bf16.mxu1 %v7141_v22 }
0x108a   :  { %6565 = vmatmul.mubr.msk.f32.vlgmr.msra.gmra.mrb[40].mxu0 %vm372_vm1, %v6270_v39  ;;  %v5597_v39 = vld [vmem:[%s10610_s5 + $0x210] sm:$0xff] }
0x108b   :  { %6569 = vmatprep.mubr.msk.f32.mxu0 %vm7488_vm0, %v7487_v36  ;;  %6568 = vmatpush3.msra.mxu0 %v6343_v48  ;;  %v7143_v16 = vpack.c.bf16 %v5597_v39, %v5595_v21  ;;  %v7147_v48 = vpack.c.bf16 %v5601_v45, %v5599_v44  ;;  %v5626_v21 = vld [vmem:[%s10606_s2 + $0x518] sm:$0xff]  ;;  %v5643_v39 = vld [vmem:[%s10606_s2 + $0x5a0] sm:$0xff]  ;;  %v5645_v45 = vld [vmem:[%s10606_s2 + $0x5b0] sm:$0xff] }
0x108c   :  { %6572 = vmatprep.subr.mxu0 %v7487_v36  ;;  %v7163_v22 = vpack.c.bf16 %v5626_v21, %v5625_v20  ;;  %v7165_v35 = vpack.c.bf16 %v5644_v42, %v5643_v39  ;;  %v7169_v47 = vpack.c.bf16 %v5646_v46, %v5645_v45  ;;  %v5658_v39 = vld [vmem:[%s10605_s3 + $0x518] sm:$0xff]  ;;  %v5659_v46 = vld [vmem:[%s10605_s3 + $0x520] sm:$0xff] }
0x108d   :  { %7144 = vmatpush1.bf16.msra.mxu1 %v7143_v16  ;;  %v5627_v16 = vld [vmem:[%s10606_s2 + $0x520] sm:$0xff] }
0x108e   :  { %7146 = vmatprep.subr.bf16.mxu1 %v7145_v43  ;;  %v5628_v43 = vld [vmem:[%s10606_s2 + $0x528] sm:$0xff] }
0x108f   :  { %v7167_v44 = vpack.c.bf16 %v5628_v43, %v5627_v16  ;;  %v5676_v16 = vld [vmem:[%s10605_s3 + $0x5a8] sm:$0xff] }
0x1091   :  { %7148 = vmatpush1.bf16.msra.mxu1 %v7147_v48  ;;  %v5629_v48 = vld [vmem:[%s10606_s2 + $0x530] sm:$0xff] }
0x1092   :  { %7150 = vmatprep.subr.bf16.mxu1 %v7149_v49  ;;  %v5630_v49 = vld [vmem:[%s10606_s2 + $0x538] sm:$0xff] }
0x1159   :  { %v3619_v61 = vpop.f32.mrb[68].mxu1 }
0x115a   :  { %v3699_v62 = vmul.f32 0.125, %v3619_v61  ;;  %v6561_v63 = vpop.f32.mrb[69].mxu1  ;;  %v7151_v61 = vpack.c.bf16 %v5605_v53, %v5603_v50  ;;  %v7171_v50 = vpack.c.bf16 %v5630_v49, %v5629_v48  ;;  %v5647_v53 = vld [vmem:[%s10606_s2 + $0x5c0] sm:$0xff]  ;;  %v5677_v49 = vld [vmem:[%s10605_s3 + $0x5b0] sm:$0xff] }
0x115b   :  { %v5607_v63 = vld [vmem:[%s10610_s5 + $0x260] sm:$0xff] }
0x115c   :  { %v3705_v1 = vadd.f32 %v3703_v59, %v3699_v62  ;;  %v5608_v59 = vld [vmem:[%s10610_s5 + $0x268] sm:$0xff]  ;;  %7152 = vmatpush1.bf16.msra.mxu1 %v7151_v61  ;;  %v5631_v61 = vld [vmem:[%s10606_s2 + $0x540] sm:$0xff] }
0x115d   :  { %v3695_v23 = vpop.f32.mrb[40].mxu0  ;;  %v7153_v62 = vpack.c.bf16 %v5610_v60, %v5608_v59  ;;  %v5648_v59 = vld [vmem:[%s10606_s2 + $0x5c8] sm:$0xff] }
0x115e   :  { %v3700_v24 = vmul.f32 0.125, %v3695_v23  ;;  %v3707_v4 = vsel %vm533_vm2, %v3705_v1, -inf  ;;  %v6566_v25 = vpop.f32.mrb[41].mxu0  ;;  %v7173_v60 = vpack.c.bf16 %v5648_v59, %v5647_v53 }
0x115f   :  { %3708 = vmax.xlane.f32.xlu0 %v3707_v4  ;;  %7154 = vmatprep.subr.bf16.mxu1 %v7153_v62  ;;  %v5632_v62 = vld [vmem:[%s10606_s2 + $0x548] sm:$0xff] }
0x1160   :  { %v3706_v5 = vadd.f32 %v3704_v3, %v3700_v24 }
0x1162   :  { %v3710_v6 = vsel %vm533_vm2, %v3706_v5, -inf }
0x1163   :  { %3711 = vmax.xlane.f32.xlu1 %v3710_v6 }
0x11ec   :  { %v3709_v7 = vpop.xlane.xlu0 %3708 }
0x11ed   :  { %v3713_v8 = vsub.f32 %v3705_v1, %v3709_v7  ;;  %v5609_v1 = vld [vmem:[%s10610_s5 + $0x270] sm:$0xff] }
0x11ee   :  { %v7155_v3 = vpack.c.bf16 %v5609_v1, %v5607_v63  ;;  %v7175_v63 = vpack.c.bf16 %v5632_v62, %v5631_v61  ;;  %v5649_v1 = vld [vmem:[%s10606_s2 + $0x5d0] sm:$0xff]  ;;  %v5662_v62 = vld [vmem:[%s10605_s3 + $0x538] sm:$0xff] }
0x11ef   :  { %v3715_v9 = vmul.f32 1.442695, %v3713_v8  ;;  %v5661_v61 = vld [vmem:[%s10605_s3 + $0x530] sm:$0xff] }
0x11f0   :  { %v3712_v10 = vpop.xlane.xlu1 %3711  ;;  %7156 = vmatpush1.bf16.msra.mxu1 %v7155_v3  ;;  %v5650_v3 = vld [vmem:[%s10606_s2 + $0x5d8] sm:$0xff] }
0x11f1   :  { %7431 = vpow2.f32 %v3715_v9  ;;  %v3714_v11 = vsub.f32 %v3706_v5, %v3712_v10  ;;  %v5671_v9 = vld [vmem:[%s10605_s3 + $0x580] sm:$0xff] }
0x11f3   :  { %v3717_v0 = vmul.f32 1.442695, %v3714_v11 }
0x11f5   :  { %7433 = vpow2.f32 %v3717_v0  ;;  %v5623_v0 = vld [vmem:[%s10606_s2 + $0x500] sm:$0xff] }
0x11fb   :  { %v7432_v2 = vpop.eup %7431 }
0x11fc   :  { %v3719_v14 = vsel %vm533_vm2, %v7432_v2, 0.0 }
0x11fd   :  { %3720 = vadd.xlane.f32.xlu0 %v3719_v14 }
0x11ff   :  { %v7434_v15 = vpop.eup %7433 }
0x1200   :  { %v3722_v17 = vsel %vm533_vm2, %v7434_v15, 0.0 }
0x1201   :  { %3723 = vadd.xlane.f32.xlu1 %v3722_v17  ;;  %v5642_v17 = vld [vmem:[%s10606_s2 + $0x598] sm:$0xff] }
0x128a   :  { %v3721_v23 = vpop.xlane.xlu0 %3720 }
0x128b   :  { %7435 = vrcp.f32 %v3721_v23  ;;  %v7177_v23 = vpack.c.bf16 %v5650_v3, %v5649_v1  ;;  %v5680_v1 = vld [vmem:[%s10605_s3 + $0x5c8] sm:$0xff] }
0x128e   :  { %v3724_v24 = vpop.xlane.xlu1 %3723 }
0x128f   :  { %7437 = vrcp.f32 %v3724_v24  ;;  %v5633_v24 = vld [vmem:[%s10606_s2 + $0x550] sm:$0xff] }
0x1295   :  { %v7436_v4 = vpop.eup %7435 }
0x1296   :  { %v3727_v25 = vmul.f32 %v7436_v4, %v7432_v2  ;;  %v5624_v2 = vld [vmem:[%s10606_s2 + $0x508] sm:$0xff]  ;;  %v5634_v4 = vld [vmem:[%s10606_s2 + $0x558] sm:$0xff] }
0x1297   :  { %v7159_v14 = vpack.c.bf16 %v5624_v2, %v5623_v0  ;;  %v5638_v0 = vld [vmem:[%s10606_s2 + $0x578] sm:$0xff] }
0x1298   :  { %v3729_v5 = vmul.f32 %v9474_v52, %v3727_v25  ;;  %v5672_v52 = vld [vmem:[%s10605_s3 + $0x588] sm:$0xff]  ;;  %v7179_v25 = vpack.c.bf16 %v5634_v4, %v5633_v24  ;;  %v5681_v4 = vld [vmem:[%s10605_s3 + $0x5d0] sm:$0xff] }
0x1299   :  { %v7438_v6 = vpop.eup %7437  ;;  %v7189_v10 = vpack.c.bf16 %v5672_v52, %v5671_v9  ;;  %v5636_v9 = vld [vmem:[%s10606_s2 + $0x568] sm:$0xff] }
0x129a   :  { %v3728_v7 = vmul.f32 %v7438_v6, %v7434_v15  ;;  %6570 = vmatmul.mubr.msk.f32.vlgmr.msra.gmra.mrb[42].mxu0 %vm533_vm2, %v3729_v5  ;;  %v5641_v15 = vld [vmem:[%s10606_s2 + $0x590] sm:$0xff]  ;;  %v5651_v5 = vld [vmem:[%s10606_s2 + $0x5e0] sm:$0xff]  ;;  %v5652_v6 = vld [vmem:[%s10606_s2 + $0x5e8] sm:$0xff] }
0x129b   :  { %6573 = vmatpush3.msra.mxu0 %v9469_v51  ;;  %6574 = vmatprep.mubr.msk.f32.mxu0 %vm7488_vm0, %v7487_v36  ;;  %v5639_v51 = vld [vmem:[%s10606_s2 + $0x580] sm:$0xff]  ;;  %v7161_v18 = vpack.c.bf16 %v5642_v17, %v5641_v15  ;;  %v5656_v15 = vld [vmem:[%s10605_s3 + $0x508] sm:$0xff]  ;;  %v5673_v17 = vld [vmem:[%s10605_s3 + $0x590] sm:$0xff] }
0x129c   :  { %v3730_v8 = vmul.f32 %v9480_v58, %v3728_v7  ;;  %v5640_v58 = vld [vmem:[%s10606_s2 + $0x588] sm:$0xff]  ;;  %7190 = vmatprep.subr.bf16.mxu1 %v7189_v10  ;;  %v7181_v7 = vpack.c.bf16 %v5652_v6, %v5651_v5  ;;  %v5653_v10 = vld [vmem:[%s10606_s2 + $0x5f0] sm:$0xff] }
0x129d   :  { %v7157_v11 = vpack.c.bf16 %v5640_v58, %v5639_v51  ;;  %v5654_v51 = vld [vmem:[%s10606_s2 + $0x5f8] sm:$0xff]  ;;  %v5664_v24 = vld [vmem:[%s10605_s3 + $0x548] sm:$0xff] }
0x129e   :  { %6575 = vmatmul.mubr.msk.f32.vlgmr.msra.gmra.mrb[44].mxu0 %vm533_vm2, %v3730_v8  ;;  %v5635_v8 = vld [vmem:[%s10606_s2 + $0x560] sm:$0xff]  ;;  %v7185_v58 = vpack.c.bf16 %v5654_v51, %v5653_v10 }
0x129f   :  { %4179 = vmatprep.mubr.f32.mxu0 %v9126_v12  ;;  %7158 = vmatprep.subr.bf16.mxu0 %v7157_v11  ;;  %v7183_v52 = vpack.c.bf16 %v5636_v9, %v5635_v8  ;;  %v5637_v11 = vld [vmem:[%s10606_s2 + $0x570] sm:$0xff]  ;;  %v5666_v8 = vld [vmem:[%s10605_s3 + $0x558] sm:$0xff]  ;;  %v5683_v9 = vld [vmem:[%s10605_s3 + $0x5e0] sm:$0xff] }
0x12a0   :  { %7160 = vmatpush3.bf16.msra.mxu0 %v7159_v14  ;;  %v7187_v2 = vpack.c.bf16 %v5638_v0, %v5637_v11  ;;  %v5655_v14 = vld [vmem:[%s10605_s3 + $0x500] sm:$0xff]  ;;  %v5668_v11 = vld [vmem:[%s10605_s3 + $0x568] sm:$0xff]  ;;  %v5685_v0 = vld [vmem:[%s10605_s3 + $0x5f0] sm:$0xff] }
0x12a1   :  { %7162 = vmatprep.subr.bf16.mxu0 %v7161_v18  ;;  %v5674_v18 = vld [vmem:[%s10605_s3 + $0x598] sm:$0xff]  ;;  %v7191_v20 = vpack.c.bf16 %v5656_v15, %v5655_v14 }
0x12a2   :  { %v7193_v21 = vpack.c.bf16 %v5674_v18, %v5673_v17  ;;  %v5669_v17 = vld [vmem:[%s10605_s3 + $0x570] sm:$0xff]  ;;  %v5670_v18 = vld [vmem:[%s10605_s3 + $0x578] sm:$0xff] }
0x12a4   :  { %7164 = vmatpush3.bf16.msra.mxu0 %v7163_v22  ;;  %v5657_v22 = vld [vmem:[%s10605_s3 + $0x510] sm:$0xff] }
0x12a5   :  { %7166 = vmatprep.subr.bf16.mxu0 %v7165_v35  ;;  %v5675_v35 = vld [vmem:[%s10605_s3 + $0x5a0] sm:$0xff] }
0x12a6   :  { %v7197_v45 = vpack.c.bf16 %v5676_v16, %v5675_v35 }
0x12a8   :  { %7168 = vmatpush3.bf16.msra.mxu0 %v7167_v44  ;;  %v7195_v44 = vpack.c.bf16 %v5658_v39, %v5657_v22 }
0x12a9   :  { %7170 = vmatprep.subr.bf16.mxu0 %v7169_v47  ;;  %v5660_v47 = vld [vmem:[%s10605_s3 + $0x528] sm:$0xff] }
0x12aa   :  { %v7199_v59 = vpack.c.bf16 %v5660_v47, %v5659_v46 }
0x12ac   :  { %7172 = vmatpush3.bf16.msra.mxu0 %v7171_v50  ;;  %v5678_v50 = vld [vmem:[%s10605_s3 + $0x5b8] sm:$0xff] }
0x12ad   :  { %7174 = vmatprep.subr.bf16.mxu0 %v7173_v60  ;;  %v7201_v60 = vpack.c.bf16 %v5678_v50, %v5677_v49 }
0x12b0   :  { %7176 = vmatpush3.bf16.msra.mxu0 %v7175_v63  ;;  %v5679_v63 = vld [vmem:[%s10605_s3 + $0x5c0] sm:$0xff] }
0x12b1   :  { %7178 = vmatprep.subr.bf16.mxu0 %v7177_v23  ;;  %v7205_v3 = vpack.c.bf16 %v5680_v1, %v5679_v63  ;;  %v5663_v23 = vld [vmem:[%s10605_s3 + $0x540] sm:$0xff]  ;;  %v5688_v1 = vld [vmem:[%s10608_s4 + $0x508] sm:$0xff] }
0x12b2   :  { %v7207_v5 = vpack.c.bf16 %v5664_v24, %v5663_v23 }
0x12b4   :  { %7180 = vmatpush3.bf16.msra.mxu0 %v7179_v25  ;;  %v5682_v25 = vld [vmem:[%s10605_s3 + $0x5d8] sm:$0xff] }
0x12b5   :  { %7182 = vmatprep.subr.bf16.mxu0 %v7181_v7  ;;  %v7209_v6 = vpack.c.bf16 %v5682_v25, %v5681_v4  ;;  %v5665_v7 = vld [vmem:[%s10605_s3 + $0x550] sm:$0xff]  ;;  %v5690_v25 = vld [vmem:[%s10608_s4 + $0x518] sm:$0xff] }
0x12b6   :  { %v7211_v10 = vpack.c.bf16 %v5666_v8, %v5665_v7  ;;  %v5689_v4 = vld [vmem:[%s10608_s4 + $0x510] sm:$0xff] }
0x12b7   :  { %v7227_v7 = vpack.c.bf16 %v5690_v25, %v5689_v4  ;;  %v9876_v25 = vld [vmem:[%s10609_s1 + $0x58] sm:$0xff] }
0x12b8   :  { %7184 = vmatpush3.bf16.msra.mxu0 %v7183_v52  ;;  %v5684_v52 = vld [vmem:[%s10605_s3 + $0x5e8] sm:$0xff] }
0x12b9   :  { %7186 = vmatprep.subr.bf16.mxu0 %v7185_v58  ;;  %v7213_v51 = vpack.c.bf16 %v5684_v52, %v5683_v9  ;;  %v5667_v58 = vld [vmem:[%s10605_s3 + $0x560] sm:$0xff]  ;;  %v5692_v52 = vld [vmem:[%s10608_s4 + $0x528] sm:$0xff] }
0x12ba   :  { %v7215_v14 = vpack.c.bf16 %v5668_v11, %v5667_v58  ;;  %v5691_v9 = vld [vmem:[%s10608_s4 + $0x520] sm:$0xff] }
0x12bb   :  { %v7231_v58 = vpack.c.bf16 %v5692_v52, %v5691_v9 }
0x12bc   :  { %7188 = vmatpush3.bf16.msra.mxu0 %v7187_v2  ;;  %v5686_v2 = vld [vmem:[%s10605_s3 + $0x5f8] sm:$0xff] }
0x12bd   :  { %v7217_v15 = vpack.c.bf16 %v5686_v2, %v5685_v0  ;;  %v5693_v0 = vld [vmem:[%s10608_s4 + $0x530] sm:$0xff]  ;;  %v5694_v2 = vld [vmem:[%s10608_s4 + $0x538] sm:$0xff] }
0x12bf   :  { %4180 = vmatmul.mubr.f32.vlgmr.msra.gmra.mrb[46].mxu0 %v9234_v26 }
0x12c0   :  { %4184 = vmatprep.mubr.f32.mxu0 %v9240_v13 }
0x12c3   :  { %4185 = vmatmul.mubr.f32.gmra.mrb[48].mxu0 %v9258_v19 }
0x12c4   :  { %4329 = vmatprep.mubr.f32.mxu0 %v9126_v12 }
0x136d   :  { %v3800_v42 = vpop.f32.mrb[42].mxu0 }
0x136e   :  { %v6571_v43 = vpop.f32.mrb[43].mxu0  ;;  %5619 = vmatmul.mubr.msk.f32.vlgmr.msra.gmra.mrb[70].mxu1 %vm372_vm1, %v3800_v42 }
0x136f   :  { %7192 = vmatpush3.bf16.msra.mxu1 %v7191_v20  ;;  %3953 = vmatprep.mubr.f32.mxu1 %v7487_v36  ;;  %v7219_v20 = vpack.c.bf16 %v5670_v18, %v5669_v17  ;;  %v7235_v17 = vpack.c.bf16 %v5694_v2, %v5693_v0 }
0x1370   :  { %7194 = vmatprep.subr.bf16.mxu1 %v7193_v21 }
0x1371   :  { %v3873_v48 = vpop.f32.mrb[44].mxu0 }
0x1372   :  { %v6576_v53 = vpop.f32.mrb[45].mxu0  ;;  %5620 = vmatmul.mubr.msk.f32.gmra.mrb[72].mxu1 %vm372_vm1, %v3873_v48 }
0x1373   :  { %7196 = vmatpush3.bf16.msra.mxu1 %v7195_v44  ;;  %4254 = vmatprep.mubr.f32.mxu1 %v9126_v12  ;;  %v7203_v12 = vpack.c.bf16 %v5662_v62, %v5661_v61  ;;  %v5704_v61 = vld [vmem:[%s10608_s4 + $0x588] sm:$0xff]  ;;  %v5687_v62 = vld [vmem:[%s10608_s4 + $0x500] sm:$0xff] }
0x1374   :  { %7198 = vmatprep.subr.bf16.mxu1 %v7197_v45  ;;  %v7223_v23 = vpack.c.bf16 %v5688_v1, %v5687_v62  ;;  %v5718_v62 = vld [vmem:[%s10608_s4 + $0x5f8] sm:$0xff] }
0x1377   :  { %7200 = vmatpush3.bf16.msra.mxu1 %v7199_v59 }
0x1378   :  { %7202 = vmatprep.subr.bf16.mxu1 %v7201_v60  ;;  %v5703_v60 = vld [vmem:[%s10608_s4 + $0x580] sm:$0xff] }
0x1379   :  { %v7221_v63 = vpack.c.bf16 %v5704_v61, %v5703_v60  ;;  %v5700_v60 = vld [vmem:[%s10608_s4 + $0x568] sm:$0xff]  ;;  %v5717_v61 = vld [vmem:[%s10608_s4 + $0x5f0] sm:$0xff] }
0x137a   :  { %v7249_v1 = vpack.c.bf16 %v5718_v62, %v5717_v61 }
0x137b   :  { %7204 = vmatpush3.bf16.msra.mxu1 %v7203_v12  ;;  %v5705_v12 = vld [vmem:[%s10608_s4 + $0x590] sm:$0xff]  ;;  %7222 = vmatprep.subr.bf16.mxu0 %v7221_v63 }
0x137c   :  { %7206 = vmatprep.subr.bf16.mxu1 %v7205_v3  ;;  %v5706_v3 = vld [vmem:[%s10608_s4 + $0x598] sm:$0xff]  ;;  %7224 = vmatpush3.bf16.msra.mxu0 %v7223_v23 }
0x137d   :  { %v7225_v24 = vpack.c.bf16 %v5706_v3, %v5705_v12  ;;  %v5701_v12 = vld [vmem:[%s10608_s4 + $0x570] sm:$0xff]  ;;  %v5702_v3 = vld [vmem:[%s10608_s4 + $0x578] sm:$0xff] }
0x137e   :  { %v7251_v23 = vpack.c.bf16 %v5702_v3, %v5701_v12 }
0x137f   :  { %7208 = vmatpush3.bf16.msra.mxu1 %v7207_v5  ;;  %v5707_v5 = vld [vmem:[%s10608_s4 + $0x5a0] sm:$0xff]  ;;  %7226 = vmatprep.subr.bf16.mxu0 %v7225_v24  ;;  %v9870_v24 = vld [vmem:[%s10609_s1 + $0x50] sm:$0xff] }
0x1380   :  { %7210 = vmatprep.subr.bf16.mxu1 %v7209_v6  ;;  %v5708_v6 = vld [vmem:[%s10608_s4 + $0x5a8] sm:$0xff]  ;;  %7228 = vmatpush3.bf16.msra.mxu0 %v7227_v7  ;;  %v5739_v4 = vadd.f32 -1.0, %v9870_v24 }
0x1381   :  { %v7229_v8 = vpack.c.bf16 %v5708_v6, %v5707_v5 }
0x1382   :  { %v4496_v5 = vmul.f32 1e+09, %v5739_v4 }
0x1383   :  { %7212 = vmatpush3.bf16.msra.mxu1 %v7211_v10  ;;  %v5709_v10 = vld [vmem:[%s10608_s4 + $0x5b0] sm:$0xff]  ;;  %7230 = vmatprep.subr.bf16.mxu0 %v7229_v8 }
0x1384   :  { %7214 = vmatprep.subr.bf16.mxu1 %v7213_v51  ;;  %v5710_v51 = vld [vmem:[%s10608_s4 + $0x5b8] sm:$0xff]  ;;  %7232 = vmatpush3.bf16.msra.mxu0 %v7231_v58 }
0x1385   :  { %v7233_v11 = vpack.c.bf16 %v5710_v51, %v5709_v10 }
0x1387   :  { %7216 = vmatpush3.bf16.msra.mxu1 %v7215_v14  ;;  %v5711_v14 = vld [vmem:[%s10608_s4 + $0x5c0] sm:$0xff]  ;;  %7234 = vmatprep.subr.bf16.mxu0 %v7233_v11 }
0x1388   :  { %7218 = vmatprep.subr.bf16.mxu1 %v7217_v15  ;;  %v5712_v15 = vld [vmem:[%s10608_s4 + $0x5c8] sm:$0xff]  ;;  %7236 = vmatpush3.bf16.msra.mxu0 %v7235_v17 }
0x1389   :  { %v7237_v18 = vpack.c.bf16 %v5712_v15, %v5711_v14 }
0x138b   :  { %7220 = vmatpush3.bf16.msra.mxu1 %v7219_v20  ;;  %v5695_v20 = vld [vmem:[%s10608_s4 + $0x540] sm:$0xff]  ;;  %7238 = vmatprep.subr.bf16.mxu0 %v7237_v18 }
0x138c   :  { %6577 = vmatprep.subr.mxu1 %v7487_v36 }
0x138e   :  { %4255 = vmatmul.mubr.f32.vlgmr.msra.gmra.mrb[74].mxu1 %v9234_v26 }
0x138f   :  { %4259 = vmatprep.mubr.f32.mxu1 %v9240_v13 }
0x1392   :  { %4260 = vmatmul.mubr.f32.gmra.mrb[76].mxu1 %v9258_v19  ;;  %v6387_v21 = vpop.f32.mrb[46].mxu0 }
0x1393   :  { %6579 = vmatprep.mubr.msk.f32.mxu1 %vm7488_vm0, %v7487_v36  ;;  %v6388_v22 = vpop.f32.mrb[47].mxu0 }
0x1394   :  { %v6389_v39 = vadd.f32 %v6388_v22, %v6387_v21  ;;  %v5696_v21 = vld [vmem:[%s10608_s4 + $0x548] sm:$0xff]  ;;  %v5713_v22 = vld [vmem:[%s10608_s4 + $0x5d0] sm:$0xff] }
0x1396   :  { %v6390_v42 = vpop.f32.mrb[48].mxu0 }
0x1397   :  { %v6391_v35 = vpop.f32.mrb[49].mxu0 }
0x1398   :  { %v6392_v16 = vadd.f32 %v6391_v35, %v6390_v42  ;;  %v7239_v42 = vpack.c.bf16 %v5696_v21, %v5695_v20  ;;  %v9884_v20 = vld [vmem:[%s10607_s0] sm:$0xff] }
0x1399   :  { %v9888_v21 = vadd.f32 %v9884_v20, %v8138_v27  ;;  %v9906_v27 = vadd.f32 %v9884_v20, %v8546_v31  ;;  %v9921_v31 = vld [vmem:[%s10607_s0 + $0x10] sm:$0xff] }
0x139a   :  { %7240 = vmatpush3.bf16.msra.mxu0 %v7239_v42  ;;  %v9944_v61 = vadd.f32 %v9921_v31, %v8938_v56 }
0x1441   :  { %v9749_v43 = vpop.f32.mrb[70].mxu1 }
0x1442   :  { %v9751_v44 = vpop.f32.mrb[71].mxu1 }
0x1445   :  { %v9753_v45 = vpop.f32.mrb[72].mxu1 }
0x1446   :  { %v9755_v46 = vpop.f32.mrb[73].mxu1  ;;  %v9982_v3 = vadd.f32 %v9921_v31, %v9753_v45 }
0x1461   :  { %v6425_v47 = vpop.f32.mrb[74].mxu1 }
0x1462   :  { %v6426_v48 = vpop.f32.mrb[75].mxu1 }
0x1463   :  { %v6427_v49 = vadd.f32 %v6426_v48, %v6425_v47  ;;  %v5698_v47 = vld [vmem:[%s10608_s4 + $0x558] sm:$0xff]  ;;  %v5715_v48 = vld [vmem:[%s10608_s4 + $0x5e0] sm:$0xff] }
0x1465   :  { %v6428_v50 = vpop.f32.mrb[76].mxu1  ;;  %6578 = vmatpush3.xpose.msk.msra.mxu1 %vm372_vm1, %v6427_v49  ;;  %v5716_v49 = vld [vmem:[%s10608_s4 + $0x5e8] sm:$0xff] }
0x1466   :  { %v6429_v53 = vpop.f32.mrb[77].mxu1  ;;  %6582 = vmatprep.subr.mxu1 %v7487_v36 }
0x1467   :  { %v6430_v59 = vadd.f32 %v6429_v53, %v6428_v50  ;;  %v7245_v53 = vpack.c.bf16 %v5716_v49, %v5715_v48 }
0x1468   :  { %6580 = vmatmul.mubr.msk.f32.vlgmr.msra.gmra.mrb[78].mxu1 %vm372_vm1, %v6389_v39  ;;  %v5714_v39 = vld [vmem:[%s10608_s4 + $0x5d8] sm:$0xff] }
0x1469   :  { %6583 = vmatpush3.xpose.msk.msra.mxu1 %vm372_vm1, %v6430_v59  ;;  %6584 = vmatprep.mubr.msk.f32.mxu1 %vm7488_vm0, %v7487_v36  ;;  %v7241_v35 = vpack.c.bf16 %v5714_v39, %v5713_v22  ;;  %v5699_v59 = vld [vmem:[%s10608_s4 + $0x560] sm:$0xff]  ;;  %v9893_v22 = vld [vmem:[%s10607_s0 + $0x8] sm:$0xff] }
0x146a   :  { %6587 = vmatprep.subr.mxu1 %v7487_v36  ;;  %v7247_v63 = vpack.c.bf16 %v5700_v60, %v5699_v59  ;;  %v779_v39 = vadd.f32 %v9893_v22, %v8140_v28  ;;  %v9910_v48 = vadd.f32 %v9893_v22, %v8548_v32  ;;  %v2364_v28 = vadd.f32 %v9884_v20, %v8934_v54  ;;  %v9930_v54 = vld [vmem:[%s10607_s0 + $0x18] sm:$0xff] }
0x146b   :  { %7242 = vmatprep.subr.bf16.mxu0 %v7241_v35  ;;  %v2366_v49 = vadd.f32 %v9893_v22, %v8936_v55  ;;  %v9925_v32 = vadd.f32 %v9921_v31, %v8142_v29  ;;  %v9934_v55 = vadd.f32 %v9930_v54, %v8144_v30  ;;  %v1579_v59 = vadd.f32 %v9930_v54, %v8552_v38 }
0x146c   :  { %6585 = vmatmul.mubr.msk.f32.vlgmr.msra.gmra.mrb[80].mxu1 %vm372_vm1, %v6392_v16  ;;  %v5697_v16 = vld [vmem:[%s10608_s4 + $0x550] sm:$0xff]  ;;  %v1581_v60 = vadd.f32 %v9910_v48, %v9906_v27  ;;  %v9948_v30 = vadd.f32 %v9930_v54, %v8940_v57  ;;  %v9956_v38 = vadd.f32 %v9893_v22, %v9454_v33  ;;  %v9970_v33 = vadd.f32 %v9930_v54, %v9458_v34 }
0x146d   :  { %6589 = vmatprep.mubr.msk.f32.mxu1 %vm7488_vm0, %v7487_v36  ;;  %v7243_v50 = vpack.c.bf16 %v5698_v47, %v5697_v16  ;;  %v787_v16 = vadd.f32 %v779_v39, %v9888_v21  ;;  %v2374_v29 = vadd.f32 %v2366_v49, %v2364_v28  ;;  %v790_v62 = vadd.f32 %v9934_v55, %v9925_v32 }
0x146e   :  { %v2377_v57 = vadd.f32 %v9948_v30, %v9944_v61  ;;  %v9978_v12 = vadd.f32 %v9893_v22, %v9751_v44 }
0x146f   :  { %7244 = vmatpush3.bf16.msra.mxu0 %v7243_v50 }
0x1470   :  { %7246 = vmatprep.subr.bf16.mxu0 %v7245_v53  ;;  %v1577_v53 = vadd.f32 %v9921_v31, %v8550_v37  ;;  %v9952_v37 = vadd.f32 %v9884_v20, %v9452_v40  ;;  %v9966_v40 = vadd.f32 %v9921_v31, %v9456_v41  ;;  %v9986_v41 = vadd.f32 %v9930_v54, %v9755_v46 }
0x1472   :  { %v3167_v56 = vadd.f32 %v9956_v38, %v9952_v37  ;;  %v3963_v44 = vadd.f32 %v9986_v41, %v9982_v3 }
0x1473   :  { %7248 = vmatpush3.bf16.msra.mxu0 %v7247_v63  ;;  %v1584_v63 = vadd.f32 %v1579_v59, %v1577_v53 }
0x1474   :  { %7250 = vmatprep.subr.bf16.mxu0 %v7249_v1  ;;  %v9974_v1 = vadd.f32 %v9884_v20, %v9749_v43  ;;  %v3170_v43 = vadd.f32 %v9970_v33, %v9966_v40 }
0x1476   :  { %v3960_v34 = vadd.f32 %v9978_v12, %v9974_v1 }
0x1477   :  { %7252 = vmatpush3.bf16.msra.mxu0 %v7251_v23 }
0x147a   :  { %4330 = vmatmul.mubr.f32.vlgmr.msra.gmra.mrb[50].mxu0 %v9234_v26  ;;  %v5740_v26 = vadd.f32 -1.0, %v9876_v25 }
0x147b   :  { %4334 = vmatprep.mubr.f32.mxu0 %v9240_v13 }
0x147c   :  { %v4497_v8 = vmul.f32 1e+09, %v5740_v26 }
0x147e   :  { %4335 = vmatmul.mubr.f32.gmra.mrb[52].mxu0 %v9258_v19 }
0x147f   :  { %4740 = vmatprep.mubr.f32.mxu0 %v7487_v36 }
0x153b   :  { %v4412_v13 = vpop.f32.mrb[78].mxu1 }
0x153c   :  { %v4492_v6 = vmul.f32 0.125, %v4412_v13  ;;  %v6581_v19 = vpop.f32.mrb[79].mxu1 }
0x153e   :  { %v4498_v7 = vadd.f32 %v4496_v5, %v4492_v6 }
0x153f   :  { %v4488_v9 = vpop.f32.mrb[80].mxu1 }
0x1540   :  { %v4493_v52 = vmul.f32 0.125, %v4488_v9  ;;  %v4500_v10 = vsel %vm533_vm2, %v4498_v7, -inf  ;;  %v6586_v51 = vpop.f32.mrb[81].mxu1 }
0x1541   :  { %4501 = vmax.xlane.f32.xlu0 %v4500_v10 }
0x1542   :  { %v4499_v58 = vadd.f32 %v4497_v8, %v4493_v52 }
0x1544   :  { %v4503_v11 = vsel %vm533_vm2, %v4499_v58, -inf }
0x1545   :  { %4504 = vmax.xlane.f32.xlu1 %v4503_v11 }
0x154d   :  { %v6463_v23 = vpop.f32.mrb[50].mxu0 }
0x154e   :  { %v6464_v4 = vpop.f32.mrb[51].mxu0 }
0x154f   :  { %v6465_v45 = vadd.f32 %v6464_v4, %v6463_v23 }
0x1551   :  { %6588 = vmatpush3.msra.mxu1 %v6465_v45  ;;  %v6466_v5 = vpop.f32.mrb[52].mxu0 }
0x1552   :  { %6592 = vmatprep.subr.mxu1 %v7487_v36  ;;  %v6467_v46 = vpop.f32.mrb[53].mxu0 }
0x1553   :  { %v6468_v26 = vadd.f32 %v6467_v46, %v6466_v5 }
0x15ce   :  { %v4502_v0 = vpop.xlane.xlu0 %4501 }
0x15cf   :  { %v4506_v2 = vsub.f32 %v4498_v7, %v4502_v0 }
0x15d1   :  { %v4508_v14 = vmul.f32 1.442695, %v4506_v2 }
0x15d2   :  { %v4505_v15 = vpop.xlane.xlu1 %4504 }
0x15d3   :  { %7439 = vpow2.f32 %v4508_v14  ;;  %v4507_v17 = vsub.f32 %v4499_v58, %v4505_v15 }
0x15d5   :  { %v4510_v18 = vmul.f32 1.442695, %v4507_v17 }
0x15d7   :  { %7441 = vpow2.f32 %v4510_v18 }
0x15dd   :  { %v9897_v42 = vpop.eup %7439 }
0x15de   :  { %v4512_v35 = vsel %vm533_vm2, %v9897_v42, 0.0 }
0x15df   :  { %4513 = vadd.xlane.f32.xlu0 %v4512_v35 }
0x15e1   :  { %v9902_v47 = vpop.eup %7441 }
0x15e2   :  { %v4515_v50 = vsel %vm533_vm2, %v9902_v47, 0.0 }
0x15e3   :  { %4516 = vadd.xlane.f32.xlu1 %v4515_v50  ;;  %788 = vadd.xlane.f32.xlu0 %v787_v16 }
0x15e7   :  { %1582 = vadd.xlane.f32.xlu1 %v1581_v60  ;;  %2375 = vadd.xlane.f32.xlu0 %v2374_v29 }
0x15eb   :  { %791 = vadd.xlane.f32.xlu1 %v790_v62  ;;  %1585 = vadd.xlane.f32.xlu0 %v1584_v63 }
0x15ef   :  { %3168 = vadd.xlane.f32.xlu1 %v3167_v56  ;;  %2378 = vadd.xlane.f32.xlu0 %v2377_v57 }
0x15f3   :  { %3961 = vadd.xlane.f32.xlu1 %v3960_v34  ;;  %3171 = vadd.xlane.f32.xlu0 %v3170_v43 }
0x15f7   :  { %3964 = vadd.xlane.f32.xlu0 %v3963_v44 }
0x166c   :  { %v4514_v13 = vpop.xlane.xlu0 %4513 }
0x166d   :  { %7443 = vrcp.f32 %v4514_v13 }
0x1670   :  { %v4517_v6 = vpop.xlane.xlu1 %4516  ;;  %v789_v19 = vpop.xlane.xlu0 %788 }
0x1671   :  { %7445 = vrcp.f32 %v4517_v6  ;;  %v794_v7 = vmul.f32 0.00390625, %v789_v19  ;;  %v5720_v6 = vld [vmem:[%s10610_s5 + $0x288] sm:$0xff] }
0x1673   :  { %v9996_v8 = vsub.f32 %v9888_v21, %v794_v7  ;;  %v9998_v9 = vsub.f32 %v779_v39, %v794_v7  ;;  %v5721_v7 = vld [vmem:[%s10610_s5 + $0x290] sm:$0xff] }
0x1674   :  { %v2376_v52 = vpop.xlane.xlu0 %2375 }
0x1675   :  { %v2380_v10 = vmul.f32 0.00390625, %v2376_v52  ;;  %v800_v51 = vmul.f32 %v9996_v8, %v9996_v8  ;;  %v801_v58 = vmul.f32 %v9998_v9, %v9998_v9  ;;  %v5724_v52 = vld [vmem:[%s10610_s5 + $0x2a8] sm:$0xff] }
0x1677   :  { %v7444_v11 = vpop.eup %7443  ;;  %v10004_v0 = vsub.f32 %v2364_v28, %v2380_v10  ;;  %v10006_v2 = vsub.f32 %v2366_v49, %v2380_v10  ;;  %v804_v17 = vadd.f32 %v801_v58, %v800_v51  ;;  %v5726_v10 = vld [vmem:[%s10610_s5 + $0x2b8] sm:$0xff] }
0x1678   :  { %v4520_v14 = vmul.f32 %v7444_v11, %v9897_v42  ;;  %v1586_v15 = vpop.xlane.xlu0 %1585  ;;  %v7257_v58 = vpack.c.bf16 %v5726_v10, %v5724_v52  ;;  %v5723_v11 = vld [vmem:[%s10610_s5 + $0x2a0] sm:$0xff] }
0x1679   :  { %v1588_v18 = vmul.f32 0.00390625, %v1586_v15  ;;  %v2386_v21 = vmul.f32 %v10004_v0, %v10004_v0  ;;  %v2387_v39 = vmul.f32 %v10006_v2, %v10006_v2  ;;  %805 = vadd.xlane.f32.xlu0 %v804_v17  ;;  %v5728_v15 = vld [vmem:[%s10610_s5 + $0x2c8] sm:$0xff]  ;;  %v5730_v17 = vld [vmem:[%s10610_s5 + $0x2d8] sm:$0xff] }
0x167a   :  { %v4522_v35 = vmul.f32 %v9870_v24, %v4520_v14  ;;  %v5725_v14 = vld [vmem:[%s10610_s5 + $0x2b0] sm:$0xff] }
0x167b   :  { %v7446_v16 = vpop.eup %7445  ;;  %v10014_v50 = vsub.f32 %v1577_v53, %v1588_v18  ;;  %v10016_v28 = vsub.f32 %v1579_v59, %v1588_v18  ;;  %v2390_v60 = vadd.f32 %v2387_v39, %v2386_v21  ;;  %v7259_v18 = vpack.c.bf16 %v5725_v14, %v5723_v11  ;;  %v5727_v39 = vld [vmem:[%s10610_s5 + $0x2c0] sm:$0xff] }
0x167c   :  { %v4521_v49 = vmul.f32 %v7446_v16, %v9902_v47  ;;  %6590 = vmatmul.mubr.msk.f32.vlgmr.msra.gmra.mrb[82].mxu1 %vm533_vm2, %v4522_v35  ;;  %v2379_v42 = vpop.xlane.xlu0 %2378  ;;  %v7261_v21 = vpack.c.bf16 %v5730_v17, %v5728_v15  ;;  %v5729_v35 = vld [vmem:[%s10610_s5 + $0x2d0] sm:$0xff]  ;;  %v5732_v16 = vld [vmem:[%s10610_s5 + $0x2e8] sm:$0xff] }
0x167d   :  { %v2381_v29 = vmul.f32 0.00390625, %v2379_v42  ;;  %6593 = vmatpush3.msra.mxu1 %v6468_v26  ;;  %6594 = vmatprep.mubr.msk.f32.mxu1 %vm7488_vm0, %v7487_v36  ;;  %v1595_v62 = vmul.f32 %v10014_v50, %v10014_v50  ;;  %v1596_v24 = vmul.f32 %v10016_v28, %v10016_v28  ;;  %v7263_v42 = vpack.c.bf16 %v5729_v35, %v5727_v39  ;;  %v4792_v39 = vld [vmem:[%s10611_s6 + $0x18] sm:$0xff]  ;;  %v4789_v35 = vld [vmem:[%s10611_s6] sm:$0xff] }
0x167e   :  { %2391 = vadd.xlane.f32.xlu0 %v2390_v60  ;;  %v4523_v53 = vmul.f32 %v9876_v25, %v4521_v49  ;;  %v5734_v49 = vld [vmem:[%s10610_s5 + $0x2f8] sm:$0xff] }
0x167f   :  { %v10028_v47 = vsub.f32 %v9944_v61, %v2381_v29  ;;  %v10031_v59 = vsub.f32 %v9948_v30, %v2381_v29  ;;  %v1600_v56 = vadd.f32 %v1596_v24, %v1595_v62  ;;  %v7265_v60 = vpack.c.bf16 %v5734_v49, %v5732_v16  ;;  %v5731_v29 = vld [vmem:[%s10610_s5 + $0x2e0] sm:$0xff]  ;;  %v5733_v62 = vld [vmem:[%s10610_s5 + $0x2f0] sm:$0xff] }
0x1680   :  { %6595 = vmatmul.mubr.msk.f32.vlgmr.msra.gmra.mrb[84].mxu1 %vm533_vm2, %v4523_v53  ;;  %v3172_v63 = vpop.xlane.xlu0 %3171  ;;  %v7267_v24 = vpack.c.bf16 %v5733_v62, %v5731_v29  ;;  %v4791_v49 = vld [vmem:[%s10611_s6 + $0x10] sm:$0xff] }
0x1681   :  { %v3174_v57 = vmul.f32 0.00390625, %v3172_v63  ;;  %v2388_v34 = vmul.f32 %v10028_v47, %v10028_v47  ;;  %v2389_v43 = vmul.f32 %v10031_v59, %v10031_v59  ;;  %v7271_v29 = vpack.c.bf16 %v4791_v49, %v4789_v35  ;;  %v4820_v35 = vld [vmem:[%s10611_s6 + $0xf8] sm:$0xff] }
0x1682   :  { %1601 = vadd.xlane.f32.xlu0 %v1600_v56 }
0x1683   :  { %v10039_v25 = vsub.f32 %v9966_v40, %v3174_v57  ;;  %v10042_v61 = vsub.f32 %v9970_v33, %v3174_v57  ;;  %v2393_v44 = vadd.f32 %v2389_v43, %v2388_v34  ;;  %v1583_v34 = vpop.xlane.xlu1 %1582 }
0x1684   :  { %v3965_v30 = vpop.xlane.xlu0 %3964 }
0x1685   :  { %v3967_v23 = vmul.f32 0.00390625, %v3965_v30  ;;  %v3181_v4 = vmul.f32 %v10039_v25, %v10039_v25  ;;  %v3182_v45 = vmul.f32 %v10042_v61, %v10042_v61  ;;  %v1587_v30 = vmul.f32 0.00390625, %v1583_v34 }
0x1686   :  { %2394 = vadd.xlane.f32.xlu0 %v2393_v44 }
0x1687   :  { %v10049_v5 = vsub.f32 %v9982_v3, %v3967_v23  ;;  %v10052_v46 = vsub.f32 %v9986_v41, %v3967_v23  ;;  %v3186_v40 = vadd.f32 %v3182_v45, %v3181_v4  ;;  %v5722_v3 = vld [vmem:[%s10610_s5 + $0x298] sm:$0xff]  ;;  %v5719_v41 = vld [vmem:[%s10610_s5 + $0x280] sm:$0xff]  ;;  %v792_v43 = vpop.xlane.xlu1 %791 }
0x1688   :  { %v7253_v19 = vpack.c.bf16 %v5722_v3, %v5720_v6  ;;  %v7255_v51 = vpack.c.bf16 %v5721_v7, %v5719_v41 }
0x1689   :  { %v3974_v33 = vmul.f32 %v10049_v5, %v10049_v5  ;;  %v3975_v26 = vmul.f32 %v10052_v46, %v10052_v46 }
0x168a   :  { %3187 = vadd.xlane.f32.xlu0 %v3186_v40  ;;  %7254 = vmatprep.subr.bf16.mxu0 %v7253_v19  ;;  %v795_v40 = vmul.f32 0.00390625, %v792_v43  ;;  %v4797_v43 = vld [vmem:[%s10611_s6 + $0x40] sm:$0xff] }
0x168b   :  { %v3979_v13 = vadd.f32 %v3975_v26, %v3974_v33  ;;  %7256 = vmatpush1.bf16.msra.mxu0 %v7255_v51  ;;  %v3169_v33 = vpop.xlane.xlu1 %3168  ;;  %v10116_v26 = vsub.f32 %v9906_v27, %v1587_v30 }
0x168c   :  { %7258 = vmatprep.subr.bf16.mxu0 %v7257_v58  ;;  %v10133_v27 = vsub.f32 %v9934_v55, %v795_v40 }
0x168d   :  { %v1593_v7 = vmul.f32 %v10116_v26, %v10116_v26 }
0x168e   :  { %3980 = vadd.xlane.f32.xlu0 %v3979_v13 }
0x168f   :  { %7260 = vmatpush1.bf16.msra.mxu0 %v7259_v18  ;;  %v3962_v52 = vpop.xlane.xlu1 %3961 }
0x1690   :  { %7262 = vmatprep.subr.bf16.mxu0 %v7261_v21  ;;  %v3966_v51 = vmul.f32 0.00390625, %v3962_v52  ;;  %v4807_v52 = vld [vmem:[%s10611_s6 + $0x90] sm:$0xff] }
0x1692   :  { %v10152_v14 = vsub.f32 %v9974_v1, %v3966_v51  ;;  %v10155_v15 = vsub.f32 %v9978_v12, %v3966_v51  ;;  %v4790_v12 = vld [vmem:[%s10611_s6 + $0x8] sm:$0xff] }
0x1693   :  { %7264 = vmatpush1.bf16.msra.mxu0 %v7263_v42  ;;  %v7269_v16 = vpack.c.bf16 %v4792_v39, %v4790_v12  ;;  %v4794_v42 = vld [vmem:[%s10611_s6 + $0x28] sm:$0xff]  ;;  %v4815_v12 = vld [vmem:[%s10611_s6 + $0xd0] sm:$0xff] }
0x1694   :  { %7266 = vmatprep.subr.bf16.mxu0 %v7265_v60  ;;  %v3973_v21 = vmul.f32 %v10155_v15, %v10155_v15  ;;  %v4796_v60 = vld [vmem:[%s10611_s6 + $0x38] sm:$0xff]  ;;  %v4818_v39 = vld [vmem:[%s10611_s6 + $0xe8] sm:$0xff] }
0x1695   :  { %v7273_v62 = vpack.c.bf16 %v4796_v60, %v4794_v42  ;;  %7270 = vmatprep.subr.bf16.mxu1 %v7269_v16  ;;  %v7297_v49 = vpack.c.bf16 %v4820_v35, %v4818_v39  ;;  %v4817_v42 = vld [vmem:[%s10611_s6 + $0xe0] sm:$0xff]  ;;  %v4819_v60 = vld [vmem:[%s10611_s6 + $0xf0] sm:$0xff]  ;;  %v4838_v35 = vld [vmem:[%s10611_s6 + $0x188] sm:$0xff] }
0x1696   :  { %7272 = vmatpush1.bf16.msra.mxu1 %v7271_v29  ;;  %v4822_v29 = vld [vmem:[%s10611_s6 + $0x108] sm:$0xff] }
0x1697   :  { %7268 = vmatpush1.bf16.msra.mxu0 %v7267_v24  ;;  %v4793_v24 = vld [vmem:[%s10611_s6 + $0x20] sm:$0xff]  ;;  %7274 = vmatprep.subr.bf16.mxu1 %v7273_v62  ;;  %v4824_v62 = vld [vmem:[%s10611_s6 + $0x118] sm:$0xff] }
0x174f   :  { %v4593_v53 = vpop.f32.mrb[82].mxu1 }
0x1750   :  { %v6591_v63 = vpop.f32.mrb[83].mxu1  ;;  %5743 = vmatmul.mubr.msk.f32.vlgmr.msra.gmra.mrb[54].mxu0 %vm372_vm1, %v4593_v53  ;;  %v4795_v53 = vld [vmem:[%s10611_s6 + $0x30] sm:$0xff] }
0x1751   :  { %4746 = vmatprep.mubr.f32.mxu0 %v7487_v36  ;;  %v10119_v36 = vsub.f32 %v9910_v48, %v1587_v30  ;;  %v3173_v48 = vmul.f32 0.00390625, %v3169_v33  ;;  %v4798_v63 = vld [vmem:[%s10611_s6 + $0x48] sm:$0xff]  ;;  %v4799_v30 = vld [vmem:[%s10611_s6 + $0x50] sm:$0xff] }
0x1753   :  { %v4666_v56 = vpop.f32.mrb[84].mxu1  ;;  %v10146_v55 = vsub.f32 %v9952_v37, %v3173_v48  ;;  %v10149_v10 = vsub.f32 %v9956_v38, %v3173_v48  ;;  %v3972_v38 = vmul.f32 %v10152_v14, %v10152_v14  ;;  %v4808_v48 = vld [vmem:[%s10611_s6 + $0x98] sm:$0xff] }
0x1754   :  { %v6596_v57 = vpop.f32.mrb[85].mxu1  ;;  %5744 = vmatmul.mubr.msk.f32.gmra.mrb[56].mxu0 %vm372_vm1, %v4666_v56  ;;  %v4800_v56 = vld [vmem:[%s10611_s6 + $0x58] sm:$0xff] }
0x1755   :  { %v3179_v17 = vmul.f32 %v10146_v55, %v10146_v55  ;;  %v3180_v37 = vmul.f32 %v10149_v10, %v10149_v10  ;;  %v3976_v1 = vadd.f32 %v3973_v21, %v3972_v38  ;;  %v7275_v57 = vpack.c.bf16 %v4795_v53, %v4793_v24 }
0x1756   :  { %v7277_v34 = vpack.c.bf16 %v4800_v56, %v4798_v63  ;;  %v7299_v24 = vpack.c.bf16 %v4819_v60, %v4817_v42  ;;  %v7301_v53 = vpack.c.bf16 %v4824_v62, %v4822_v29  ;;  %v4821_v63 = vld [vmem:[%s10611_s6 + $0x100] sm:$0xff]  ;;  %v4823_v56 = vld [vmem:[%s10611_s6 + $0x110] sm:$0xff]  ;;  %v4842_v62 = vld [vmem:[%s10611_s6 + $0x1a8] sm:$0xff] }
0x1757   :  { %v3183_v18 = vadd.f32 %v3180_v37, %v3179_v17  ;;  %7276 = vmatpush1.bf16.msra.mxu1 %v7275_v57  ;;  %v4811_v17 = vld [vmem:[%s10611_s6 + $0xb0] sm:$0xff]  ;;  %v4814_v37 = vld [vmem:[%s10611_s6 + $0xc8] sm:$0xff]  ;;  %v4837_v42 = vld [vmem:[%s10611_s6 + $0x180] sm:$0xff] }
0x1758   :  { %7278 = vmatprep.subr.bf16.mxu1 %v7277_v34  ;;  %v4826_v57 = vld [vmem:[%s10611_s6 + $0x128] sm:$0xff]  ;;  %v4828_v34 = vld [vmem:[%s10611_s6 + $0x138] sm:$0xff]  ;;  %v4839_v60 = vld [vmem:[%s10611_s6 + $0x190] sm:$0xff] }
0x1759   :  { %v7319_v29 = vpack.c.bf16 %v4839_v60, %v4837_v42 }
0x1823   :  { %v4742_v44 = vpop.f32.mrb[54].mxu0 }
0x1824   :  { %v10110_v23 = vadd.f32 %v9884_v20, %v4742_v44  ;;  %v4744_v4 = vpop.f32.mrb[55].mxu0  ;;  %v4802_v44 = vld [vmem:[%s10611_s6 + $0x68] sm:$0xff] }
0x1825   :  { %v10113_v45 = vadd.f32 %v9893_v22, %v4744_v4  ;;  %v10130_v22 = vsub.f32 %v9925_v32, %v795_v40  ;;  %v803_v32 = vmul.f32 %v10133_v27, %v10133_v27  ;;  %v4804_v4 = vld [vmem:[%s10611_s6 + $0x78] sm:$0xff]  ;;  %v7279_v40 = vpack.c.bf16 %v4799_v30, %v4797_v43 }
0x1826   :  { %v7281_v33 = vpack.c.bf16 %v4804_v4, %v4802_v44  ;;  %v7303_v43 = vpack.c.bf16 %v4823_v56, %v4821_v63  ;;  %v7305_v30 = vpack.c.bf16 %v4828_v34, %v4826_v57  ;;  %v4825_v44 = vld [vmem:[%s10611_s6 + $0x120] sm:$0xff]  ;;  %v4827_v4 = vld [vmem:[%s10611_s6 + $0x130] sm:$0xff]  ;;  %v4846_v34 = vld [vmem:[%s10611_s6 + $0x1c8] sm:$0xff] }
0x1827   :  { %v4748_v13 = vpop.f32.mrb[56].mxu0  ;;  %v4753_v6 = vadd.f32 %v10113_v45, %v10110_v23  ;;  %7280 = vmatpush1.bf16.msra.mxu1 %v7279_v40  ;;  %v4830_v40 = vld [vmem:[%s10611_s6 + $0x148] sm:$0xff]  ;;  %v4841_v63 = vld [vmem:[%s10611_s6 + $0x1a0] sm:$0xff]  ;;  %v4843_v56 = vld [vmem:[%s10611_s6 + $0x1b0] sm:$0xff] }
0x1828   :  { %v10124_v3 = vadd.f32 %v9921_v31, %v4748_v13  ;;  %v4750_v20 = vpop.f32.mrb[57].mxu0  ;;  %v1594_v31 = vmul.f32 %v10119_v36, %v10119_v36  ;;  %v4801_v13 = vld [vmem:[%s10611_s6 + $0x60] sm:$0xff]  ;;  %7282 = vmatprep.subr.bf16.mxu1 %v7281_v33  ;;  %v4832_v33 = vld [vmem:[%s10611_s6 + $0x158] sm:$0xff]  ;;  %v7323_v57 = vpack.c.bf16 %v4843_v56, %v4841_v63 }
0x1829   :  { %v10127_v41 = vadd.f32 %v9930_v54, %v4750_v20  ;;  %4754 = vadd.xlane.f32.xlu1 %v4753_v6  ;;  %v802_v54 = vmul.f32 %v10130_v22, %v10130_v22  ;;  %v4803_v6 = vld [vmem:[%s10611_s6 + $0x70] sm:$0xff]  ;;  %v4806_v20 = vld [vmem:[%s10611_s6 + $0x88] sm:$0xff] }
0x182a   :  { %v1597_v58 = vadd.f32 %v1594_v31, %v1593_v7  ;;  %v7285_v7 = vpack.c.bf16 %v4808_v48, %v4806_v20  ;;  %v4805_v31 = vld [vmem:[%s10611_s6 + $0x80] sm:$0xff]  ;;  %v4831_v48 = vld [vmem:[%s10611_s6 + $0x150] sm:$0xff] }
0x182b   :  { %v4756_v19 = vadd.f32 %v10127_v41, %v10124_v3  ;;  %v807_v11 = vadd.f32 %v803_v32, %v802_v54  ;;  %v4810_v54 = vld [vmem:[%s10611_s6 + $0xa8] sm:$0xff]  ;;  %v4812_v32 = vld [vmem:[%s10611_s6 + $0xb8] sm:$0xff]  ;;  %v7287_v51 = vpack.c.bf16 %v4807_v52, %v4805_v31  ;;  %v4829_v20 = vld [vmem:[%s10611_s6 + $0x140] sm:$0xff] }
0x182d   :  { %4757 = vadd.xlane.f32.xlu1 %v4756_v19  ;;  %v7283_v19 = vpack.c.bf16 %v4803_v6, %v4801_v13  ;;  %v7307_v13 = vpack.c.bf16 %v4827_v4, %v4825_v44  ;;  %v7309_v6 = vpack.c.bf16 %v4832_v33, %v4830_v40  ;;  %v4847_v4 = vld [vmem:[%s10611_s6 + $0x1d0] sm:$0xff]  ;;  %v4850_v40 = vld [vmem:[%s10611_s6 + $0x1e8] sm:$0xff]  ;;  %v4852_v33 = vld [vmem:[%s10611_s6 + $0x1f8] sm:$0xff] }
0x182f   :  { %7284 = vmatpush1.bf16.msra.mxu1 %v7283_v19  ;;  %v7311_v19 = vpack.c.bf16 %v4831_v48, %v4829_v20  ;;  %v4849_v20 = vld [vmem:[%s10611_s6 + $0x1e0] sm:$0xff]  ;;  %v4851_v48 = vld [vmem:[%s10611_s6 + $0x1f0] sm:$0xff] }
0x1830   :  { %7286 = vmatprep.subr.bf16.mxu1 %v7285_v7 }
0x1831   :  { %1598 = vadd.xlane.f32.xlu1 %v1597_v58  ;;  %v7289_v58 = vpack.c.bf16 %v4812_v32, %v4810_v54 }
0x1833   :  { %7288 = vmatpush1.bf16.msra.mxu1 %v7287_v51 }
0x1834   :  { %7290 = vmatprep.subr.bf16.mxu1 %v7289_v58 }
0x1835   :  { %808 = vadd.xlane.f32.xlu1 %v807_v11  ;;  %v4809_v11 = vld [vmem:[%s10611_s6 + $0xa0] sm:$0xff] }
0x1836   :  { %v7291_v38 = vpack.c.bf16 %v4811_v17, %v4809_v11 }
0x1838   :  { %7292 = vmatpush1.bf16.msra.mxu1 %v7291_v38 }
0x1839   :  { %3184 = vadd.xlane.f32.xlu1 %v3183_v18  ;;  %v4816_v18 = vld [vmem:[%s10611_s6 + $0xd8] sm:$0xff] }
0x183a   :  { %v7293_v21 = vpack.c.bf16 %v4816_v18, %v4814_v37 }
0x183c   :  { %7294 = vmatprep.subr.bf16.mxu1 %v7293_v21  ;;  %v4834_v21 = vld [vmem:[%s10611_s6 + $0x168] sm:$0xff] }
0x183d   :  { %3977 = vadd.xlane.f32.xlu1 %v3976_v1  ;;  %v4813_v1 = vld [vmem:[%s10611_s6 + $0xc0] sm:$0xff] }
0x183e   :  { %v7295_v16 = vpack.c.bf16 %v4815_v12, %v4813_v1  ;;  %v4833_v1 = vld [vmem:[%s10611_s6 + $0x160] sm:$0xff]  ;;  %v4835_v12 = vld [vmem:[%s10611_s6 + $0x170] sm:$0xff] }
0x183f   :  { %v7315_v39 = vpack.c.bf16 %v4835_v12, %v4833_v1 }
0x1840   :  { %7296 = vmatpush1.bf16.msra.mxu1 %v7295_v16  ;;  %v4840_v16 = vld [vmem:[%s10611_s6 + $0x198] sm:$0xff] }
0x1841   :  { %7298 = vmatprep.subr.bf16.mxu1 %v7297_v49  ;;  %v7317_v49 = vpack.c.bf16 %v4840_v16, %v4838_v35  ;;  %v4863_v35 = vld [vmem:[%s10612_s7 + $0x50] sm:$0xff]  ;;  %v4866_v16 = vld [vmem:[%s10612_s7 + $0x68] sm:$0xff] }
0x1844   :  { %7300 = vmatpush1.bf16.msra.mxu1 %v7299_v24  ;;  %v4844_v24 = vld [vmem:[%s10611_s6 + $0x1b8] sm:$0xff] }
0x1845   :  { %7302 = vmatprep.subr.bf16.mxu1 %v7301_v53  ;;  %v7321_v53 = vpack.c.bf16 %v4844_v24, %v4842_v62  ;;  %v4867_v62 = vld [vmem:[%s10612_s7 + $0x70] sm:$0xff]  ;;  %v4870_v24 = vld [vmem:[%s10612_s7 + $0x88] sm:$0xff] }
0x1848   :  { %7304 = vmatpush1.bf16.msra.mxu1 %v7303_v43  ;;  %v4848_v43 = vld [vmem:[%s10611_s6 + $0x1d8] sm:$0xff] }
0x1849   :  { %7306 = vmatprep.subr.bf16.mxu1 %v7305_v30  ;;  %v4845_v30 = vld [vmem:[%s10611_s6 + $0x1c0] sm:$0xff]  ;;  %v7325_v44 = vpack.c.bf16 %v4848_v43, %v4846_v34  ;;  %v4871_v34 = vld [vmem:[%s10612_s7 + $0x90] sm:$0xff]  ;;  %v4874_v43 = vld [vmem:[%s10612_s7 + $0xa8] sm:$0xff] }
0x184c   :  { %7308 = vmatpush1.bf16.msra.mxu1 %v7307_v13  ;;  %v7327_v13 = vpack.c.bf16 %v4847_v4, %v4845_v30  ;;  %v4876_v30 = vld [vmem:[%s10612_s7 + $0xb8] sm:$0xff] }
0x184d   :  { %7310 = vmatprep.subr.bf16.mxu1 %v7309_v6  ;;  %v7329_v6 = vpack.c.bf16 %v4852_v33, %v4850_v40  ;;  %v7353_v4 = vpack.c.bf16 %v4876_v30, %v4874_v43  ;;  %v4873_v40 = vld [vmem:[%s10612_s7 + $0xa0] sm:$0xff]  ;;  %v4875_v33 = vld [vmem:[%s10612_s7 + $0xb0] sm:$0xff] }
0x184e   :  { %v4897_v43 = vld [vmem:[%s10612_s7 + $0x160] sm:$0xff]  ;;  %v4899_v30 = vld [vmem:[%s10612_s7 + $0x170] sm:$0xff] }
0x1850   :  { %7312 = vmatpush1.bf16.msra.mxu1 %v7311_v19  ;;  %v7331_v19 = vpack.c.bf16 %v4851_v48, %v4849_v20  ;;  %v7355_v20 = vpack.c.bf16 %v4875_v33, %v4873_v40  ;;  %v7379_v40 = vpack.c.bf16 %v4899_v30, %v4897_v43 }
0x18b6   :  { %v4755_v7 = vpop.xlane.xlu1 %4754 }
0x18b7   :  { %v4759_v31 = vmul.f32 0.00390625, %v4755_v7  ;;  %v4854_v7 = vld [vmem:[%s10612_s7 + $0x8] sm:$0xff] }
0x18b9   :  { %v10298_v52 = vsub.f32 %v10110_v23, %v4759_v31  ;;  %v10301_v54 = vsub.f32 %v10113_v45, %v4759_v31  ;;  %v4856_v31 = vld [vmem:[%s10612_s7 + $0x18] sm:$0xff] }
0x18ba   :  { %v4758_v32 = vpop.xlane.xlu1 %4757 }
0x18bb   :  { %v4760_v51 = vmul.f32 0.00390625, %v4758_v32  ;;  %v4765_v58 = vmul.f32 %v10298_v52, %v10298_v52  ;;  %v4766_v11 = vmul.f32 %v10301_v54, %v10301_v54  ;;  %v4853_v32 = vld [vmem:[%s10612_s7] sm:$0xff] }
0x18bd   :  { %v10308_v17 = vsub.f32 %v10124_v3, %v4760_v51  ;;  %v10311_v37 = vsub.f32 %v10127_v41, %v4760_v51  ;;  %v4769_v18 = vadd.f32 %v4766_v11, %v4765_v58  ;;  %v4836_v3 = vld [vmem:[%s10611_s6 + $0x178] sm:$0xff]  ;;  %v7333_v51 = vpack.c.bf16 %v4856_v31, %v4854_v7  ;;  %v4855_v58 = vld [vmem:[%s10612_s7 + $0x10] sm:$0xff]  ;;  %v4858_v11 = vld [vmem:[%s10612_s7 + $0x28] sm:$0xff] }
0x18be   :  { %v7313_v41 = vpack.c.bf16 %v4836_v3, %v4834_v21  ;;  %v4859_v21 = vld [vmem:[%s10612_s7 + $0x30] sm:$0xff]  ;;  %v4862_v3 = vld [vmem:[%s10612_s7 + $0x48] sm:$0xff] }
0x18bf   :  { %4770 = vadd.xlane.f32.xlu1 %v4769_v18  ;;  %v4767_v23 = vmul.f32 %v10308_v17, %v10308_v17  ;;  %v4768_v45 = vmul.f32 %v10311_v37, %v10311_v37  ;;  %v4860_v18 = vld [vmem:[%s10612_s7 + $0x38] sm:$0xff]  ;;  %7334 = vmatprep.subr.bf16.mxu0 %v7333_v51  ;;  %v4879_v7 = vld [vmem:[%s10612_s7 + $0xd0] sm:$0xff]  ;;  %v4882_v31 = vld [vmem:[%s10612_s7 + $0xe8] sm:$0xff] }
0x18c0   :  { %7314 = vmatprep.subr.bf16.mxu1 %v7313_v41  ;;  %v4864_v41 = vld [vmem:[%s10612_s7 + $0x58] sm:$0xff] }
0x18c1   :  { %v4772_v38 = vadd.f32 %v4768_v45, %v4767_v23  ;;  %7316 = vmatpush1.bf16.msra.mxu1 %v7315_v39  ;;  %v7335_v23 = vpack.c.bf16 %v4855_v58, %v4853_v32  ;;  %v7337_v45 = vpack.c.bf16 %v4860_v18, %v4858_v11  ;;  %v7341_v12 = vpack.c.bf16 %v4864_v41, %v4862_v3  ;;  %v4861_v39 = vld [vmem:[%s10612_s7 + $0x40] sm:$0xff]  ;;  %v4884_v32 = vld [vmem:[%s10612_s7 + $0xf8] sm:$0xff]  ;;  %v4883_v18 = vld [vmem:[%s10612_s7 + $0xf0] sm:$0xff] }
0x18c2   :  { %7318 = vmatprep.subr.bf16.mxu1 %v7317_v49  ;;  %v4868_v49 = vld [vmem:[%s10612_s7 + $0x78] sm:$0xff]  ;;  %v7343_v42 = vpack.c.bf16 %v4863_v35, %v4861_v39  ;;  %v7361_v58 = vpack.c.bf16 %v4884_v32, %v4882_v31  ;;  %v4881_v11 = vld [vmem:[%s10612_s7 + $0xe0] sm:$0xff]  ;;  %v4887_v41 = vld [vmem:[%s10612_s7 + $0x110] sm:$0xff] }
0x18c3   :  { %4773 = vadd.xlane.f32.xlu1 %v4772_v38  ;;  %v4857_v38 = vld [vmem:[%s10612_s7 + $0x20] sm:$0xff]  ;;  %7336 = vmatpush1.bf16.msra.mxu0 %v7335_v23  ;;  %v7345_v60 = vpack.c.bf16 %v4868_v49, %v4866_v16  ;;  %v4886_v23 = vld [vmem:[%s10612_s7 + $0x108] sm:$0xff]  ;;  %v4891_v49 = vld [vmem:[%s10612_s7 + $0x130] sm:$0xff] }
0x18c4   :  { %v7339_v1 = vpack.c.bf16 %v4859_v21, %v4857_v38  ;;  %7338 = vmatprep.subr.bf16.mxu0 %v7337_v45  ;;  %v4888_v45 = vld [vmem:[%s10612_s7 + $0x118] sm:$0xff]  ;;  %v7363_v38 = vpack.c.bf16 %v4883_v18, %v4881_v11  ;;  %v4885_v3 = vld [vmem:[%s10612_s7 + $0x100] sm:$0xff]  ;;  %v4907_v32 = vld [vmem:[%s10612_s7 + $0x1b0] sm:$0xff] }
0x18c5   :  { %7320 = vmatpush1.bf16.msra.mxu1 %v7319_v29  ;;  %v4865_v29 = vld [vmem:[%s10612_s7 + $0x60] sm:$0xff]  ;;  %v7365_v21 = vpack.c.bf16 %v4888_v45, %v4886_v23  ;;  %v7367_v39 = vpack.c.bf16 %v4887_v41, %v4885_v3  ;;  %v4911_v45 = vld [vmem:[%s10612_s7 + $0x1d0] sm:$0xff]  ;;  %v1599_v41 = vpop.xlane.xlu1 %1598 }
0x18c6   :  { %7322 = vmatprep.subr.bf16.mxu1 %v7321_v53  ;;  %v4872_v53 = vld [vmem:[%s10612_s7 + $0x98] sm:$0xff]  ;;  %v7347_v63 = vpack.c.bf16 %v4867_v62, %v4865_v29  ;;  %v4889_v16 = vld [vmem:[%s10612_s7 + $0x120] sm:$0xff] }
0x18c7   :  { %7340 = vmatpush1.bf16.msra.mxu0 %v7339_v1  ;;  %v7349_v56 = vpack.c.bf16 %v4872_v53, %v4870_v24  ;;  %v4890_v1 = vld [vmem:[%s10612_s7 + $0x128] sm:$0xff]  ;;  %v7371_v29 = vpack.c.bf16 %v4891_v49, %v4889_v16  ;;  %v4893_v24 = vld [vmem:[%s10612_s7 + $0x140] sm:$0xff]  ;;  %v4895_v53 = vld [vmem:[%s10612_s7 + $0x150] sm:$0xff]  ;;  %v1603_v49 = vmul.f32 0.00390625, %v1599_v41 }
0x18c8   :  { %7342 = vmatprep.subr.bf16.mxu0 %v7341_v12  ;;  %v4892_v12 = vld [vmem:[%s10612_s7 + $0x138] sm:$0xff]  ;;  %v4905_v31 = vld [vmem:[%s10612_s7 + $0x1a0] sm:$0xff] }
0x18c9   :  { %7324 = vmatpush1.bf16.msra.mxu1 %v7323_v57  ;;  %v4869_v57 = vld [vmem:[%s10612_s7 + $0x80] sm:$0xff]  ;;  %v7369_v35 = vpack.c.bf16 %v4892_v12, %v4890_v1  ;;  %v7387_v11 = vpack.c.bf16 %v4907_v32, %v4905_v31  ;;  %v809_v12 = vpop.xlane.xlu1 %808 }
0x18ca   :  { %7326 = vmatprep.subr.bf16.mxu1 %v7325_v44  ;;  %v7351_v44 = vpack.c.bf16 %v4871_v34, %v4869_v57  ;;  %v7375_v57 = vpack.c.bf16 %v4895_v53, %v4893_v24  ;;  %v4909_v23 = vld [vmem:[%s10612_s7 + $0x1c0] sm:$0xff]  ;;  %v1605_v53 = vadd.f32 1e-05, %v1603_v49 }
0x18cb   :  { %7344 = vmatpush1.bf16.msra.mxu0 %v7343_v42  ;;  %v4894_v42 = vld [vmem:[%s10612_s7 + $0x148] sm:$0xff] }
0x18cc   :  { %7346 = vmatprep.subr.bf16.mxu0 %v7345_v60  ;;  %v4896_v60 = vld [vmem:[%s10612_s7 + $0x158] sm:$0xff] }
0x18cd   :  { %7328 = vmatpush1.bf16.msra.mxu1 %v7327_v13  ;;  %v4878_v13 = vld [vmem:[%s10612_s7 + $0xc8] sm:$0xff]  ;;  %v7373_v62 = vpack.c.bf16 %v4896_v60, %v4894_v42  ;;  %v3185_v16 = vpop.xlane.xlu1 %3184 }
0x18ce   :  { %7330 = vmatprep.subr.bf16.mxu1 %v7329_v6  ;;  %v4880_v6 = vld [vmem:[%s10612_s7 + $0xd8] sm:$0xff]  ;;  %v3189_v43 = vmul.f32 0.00390625, %v3185_v16 }
0x18cf   :  { %7348 = vmatpush1.bf16.msra.mxu0 %v7347_v63  ;;  %v7357_v48 = vpack.c.bf16 %v4880_v6, %v4878_v13  ;;  %v4898_v63 = vld [vmem:[%s10612_s7 + $0x168] sm:$0xff]  ;;  %v4901_v13 = vld [vmem:[%s10612_s7 + $0x180] sm:$0xff]  ;;  %v4903_v6 = vld [vmem:[%s10612_s7 + $0x190] sm:$0xff] }
0x18d0   :  { %7350 = vmatprep.subr.bf16.mxu0 %v7349_v56  ;;  %v4900_v56 = vld [vmem:[%s10612_s7 + $0x178] sm:$0xff] }
0x18d1   :  { %7332 = vmatpush1.bf16.msra.mxu1 %v7331_v19  ;;  %v4877_v19 = vld [vmem:[%s10612_s7 + $0xc0] sm:$0xff]  ;;  %v7377_v34 = vpack.c.bf16 %v4900_v56, %v4898_v63 }
0x18d2   :  { %v7359_v51 = vpack.c.bf16 %v4879_v7, %v4877_v19  ;;  %v7383_v19 = vpack.c.bf16 %v4903_v6, %v4901_v13  ;;  %v3191_v13 = vadd.f32 1e-05, %v3189_v43 }
0x18d3   :  { %7352 = vmatpush1.bf16.msra.mxu0 %v7351_v44  ;;  %v4902_v44 = vld [vmem:[%s10612_s7 + $0x188] sm:$0xff] }
0x18d4   :  { %7354 = vmatprep.subr.bf16.mxu0 %v7353_v4  ;;  %v4904_v4 = vld [vmem:[%s10612_s7 + $0x198] sm:$0xff] }
0x18d5   :  { %v7381_v33 = vpack.c.bf16 %v4904_v4, %v4902_v44 }
0x18d7   :  { %7356 = vmatpush1.bf16.msra.mxu0 %v7355_v20  ;;  %v4906_v20 = vld [vmem:[%s10612_s7 + $0x1a8] sm:$0xff] }
0x18d8   :  { %7358 = vmatprep.subr.bf16.mxu0 %v7357_v48  ;;  %v4908_v48 = vld [vmem:[%s10612_s7 + $0x1b8] sm:$0xff] }
0x18d9   :  { %v7385_v7 = vpack.c.bf16 %v4908_v48, %v4906_v20 }
0x18db   :  { %7360 = vmatpush1.bf16.msra.mxu0 %v7359_v51  ;;  %v4910_v51 = vld [vmem:[%s10612_s7 + $0x1c8] sm:$0xff] }
0x18dc   :  { %7362 = vmatprep.subr.bf16.mxu0 %v7361_v58  ;;  %v4912_v58 = vld [vmem:[%s10612_s7 + $0x1d8] sm:$0xff] }
0x18dd   :  { %v7389_v18 = vpack.c.bf16 %v4912_v58, %v4910_v51 }
0x18df   :  { %7364 = vmatpush1.bf16.msra.mxu0 %v7363_v38  ;;  %v7391_v38 = vpack.c.bf16 %v4911_v45, %v4909_v23 }
0x18e0   :  { %7366 = vmatprep.subr.bf16.mxu0 %v7365_v21  ;;  %v806_v21 = vpop.xlane.xlu0 %805 }
0x18e1   :  { %v810_v60 = vmul.f32 0.00390625, %v806_v21 }
0x18e3   :  { %7368 = vmatpush1.bf16.msra.mxu0 %v7367_v39 }
0x18e4   :  { %7370 = vmatprep.subr.bf16.mxu0 %v7369_v35  ;;  %v2392_v3 = vpop.xlane.xlu0 %2391  ;;  %v811_v35 = vmul.f32 0.00390625, %v809_v12 }
0x18e7   :  { %7372 = vmatpush1.bf16.msra.mxu0 %v7371_v29  ;;  %v813_v29 = vadd.f32 1e-05, %v811_v35 }
0x18e8   :  { %7374 = vmatprep.subr.bf16.mxu0 %v7373_v62  ;;  %v1602_v1 = vpop.xlane.xlu0 %1601  ;;  %v2396_v62 = vmul.f32 0.00390625, %v2392_v3 }
0x18e9   :  { %v1604_v42 = vmul.f32 0.00390625, %v1602_v1  ;;  %7447 = vrsqrt.f32 %v813_v29 }
0x18ea   :  { %v2398_v30 = vadd.f32 1e-05, %v2396_v62  ;;  %7449 = vrsqrt.f32 %v1605_v53 }
0x18eb   :  { %7376 = vmatpush1.bf16.msra.mxu0 %v7375_v57  ;;  %v1606_v63 = vadd.f32 1e-05, %v1604_v42  ;;  %v3978_v57 = vpop.xlane.xlu1 %3977 }
0x18ec   :  { %7378 = vmatprep.subr.bf16.mxu0 %v7377_v34  ;;  %v2395_v39 = vpop.xlane.xlu0 %2394  ;;  %v812_v34 = vadd.f32 1e-05, %v810_v60  ;;  %v3982_v44 = vmul.f32 0.00390625, %v3978_v57 }
0x18ed   :  { %v2397_v56 = vmul.f32 0.00390625, %v2395_v39  ;;  %7451 = vrsqrt.f32 %v1606_v63 }
0x18ee   :  { %7453 = vrsqrt.f32 %v812_v34  ;;  %v3984_v6 = vadd.f32 1e-05, %v3982_v44 }
0x18ef   :  { %7380 = vmatpush1.bf16.msra.mxu0 %v7379_v40  ;;  %v2399_v4 = vadd.f32 1e-05, %v2397_v56  ;;  %7455 = vrsqrt.f32 %v2398_v30 }
0x18f0   :  { %7382 = vmatprep.subr.bf16.mxu0 %v7381_v33  ;;  %v3188_v24 = vpop.xlane.xlu0 %3187 }
0x18f1   :  { %v3190_v40 = vmul.f32 0.00390625, %v3188_v24  ;;  %7457 = vrsqrt.f32 %v2399_v4 }
0x18f2   :  { %7459 = vrsqrt.f32 %v3191_v13 }
0x18f3   :  { %7384 = vmatpush1.bf16.msra.mxu0 %v7383_v19  ;;  %v3192_v20 = vadd.f32 1e-05, %v3190_v40  ;;  %7461 = vrsqrt.f32 %v3984_v6  ;;  %v7448_v19 = vpop.eup %7447 }
0x18f4   :  { %7386 = vmatprep.subr.bf16.mxu0 %v7385_v7  ;;  %v3981_v33 = vpop.xlane.xlu0 %3980  ;;  %v7450_v32 = vpop.eup %7449  ;;  %v819_v23 = vmul.f32 %v7448_v19, %v10133_v27 }
0x18f5   :  { %v3983_v48 = vmul.f32 0.00390625, %v3981_v33  ;;  %7463 = vrsqrt.f32 %v3192_v20  ;;  %v1610_v21 = vmul.f32 %v7450_v32, %v10119_v36 }
0x18f7   :  { %7388 = vmatpush1.bf16.msra.mxu0 %v7387_v11  ;;  %v3985_v7 = vadd.f32 1e-05, %v3983_v48  ;;  %v7452_v58 = vpop.eup %7451 }
0x18f8   :  { %7390 = vmatprep.subr.bf16.mxu0 %v7389_v18  ;;  %v7454_v11 = vpop.eup %7453  ;;  %v818_v18 = vmul.f32 %v7448_v19, %v10130_v22  ;;  %v1611_v1 = vmul.f32 %v7452_v58, %v10014_v50  ;;  %v1612_v12 = vmul.f32 %v7452_v58, %v10016_v28 }
0x18f9   :  { %7465 = vrsqrt.f32 %v3985_v7  ;;  %v7456_v41 = vpop.eup %7455  ;;  %v816_v16 = vmul.f32 %v7454_v11, %v9996_v8  ;;  %v817_v22 = vmul.f32 %v7454_v11, %v9998_v9 }
0x18fa   :  { %v1616_v42 = vadd.f32 %v1612_v12, %v819_v23  ;;  %v1615_v60 = vadd.f32 %v1611_v1, %v818_v18  ;;  %v2402_v24 = vmul.f32 %v7456_v41, %v10004_v0  ;;  %v2403_v8 = vmul.f32 %v7456_v41, %v10006_v2 }
0x18fb   :  { %7392 = vmatpush1.bf16.msra.mxu0 %v7391_v38  ;;  %v1609_v38 = vmul.f32 %v7450_v32, %v10116_v26  ;;  %v7458_v35 = vpop.eup %7457  ;;  %v1614_v29 = vadd.f32 %v1610_v21, %v817_v22 }
0x18fc   :  { %v7460_v27 = vpop.eup %7459  ;;  %v2405_v62 = vmul.f32 %v7458_v35, %v10031_v59  ;;  %v2404_v50 = vmul.f32 %v7458_v35, %v10028_v47 }
0x18fd   :  { %v1613_v26 = vadd.f32 %v1609_v38, %v816_v16  ;;  %v7462_v36 = vpop.eup %7461  ;;  %v3195_v53 = vmul.f32 %v7460_v27, %v10146_v55  ;;  %v3196_v9 = vmul.f32 %v7460_v27, %v10149_v10  ;;  %v2407_v57 = vadd.f32 %v2403_v8, %v1614_v29 }
0x18fe   :  { %v2409_v63 = vadd.f32 %v2405_v62, %v1616_v42  ;;  %v2408_v56 = vadd.f32 %v2404_v50, %v1615_v60  ;;  %v3989_v34 = vmul.f32 %v7462_v36, %v10155_v15  ;;  %v3988_v30 = vmul.f32 %v7462_v36, %v10152_v14 }
0x18ff   :  { %v7464_v28 = vpop.eup %7463  ;;  %v2406_v43 = vadd.f32 %v2402_v24, %v1613_v26  ;;  %v3200_v0 = vadd.f32 %v3196_v9, %v2407_v57 }
0x1900   :  { %v3198_v59 = vmul.f32 %v7464_v28, %v10042_v61  ;;  %v3197_v47 = vmul.f32 %v7464_v28, %v10039_v25 }
0x1901   :  { %v3199_v4 = vadd.f32 %v3195_v53, %v2406_v43  ;;  %v3993_v33 = vadd.f32 %v3989_v34, %v3200_v0 }
0x1902   :  { %v3202_v40 = vadd.f32 %v3198_v59, %v2409_v63  ;;  %v3201_v2 = vadd.f32 %v3197_v47, %v2408_v56 }
0x1903   :  { %v7466_v44 = vpop.eup %7465  ;;  %v3992_v13 = vadd.f32 %v3988_v30, %v3199_v4 }
0x1904   :  { %v3991_v14 = vmul.f32 %v7466_v44, %v10052_v46  ;;  %v3990_v61 = vmul.f32 %v7466_v44, %v10049_v5  ;;  %v4916_v5 = vld [vmem:[%s10612_s7 + $0x1f8] sm:$0xff] }
0x1906   :  { %v3995_v25 = vadd.f32 %v3991_v14, %v3202_v40  ;;  %v3994_v7 = vadd.f32 %v3990_v61, %v3201_v2 }
0x194c   :  { %v4771_v31 = vpop.xlane.xlu1 %4770 }
0x194d   :  { %v4775_v51 = vmul.f32 0.00390625, %v4771_v31 }
0x194f   :  { %v4777_v45 = vadd.f32 1e-05, %v4775_v51 }
0x1950   :  { %v4774_v3 = vpop.xlane.xlu1 %4773 }
0x1951   :  { %7467 = vrsqrt.f32 %v4777_v45  ;;  %v4776_v39 = vmul.f32 0.00390625, %v4774_v3 }
0x1953   :  { %v4778_v49 = vadd.f32 1e-05, %v4776_v39 }
0x1955   :  { %7469 = vrsqrt.f32 %v4778_v49 }
0x195b   :  { %v7468_v55 = vpop.eup %7467 }
0x195c   :  { %v4782_v10 = vmul.f32 %v7468_v55, %v10301_v54  ;;  %v4781_v6 = vmul.f32 %v7468_v55, %v10298_v52  ;;  %v4914_v52 = vld [vmem:[%s10612_s7 + $0x1e8] sm:$0xff] }
0x195d   :  { %v7393_v46 = vpack.c.bf16 %v4916_v5, %v4914_v52 }
0x195e   :  { %v4786_v15 = vadd.f32 %v4782_v10, %v3993_v33  ;;  %v4785_v20 = vadd.f32 %v4781_v6, %v3992_v13 }
0x195f   :  { %v7470_v48 = vpop.eup %7469  ;;  %7394 = vmatprep.subr.bf16.mxu0 %v7393_v46 }
0x1960   :  { %4981 = vmatprep.mubr.f32.mxu1 %v4786_v15  ;;  %v4784_v19 = vmul.f32 %v7470_v48, %v10311_v37  ;;  %v4783_v31 = vmul.f32 %v7470_v48, %v10308_v17  ;;  %v4913_v37 = vld [vmem:[%s10612_s7 + $0x1e0] sm:$0xff]  ;;  %v4915_v17 = vld [vmem:[%s10612_s7 + $0x1f0] sm:$0xff] }
0x1961   :  { %4982 = vmatmul.mubr.f32.vlgmr.msra.gmra.mrb[86].mxu1 %v4785_v20  ;;  %v7395_v51 = vpack.c.bf16 %v4915_v17, %v4913_v37 }
0x1962   :  { %v4788_v32 = vadd.f32 %v4784_v19, %v3995_v25  ;;  %v4787_v54 = vadd.f32 %v4783_v31, %v3994_v7 }
0x1963   :  { %7396 = vmatpush1.bf16.msra.mxu0 %v7395_v51 }
0x1964   :  { %4987 = vmatprep.mubr.f32.mxu1 %v4788_v32 }
0x1965   :  { %4988 = vmatmul.mubr.f32.gmra.mrb[88].mxu1 %v4787_v54 }
0x1a34   :  { %v4983_v58 = vpop.f32.mrb[86].mxu1 }
0x1a35   :  { %v4985_v11 = vpop.f32.mrb[87].mxu1  ;;  %v4994_v23 = vmax.f32 %v4983_v58, 0.0 }
0x1a36   :  { %v4995_v18 = vmax.f32 %v4985_v11, 0.0 }
0x1a38   :  { %v4989_v45 = vpop.f32.mrb[88].mxu1  ;;  %5062 = vmatprep.mubr.f32.mxu0 %v4995_v18 }
0x1a39   :  { %v4991_v38 = vpop.f32.mrb[89].mxu1  ;;  %5063 = vmatmul.mubr.f32.vlgmr.msra.gmra.mrb[58].mxu0 %v4994_v23  ;;  %v4996_v3 = vmax.f32 %v4989_v45, 0.0 }
0x1a3a   :  { %v4997_v21 = vmax.f32 %v4991_v38, 0.0 }
0x1a3c   :  { %5068 = vmatprep.mubr.f32.mxu0 %v4997_v21 }
0x1a3d   :  { %5069 = vmatmul.mubr.f32.gmra.mrb[60].mxu0 %v4996_v3 }
0x1b0c   :  { %v5064_v41 = vpop.f32.mrb[58].mxu0 }
0x1b0d   :  { %v5065_v1 = vadd.f32 %v5064_v41, %v4785_v20  ;;  %v5066_v12 = vpop.f32.mrb[59].mxu0 }
0x1b0e   :  { %v5067_v39 = vadd.f32 %v5066_v12, %v4786_v15 }
0x1b10   :  { %v5070_v35 = vpop.f32.mrb[60].mxu0  ;;  %v5075_v16 = vadd.f32 %v5067_v39, %v5065_v1 }
0x1b11   :  { %v5071_v22 = vadd.f32 %v5070_v35, %v4787_v54  ;;  %v5072_v27 = vpop.f32.mrb[61].mxu0 }
0x1b12   :  { %v5073_v49 = vadd.f32 %v5072_v27, %v4788_v32  ;;  %5076 = vadd.xlane.f32.xlu0 %v5075_v16 }
0x1b14   :  { %v5078_v42 = vadd.f32 %v5073_v49, %v5071_v22 }
0x1b16   :  { %5079 = vadd.xlane.f32.xlu1 %v5078_v42 }
0x1b9f   :  { %v5077_v60 = vpop.xlane.xlu0 %5076 }
0x1ba0   :  { %v5081_v26 = vmul.f32 0.00390625, %v5077_v60 }
0x1ba2   :  { %v5083_v29 = vsub.f32 %v5065_v1, %v5081_v26  ;;  %v5084_v36 = vsub.f32 %v5067_v39, %v5081_v26 }
0x1ba3   :  { %v5080_v62 = vpop.xlane.xlu1 %5079 }
0x1ba4   :  { %v5082_v50 = vmul.f32 0.00390625, %v5080_v62  ;;  %v5087_v28 = vmul.f32 %v5083_v29, %v5083_v29  ;;  %v5088_v24 = vmul.f32 %v5084_v36, %v5084_v36 }
0x1ba6   :  { %v5085_v53 = vsub.f32 %v5071_v22, %v5082_v50  ;;  %v5086_v8 = vsub.f32 %v5073_v49, %v5082_v50  ;;  %v5091_v9 = vadd.f32 %v5088_v24, %v5087_v28 }
0x1ba8   :  { %5092 = vadd.xlane.f32.xlu0 %v5091_v9  ;;  %v5089_v63 = vmul.f32 %v5085_v53, %v5085_v53  ;;  %v5090_v56 = vmul.f32 %v5086_v8, %v5086_v8 }
0x1baa   :  { %v5094_v57 = vadd.f32 %v5090_v56, %v5089_v63 }
0x1bac   :  { %5095 = vadd.xlane.f32.xlu1 %v5094_v57 }
0x1c35   :  { %v5093_v34 = vpop.xlane.xlu0 %5092 }
0x1c36   :  { %v5097_v43 = vmul.f32 0.00390625, %v5093_v34 }
0x1c38   :  { %v5099_v30 = vadd.f32 1e-05, %v5097_v43 }
0x1c39   :  { %v5096_v59 = vpop.xlane.xlu1 %5095 }
0x1c3a   :  { %7471 = vrsqrt.f32 %v5099_v30  ;;  %v5098_v47 = vmul.f32 0.00390625, %v5096_v59 }
0x1c3c   :  { %v5100_v44 = vadd.f32 1e-05, %v5098_v47 }
0x1c3e   :  { %7473 = vrsqrt.f32 %v5100_v44 }
0x1c44   :  { %v7472_v0 = vpop.eup %7471 }
0x1c45   :  { %v5103_v4 = vmul.f32 %v7472_v0, %v5083_v29  ;;  %v5104_v55 = vmul.f32 %v7472_v0, %v5084_v36 }
0x1c47   :  { %5107 = vst [vmem:[%s10613_s8] sm:$0xff] %v5103_v4  ;;  %5108 = vst [vmem:[%s10613_s8 + $0x8] sm:$0xff] %v5104_v55 }
0x1c48   :  { %v7474_v40 = vpop.eup %7473 }
0x1c49   :  { %v5105_v2 = vmul.f32 %v7474_v40, %v5085_v53  ;;  %v5106_v33 = vmul.f32 %v7474_v40, %v5086_v8 }
0x1c4b   :  { %5109 = vst [vmem:[%s10613_s8 + $0x10] sm:$0xff] %v5105_v2  ;;  %5110 = vst [vmem:[%s10613_s8 + $0x18] sm:$0xff] %v5106_v33 }

</bundles_post_ra>
